<compile_context>
chip_gen: v5e
topology: v5e:2x2
jax: 0.10.0
libtpu: 0.0.40
codegen_flags: <defaults>
</compile_context>

<pallas_src>
import jax
import jax.numpy as jnp
from jax.experimental import pallas as pl
from jax.experimental.pallas import tpu as pltpu

N = 2            # batch
IN_SIZE = 64     # latent size
HC = 16          # 128 / 8
WC = 128         # 1024 / 8
NEG_SLOPE = 0.2


# ----------------------------------------------------------------------------
# Fused kernel: Linear + LeakyReLU + (Conv5x5+LeakyReLU)x2 + Conv3x3 + Tanh
# ----------------------------------------------------------------------------
def _make_generator_kernel(batch):
    rows = batch * HC   # images stacked along the sublane axis

    def kernel(x_ref, lw_ref, lb_ref, c0w_ref, c0b_ref, c1w_ref, c1b_ref,
               c2w_ref, c2b_ref, o_ref, act_ref):
        # ------- Stage 1: Linear(64 -> HC*WC) + LeakyReLU, written directly
        #         in (batch*HC, WC) image layout (no relayout of a (N,2048)).
        x = x_ref[...]                                        # (batch, 64)
        for h in range(HC):
            w_h = lw_ref[h]                                   # (64, WC)
            y = jnp.dot(x, w_h,
                        precision=jax.lax.Precision.HIGHEST,
                        preferred_element_type=jnp.float32)   # (batch, WC)
            y = y + lb_ref[h]                                 # (1, WC) bcast
            y = jnp.maximum(y, NEG_SLOPE * y)                 # LeakyReLU
            for n in range(batch):
                r = n * HC + h
                act_ref[r:r + 1, :] = y[n:n + 1, :]

        a = act_ref[...]                                      # (rows, WC)

        # Boundary-mask index maps, hoisted once and reused by all 3 convs.
        # HC is a power of two, so `& (HC-1)` == `% HC`.
        row_in_img = jax.lax.broadcasted_iota(jnp.int32, (rows, WC), 0) & (HC - 1)
        col = jax.lax.broadcasted_iota(jnp.int32, (rows, WC), 1)

        def conv(a, w_ref, b_ref, ksize, act):
            pad = ksize // 2
            acc = jnp.zeros((rows, WC), jnp.float32)
            for dy in range(ksize):
                oy = dy - pad
                if oy > 0:
                    rmask = row_in_img < (HC - oy)
                elif oy < 0:
                    rmask = row_in_img >= (-oy)
                else:
                    rmask = None
                # t_row[r, c] = a[(r + oy) mod rows, c]  (sublane rotate, XLU)
                t_row = a if oy == 0 else pltpu.roll(a, shift=(-oy) % rows, axis=0)
                for dx in range(ksize):
                    ox = dx - pad
                    if ox > 0:
                        cmask = col < (WC - ox)
                    elif ox < 0:
                        cmask = col >= (-ox)
                    else:
                        cmask = None
                    # t[r, c] = a[(r+oy) mod rows, (c+ox) mod WC]  (lane rotate)
                    t = t_row if ox == 0 else pltpu.roll(t_row, shift=(-ox) % WC, axis=1)
                    if rmask is not None and cmask is not None:
                        m = rmask & cmask
                    elif rmask is not None:
                        m = rmask
                    else:
                        m = cmask
                    if m is not None:           # zero-padding / no cross-image bleed
                        t = jnp.where(m, t, 0.0)
                    acc = acc + w_ref[dy, dx] * t
            acc = acc + b_ref[0]
            if act == "leaky":
                return jnp.maximum(acc, NEG_SLOPE * acc)
            return jnp.tanh(acc)

        a = conv(a, c0w_ref, c0b_ref, 5, "leaky")
        a = conv(a, c1w_ref, c1b_ref, 5, "leaky")
        a = conv(a, c2w_ref, c2b_ref, 3, "tanh")
        o_ref[...] = a

    return kernel


def generator_pallas(x2d, lw, lb, c0w, c0b, c1w, c1b, c2w, c2b):
    """x2d: (n, 64); lw: (HC, 64, WC); lb: (HC, 1, WC). Returns (n*HC, WC)."""
    n = x2d.shape[0]
    rows = n * HC
    smem = pl.BlockSpec(memory_space=pltpu.MemorySpace.SMEM)
    return pl.pallas_call(
        _make_generator_kernel(n),
        out_shape=jax.ShapeDtypeStruct((rows, WC), jnp.float32),
        in_specs=[
            pl.BlockSpec((n, IN_SIZE), lambda: (0, 0)),          # x
            pl.BlockSpec((HC, IN_SIZE, WC), lambda: (0, 0, 0)),  # linear weight
            pl.BlockSpec((HC, 1, WC), lambda: (0, 0, 0)),        # linear bias
            smem, smem,                                          # conv0 w, b
            smem, smem,                                          # conv1 w, b
            smem, smem,                                          # conv2 w, b
        ],
        out_specs=pl.BlockSpec((rows, WC), lambda: (0, 0)),
        scratch_shapes=[pltpu.VMEM((rows, WC), jnp.float32)],
    )(x2d, lw, lb, c0w, c0b, c1w, c1b, c2w, c2b)


# ----------------------------------------------------------------------------
# Parameter init (deterministic, synthetic — xavier-ish small weights)
# ----------------------------------------------------------------------------
def init_params(key):
    k = jax.random.split(key, 8)
    params = {}
    # Linear(64 -> 2048): stored transposed (in, out) for x @ W
    lim_lin = (6.0 / (IN_SIZE + HC * WC)) ** 0.5
    params["lin_w"] = jax.random.uniform(
        k[0], (IN_SIZE, HC * WC), jnp.float32, -lim_lin, lim_lin)
    params["lin_b"] = jax.random.uniform(
        k[1], (HC * WC,), jnp.float32, -lim_lin, lim_lin)
    # Two 5x5 conv layers (1->1 channel)
    lim5 = (6.0 / (25 + 25)) ** 0.5
    params["c0_w"] = jax.random.uniform(k[2], (5, 5), jnp.float32, -lim5, lim5)
    params["c0_b"] = jnp.zeros((1,), jnp.float32)
    params["c1_w"] = jax.random.uniform(k[3], (5, 5), jnp.float32, -lim5, lim5)
    params["c1_b"] = jnp.zeros((1,), jnp.float32)
    # Output 3x3 conv
    lim3 = (6.0 / (9 + 9)) ** 0.5
    params["c2_w"] = jax.random.uniform(k[4], (3, 3), jnp.float32, -lim3, lim3)
    params["c2_b"] = jnp.zeros((1,), jnp.float32)
    return params


# ----------------------------------------------------------------------------
# Full forward (single fused Pallas call) and a pure-JAX reference
# ----------------------------------------------------------------------------
@jax.jit
def generator_forward(params, x):
    # x: (N, 1, 64)
    n = x.shape[0]
    x2d = x.reshape(n, IN_SIZE)
    # Pre-reshape linear params into image layout (tiny, done under jit).
    lw = params["lin_w"].reshape(IN_SIZE, HC, WC).transpose(1, 0, 2)  # (HC,64,WC)
    lb = params["lin_b"].reshape(HC, 1, WC)
    out2d = generator_pallas(x2d, lw, lb,
                             params["c0_w"], params["c0_b"],
                             params["c1_w"], params["c1_b"],
                             params["c2_w"], params["c2_b"])
    return out2d.reshape(n, 1, HC, WC)                                # NCHW


def _ref_conv(x, w, b, ksize, act):
    pad = ksize // 2
    xp = jnp.pad(x, ((0, 0), (pad, pad), (pad, pad)))
    n, h, wd = x.shape
    acc = jnp.zeros_like(x)
    for dy in range(ksize):
        for dx in range(ksize):
            acc = acc + w[dy, dx] * xp[:, dy:dy + h, dx:dx + wd]
    acc = acc + b[0]
    if act == "leaky":
        return jnp.maximum(acc, NEG_SLOPE * acc)
    return jnp.tanh(acc)


def reference_forward(params, x):
    n = x.shape[0]
    y = jnp.dot(x.reshape(n, IN_SIZE), params["lin_w"],
                precision=jax.lax.Precision.HIGHEST,
                preferred_element_type=jnp.float32) + params["lin_b"]
    y = jnp.maximum(y, NEG_SLOPE * y)
    h = y.reshape(n, HC, WC)
    h = _ref_conv(h, params["c0_w"], params["c0_b"], 5, "leaky")
    h = _ref_conv(h, params["c1_w"], params["c1_b"], 5, "leaky")
    h = _ref_conv(h, params["c2_w"], params["c2_b"], 3, "tanh")
    return h.reshape(n, 1, HC, WC)


if __name__ == "__main__":
    key = jax.random.PRNGKey(0)
    pkey, xkey = jax.random.split(key)
    params = init_params(pkey)
    x = jax.random.normal(xkey, (N, 1, IN_SIZE), jnp.float32)

    out = generator_forward(params, x)
    out = jax.block_until_ready(out)

    assert out.shape == (N, 1, HC, WC), out.shape
    assert bool(jnp.all(jnp.isfinite(out)))
    ref = reference_forward(params, x)
    assert bool(jnp.allclose(out, ref, atol=1e-4, rtol=1e-4)), (
        float(jnp.max(jnp.abs(out - ref))))
    print("KERNEL_OK")
</pallas_src>

<mosaic_0001>
module attributes {stable_mosaic.version = 11 : i64} {
  func.func @kernel(%arg0: memref<2x64xf32, #tpu.memory_space<vmem>>, %arg1: memref<16x64x128xf32, #tpu.memory_space<vmem>>, %arg2: memref<16x1x128xf32, #tpu.memory_space<vmem>>, %arg3: memref<5x5xf32, #tpu.memory_space<smem>>, %arg4: memref<1xf32, #tpu.memory_space<smem>>, %arg5: memref<5x5xf32, #tpu.memory_space<smem>>, %arg6: memref<1xf32, #tpu.memory_space<smem>>, %arg7: memref<3x3xf32, #tpu.memory_space<smem>>, %arg8: memref<1xf32, #tpu.memory_space<smem>>, %arg9: memref<32x128xf32, #tpu.memory_space<vmem>>, %arg10: memref<32x128xf32, #tpu.memory_space<vmem>>) attributes {dimension_semantics = [], scalar_prefetch = 0 : i64, scratch_operands = 1 : i64, tpu.core_type = #tpu.core_type<tc>} {
    %c0 = arith.constant 0 : index
    %c0_0 = arith.constant 0 : index
    %0 = vector.load %arg0[%c0, %c0_0] : memref<2x64xf32, #tpu.memory_space<vmem>>, vector<2x64xf32>
    %c0_1 = arith.constant 0 : index
    %c0_2 = arith.constant 0 : index
    %c0_3 = arith.constant 0 : index
    %1 = vector.load %arg1[%c0_1, %c0_2, %c0_3] : memref<16x64x128xf32, #tpu.memory_space<vmem>>, vector<1x64x128xf32>
    %2 = vector.shape_cast %1 : vector<1x64x128xf32> to vector<64x128xf32>
    %cst = arith.constant dense<0.000000e+00> : vector<2x128xf32>
    %3 = tpu.matmul %0, %2, %cst {dimension_numbers = #tpu.dot_dimension_numbers<[1], [0], [0], [1], [0, 0, 1, 1], [], []>, precision = #tpu.contract_precision<fp32>} : vector<2x64xf32>, vector<64x128xf32>, vector<2x128xf32> -> vector<2x128xf32>
    %c0_4 = arith.constant 0 : index
    %c0_5 = arith.constant 0 : index
    %c0_6 = arith.constant 0 : index
    %4 = vector.load %arg2[%c0_4, %c0_5, %c0_6] : memref<16x1x128xf32, #tpu.memory_space<vmem>>, vector<1x1x128xf32>
    %5 = vector.shape_cast %4 : vector<1x1x128xf32> to vector<1x128xf32>
    %6 = vector.broadcast %5 : vector<1x128xf32> to vector<2x128xf32>
    %7 = arith.addf %3, %6 : vector<2x128xf32>
    %cst_7 = arith.constant 2.000000e-01 : f32
    %8 = vector.broadcast %cst_7 : f32 to vector<2x128xf32>
    %9 = arith.mulf %8, %7 : vector<2x128xf32>
    %10 = arith.maximumf %7, %9 : vector<2x128xf32>
    %11 = vector.extract_strided_slice %10 {offsets = [0, 0], sizes = [1, 128], strides = [1, 1]} : vector<2x128xf32> to vector<1x128xf32>
    %c0_8 = arith.constant 0 : index
    %c0_9 = arith.constant 0 : index
    %12 = vector.load %arg10[%c0_8, %c0_9] : memref<32x128xf32, #tpu.memory_space<vmem>>, vector<1x128xf32>
    tpu.vector_store %arg10[%c0_8, %c0_9], %11 {strides = array<i32>} : memref<32x128xf32, #tpu.memory_space<vmem>>, vector<1x128xf32>,
    %13 = vector.extract_strided_slice %10 {offsets = [1, 0], sizes = [1, 128], strides = [1, 1]} : vector<2x128xf32> to vector<1x128xf32>
    %c16 = arith.constant 16 : index
    %c0_10 = arith.constant 0 : index
    %14 = vector.load %arg10[%c16, %c0_10] : memref<32x128xf32, #tpu.memory_space<vmem>>, vector<1x128xf32>
    tpu.vector_store %arg10[%c16, %c0_10], %13 {strides = array<i32>} : memref<32x128xf32, #tpu.memory_space<vmem>>, vector<1x128xf32>,
    %c1 = arith.constant 1 : index
    %c0_11 = arith.constant 0 : index
    %c0_12 = arith.constant 0 : index
    %15 = vector.load %arg1[%c1, %c0_11, %c0_12] : memref<16x64x128xf32, #tpu.memory_space<vmem>>, vector<1x64x128xf32>
    %16 = vector.shape_cast %15 : vector<1x64x128xf32> to vector<64x128xf32>
    %cst_13 = arith.constant dense<0.000000e+00> : vector<2x128xf32>
    %17 = tpu.matmul %0, %16, %cst_13 {dimension_numbers = #tpu.dot_dimension_numbers<[1], [0], [0], [1], [0, 0, 1, 1], [], []>, precision = #tpu.contract_precision<fp32>} : vector<2x64xf32>, vector<64x128xf32>, vector<2x128xf32> -> vector<2x128xf32>
    %c1_14 = arith.constant 1 : index
    %c0_15 = arith.constant 0 : index
    %c0_16 = arith.constant 0 : index
    %18 = vector.load %arg2[%c1_14, %c0_15, %c0_16] : memref<16x1x128xf32, #tpu.memory_space<vmem>>, vector<1x1x128xf32>
    %19 = vector.shape_cast %18 : vector<1x1x128xf32> to vector<1x128xf32>
    %20 = vector.broadcast %19 : vector<1x128xf32> to vector<2x128xf32>
    %21 = arith.addf %17, %20 : vector<2x128xf32>
    %cst_17 = arith.constant 2.000000e-01 : f32
    %22 = vector.broadcast %cst_17 : f32 to vector<2x128xf32>
    %23 = arith.mulf %22, %21 : vector<2x128xf32>
    %24 = arith.maximumf %21, %23 : vector<2x128xf32>
    %25 = vector.extract_strided_slice %24 {offsets = [0, 0], sizes = [1, 128], strides = [1, 1]} : vector<2x128xf32> to vector<1x128xf32>
    %c1_18 = arith.constant 1 : index
    %c0_19 = arith.constant 0 : index
    %26 = vector.load %arg10[%c1_18, %c0_19] : memref<32x128xf32, #tpu.memory_space<vmem>>, vector<1x128xf32>
    tpu.vector_store %arg10[%c1_18, %c0_19], %25 {strides = array<i32>} : memref<32x128xf32, #tpu.memory_space<vmem>>, vector<1x128xf32>,
    %27 = vector.extract_strided_slice %24 {offsets = [1, 0], sizes = [1, 128], strides = [1, 1]} : vector<2x128xf32> to vector<1x128xf32>
    %c17 = arith.constant 17 : index
    %c0_20 = arith.constant 0 : index
    %28 = vector.load %arg10[%c17, %c0_20] : memref<32x128xf32, #tpu.memory_space<vmem>>, vector<1x128xf32>
    tpu.vector_store %arg10[%c17, %c0_20], %27 {strides = array<i32>} : memref<32x128xf32, #tpu.memory_space<vmem>>, vector<1x128xf32>,
    %c2 = arith.constant 2 : index
    %c0_21 = arith.constant 0 : index
    %c0_22 = arith.constant 0 : index
    %29 = vector.load %arg1[%c2, %c0_21, %c0_22] : memref<16x64x128xf32, #tpu.memory_space<vmem>>, vector<1x64x128xf32>
    %30 = vector.shape_cast %29 : vector<1x64x128xf32> to vector<64x128xf32>
    %cst_23 = arith.constant dense<0.000000e+00> : vector<2x128xf32>
    %31 = tpu.matmul %0, %30, %cst_23 {dimension_numbers = #tpu.dot_dimension_numbers<[1], [0], [0], [1], [0, 0, 1, 1], [], []>, precision = #tpu.contract_precision<fp32>} : vector<2x64xf32>, vector<64x128xf32>, vector<2x128xf32> -> vector<2x128xf32>
    %c2_24 = arith.constant 2 : index
    %c0_25 = arith.constant 0 : index
    %c0_26 = arith.constant 0 : index
    %32 = vector.load %arg2[%c2_24, %c0_25, %c0_26] : memref<16x1x128xf32, #tpu.memory_space<vmem>>, vector<1x1x128xf32>
    %33 = vector.shape_cast %32 : vector<1x1x128xf32> to vector<1x128xf32>
    %34 = vector.broadcast %33 : vector<1x128xf32> to vector<2x128xf32>
    %35 = arith.addf %31, %34 : vector<2x128xf32>
    %cst_27 = arith.constant 2.000000e-01 : f32
    %36 = vector.broadcast %cst_27 : f32 to vector<2x128xf32>
    %37 = arith.mulf %36, %35 : vector<2x128xf32>
    %38 = arith.maximumf %35, %37 : vector<2x128xf32>
    %39 = vector.extract_strided_slice %38 {offsets = [0, 0], sizes = [1, 128], strides = [1, 1]} : vector<2x128xf32> to vector<1x128xf32>
    %c2_28 = arith.constant 2 : index
    %c0_29 = arith.constant 0 : index
    %40 = vector.load %arg10[%c2_28, %c0_29] : memref<32x128xf32, #tpu.memory_space<vmem>>, vector<1x128xf32>
    tpu.vector_store %arg10[%c2_28, %c0_29], %39 {strides = array<i32>} : memref<32x128xf32, #tpu.memory_space<vmem>>, vector<1x128xf32>,
    %41 = vector.extract_strided_slice %38 {offsets = [1, 0], sizes = [1, 128], strides = [1, 1]} : vector<2x128xf32> to vector<1x128xf32>
    %c18 = arith.constant 18 : index
    %c0_30 = arith.constant 0 : index
    %42 = vector.load %arg10[%c18, %c0_30] : memref<32x128xf32, #tpu.memory_space<vmem>>, vector<1x128xf32>
    tpu.vector_store %arg10[%c18, %c0_30], %41 {strides = array<i32>} : memref<32x128xf32, #tpu.memory_space<vmem>>, vector<1x128xf32>,
    %c3 = arith.constant 3 : index
    %c0_31 = arith.constant 0 : index
    %c0_32 = arith.constant 0 : index
    %43 = vector.load %arg1[%c3, %c0_31, %c0_32] : memref<16x64x128xf32, #tpu.memory_space<vmem>>, vector<1x64x128xf32>
    %44 = vector.shape_cast %43 : vector<1x64x128xf32> to vector<64x128xf32>
    %cst_33 = arith.constant dense<0.000000e+00> : vector<2x128xf32>
    %45 = tpu.matmul %0, %44, %cst_33 {dimension_numbers = #tpu.dot_dimension_numbers<[1], [0], [0], [1], [0, 0, 1, 1], [], []>, precision = #tpu.contract_precision<fp32>} : vector<2x64xf32>, vector<64x128xf32>, vector<2x128xf32> -> vector<2x128xf32>
    %c3_34 = arith.constant 3 : index
    %c0_35 = arith.constant 0 : index
    %c0_36 = arith.constant 0 : index
    %46 = vector.load %arg2[%c3_34, %c0_35, %c0_36] : memref<16x1x128xf32, #tpu.memory_space<vmem>>, vector<1x1x128xf32>
    %47 = vector.shape_cast %46 : vector<1x1x128xf32> to vector<1x128xf32>
    %48 = vector.broadcast %47 : vector<1x128xf32> to vector<2x128xf32>
    %49 = arith.addf %45, %48 : vector<2x128xf32>
    %cst_37 = arith.constant 2.000000e-01 : f32
    %50 = vector.broadcast %cst_37 : f32 to vector<2x128xf32>
    %51 = arith.mulf %50, %49 : vector<2x128xf32>
    %52 = arith.maximumf %49, %51 : vector<2x128xf32>
    %53 = vector.extract_strided_slice %52 {offsets = [0, 0], sizes = [1, 128], strides = [1, 1]} : vector<2x128xf32> to vector<1x128xf32>
    %c3_38 = arith.constant 3 : index
    %c0_39 = arith.constant 0 : index
    %54 = vector.load %arg10[%c3_38, %c0_39] : memref<32x128xf32, #tpu.memory_space<vmem>>, vector<1x128xf32>
    tpu.vector_store %arg10[%c3_38, %c0_39], %53 {strides = array<i32>} : memref<32x128xf32, #tpu.memory_space<vmem>>, vector<1x128xf32>,
    %55 = vector.extract_strided_slice %52 {offsets = [1, 0], sizes = [1, 128], strides = [1, 1]} : vector<2x128xf32> to vector<1x128xf32>
    %c19 = arith.constant 19 : index
    %c0_40 = arith.constant 0 : index
    %56 = vector.load %arg10[%c19, %c0_40] : memref<32x128xf32, #tpu.memory_space<vmem>>, vector<1x128xf32>
    tpu.vector_store %arg10[%c19, %c0_40], %55 {strides = array<i32>} : memref<32x128xf32, #tpu.memory_space<vmem>>, vector<1x128xf32>,
    %c4 = arith.constant 4 : index
    %c0_41 = arith.constant 0 : index
    %c0_42 = arith.constant 0 : index
    %57 = vector.load %arg1[%c4, %c0_41, %c0_42] : memref<16x64x128xf32, #tpu.memory_space<vmem>>, vector<1x64x128xf32>
    %58 = vector.shape_cast %57 : vector<1x64x128xf32> to vector<64x128xf32>
    %cst_43 = arith.constant dense<0.000000e+00> : vector<2x128xf32>
    %59 = tpu.matmul %0, %58, %cst_43 {dimension_numbers = #tpu.dot_dimension_numbers<[1], [0], [0], [1], [0, 0, 1, 1], [], []>, precision = #tpu.contract_precision<fp32>} : vector<2x64xf32>, vector<64x128xf32>, vector<2x128xf32> -> vector<2x128xf32>
    %c4_44 = arith.constant 4 : index
    %c0_45 = arith.constant 0 : index
    %c0_46 = arith.constant 0 : index
    %60 = vector.load %arg2[%c4_44, %c0_45, %c0_46] : memref<16x1x128xf32, #tpu.memory_space<vmem>>, vector<1x1x128xf32>
    %61 = vector.shape_cast %60 : vector<1x1x128xf32> to vector<1x128xf32>
    %62 = vector.broadcast %61 : vector<1x128xf32> to vector<2x128xf32>
    %63 = arith.addf %59, %62 : vector<2x128xf32>
    %cst_47 = arith.constant 2.000000e-01 : f32
    %64 = vector.broadcast %cst_47 : f32 to vector<2x128xf32>
    %65 = arith.mulf %64, %63 : vector<2x128xf32>
    %66 = arith.maximumf %63, %65 : vector<2x128xf32>
    %67 = vector.extract_strided_slice %66 {offsets = [0, 0], sizes = [1, 128], strides = [1, 1]} : vector<2x128xf32> to vector<1x128xf32>
    %c4_48 = arith.constant 4 : index
    %c0_49 = arith.constant 0 : index
    %68 = vector.load %arg10[%c4_48, %c0_49] : memref<32x128xf32, #tpu.memory_space<vmem>>, vector<1x128xf32>
    tpu.vector_store %arg10[%c4_48, %c0_49], %67 {strides = array<i32>} : memref<32x128xf32, #tpu.memory_space<vmem>>, vector<1x128xf32>,
    %69 = vector.extract_strided_slice %66 {offsets = [1, 0], sizes = [1, 128], strides = [1, 1]} : vector<2x128xf32> to vector<1x128xf32>
    %c20 = arith.constant 20 : index
    %c0_50 = arith.constant 0 : index
    %70 = vector.load %arg10[%c20, %c0_50] : memref<32x128xf32, #tpu.memory_space<vmem>>, vector<1x128xf32>
    tpu.vector_store %arg10[%c20, %c0_50], %69 {strides = array<i32>} : memref<32x128xf32, #tpu.memory_space<vmem>>, vector<1x128xf32>,
    %c5 = arith.constant 5 : index
    %c0_51 = arith.constant 0 : index
    %c0_52 = arith.constant 0 : index
    %71 = vector.load %arg1[%c5, %c0_51, %c0_52] : memref<16x64x128xf32, #tpu.memory_space<vmem>>, vector<1x64x128xf32>
    %72 = vector.shape_cast %71 : vector<1x64x128xf32> to vector<64x128xf32>
    %cst_53 = arith.constant dense<0.000000e+00> : vector<2x128xf32>
    %73 = tpu.matmul %0, %72, %cst_53 {dimension_numbers = #tpu.dot_dimension_numbers<[1], [0], [0], [1], [0, 0, 1, 1], [], []>, precision = #tpu.contract_precision<fp32>} : vector<2x64xf32>, vector<64x128xf32>, vector<2x128xf32> -> vector<2x128xf32>
    %c5_54 = arith.constant 5 : index
    %c0_55 = arith.constant 0 : index
    %c0_56 = arith.constant 0 : index
    %74 = vector.load %arg2[%c5_54, %c0_55, %c0_56] : memref<16x1x128xf32, #tpu.memory_space<vmem>>, vector<1x1x128xf32>
    %75 = vector.shape_cast %74 : vector<1x1x128xf32> to vector<1x128xf32>
    %76 = vector.broadcast %75 : vector<1x128xf32> to vector<2x128xf32>
    %77 = arith.addf %73, %76 : vector<2x128xf32>
    %cst_57 = arith.constant 2.000000e-01 : f32
    %78 = vector.broadcast %cst_57 : f32 to vector<2x128xf32>
    %79 = arith.mulf %78, %77 : vector<2x128xf32>
    %80 = arith.maximumf %77, %79 : vector<2x128xf32>
    %81 = vector.extract_strided_slice %80 {offsets = [0, 0], sizes = [1, 128], strides = [1, 1]} : vector<2x128xf32> to vector<1x128xf32>
    %c5_58 = arith.constant 5 : index
    %c0_59 = arith.constant 0 : index
    %82 = vector.load %arg10[%c5_58, %c0_59] : memref<32x128xf32, #tpu.memory_space<vmem>>, vector<1x128xf32>
    tpu.vector_store %arg10[%c5_58, %c0_59], %81 {strides = array<i32>} : memref<32x128xf32, #tpu.memory_space<vmem>>, vector<1x128xf32>,
    %83 = vector.extract_strided_slice %80 {offsets = [1, 0], sizes = [1, 128], strides = [1, 1]} : vector<2x128xf32> to vector<1x128xf32>
    %c21 = arith.constant 21 : index
    %c0_60 = arith.constant 0 : index
    %84 = vector.load %arg10[%c21, %c0_60] : memref<32x128xf32, #tpu.memory_space<vmem>>, vector<1x128xf32>
    tpu.vector_store %arg10[%c21, %c0_60], %83 {strides = array<i32>} : memref<32x128xf32, #tpu.memory_space<vmem>>, vector<1x128xf32>,
    %c6 = arith.constant 6 : index
    %c0_61 = arith.constant 0 : index
    %c0_62 = arith.constant 0 : index
    %85 = vector.load %arg1[%c6, %c0_61, %c0_62] : memref<16x64x128xf32, #tpu.memory_space<vmem>>, vector<1x64x128xf32>
    %86 = vector.shape_cast %85 : vector<1x64x128xf32> to vector<64x128xf32>
    %cst_63 = arith.constant dense<0.000000e+00> : vector<2x128xf32>
    %87 = tpu.matmul %0, %86, %cst_63 {dimension_numbers = #tpu.dot_dimension_numbers<[1], [0], [0], [1], [0, 0, 1, 1], [], []>, precision = #tpu.contract_precision<fp32>} : vector<2x64xf32>, vector<64x128xf32>, vector<2x128xf32> -> vector<2x128xf32>
    %c6_64 = arith.constant 6 : index
    %c0_65 = arith.constant 0 : index
    %c0_66 = arith.constant 0 : index
    %88 = vector.load %arg2[%c6_64, %c0_65, %c0_66] : memref<16x1x128xf32, #tpu.memory_space<vmem>>, vector<1x1x128xf32>
    %89 = vector.shape_cast %88 : vector<1x1x128xf32> to vector<1x128xf32>
    %90 = vector.broadcast %89 : vector<1x128xf32> to vector<2x128xf32>
    %91 = arith.addf %87, %90 : vector<2x128xf32>
    %cst_67 = arith.constant 2.000000e-01 : f32
    %92 = vector.broadcast %cst_67 : f32 to vector<2x128xf32>
    %93 = arith.mulf %92, %91 : vector<2x128xf32>
    %94 = arith.maximumf %91, %93 : vector<2x128xf32>
    %95 = vector.extract_strided_slice %94 {offsets = [0, 0], sizes = [1, 128], strides = [1, 1]} : vector<2x128xf32> to vector<1x128xf32>
    %c6_68 = arith.constant 6 : index
    %c0_69 = arith.constant 0 : index
    %96 = vector.load %arg10[%c6_68, %c0_69] : memref<32x128xf32, #tpu.memory_space<vmem>>, vector<1x128xf32>
    tpu.vector_store %arg10[%c6_68, %c0_69], %95 {strides = array<i32>} : memref<32x128xf32, #tpu.memory_space<vmem>>, vector<1x128xf32>,
    %97 = vector.extract_strided_slice %94 {offsets = [1, 0], sizes = [1, 128], strides = [1, 1]} : vector<2x128xf32> to vector<1x128xf32>
    %c22 = arith.constant 22 : index
    %c0_70 = arith.constant 0 : index
    %98 = vector.load %arg10[%c22, %c0_70] : memref<32x128xf32, #tpu.memory_space<vmem>>, vector<1x128xf32>
    tpu.vector_store %arg10[%c22, %c0_70], %97 {strides = array<i32>} : memref<32x128xf32, #tpu.memory_space<vmem>>, vector<1x128xf32>,
    %c7 = arith.constant 7 : index
    %c0_71 = arith.constant 0 : index
    %c0_72 = arith.constant 0 : index
    %99 = vector.load %arg1[%c7, %c0_71, %c0_72] : memref<16x64x128xf32, #tpu.memory_space<vmem>>, vector<1x64x128xf32>
    %100 = vector.shape_cast %99 : vector<1x64x128xf32> to vector<64x128xf32>
    %cst_73 = arith.constant dense<0.000000e+00> : vector<2x128xf32>
    %101 = tpu.matmul %0, %100, %cst_73 {dimension_numbers = #tpu.dot_dimension_numbers<[1], [0], [0], [1], [0, 0, 1, 1], [], []>, precision = #tpu.contract_precision<fp32>} : vector<2x64xf32>, vector<64x128xf32>, vector<2x128xf32> -> vector<2x128xf32>
    %c7_74 = arith.constant 7 : index
    %c0_75 = arith.constant 0 : index
    %c0_76 = arith.constant 0 : index
    %102 = vector.load %arg2[%c7_74, %c0_75, %c0_76] : memref<16x1x128xf32, #tpu.memory_space<vmem>>, vector<1x1x128xf32>
    %103 = vector.shape_cast %102 : vector<1x1x128xf32> to vector<1x128xf32>
    %104 = vector.broadcast %103 : vector<1x128xf32> to vector<2x128xf32>
    %105 = arith.addf %101, %104 : vector<2x128xf32>
    %cst_77 = arith.constant 2.000000e-01 : f32
    %106 = vector.broadcast %cst_77 : f32 to vector<2x128xf32>
    %107 = arith.mulf %106, %105 : vector<2x128xf32>
    %108 = arith.maximumf %105, %107 : vector<2x128xf32>
    %109 = vector.extract_strided_slice %108 {offsets = [0, 0], sizes = [1, 128], strides = [1, 1]} : vector<2x128xf32> to vector<1x128xf32>
    %c7_78 = arith.constant 7 : index
    %c0_79 = arith.constant 0 : index
    %110 = vector.load %arg10[%c7_78, %c0_79] : memref<32x128xf32, #tpu.memory_space<vmem>>, vector<1x128xf32>
    tpu.vector_store %arg10[%c7_78, %c0_79], %109 {strides = array<i32>} : memref<32x128xf32, #tpu.memory_space<vmem>>, vector<1x128xf32>,
    %111 = vector.extract_strided_slice %108 {offsets = [1, 0], sizes = [1, 128], strides = [1, 1]} : vector<2x128xf32> to vector<1x128xf32>
    %c23 = arith.constant 23 : index
    %c0_80 = arith.constant 0 : index
    %112 = vector.load %arg10[%c23, %c0_80] : memref<32x128xf32, #tpu.memory_space<vmem>>, vector<1x128xf32>
    tpu.vector_store %arg10[%c23, %c0_80], %111 {strides = array<i32>} : memref<32x128xf32, #tpu.memory_space<vmem>>, vector<1x128xf32>,
    %c8 = arith.constant 8 : index
    %c0_81 = arith.constant 0 : index
    %c0_82 = arith.constant 0 : index
    %113 = vector.load %arg1[%c8, %c0_81, %c0_82] : memref<16x64x128xf32, #tpu.memory_space<vmem>>, vector<1x64x128xf32>
    %114 = vector.shape_cast %113 : vector<1x64x128xf32> to vector<64x128xf32>
    %cst_83 = arith.constant dense<0.000000e+00> : vector<2x128xf32>
    %115 = tpu.matmul %0, %114, %cst_83 {dimension_numbers = #tpu.dot_dimension_numbers<[1], [0], [0], [1], [0, 0, 1, 1], [], []>, precision = #tpu.contract_precision<fp32>} : vector<2x64xf32>, vector<64x128xf32>, vector<2x128xf32> -> vector<2x128xf32>
    %c8_84 = arith.constant 8 : index
    %c0_85 = arith.constant 0 : index
    %c0_86 = arith.constant 0 : index
    %116 = vector.load %arg2[%c8_84, %c0_85, %c0_86] : memref<16x1x128xf32, #tpu.memory_space<vmem>>, vector<1x1x128xf32>
    %117 = vector.shape_cast %116 : vector<1x1x128xf32> to vector<1x128xf32>
    %118 = vector.broadcast %117 : vector<1x128xf32> to vector<2x128xf32>
    %119 = arith.addf %115, %118 : vector<2x128xf32>
    %cst_87 = arith.constant 2.000000e-01 : f32
    %120 = vector.broadcast %cst_87 : f32 to vector<2x128xf32>
    %121 = arith.mulf %120, %119 : vector<2x128xf32>
    %122 = arith.maximumf %119, %121 : vector<2x128xf32>
    %123 = vector.extract_strided_slice %122 {offsets = [0, 0], sizes = [1, 128], strides = [1, 1]} : vector<2x128xf32> to vector<1x128xf32>
    %c8_88 = arith.constant 8 : index
    %c0_89 = arith.constant 0 : index
    %124 = vector.load %arg10[%c8_88, %c0_89] : memref<32x128xf32, #tpu.memory_space<vmem>>, vector<1x128xf32>
    tpu.vector_store %arg10[%c8_88, %c0_89], %123 {strides = array<i32>} : memref<32x128xf32, #tpu.memory_space<vmem>>, vector<1x128xf32>,
    %125 = vector.extract_strided_slice %122 {offsets = [1, 0], sizes = [1, 128], strides = [1, 1]} : vector<2x128xf32> to vector<1x128xf32>
    %c24 = arith.constant 24 : index
    %c0_90 = arith.constant 0 : index
    %126 = vector.load %arg10[%c24, %c0_90] : memref<32x128xf32, #tpu.memory_space<vmem>>, vector<1x128xf32>
    tpu.vector_store %arg10[%c24, %c0_90], %125 {strides = array<i32>} : memref<32x128xf32, #tpu.memory_space<vmem>>, vector<1x128xf32>,
    %c9 = arith.constant 9 : index
    %c0_91 = arith.constant 0 : index
    %c0_92 = arith.constant 0 : index
    %127 = vector.load %arg1[%c9, %c0_91, %c0_92] : memref<16x64x128xf32, #tpu.memory_space<vmem>>, vector<1x64x128xf32>
    %128 = vector.shape_cast %127 : vector<1x64x128xf32> to vector<64x128xf32>
    %cst_93 = arith.constant dense<0.000000e+00> : vector<2x128xf32>
    %129 = tpu.matmul %0, %128, %cst_93 {dimension_numbers = #tpu.dot_dimension_numbers<[1], [0], [0], [1], [0, 0, 1, 1], [], []>, precision = #tpu.contract_precision<fp32>} : vector<2x64xf32>, vector<64x128xf32>, vector<2x128xf32> -> vector<2x128xf32>
    %c9_94 = arith.constant 9 : index
    %c0_95 = arith.constant 0 : index
    %c0_96 = arith.constant 0 : index
    %130 = vector.load %arg2[%c9_94, %c0_95, %c0_96] : memref<16x1x128xf32, #tpu.memory_space<vmem>>, vector<1x1x128xf32>
    %131 = vector.shape_cast %130 : vector<1x1x128xf32> to vector<1x128xf32>
    %132 = vector.broadcast %131 : vector<1x128xf32> to vector<2x128xf32>
    %133 = arith.addf %129, %132 : vector<2x128xf32>
    %cst_97 = arith.constant 2.000000e-01 : f32
    %134 = vector.broadcast %cst_97 : f32 to vector<2x128xf32>
    %135 = arith.mulf %134, %133 : vector<2x128xf32>
    %136 = arith.maximumf %133, %135 : vector<2x128xf32>
    %137 = vector.extract_strided_slice %136 {offsets = [0, 0], sizes = [1, 128], strides = [1, 1]} : vector<2x128xf32> to vector<1x128xf32>
    %c9_98 = arith.constant 9 : index
    %c0_99 = arith.constant 0 : index
    %138 = vector.load %arg10[%c9_98, %c0_99] : memref<32x128xf32, #tpu.memory_space<vmem>>, vector<1x128xf32>
    tpu.vector_store %arg10[%c9_98, %c0_99], %137 {strides = array<i32>} : memref<32x128xf32, #tpu.memory_space<vmem>>, vector<1x128xf32>,
    %139 = vector.extract_strided_slice %136 {offsets = [1, 0], sizes = [1, 128], strides = [1, 1]} : vector<2x128xf32> to vector<1x128xf32>
    %c25 = arith.constant 25 : index
    %c0_100 = arith.constant 0 : index
    %140 = vector.load %arg10[%c25, %c0_100] : memref<32x128xf32, #tpu.memory_space<vmem>>, vector<1x128xf32>
    tpu.vector_store %arg10[%c25, %c0_100], %139 {strides = array<i32>} : memref<32x128xf32, #tpu.memory_space<vmem>>, vector<1x128xf32>,
    %c10 = arith.constant 10 : index
    %c0_101 = arith.constant 0 : index
    %c0_102 = arith.constant 0 : index
    %141 = vector.load %arg1[%c10, %c0_101, %c0_102] : memref<16x64x128xf32, #tpu.memory_space<vmem>>, vector<1x64x128xf32>
    %142 = vector.shape_cast %141 : vector<1x64x128xf32> to vector<64x128xf32>
    %cst_103 = arith.constant dense<0.000000e+00> : vector<2x128xf32>
    %143 = tpu.matmul %0, %142, %cst_103 {dimension_numbers = #tpu.dot_dimension_numbers<[1], [0], [0], [1], [0, 0, 1, 1], [], []>, precision = #tpu.contract_precision<fp32>} : vector<2x64xf32>, vector<64x128xf32>, vector<2x128xf32> -> vector<2x128xf32>
    %c10_104 = arith.constant 10 : index
    %c0_105 = arith.constant 0 : index
    %c0_106 = arith.constant 0 : index
    %144 = vector.load %arg2[%c10_104, %c0_105, %c0_106] : memref<16x1x128xf32, #tpu.memory_space<vmem>>, vector<1x1x128xf32>
    %145 = vector.shape_cast %144 : vector<1x1x128xf32> to vector<1x128xf32>
    %146 = vector.broadcast %145 : vector<1x128xf32> to vector<2x128xf32>
    %147 = arith.addf %143, %146 : vector<2x128xf32>
    %cst_107 = arith.constant 2.000000e-01 : f32
    %148 = vector.broadcast %cst_107 : f32 to vector<2x128xf32>
    %149 = arith.mulf %148, %147 : vector<2x128xf32>
    %150 = arith.maximumf %147, %149 : vector<2x128xf32>
    %151 = vector.extract_strided_slice %150 {offsets = [0, 0], sizes = [1, 128], strides = [1, 1]} : vector<2x128xf32> to vector<1x128xf32>
    %c10_108 = arith.constant 10 : index
    %c0_109 = arith.constant 0 : index
    %152 = vector.load %arg10[%c10_108, %c0_109] : memref<32x128xf32, #tpu.memory_space<vmem>>, vector<1x128xf32>
    tpu.vector_store %arg10[%c10_108, %c0_109], %151 {strides = array<i32>} : memref<32x128xf32, #tpu.memory_space<vmem>>, vector<1x128xf32>,
    %153 = vector.extract_strided_slice %150 {offsets = [1, 0], sizes = [1, 128], strides = [1, 1]} : vector<2x128xf32> to vector<1x128xf32>
    %c26 = arith.constant 26 : index
    %c0_110 = arith.constant 0 : index
    %154 = vector.load %arg10[%c26, %c0_110] : memref<32x128xf32, #tpu.memory_space<vmem>>, vector<1x128xf32>
    tpu.vector_store %arg10[%c26, %c0_110], %153 {strides = array<i32>} : memref<32x128xf32, #tpu.memory_space<vmem>>, vector<1x128xf32>,
    %c11 = arith.constant 11 : index
    %c0_111 = arith.constant 0 : index
    %c0_112 = arith.constant 0 : index
    %155 = vector.load %arg1[%c11, %c0_111, %c0_112] : memref<16x64x128xf32, #tpu.memory_space<vmem>>, vector<1x64x128xf32>
    %156 = vector.shape_cast %155 : vector<1x64x128xf32> to vector<64x128xf32>
    %cst_113 = arith.constant dense<0.000000e+00> : vector<2x128xf32>
    %157 = tpu.matmul %0, %156, %cst_113 {dimension_numbers = #tpu.dot_dimension_numbers<[1], [0], [0], [1], [0, 0, 1, 1], [], []>, precision = #tpu.contract_precision<fp32>} : vector<2x64xf32>, vector<64x128xf32>, vector<2x128xf32> -> vector<2x128xf32>
    %c11_114 = arith.constant 11 : index
    %c0_115 = arith.constant 0 : index
    %c0_116 = arith.constant 0 : index
    %158 = vector.load %arg2[%c11_114, %c0_115, %c0_116] : memref<16x1x128xf32, #tpu.memory_space<vmem>>, vector<1x1x128xf32>
    %159 = vector.shape_cast %158 : vector<1x1x128xf32> to vector<1x128xf32>
    %160 = vector.broadcast %159 : vector<1x128xf32> to vector<2x128xf32>
    %161 = arith.addf %157, %160 : vector<2x128xf32>
    %cst_117 = arith.constant 2.000000e-01 : f32
    %162 = vector.broadcast %cst_117 : f32 to vector<2x128xf32>
    %163 = arith.mulf %162, %161 : vector<2x128xf32>
    %164 = arith.maximumf %161, %163 : vector<2x128xf32>
    %165 = vector.extract_strided_slice %164 {offsets = [0, 0], sizes = [1, 128], strides = [1, 1]} : vector<2x128xf32> to vector<1x128xf32>
    %c11_118 = arith.constant 11 : index
    %c0_119 = arith.constant 0 : index
    %166 = vector.load %arg10[%c11_118, %c0_119] : memref<32x128xf32, #tpu.memory_space<vmem>>, vector<1x128xf32>
    tpu.vector_store %arg10[%c11_118, %c0_119], %165 {strides = array<i32>} : memref<32x128xf32, #tpu.memory_space<vmem>>, vector<1x128xf32>,
    %167 = vector.extract_strided_slice %164 {offsets = [1, 0], sizes = [1, 128], strides = [1, 1]} : vector<2x128xf32> to vector<1x128xf32>
    %c27 = arith.constant 27 : index
    %c0_120 = arith.constant 0 : index
    %168 = vector.load %arg10[%c27, %c0_120] : memref<32x128xf32, #tpu.memory_space<vmem>>, vector<1x128xf32>
    tpu.vector_store %arg10[%c27, %c0_120], %167 {strides = array<i32>} : memref<32x128xf32, #tpu.memory_space<vmem>>, vector<1x128xf32>,
    %c12 = arith.constant 12 : index
    %c0_121 = arith.constant 0 : index
    %c0_122 = arith.constant 0 : index
    %169 = vector.load %arg1[%c12, %c0_121, %c0_122] : memref<16x64x128xf32, #tpu.memory_space<vmem>>, vector<1x64x128xf32>
    %170 = vector.shape_cast %169 : vector<1x64x128xf32> to vector<64x128xf32>
    %cst_123 = arith.constant dense<0.000000e+00> : vector<2x128xf32>
    %171 = tpu.matmul %0, %170, %cst_123 {dimension_numbers = #tpu.dot_dimension_numbers<[1], [0], [0], [1], [0, 0, 1, 1], [], []>, precision = #tpu.contract_precision<fp32>} : vector<2x64xf32>, vector<64x128xf32>, vector<2x128xf32> -> vector<2x128xf32>
    %c12_124 = arith.constant 12 : index
    %c0_125 = arith.constant 0 : index
    %c0_126 = arith.constant 0 : index
    %172 = vector.load %arg2[%c12_124, %c0_125, %c0_126] : memref<16x1x128xf32, #tpu.memory_space<vmem>>, vector<1x1x128xf32>
    %173 = vector.shape_cast %172 : vector<1x1x128xf32> to vector<1x128xf32>
    %174 = vector.broadcast %173 : vector<1x128xf32> to vector<2x128xf32>
    %175 = arith.addf %171, %174 : vector<2x128xf32>
    %cst_127 = arith.constant 2.000000e-01 : f32
    %176 = vector.broadcast %cst_127 : f32 to vector<2x128xf32>
    %177 = arith.mulf %176, %175 : vector<2x128xf32>
    %178 = arith.maximumf %175, %177 : vector<2x128xf32>
    %179 = vector.extract_strided_slice %178 {offsets = [0, 0], sizes = [1, 128], strides = [1, 1]} : vector<2x128xf32> to vector<1x128xf32>
    %c12_128 = arith.constant 12 : index
    %c0_129 = arith.constant 0 : index
    %180 = vector.load %arg10[%c12_128, %c0_129] : memref<32x128xf32, #tpu.memory_space<vmem>>, vector<1x128xf32>
    tpu.vector_store %arg10[%c12_128, %c0_129], %179 {strides = array<i32>} : memref<32x128xf32, #tpu.memory_space<vmem>>, vector<1x128xf32>,
    %181 = vector.extract_strided_slice %178 {offsets = [1, 0], sizes = [1, 128], strides = [1, 1]} : vector<2x128xf32> to vector<1x128xf32>
    %c28 = arith.constant 28 : index
    %c0_130 = arith.constant 0 : index
    %182 = vector.load %arg10[%c28, %c0_130] : memref<32x128xf32, #tpu.memory_space<vmem>>, vector<1x128xf32>
    tpu.vector_store %arg10[%c28, %c0_130], %181 {strides = array<i32>} : memref<32x128xf32, #tpu.memory_space<vmem>>, vector<1x128xf32>,
    %c13 = arith.constant 13 : index
    %c0_131 = arith.constant 0 : index
    %c0_132 = arith.constant 0 : index
    %183 = vector.load %arg1[%c13, %c0_131, %c0_132] : memref<16x64x128xf32, #tpu.memory_space<vmem>>, vector<1x64x128xf32>
    %184 = vector.shape_cast %183 : vector<1x64x128xf32> to vector<64x128xf32>
    %cst_133 = arith.constant dense<0.000000e+00> : vector<2x128xf32>
    %185 = tpu.matmul %0, %184, %cst_133 {dimension_numbers = #tpu.dot_dimension_numbers<[1], [0], [0], [1], [0, 0, 1, 1], [], []>, precision = #tpu.contract_precision<fp32>} : vector<2x64xf32>, vector<64x128xf32>, vector<2x128xf32> -> vector<2x128xf32>
    %c13_134 = arith.constant 13 : index
    %c0_135 = arith.constant 0 : index
    %c0_136 = arith.constant 0 : index
    %186 = vector.load %arg2[%c13_134, %c0_135, %c0_136] : memref<16x1x128xf32, #tpu.memory_space<vmem>>, vector<1x1x128xf32>
    %187 = vector.shape_cast %186 : vector<1x1x128xf32> to vector<1x128xf32>
    %188 = vector.broadcast %187 : vector<1x128xf32> to vector<2x128xf32>
    %189 = arith.addf %185, %188 : vector<2x128xf32>
    %cst_137 = arith.constant 2.000000e-01 : f32
    %190 = vector.broadcast %cst_137 : f32 to vector<2x128xf32>
    %191 = arith.mulf %190, %189 : vector<2x128xf32>
    %192 = arith.maximumf %189, %191 : vector<2x128xf32>
    %193 = vector.extract_strided_slice %192 {offsets = [0, 0], sizes = [1, 128], strides = [1, 1]} : vector<2x128xf32> to vector<1x128xf32>
    %c13_138 = arith.constant 13 : index
    %c0_139 = arith.constant 0 : index
    %194 = vector.load %arg10[%c13_138, %c0_139] : memref<32x128xf32, #tpu.memory_space<vmem>>, vector<1x128xf32>
    tpu.vector_store %arg10[%c13_138, %c0_139], %193 {strides = array<i32>} : memref<32x128xf32, #tpu.memory_space<vmem>>, vector<1x128xf32>,
    %195 = vector.extract_strided_slice %192 {offsets = [1, 0], sizes = [1, 128], strides = [1, 1]} : vector<2x128xf32> to vector<1x128xf32>
    %c29 = arith.constant 29 : index
    %c0_140 = arith.constant 0 : index
    %196 = vector.load %arg10[%c29, %c0_140] : memref<32x128xf32, #tpu.memory_space<vmem>>, vector<1x128xf32>
    tpu.vector_store %arg10[%c29, %c0_140], %195 {strides = array<i32>} : memref<32x128xf32, #tpu.memory_space<vmem>>, vector<1x128xf32>,
    %c14 = arith.constant 14 : index
    %c0_141 = arith.constant 0 : index
    %c0_142 = arith.constant 0 : index
    %197 = vector.load %arg1[%c14, %c0_141, %c0_142] : memref<16x64x128xf32, #tpu.memory_space<vmem>>, vector<1x64x128xf32>
    %198 = vector.shape_cast %197 : vector<1x64x128xf32> to vector<64x128xf32>
    %cst_143 = arith.constant dense<0.000000e+00> : vector<2x128xf32>
    %199 = tpu.matmul %0, %198, %cst_143 {dimension_numbers = #tpu.dot_dimension_numbers<[1], [0], [0], [1], [0, 0, 1, 1], [], []>, precision = #tpu.contract_precision<fp32>} : vector<2x64xf32>, vector<64x128xf32>, vector<2x128xf32> -> vector<2x128xf32>
    %c14_144 = arith.constant 14 : index
    %c0_145 = arith.constant 0 : index
    %c0_146 = arith.constant 0 : index
    %200 = vector.load %arg2[%c14_144, %c0_145, %c0_146] : memref<16x1x128xf32, #tpu.memory_space<vmem>>, vector<1x1x128xf32>
    %201 = vector.shape_cast %200 : vector<1x1x128xf32> to vector<1x128xf32>
    %202 = vector.broadcast %201 : vector<1x128xf32> to vector<2x128xf32>
    %203 = arith.addf %199, %202 : vector<2x128xf32>
    %cst_147 = arith.constant 2.000000e-01 : f32
    %204 = vector.broadcast %cst_147 : f32 to vector<2x128xf32>
    %205 = arith.mulf %204, %203 : vector<2x128xf32>
    %206 = arith.maximumf %203, %205 : vector<2x128xf32>
    %207 = vector.extract_strided_slice %206 {offsets = [0, 0], sizes = [1, 128], strides = [1, 1]} : vector<2x128xf32> to vector<1x128xf32>
    %c14_148 = arith.constant 14 : index
    %c0_149 = arith.constant 0 : index
    %208 = vector.load %arg10[%c14_148, %c0_149] : memref<32x128xf32, #tpu.memory_space<vmem>>, vector<1x128xf32>
    tpu.vector_store %arg10[%c14_148, %c0_149], %207 {strides = array<i32>} : memref<32x128xf32, #tpu.memory_space<vmem>>, vector<1x128xf32>,
    %209 = vector.extract_strided_slice %206 {offsets = [1, 0], sizes = [1, 128], strides = [1, 1]} : vector<2x128xf32> to vector<1x128xf32>
    %c30 = arith.constant 30 : index
    %c0_150 = arith.constant 0 : index
    %210 = vector.load %arg10[%c30, %c0_150] : memref<32x128xf32, #tpu.memory_space<vmem>>, vector<1x128xf32>
    tpu.vector_store %arg10[%c30, %c0_150], %209 {strides = array<i32>} : memref<32x128xf32, #tpu.memory_space<vmem>>, vector<1x128xf32>,
    %c15 = arith.constant 15 : index
    %c0_151 = arith.constant 0 : index
    %c0_152 = arith.constant 0 : index
    %211 = vector.load %arg1[%c15, %c0_151, %c0_152] : memref<16x64x128xf32, #tpu.memory_space<vmem>>, vector<1x64x128xf32>
    %212 = vector.shape_cast %211 : vector<1x64x128xf32> to vector<64x128xf32>
    %cst_153 = arith.constant dense<0.000000e+00> : vector<2x128xf32>
    %213 = tpu.matmul %0, %212, %cst_153 {dimension_numbers = #tpu.dot_dimension_numbers<[1], [0], [0], [1], [0, 0, 1, 1], [], []>, precision = #tpu.contract_precision<fp32>} : vector<2x64xf32>, vector<64x128xf32>, vector<2x128xf32> -> vector<2x128xf32>
    %c15_154 = arith.constant 15 : index
    %c0_155 = arith.constant 0 : index
    %c0_156 = arith.constant 0 : index
    %214 = vector.load %arg2[%c15_154, %c0_155, %c0_156] : memref<16x1x128xf32, #tpu.memory_space<vmem>>, vector<1x1x128xf32>
    %215 = vector.shape_cast %214 : vector<1x1x128xf32> to vector<1x128xf32>
    %216 = vector.broadcast %215 : vector<1x128xf32> to vector<2x128xf32>
    %217 = arith.addf %213, %216 : vector<2x128xf32>
    %cst_157 = arith.constant 2.000000e-01 : f32
    %218 = vector.broadcast %cst_157 : f32 to vector<2x128xf32>
    %219 = arith.mulf %218, %217 : vector<2x128xf32>
    %220 = arith.maximumf %217, %219 : vector<2x128xf32>
    %221 = vector.extract_strided_slice %220 {offsets = [0, 0], sizes = [1, 128], strides = [1, 1]} : vector<2x128xf32> to vector<1x128xf32>
    %c15_158 = arith.constant 15 : index
    %c0_159 = arith.constant 0 : index
    %222 = vector.load %arg10[%c15_158, %c0_159] : memref<32x128xf32, #tpu.memory_space<vmem>>, vector<1x128xf32>
    tpu.vector_store %arg10[%c15_158, %c0_159], %221 {strides = array<i32>} : memref<32x128xf32, #tpu.memory_space<vmem>>, vector<1x128xf32>,
    %223 = vector.extract_strided_slice %220 {offsets = [1, 0], sizes = [1, 128], strides = [1, 1]} : vector<2x128xf32> to vector<1x128xf32>
    %c31 = arith.constant 31 : index
    %c0_160 = arith.constant 0 : index
    %224 = vector.load %arg10[%c31, %c0_160] : memref<32x128xf32, #tpu.memory_space<vmem>>, vector<1x128xf32>
    tpu.vector_store %arg10[%c31, %c0_160], %223 {strides = array<i32>} : memref<32x128xf32, #tpu.memory_space<vmem>>, vector<1x128xf32>,
    %c0_161 = arith.constant 0 : index
    %c0_162 = arith.constant 0 : index
    %225 = vector.load %arg10[%c0_161, %c0_162] : memref<32x128xf32, #tpu.memory_space<vmem>>, vector<32x128xf32>
    %226 = tpu.iota {dimensions = array<i32: 0>} : vector<32x128xi32>
    %c15_i32 = arith.constant 15 : i32
    %227 = vector.broadcast %c15_i32 : i32 to vector<32x128xi32>
    %228 = arith.andi %226, %227 : vector<32x128xi32>
    %229 = tpu.iota {dimensions = array<i32: 1>} : vector<32x128xi32>
    %cst_163 = arith.constant 0.000000e+00 : f32
    %230 = vector.broadcast %cst_163 : f32 to vector<32x128xf32>
    %c2_i32 = arith.constant 2 : i32
    %231 = vector.broadcast %c2_i32 : i32 to vector<32x128xi32>
    %232 = arith.cmpi sge, %228, %231 : vector<32x128xi32>
    %c2_i32_164 = arith.constant 2 : i32
    %233 = tpu.dynamic_rotate %225 by %c2_i32_164 dim 0 : vector<32x128xf32>, i32 -> vector<32x128xf32>
    %c2_i32_165 = arith.constant 2 : i32
    %234 = vector.broadcast %c2_i32_165 : i32 to vector<32x128xi32>
    %235 = arith.cmpi sge, %229, %234 : vector<32x128xi32>
    %c2_i32_166 = arith.constant 2 : i32
    %236 = tpu.dynamic_rotate %233 by %c2_i32_166 dim 1 : vector<32x128xf32>, i32 -> vector<32x128xf32>
    %237 = arith.andi %232, %235 : vector<32x128xi1>
    %cst_167 = arith.constant 0.000000e+00 : f32
    %238 = vector.broadcast %cst_167 : f32 to vector<32x128xf32>
    %239 = arith.select %237, %236, %238 : vector<32x128xi1>, vector<32x128xf32>
    %c0_168 = arith.constant 0 : index
    %c0_169 = arith.constant 0 : index
    %240 = memref.load %arg3[%c0_168, %c0_169] : memref<5x5xf32, #tpu.memory_space<smem>>
    %241 = vector.broadcast %240 : f32 to vector<32x128xf32>
    %242 = arith.mulf %241, %239 : vector<32x128xf32>
    %243 = arith.addf %230, %242 : vector<32x128xf32>
    %c1_i32 = arith.constant 1 : i32
    %244 = vector.broadcast %c1_i32 : i32 to vector<32x128xi32>
    %245 = arith.cmpi sge, %229, %244 : vector<32x128xi32>
    %c1_i32_170 = arith.constant 1 : i32
    %246 = tpu.dynamic_rotate %233 by %c1_i32_170 dim 1 : vector<32x128xf32>, i32 -> vector<32x128xf32>
    %247 = arith.andi %232, %245 : vector<32x128xi1>
    %cst_171 = arith.constant 0.000000e+00 : f32
    %248 = vector.broadcast %cst_171 : f32 to vector<32x128xf32>
    %249 = arith.select %247, %246, %248 : vector<32x128xi1>, vector<32x128xf32>
    %c0_172 = arith.constant 0 : index
    %c1_173 = arith.constant 1 : index
    %250 = memref.load %arg3[%c0_172, %c1_173] : memref<5x5xf32, #tpu.memory_space<smem>>
    %251 = vector.broadcast %250 : f32 to vector<32x128xf32>
    %252 = arith.mulf %251, %249 : vector<32x128xf32>
    %253 = arith.addf %243, %252 : vector<32x128xf32>
    %cst_174 = arith.constant 0.000000e+00 : f32
    %254 = vector.broadcast %cst_174 : f32 to vector<32x128xf32>
    %255 = arith.select %232, %233, %254 : vector<32x128xi1>, vector<32x128xf32>
    %c0_175 = arith.constant 0 : index
    %c2_176 = arith.constant 2 : index
    %256 = memref.load %arg3[%c0_175, %c2_176] : memref<5x5xf32, #tpu.memory_space<smem>>
    %257 = vector.broadcast %256 : f32 to vector<32x128xf32>
    %258 = arith.mulf %257, %255 : vector<32x128xf32>
    %259 = arith.addf %253, %258 : vector<32x128xf32>
    %c127_i32 = arith.constant 127 : i32
    %260 = vector.broadcast %c127_i32 : i32 to vector<32x128xi32>
    %261 = arith.cmpi slt, %229, %260 : vector<32x128xi32>
    %c127_i32_177 = arith.constant 127 : i32
    %262 = tpu.dynamic_rotate %233 by %c127_i32_177 dim 1 : vector<32x128xf32>, i32 -> vector<32x128xf32>
    %263 = arith.andi %232, %261 : vector<32x128xi1>
    %cst_178 = arith.constant 0.000000e+00 : f32
    %264 = vector.broadcast %cst_178 : f32 to vector<32x128xf32>
    %265 = arith.select %263, %262, %264 : vector<32x128xi1>, vector<32x128xf32>
    %c0_179 = arith.constant 0 : index
    %c3_180 = arith.constant 3 : index
    %266 = memref.load %arg3[%c0_179, %c3_180] : memref<5x5xf32, #tpu.memory_space<smem>>
    %267 = vector.broadcast %266 : f32 to vector<32x128xf32>
    %268 = arith.mulf %267, %265 : vector<32x128xf32>
    %269 = arith.addf %259, %268 : vector<32x128xf32>
    %c126_i32 = arith.constant 126 : i32
    %270 = vector.broadcast %c126_i32 : i32 to vector<32x128xi32>
    %271 = arith.cmpi slt, %229, %270 : vector<32x128xi32>
    %c126_i32_181 = arith.constant 126 : i32
    %272 = tpu.dynamic_rotate %233 by %c126_i32_181 dim 1 : vector<32x128xf32>, i32 -> vector<32x128xf32>
    %273 = arith.andi %232, %271 : vector<32x128xi1>
    %cst_182 = arith.constant 0.000000e+00 : f32
    %274 = vector.broadcast %cst_182 : f32 to vector<32x128xf32>
    %275 = arith.select %273, %272, %274 : vector<32x128xi1>, vector<32x128xf32>
    %c0_183 = arith.constant 0 : index
    %c4_184 = arith.constant 4 : index
    %276 = memref.load %arg3[%c0_183, %c4_184] : memref<5x5xf32, #tpu.memory_space<smem>>
    %277 = vector.broadcast %276 : f32 to vector<32x128xf32>
    %278 = arith.mulf %277, %275 : vector<32x128xf32>
    %279 = arith.addf %269, %278 : vector<32x128xf32>
    %c1_i32_185 = arith.constant 1 : i32
    %280 = vector.broadcast %c1_i32_185 : i32 to vector<32x128xi32>
    %281 = arith.cmpi sge, %228, %280 : vector<32x128xi32>
    %c1_i32_186 = arith.constant 1 : i32
    %282 = tpu.dynamic_rotate %225 by %c1_i32_186 dim 0 : vector<32x128xf32>, i32 -> vector<32x128xf32>
    %c2_i32_187 = arith.constant 2 : i32
    %283 = vector.broadcast %c2_i32_187 : i32 to vector<32x128xi32>
    %284 = arith.cmpi sge, %229, %283 : vector<32x128xi32>
    %c2_i32_188 = arith.constant 2 : i32
    %285 = tpu.dynamic_rotate %282 by %c2_i32_188 dim 1 : vector<32x128xf32>, i32 -> vector<32x128xf32>
    %286 = arith.andi %281, %284 : vector<32x128xi1>
    %cst_189 = arith.constant 0.000000e+00 : f32
    %287 = vector.broadcast %cst_189 : f32 to vector<32x128xf32>
    %288 = arith.select %286, %285, %287 : vector<32x128xi1>, vector<32x128xf32>
    %c1_190 = arith.constant 1 : index
    %c0_191 = arith.constant 0 : index
    %289 = memref.load %arg3[%c1_190, %c0_191] : memref<5x5xf32, #tpu.memory_space<smem>>
    %290 = vector.broadcast %289 : f32 to vector<32x128xf32>
    %291 = arith.mulf %290, %288 : vector<32x128xf32>
    %292 = arith.addf %279, %291 : vector<32x128xf32>
    %c1_i32_192 = arith.constant 1 : i32
    %293 = vector.broadcast %c1_i32_192 : i32 to vector<32x128xi32>
    %294 = arith.cmpi sge, %229, %293 : vector<32x128xi32>
    %c1_i32_193 = arith.constant 1 : i32
    %295 = tpu.dynamic_rotate %282 by %c1_i32_193 dim 1 : vector<32x128xf32>, i32 -> vector<32x128xf32>
    %296 = arith.andi %281, %294 : vector<32x128xi1>
    %cst_194 = arith.constant 0.000000e+00 : f32
    %297 = vector.broadcast %cst_194 : f32 to vector<32x128xf32>
    %298 = arith.select %296, %295, %297 : vector<32x128xi1>, vector<32x128xf32>
    %c1_195 = arith.constant 1 : index
    %c1_196 = arith.constant 1 : index
    %299 = memref.load %arg3[%c1_195, %c1_196] : memref<5x5xf32, #tpu.memory_space<smem>>
    %300 = vector.broadcast %299 : f32 to vector<32x128xf32>
    %301 = arith.mulf %300, %298 : vector<32x128xf32>
    %302 = arith.addf %292, %301 : vector<32x128xf32>
    %cst_197 = arith.constant 0.000000e+00 : f32
    %303 = vector.broadcast %cst_197 : f32 to vector<32x128xf32>
    %304 = arith.select %281, %282, %303 : vector<32x128xi1>, vector<32x128xf32>
    %c1_198 = arith.constant 1 : index
    %c2_199 = arith.constant 2 : index
    %305 = memref.load %arg3[%c1_198, %c2_199] : memref<5x5xf32, #tpu.memory_space<smem>>
    %306 = vector.broadcast %305 : f32 to vector<32x128xf32>
    %307 = arith.mulf %306, %304 : vector<32x128xf32>
    %308 = arith.addf %302, %307 : vector<32x128xf32>
    %c127_i32_200 = arith.constant 127 : i32
    %309 = vector.broadcast %c127_i32_200 : i32 to vector<32x128xi32>
    %310 = arith.cmpi slt, %229, %309 : vector<32x128xi32>
    %c127_i32_201 = arith.constant 127 : i32
    %311 = tpu.dynamic_rotate %282 by %c127_i32_201 dim 1 : vector<32x128xf32>, i32 -> vector<32x128xf32>
    %312 = arith.andi %281, %310 : vector<32x128xi1>
    %cst_202 = arith.constant 0.000000e+00 : f32
    %313 = vector.broadcast %cst_202 : f32 to vector<32x128xf32>
    %314 = arith.select %312, %311, %313 : vector<32x128xi1>, vector<32x128xf32>
    %c1_203 = arith.constant 1 : index
    %c3_204 = arith.constant 3 : index
    %315 = memref.load %arg3[%c1_203, %c3_204] : memref<5x5xf32, #tpu.memory_space<smem>>
    %316 = vector.broadcast %315 : f32 to vector<32x128xf32>
    %317 = arith.mulf %316, %314 : vector<32x128xf32>
    %318 = arith.addf %308, %317 : vector<32x128xf32>
    %c126_i32_205 = arith.constant 126 : i32
    %319 = vector.broadcast %c126_i32_205 : i32 to vector<32x128xi32>
    %320 = arith.cmpi slt, %229, %319 : vector<32x128xi32>
    %c126_i32_206 = arith.constant 126 : i32
    %321 = tpu.dynamic_rotate %282 by %c126_i32_206 dim 1 : vector<32x128xf32>, i32 -> vector<32x128xf32>
    %322 = arith.andi %281, %320 : vector<32x128xi1>
    %cst_207 = arith.constant 0.000000e+00 : f32
    %323 = vector.broadcast %cst_207 : f32 to vector<32x128xf32>
    %324 = arith.select %322, %321, %323 : vector<32x128xi1>, vector<32x128xf32>
    %c1_208 = arith.constant 1 : index
    %c4_209 = arith.constant 4 : index
    %325 = memref.load %arg3[%c1_208, %c4_209] : memref<5x5xf32, #tpu.memory_space<smem>>
    %326 = vector.broadcast %325 : f32 to vector<32x128xf32>
    %327 = arith.mulf %326, %324 : vector<32x128xf32>
    %328 = arith.addf %318, %327 : vector<32x128xf32>
    %c2_i32_210 = arith.constant 2 : i32
    %329 = vector.broadcast %c2_i32_210 : i32 to vector<32x128xi32>
    %330 = arith.cmpi sge, %229, %329 : vector<32x128xi32>
    %c2_i32_211 = arith.constant 2 : i32
    %331 = tpu.dynamic_rotate %225 by %c2_i32_211 dim 1 : vector<32x128xf32>, i32 -> vector<32x128xf32>
    %cst_212 = arith.constant 0.000000e+00 : f32
    %332 = vector.broadcast %cst_212 : f32 to vector<32x128xf32>
    %333 = arith.select %330, %331, %332 : vector<32x128xi1>, vector<32x128xf32>
    %c2_213 = arith.constant 2 : index
    %c0_214 = arith.constant 0 : index
    %334 = memref.load %arg3[%c2_213, %c0_214] : memref<5x5xf32, #tpu.memory_space<smem>>
    %335 = vector.broadcast %334 : f32 to vector<32x128xf32>
    %336 = arith.mulf %335, %333 : vector<32x128xf32>
    %337 = arith.addf %328, %336 : vector<32x128xf32>
    %c1_i32_215 = arith.constant 1 : i32
    %338 = vector.broadcast %c1_i32_215 : i32 to vector<32x128xi32>
    %339 = arith.cmpi sge, %229, %338 : vector<32x128xi32>
    %c1_i32_216 = arith.constant 1 : i32
    %340 = tpu.dynamic_rotate %225 by %c1_i32_216 dim 1 : vector<32x128xf32>, i32 -> vector<32x128xf32>
    %cst_217 = arith.constant 0.000000e+00 : f32
    %341 = vector.broadcast %cst_217 : f32 to vector<32x128xf32>
    %342 = arith.select %339, %340, %341 : vector<32x128xi1>, vector<32x128xf32>
    %c2_218 = arith.constant 2 : index
    %c1_219 = arith.constant 1 : index
    %343 = memref.load %arg3[%c2_218, %c1_219] : memref<5x5xf32, #tpu.memory_space<smem>>
    %344 = vector.broadcast %343 : f32 to vector<32x128xf32>
    %345 = arith.mulf %344, %342 : vector<32x128xf32>
    %346 = arith.addf %337, %345 : vector<32x128xf32>
    %c2_220 = arith.constant 2 : index
    %c2_221 = arith.constant 2 : index
    %347 = memref.load %arg3[%c2_220, %c2_221] : memref<5x5xf32, #tpu.memory_space<smem>>
    %348 = vector.broadcast %347 : f32 to vector<32x128xf32>
    %349 = arith.mulf %348, %225 : vector<32x128xf32>
    %350 = arith.addf %346, %349 : vector<32x128xf32>
    %c127_i32_222 = arith.constant 127 : i32
    %351 = vector.broadcast %c127_i32_222 : i32 to vector<32x128xi32>
    %352 = arith.cmpi slt, %229, %351 : vector<32x128xi32>
    %c127_i32_223 = arith.constant 127 : i32
    %353 = tpu.dynamic_rotate %225 by %c127_i32_223 dim 1 : vector<32x128xf32>, i32 -> vector<32x128xf32>
    %cst_224 = arith.constant 0.000000e+00 : f32
    %354 = vector.broadcast %cst_224 : f32 to vector<32x128xf32>
    %355 = arith.select %352, %353, %354 : vector<32x128xi1>, vector<32x128xf32>
    %c2_225 = arith.constant 2 : index
    %c3_226 = arith.constant 3 : index
    %356 = memref.load %arg3[%c2_225, %c3_226] : memref<5x5xf32, #tpu.memory_space<smem>>
    %357 = vector.broadcast %356 : f32 to vector<32x128xf32>
    %358 = arith.mulf %357, %355 : vector<32x128xf32>
    %359 = arith.addf %350, %358 : vector<32x128xf32>
    %c126_i32_227 = arith.constant 126 : i32
    %360 = vector.broadcast %c126_i32_227 : i32 to vector<32x128xi32>
    %361 = arith.cmpi slt, %229, %360 : vector<32x128xi32>
    %c126_i32_228 = arith.constant 126 : i32
    %362 = tpu.dynamic_rotate %225 by %c126_i32_228 dim 1 : vector<32x128xf32>, i32 -> vector<32x128xf32>
    %cst_229 = arith.constant 0.000000e+00 : f32
    %363 = vector.broadcast %cst_229 : f32 to vector<32x128xf32>
    %364 = arith.select %361, %362, %363 : vector<32x128xi1>, vector<32x128xf32>
    %c2_230 = arith.constant 2 : index
    %c4_231 = arith.constant 4 : index
    %365 = memref.load %arg3[%c2_230, %c4_231] : memref<5x5xf32, #tpu.memory_space<smem>>
    %366 = vector.broadcast %365 : f32 to vector<32x128xf32>
    %367 = arith.mulf %366, %364 : vector<32x128xf32>
    %368 = arith.addf %359, %367 : vector<32x128xf32>
    %c15_i32_232 = arith.constant 15 : i32
    %369 = vector.broadcast %c15_i32_232 : i32 to vector<32x128xi32>
    %370 = arith.cmpi slt, %228, %369 : vector<32x128xi32>
    %c31_i32 = arith.constant 31 : i32
    %371 = tpu.dynamic_rotate %225 by %c31_i32 dim 0 : vector<32x128xf32>, i32 -> vector<32x128xf32>
    %c2_i32_233 = arith.constant 2 : i32
    %372 = vector.broadcast %c2_i32_233 : i32 to vector<32x128xi32>
    %373 = arith.cmpi sge, %229, %372 : vector<32x128xi32>
    %c2_i32_234 = arith.constant 2 : i32
    %374 = tpu.dynamic_rotate %371 by %c2_i32_234 dim 1 : vector<32x128xf32>, i32 -> vector<32x128xf32>
    %375 = arith.andi %370, %373 : vector<32x128xi1>
    %cst_235 = arith.constant 0.000000e+00 : f32
    %376 = vector.broadcast %cst_235 : f32 to vector<32x128xf32>
    %377 = arith.select %375, %374, %376 : vector<32x128xi1>, vector<32x128xf32>
    %c3_236 = arith.constant 3 : index
    %c0_237 = arith.constant 0 : index
    %378 = memref.load %arg3[%c3_236, %c0_237] : memref<5x5xf32, #tpu.memory_space<smem>>
    %379 = vector.broadcast %378 : f32 to vector<32x128xf32>
    %380 = arith.mulf %379, %377 : vector<32x128xf32>
    %381 = arith.addf %368, %380 : vector<32x128xf32>
    %c1_i32_238 = arith.constant 1 : i32
    %382 = vector.broadcast %c1_i32_238 : i32 to vector<32x128xi32>
    %383 = arith.cmpi sge, %229, %382 : vector<32x128xi32>
    %c1_i32_239 = arith.constant 1 : i32
    %384 = tpu.dynamic_rotate %371 by %c1_i32_239 dim 1 : vector<32x128xf32>, i32 -> vector<32x128xf32>
    %385 = arith.andi %370, %383 : vector<32x128xi1>
    %cst_240 = arith.constant 0.000000e+00 : f32
    %386 = vector.broadcast %cst_240 : f32 to vector<32x128xf32>
    %387 = arith.select %385, %384, %386 : vector<32x128xi1>, vector<32x128xf32>
    %c3_241 = arith.constant 3 : index
    %c1_242 = arith.constant 1 : index
    %388 = memref.load %arg3[%c3_241, %c1_242] : memref<5x5xf32, #tpu.memory_space<smem>>
    %389 = vector.broadcast %388 : f32 to vector<32x128xf32>
    %390 = arith.mulf %389, %387 : vector<32x128xf32>
    %391 = arith.addf %381, %390 : vector<32x128xf32>
    %cst_243 = arith.constant 0.000000e+00 : f32
    %392 = vector.broadcast %cst_243 : f32 to vector<32x128xf32>
    %393 = arith.select %370, %371, %392 : vector<32x128xi1>, vector<32x128xf32>
    %c3_244 = arith.constant 3 : index
    %c2_245 = arith.constant 2 : index
    %394 = memref.load %arg3[%c3_244, %c2_245] : memref<5x5xf32, #tpu.memory_space<smem>>
    %395 = vector.broadcast %394 : f32 to vector<32x128xf32>
    %396 = arith.mulf %395, %393 : vector<32x128xf32>
    %397 = arith.addf %391, %396 : vector<32x128xf32>
    %c127_i32_246 = arith.constant 127 : i32
    %398 = vector.broadcast %c127_i32_246 : i32 to vector<32x128xi32>
    %399 = arith.cmpi slt, %229, %398 : vector<32x128xi32>
    %c127_i32_247 = arith.constant 127 : i32
    %400 = tpu.dynamic_rotate %371 by %c127_i32_247 dim 1 : vector<32x128xf32>, i32 -> vector<32x128xf32>
    %401 = arith.andi %370, %399 : vector<32x128xi1>
    %cst_248 = arith.constant 0.000000e+00 : f32
    %402 = vector.broadcast %cst_248 : f32 to vector<32x128xf32>
    %403 = arith.select %401, %400, %402 : vector<32x128xi1>, vector<32x128xf32>
    %c3_249 = arith.constant 3 : index
    %c3_250 = arith.constant 3 : index
    %404 = memref.load %arg3[%c3_249, %c3_250] : memref<5x5xf32, #tpu.memory_space<smem>>
    %405 = vector.broadcast %404 : f32 to vector<32x128xf32>
    %406 = arith.mulf %405, %403 : vector<32x128xf32>
    %407 = arith.addf %397, %406 : vector<32x128xf32>
    %c126_i32_251 = arith.constant 126 : i32
    %408 = vector.broadcast %c126_i32_251 : i32 to vector<32x128xi32>
    %409 = arith.cmpi slt, %229, %408 : vector<32x128xi32>
    %c126_i32_252 = arith.constant 126 : i32
    %410 = tpu.dynamic_rotate %371 by %c126_i32_252 dim 1 : vector<32x128xf32>, i32 -> vector<32x128xf32>
    %411 = arith.andi %370, %409 : vector<32x128xi1>
    %cst_253 = arith.constant 0.000000e+00 : f32
    %412 = vector.broadcast %cst_253 : f32 to vector<32x128xf32>
    %413 = arith.select %411, %410, %412 : vector<32x128xi1>, vector<32x128xf32>
    %c3_254 = arith.constant 3 : index
    %c4_255 = arith.constant 4 : index
    %414 = memref.load %arg3[%c3_254, %c4_255] : memref<5x5xf32, #tpu.memory_space<smem>>
    %415 = vector.broadcast %414 : f32 to vector<32x128xf32>
    %416 = arith.mulf %415, %413 : vector<32x128xf32>
    %417 = arith.addf %407, %416 : vector<32x128xf32>
    %c14_i32 = arith.constant 14 : i32
    %418 = vector.broadcast %c14_i32 : i32 to vector<32x128xi32>
    %419 = arith.cmpi slt, %228, %418 : vector<32x128xi32>
    %c30_i32 = arith.constant 30 : i32
    %420 = tpu.dynamic_rotate %225 by %c30_i32 dim 0 : vector<32x128xf32>, i32 -> vector<32x128xf32>
    %c2_i32_256 = arith.constant 2 : i32
    %421 = vector.broadcast %c2_i32_256 : i32 to vector<32x128xi32>
    %422 = arith.cmpi sge, %229, %421 : vector<32x128xi32>
    %c2_i32_257 = arith.constant 2 : i32
    %423 = tpu.dynamic_rotate %420 by %c2_i32_257 dim 1 : vector<32x128xf32>, i32 -> vector<32x128xf32>
    %424 = arith.andi %419, %422 : vector<32x128xi1>
    %cst_258 = arith.constant 0.000000e+00 : f32
    %425 = vector.broadcast %cst_258 : f32 to vector<32x128xf32>
    %426 = arith.select %424, %423, %425 : vector<32x128xi1>, vector<32x128xf32>
    %c4_259 = arith.constant 4 : index
    %c0_260 = arith.constant 0 : index
    %427 = memref.load %arg3[%c4_259, %c0_260] : memref<5x5xf32, #tpu.memory_space<smem>>
    %428 = vector.broadcast %427 : f32 to vector<32x128xf32>
    %429 = arith.mulf %428, %426 : vector<32x128xf32>
    %430 = arith.addf %417, %429 : vector<32x128xf32>
    %c1_i32_261 = arith.constant 1 : i32
    %431 = vector.broadcast %c1_i32_261 : i32 to vector<32x128xi32>
    %432 = arith.cmpi sge, %229, %431 : vector<32x128xi32>
    %c1_i32_262 = arith.constant 1 : i32
    %433 = tpu.dynamic_rotate %420 by %c1_i32_262 dim 1 : vector<32x128xf32>, i32 -> vector<32x128xf32>
    %434 = arith.andi %419, %432 : vector<32x128xi1>
    %cst_263 = arith.constant 0.000000e+00 : f32
    %435 = vector.broadcast %cst_263 : f32 to vector<32x128xf32>
    %436 = arith.select %434, %433, %435 : vector<32x128xi1>, vector<32x128xf32>
    %c4_264 = arith.constant 4 : index
    %c1_265 = arith.constant 1 : index
    %437 = memref.load %arg3[%c4_264, %c1_265] : memref<5x5xf32, #tpu.memory_space<smem>>
    %438 = vector.broadcast %437 : f32 to vector<32x128xf32>
    %439 = arith.mulf %438, %436 : vector<32x128xf32>
    %440 = arith.addf %430, %439 : vector<32x128xf32>
    %cst_266 = arith.constant 0.000000e+00 : f32
    %441 = vector.broadcast %cst_266 : f32 to vector<32x128xf32>
    %442 = arith.select %419, %420, %441 : vector<32x128xi1>, vector<32x128xf32>
    %c4_267 = arith.constant 4 : index
    %c2_268 = arith.constant 2 : index
    %443 = memref.load %arg3[%c4_267, %c2_268] : memref<5x5xf32, #tpu.memory_space<smem>>
    %444 = vector.broadcast %443 : f32 to vector<32x128xf32>
    %445 = arith.mulf %444, %442 : vector<32x128xf32>
    %446 = arith.addf %440, %445 : vector<32x128xf32>
    %c127_i32_269 = arith.constant 127 : i32
    %447 = vector.broadcast %c127_i32_269 : i32 to vector<32x128xi32>
    %448 = arith.cmpi slt, %229, %447 : vector<32x128xi32>
    %c127_i32_270 = arith.constant 127 : i32
    %449 = tpu.dynamic_rotate %420 by %c127_i32_270 dim 1 : vector<32x128xf32>, i32 -> vector<32x128xf32>
    %450 = arith.andi %419, %448 : vector<32x128xi1>
    %cst_271 = arith.constant 0.000000e+00 : f32
    %451 = vector.broadcast %cst_271 : f32 to vector<32x128xf32>
    %452 = arith.select %450, %449, %451 : vector<32x128xi1>, vector<32x128xf32>
    %c4_272 = arith.constant 4 : index
    %c3_273 = arith.constant 3 : index
    %453 = memref.load %arg3[%c4_272, %c3_273] : memref<5x5xf32, #tpu.memory_space<smem>>
    %454 = vector.broadcast %453 : f32 to vector<32x128xf32>
    %455 = arith.mulf %454, %452 : vector<32x128xf32>
    %456 = arith.addf %446, %455 : vector<32x128xf32>
    %c126_i32_274 = arith.constant 126 : i32
    %457 = vector.broadcast %c126_i32_274 : i32 to vector<32x128xi32>
    %458 = arith.cmpi slt, %229, %457 : vector<32x128xi32>
    %c126_i32_275 = arith.constant 126 : i32
    %459 = tpu.dynamic_rotate %420 by %c126_i32_275 dim 1 : vector<32x128xf32>, i32 -> vector<32x128xf32>
    %460 = arith.andi %419, %458 : vector<32x128xi1>
    %cst_276 = arith.constant 0.000000e+00 : f32
    %461 = vector.broadcast %cst_276 : f32 to vector<32x128xf32>
    %462 = arith.select %460, %459, %461 : vector<32x128xi1>, vector<32x128xf32>
    %c4_277 = arith.constant 4 : index
    %c4_278 = arith.constant 4 : index
    %463 = memref.load %arg3[%c4_277, %c4_278] : memref<5x5xf32, #tpu.memory_space<smem>>
    %464 = vector.broadcast %463 : f32 to vector<32x128xf32>
    %465 = arith.mulf %464, %462 : vector<32x128xf32>
    %466 = arith.addf %456, %465 : vector<32x128xf32>
    %c0_279 = arith.constant 0 : index
    %467 = memref.load %arg4[%c0_279] : memref<1xf32, #tpu.memory_space<smem>>
    %468 = vector.broadcast %467 : f32 to vector<32x128xf32>
    %469 = arith.addf %466, %468 : vector<32x128xf32>
    %cst_280 = arith.constant 2.000000e-01 : f32
    %470 = vector.broadcast %cst_280 : f32 to vector<32x128xf32>
    %471 = arith.mulf %470, %469 : vector<32x128xf32>
    %472 = arith.maximumf %469, %471 : vector<32x128xf32>
    %cst_281 = arith.constant 0.000000e+00 : f32
    %473 = vector.broadcast %cst_281 : f32 to vector<32x128xf32>
    %c2_i32_282 = arith.constant 2 : i32
    %474 = vector.broadcast %c2_i32_282 : i32 to vector<32x128xi32>
    %475 = arith.cmpi sge, %228, %474 : vector<32x128xi32>
    %c2_i32_283 = arith.constant 2 : i32
    %476 = tpu.dynamic_rotate %472 by %c2_i32_283 dim 0 : vector<32x128xf32>, i32 -> vector<32x128xf32>
    %c2_i32_284 = arith.constant 2 : i32
    %477 = vector.broadcast %c2_i32_284 : i32 to vector<32x128xi32>
    %478 = arith.cmpi sge, %229, %477 : vector<32x128xi32>
    %c2_i32_285 = arith.constant 2 : i32
    %479 = tpu.dynamic_rotate %476 by %c2_i32_285 dim 1 : vector<32x128xf32>, i32 -> vector<32x128xf32>
    %480 = arith.andi %475, %478 : vector<32x128xi1>
    %cst_286 = arith.constant 0.000000e+00 : f32
    %481 = vector.broadcast %cst_286 : f32 to vector<32x128xf32>
    %482 = arith.select %480, %479, %481 : vector<32x128xi1>, vector<32x128xf32>
    %c0_287 = arith.constant 0 : index
    %c0_288 = arith.constant 0 : index
    %483 = memref.load %arg5[%c0_287, %c0_288] : memref<5x5xf32, #tpu.memory_space<smem>>
    %484 = vector.broadcast %483 : f32 to vector<32x128xf32>
    %485 = arith.mulf %484, %482 : vector<32x128xf32>
    %486 = arith.addf %473, %485 : vector<32x128xf32>
    %c1_i32_289 = arith.constant 1 : i32
    %487 = vector.broadcast %c1_i32_289 : i32 to vector<32x128xi32>
    %488 = arith.cmpi sge, %229, %487 : vector<32x128xi32>
    %c1_i32_290 = arith.constant 1 : i32
    %489 = tpu.dynamic_rotate %476 by %c1_i32_290 dim 1 : vector<32x128xf32>, i32 -> vector<32x128xf32>
    %490 = arith.andi %475, %488 : vector<32x128xi1>
    %cst_291 = arith.constant 0.000000e+00 : f32
    %491 = vector.broadcast %cst_291 : f32 to vector<32x128xf32>
    %492 = arith.select %490, %489, %491 : vector<32x128xi1>, vector<32x128xf32>
    %c0_292 = arith.constant 0 : index
    %c1_293 = arith.constant 1 : index
    %493 = memref.load %arg5[%c0_292, %c1_293] : memref<5x5xf32, #tpu.memory_space<smem>>
    %494 = vector.broadcast %493 : f32 to vector<32x128xf32>
    %495 = arith.mulf %494, %492 : vector<32x128xf32>
    %496 = arith.addf %486, %495 : vector<32x128xf32>
    %cst_294 = arith.constant 0.000000e+00 : f32
    %497 = vector.broadcast %cst_294 : f32 to vector<32x128xf32>
    %498 = arith.select %475, %476, %497 : vector<32x128xi1>, vector<32x128xf32>
    %c0_295 = arith.constant 0 : index
    %c2_296 = arith.constant 2 : index
    %499 = memref.load %arg5[%c0_295, %c2_296] : memref<5x5xf32, #tpu.memory_space<smem>>
    %500 = vector.broadcast %499 : f32 to vector<32x128xf32>
    %501 = arith.mulf %500, %498 : vector<32x128xf32>
    %502 = arith.addf %496, %501 : vector<32x128xf32>
    %c127_i32_297 = arith.constant 127 : i32
    %503 = vector.broadcast %c127_i32_297 : i32 to vector<32x128xi32>
    %504 = arith.cmpi slt, %229, %503 : vector<32x128xi32>
    %c127_i32_298 = arith.constant 127 : i32
    %505 = tpu.dynamic_rotate %476 by %c127_i32_298 dim 1 : vector<32x128xf32>, i32 -> vector<32x128xf32>
    %506 = arith.andi %475, %504 : vector<32x128xi1>
    %cst_299 = arith.constant 0.000000e+00 : f32
    %507 = vector.broadcast %cst_299 : f32 to vector<32x128xf32>
    %508 = arith.select %506, %505, %507 : vector<32x128xi1>, vector<32x128xf32>
    %c0_300 = arith.constant 0 : index
    %c3_301 = arith.constant 3 : index
    %509 = memref.load %arg5[%c0_300, %c3_301] : memref<5x5xf32, #tpu.memory_space<smem>>
    %510 = vector.broadcast %509 : f32 to vector<32x128xf32>
    %511 = arith.mulf %510, %508 : vector<32x128xf32>
    %512 = arith.addf %502, %511 : vector<32x128xf32>
    %c126_i32_302 = arith.constant 126 : i32
    %513 = vector.broadcast %c126_i32_302 : i32 to vector<32x128xi32>
    %514 = arith.cmpi slt, %229, %513 : vector<32x128xi32>
    %c126_i32_303 = arith.constant 126 : i32
    %515 = tpu.dynamic_rotate %476 by %c126_i32_303 dim 1 : vector<32x128xf32>, i32 -> vector<32x128xf32>
    %516 = arith.andi %475, %514 : vector<32x128xi1>
    %cst_304 = arith.constant 0.000000e+00 : f32
    %517 = vector.broadcast %cst_304 : f32 to vector<32x128xf32>
    %518 = arith.select %516, %515, %517 : vector<32x128xi1>, vector<32x128xf32>
    %c0_305 = arith.constant 0 : index
    %c4_306 = arith.constant 4 : index
    %519 = memref.load %arg5[%c0_305, %c4_306] : memref<5x5xf32, #tpu.memory_space<smem>>
    %520 = vector.broadcast %519 : f32 to vector<32x128xf32>
    %521 = arith.mulf %520, %518 : vector<32x128xf32>
    %522 = arith.addf %512, %521 : vector<32x128xf32>
    %c1_i32_307 = arith.constant 1 : i32
    %523 = vector.broadcast %c1_i32_307 : i32 to vector<32x128xi32>
    %524 = arith.cmpi sge, %228, %523 : vector<32x128xi32>
    %c1_i32_308 = arith.constant 1 : i32
    %525 = tpu.dynamic_rotate %472 by %c1_i32_308 dim 0 : vector<32x128xf32>, i32 -> vector<32x128xf32>
    %c2_i32_309 = arith.constant 2 : i32
    %526 = vector.broadcast %c2_i32_309 : i32 to vector<32x128xi32>
    %527 = arith.cmpi sge, %229, %526 : vector<32x128xi32>
    %c2_i32_310 = arith.constant 2 : i32
    %528 = tpu.dynamic_rotate %525 by %c2_i32_310 dim 1 : vector<32x128xf32>, i32 -> vector<32x128xf32>
    %529 = arith.andi %524, %527 : vector<32x128xi1>
    %cst_311 = arith.constant 0.000000e+00 : f32
    %530 = vector.broadcast %cst_311 : f32 to vector<32x128xf32>
    %531 = arith.select %529, %528, %530 : vector<32x128xi1>, vector<32x128xf32>
    %c1_312 = arith.constant 1 : index
    %c0_313 = arith.constant 0 : index
    %532 = memref.load %arg5[%c1_312, %c0_313] : memref<5x5xf32, #tpu.memory_space<smem>>
    %533 = vector.broadcast %532 : f32 to vector<32x128xf32>
    %534 = arith.mulf %533, %531 : vector<32x128xf32>
    %535 = arith.addf %522, %534 : vector<32x128xf32>
    %c1_i32_314 = arith.constant 1 : i32
    %536 = vector.broadcast %c1_i32_314 : i32 to vector<32x128xi32>
    %537 = arith.cmpi sge, %229, %536 : vector<32x128xi32>
    %c1_i32_315 = arith.constant 1 : i32
    %538 = tpu.dynamic_rotate %525 by %c1_i32_315 dim 1 : vector<32x128xf32>, i32 -> vector<32x128xf32>
    %539 = arith.andi %524, %537 : vector<32x128xi1>
    %cst_316 = arith.constant 0.000000e+00 : f32
    %540 = vector.broadcast %cst_316 : f32 to vector<32x128xf32>
    %541 = arith.select %539, %538, %540 : vector<32x128xi1>, vector<32x128xf32>
    %c1_317 = arith.constant 1 : index
    %c1_318 = arith.constant 1 : index
    %542 = memref.load %arg5[%c1_317, %c1_318] : memref<5x5xf32, #tpu.memory_space<smem>>
    %543 = vector.broadcast %542 : f32 to vector<32x128xf32>
    %544 = arith.mulf %543, %541 : vector<32x128xf32>
    %545 = arith.addf %535, %544 : vector<32x128xf32>
    %cst_319 = arith.constant 0.000000e+00 : f32
    %546 = vector.broadcast %cst_319 : f32 to vector<32x128xf32>
    %547 = arith.select %524, %525, %546 : vector<32x128xi1>, vector<32x128xf32>
    %c1_320 = arith.constant 1 : index
    %c2_321 = arith.constant 2 : index
    %548 = memref.load %arg5[%c1_320, %c2_321] : memref<5x5xf32, #tpu.memory_space<smem>>
    %549 = vector.broadcast %548 : f32 to vector<32x128xf32>
    %550 = arith.mulf %549, %547 : vector<32x128xf32>
    %551 = arith.addf %545, %550 : vector<32x128xf32>
    %c127_i32_322 = arith.constant 127 : i32
    %552 = vector.broadcast %c127_i32_322 : i32 to vector<32x128xi32>
    %553 = arith.cmpi slt, %229, %552 : vector<32x128xi32>
    %c127_i32_323 = arith.constant 127 : i32
    %554 = tpu.dynamic_rotate %525 by %c127_i32_323 dim 1 : vector<32x128xf32>, i32 -> vector<32x128xf32>
    %555 = arith.andi %524, %553 : vector<32x128xi1>
    %cst_324 = arith.constant 0.000000e+00 : f32
    %556 = vector.broadcast %cst_324 : f32 to vector<32x128xf32>
    %557 = arith.select %555, %554, %556 : vector<32x128xi1>, vector<32x128xf32>
    %c1_325 = arith.constant 1 : index
    %c3_326 = arith.constant 3 : index
    %558 = memref.load %arg5[%c1_325, %c3_326] : memref<5x5xf32, #tpu.memory_space<smem>>
    %559 = vector.broadcast %558 : f32 to vector<32x128xf32>
    %560 = arith.mulf %559, %557 : vector<32x128xf32>
    %561 = arith.addf %551, %560 : vector<32x128xf32>
    %c126_i32_327 = arith.constant 126 : i32
    %562 = vector.broadcast %c126_i32_327 : i32 to vector<32x128xi32>
    %563 = arith.cmpi slt, %229, %562 : vector<32x128xi32>
    %c126_i32_328 = arith.constant 126 : i32
    %564 = tpu.dynamic_rotate %525 by %c126_i32_328 dim 1 : vector<32x128xf32>, i32 -> vector<32x128xf32>
    %565 = arith.andi %524, %563 : vector<32x128xi1>
    %cst_329 = arith.constant 0.000000e+00 : f32
    %566 = vector.broadcast %cst_329 : f32 to vector<32x128xf32>
    %567 = arith.select %565, %564, %566 : vector<32x128xi1>, vector<32x128xf32>
    %c1_330 = arith.constant 1 : index
    %c4_331 = arith.constant 4 : index
    %568 = memref.load %arg5[%c1_330, %c4_331] : memref<5x5xf32, #tpu.memory_space<smem>>
    %569 = vector.broadcast %568 : f32 to vector<32x128xf32>
    %570 = arith.mulf %569, %567 : vector<32x128xf32>
    %571 = arith.addf %561, %570 : vector<32x128xf32>
    %c2_i32_332 = arith.constant 2 : i32
    %572 = vector.broadcast %c2_i32_332 : i32 to vector<32x128xi32>
    %573 = arith.cmpi sge, %229, %572 : vector<32x128xi32>
    %c2_i32_333 = arith.constant 2 : i32
    %574 = tpu.dynamic_rotate %472 by %c2_i32_333 dim 1 : vector<32x128xf32>, i32 -> vector<32x128xf32>
    %cst_334 = arith.constant 0.000000e+00 : f32
    %575 = vector.broadcast %cst_334 : f32 to vector<32x128xf32>
    %576 = arith.select %573, %574, %575 : vector<32x128xi1>, vector<32x128xf32>
    %c2_335 = arith.constant 2 : index
    %c0_336 = arith.constant 0 : index
    %577 = memref.load %arg5[%c2_335, %c0_336] : memref<5x5xf32, #tpu.memory_space<smem>>
    %578 = vector.broadcast %577 : f32 to vector<32x128xf32>
    %579 = arith.mulf %578, %576 : vector<32x128xf32>
    %580 = arith.addf %571, %579 : vector<32x128xf32>
    %c1_i32_337 = arith.constant 1 : i32
    %581 = vector.broadcast %c1_i32_337 : i32 to vector<32x128xi32>
    %582 = arith.cmpi sge, %229, %581 : vector<32x128xi32>
    %c1_i32_338 = arith.constant 1 : i32
    %583 = tpu.dynamic_rotate %472 by %c1_i32_338 dim 1 : vector<32x128xf32>, i32 -> vector<32x128xf32>
    %cst_339 = arith.constant 0.000000e+00 : f32
    %584 = vector.broadcast %cst_339 : f32 to vector<32x128xf32>
    %585 = arith.select %582, %583, %584 : vector<32x128xi1>, vector<32x128xf32>
    %c2_340 = arith.constant 2 : index
    %c1_341 = arith.constant 1 : index
    %586 = memref.load %arg5[%c2_340, %c1_341] : memref<5x5xf32, #tpu.memory_space<smem>>
    %587 = vector.broadcast %586 : f32 to vector<32x128xf32>
    %588 = arith.mulf %587, %585 : vector<32x128xf32>
    %589 = arith.addf %580, %588 : vector<32x128xf32>
    %c2_342 = arith.constant 2 : index
    %c2_343 = arith.constant 2 : index
    %590 = memref.load %arg5[%c2_342, %c2_343] : memref<5x5xf32, #tpu.memory_space<smem>>
    %591 = vector.broadcast %590 : f32 to vector<32x128xf32>
    %592 = arith.mulf %591, %472 : vector<32x128xf32>
    %593 = arith.addf %589, %592 : vector<32x128xf32>
    %c127_i32_344 = arith.constant 127 : i32
    %594 = vector.broadcast %c127_i32_344 : i32 to vector<32x128xi32>
    %595 = arith.cmpi slt, %229, %594 : vector<32x128xi32>
    %c127_i32_345 = arith.constant 127 : i32
    %596 = tpu.dynamic_rotate %472 by %c127_i32_345 dim 1 : vector<32x128xf32>, i32 -> vector<32x128xf32>
    %cst_346 = arith.constant 0.000000e+00 : f32
    %597 = vector.broadcast %cst_346 : f32 to vector<32x128xf32>
    %598 = arith.select %595, %596, %597 : vector<32x128xi1>, vector<32x128xf32>
    %c2_347 = arith.constant 2 : index
    %c3_348 = arith.constant 3 : index
    %599 = memref.load %arg5[%c2_347, %c3_348] : memref<5x5xf32, #tpu.memory_space<smem>>
    %600 = vector.broadcast %599 : f32 to vector<32x128xf32>
    %601 = arith.mulf %600, %598 : vector<32x128xf32>
    %602 = arith.addf %593, %601 : vector<32x128xf32>
    %c126_i32_349 = arith.constant 126 : i32
    %603 = vector.broadcast %c126_i32_349 : i32 to vector<32x128xi32>
    %604 = arith.cmpi slt, %229, %603 : vector<32x128xi32>
    %c126_i32_350 = arith.constant 126 : i32
    %605 = tpu.dynamic_rotate %472 by %c126_i32_350 dim 1 : vector<32x128xf32>, i32 -> vector<32x128xf32>
    %cst_351 = arith.constant 0.000000e+00 : f32
    %606 = vector.broadcast %cst_351 : f32 to vector<32x128xf32>
    %607 = arith.select %604, %605, %606 : vector<32x128xi1>, vector<32x128xf32>
    %c2_352 = arith.constant 2 : index
    %c4_353 = arith.constant 4 : index
    %608 = memref.load %arg5[%c2_352, %c4_353] : memref<5x5xf32, #tpu.memory_space<smem>>
    %609 = vector.broadcast %608 : f32 to vector<32x128xf32>
    %610 = arith.mulf %609, %607 : vector<32x128xf32>
    %611 = arith.addf %602, %610 : vector<32x128xf32>
    %c15_i32_354 = arith.constant 15 : i32
    %612 = vector.broadcast %c15_i32_354 : i32 to vector<32x128xi32>
    %613 = arith.cmpi slt, %228, %612 : vector<32x128xi32>
    %c31_i32_355 = arith.constant 31 : i32
    %614 = tpu.dynamic_rotate %472 by %c31_i32_355 dim 0 : vector<32x128xf32>, i32 -> vector<32x128xf32>
    %c2_i32_356 = arith.constant 2 : i32
    %615 = vector.broadcast %c2_i32_356 : i32 to vector<32x128xi32>
    %616 = arith.cmpi sge, %229, %615 : vector<32x128xi32>
    %c2_i32_357 = arith.constant 2 : i32
    %617 = tpu.dynamic_rotate %614 by %c2_i32_357 dim 1 : vector<32x128xf32>, i32 -> vector<32x128xf32>
    %618 = arith.andi %613, %616 : vector<32x128xi1>
    %cst_358 = arith.constant 0.000000e+00 : f32
    %619 = vector.broadcast %cst_358 : f32 to vector<32x128xf32>
    %620 = arith.select %618, %617, %619 : vector<32x128xi1>, vector<32x128xf32>
    %c3_359 = arith.constant 3 : index
    %c0_360 = arith.constant 0 : index
    %621 = memref.load %arg5[%c3_359, %c0_360] : memref<5x5xf32, #tpu.memory_space<smem>>
    %622 = vector.broadcast %621 : f32 to vector<32x128xf32>
    %623 = arith.mulf %622, %620 : vector<32x128xf32>
    %624 = arith.addf %611, %623 : vector<32x128xf32>
    %c1_i32_361 = arith.constant 1 : i32
    %625 = vector.broadcast %c1_i32_361 : i32 to vector<32x128xi32>
    %626 = arith.cmpi sge, %229, %625 : vector<32x128xi32>
    %c1_i32_362 = arith.constant 1 : i32
    %627 = tpu.dynamic_rotate %614 by %c1_i32_362 dim 1 : vector<32x128xf32>, i32 -> vector<32x128xf32>
    %628 = arith.andi %613, %626 : vector<32x128xi1>
    %cst_363 = arith.constant 0.000000e+00 : f32
    %629 = vector.broadcast %cst_363 : f32 to vector<32x128xf32>
    %630 = arith.select %628, %627, %629 : vector<32x128xi1>, vector<32x128xf32>
    %c3_364 = arith.constant 3 : index
    %c1_365 = arith.constant 1 : index
    %631 = memref.load %arg5[%c3_364, %c1_365] : memref<5x5xf32, #tpu.memory_space<smem>>
    %632 = vector.broadcast %631 : f32 to vector<32x128xf32>
    %633 = arith.mulf %632, %630 : vector<32x128xf32>
    %634 = arith.addf %624, %633 : vector<32x128xf32>
    %cst_366 = arith.constant 0.000000e+00 : f32
    %635 = vector.broadcast %cst_366 : f32 to vector<32x128xf32>
    %636 = arith.select %613, %614, %635 : vector<32x128xi1>, vector<32x128xf32>
    %c3_367 = arith.constant 3 : index
    %c2_368 = arith.constant 2 : index
    %637 = memref.load %arg5[%c3_367, %c2_368] : memref<5x5xf32, #tpu.memory_space<smem>>
    %638 = vector.broadcast %637 : f32 to vector<32x128xf32>
    %639 = arith.mulf %638, %636 : vector<32x128xf32>
    %640 = arith.addf %634, %639 : vector<32x128xf32>
    %c127_i32_369 = arith.constant 127 : i32
    %641 = vector.broadcast %c127_i32_369 : i32 to vector<32x128xi32>
    %642 = arith.cmpi slt, %229, %641 : vector<32x128xi32>
    %c127_i32_370 = arith.constant 127 : i32
    %643 = tpu.dynamic_rotate %614 by %c127_i32_370 dim 1 : vector<32x128xf32>, i32 -> vector<32x128xf32>
    %644 = arith.andi %613, %642 : vector<32x128xi1>
    %cst_371 = arith.constant 0.000000e+00 : f32
    %645 = vector.broadcast %cst_371 : f32 to vector<32x128xf32>
    %646 = arith.select %644, %643, %645 : vector<32x128xi1>, vector<32x128xf32>
    %c3_372 = arith.constant 3 : index
    %c3_373 = arith.constant 3 : index
    %647 = memref.load %arg5[%c3_372, %c3_373] : memref<5x5xf32, #tpu.memory_space<smem>>
    %648 = vector.broadcast %647 : f32 to vector<32x128xf32>
    %649 = arith.mulf %648, %646 : vector<32x128xf32>
    %650 = arith.addf %640, %649 : vector<32x128xf32>
    %c126_i32_374 = arith.constant 126 : i32
    %651 = vector.broadcast %c126_i32_374 : i32 to vector<32x128xi32>
    %652 = arith.cmpi slt, %229, %651 : vector<32x128xi32>
    %c126_i32_375 = arith.constant 126 : i32
    %653 = tpu.dynamic_rotate %614 by %c126_i32_375 dim 1 : vector<32x128xf32>, i32 -> vector<32x128xf32>
    %654 = arith.andi %613, %652 : vector<32x128xi1>
    %cst_376 = arith.constant 0.000000e+00 : f32
    %655 = vector.broadcast %cst_376 : f32 to vector<32x128xf32>
    %656 = arith.select %654, %653, %655 : vector<32x128xi1>, vector<32x128xf32>
    %c3_377 = arith.constant 3 : index
    %c4_378 = arith.constant 4 : index
    %657 = memref.load %arg5[%c3_377, %c4_378] : memref<5x5xf32, #tpu.memory_space<smem>>
    %658 = vector.broadcast %657 : f32 to vector<32x128xf32>
    %659 = arith.mulf %658, %656 : vector<32x128xf32>
    %660 = arith.addf %650, %659 : vector<32x128xf32>
    %c14_i32_379 = arith.constant 14 : i32
    %661 = vector.broadcast %c14_i32_379 : i32 to vector<32x128xi32>
    %662 = arith.cmpi slt, %228, %661 : vector<32x128xi32>
    %c30_i32_380 = arith.constant 30 : i32
    %663 = tpu.dynamic_rotate %472 by %c30_i32_380 dim 0 : vector<32x128xf32>, i32 -> vector<32x128xf32>
    %c2_i32_381 = arith.constant 2 : i32
    %664 = vector.broadcast %c2_i32_381 : i32 to vector<32x128xi32>
    %665 = arith.cmpi sge, %229, %664 : vector<32x128xi32>
    %c2_i32_382 = arith.constant 2 : i32
    %666 = tpu.dynamic_rotate %663 by %c2_i32_382 dim 1 : vector<32x128xf32>, i32 -> vector<32x128xf32>
    %667 = arith.andi %662, %665 : vector<32x128xi1>
    %cst_383 = arith.constant 0.000000e+00 : f32
    %668 = vector.broadcast %cst_383 : f32 to vector<32x128xf32>
    %669 = arith.select %667, %666, %668 : vector<32x128xi1>, vector<32x128xf32>
    %c4_384 = arith.constant 4 : index
    %c0_385 = arith.constant 0 : index
    %670 = memref.load %arg5[%c4_384, %c0_385] : memref<5x5xf32, #tpu.memory_space<smem>>
    %671 = vector.broadcast %670 : f32 to vector<32x128xf32>
    %672 = arith.mulf %671, %669 : vector<32x128xf32>
    %673 = arith.addf %660, %672 : vector<32x128xf32>
    %c1_i32_386 = arith.constant 1 : i32
    %674 = vector.broadcast %c1_i32_386 : i32 to vector<32x128xi32>
    %675 = arith.cmpi sge, %229, %674 : vector<32x128xi32>
    %c1_i32_387 = arith.constant 1 : i32
    %676 = tpu.dynamic_rotate %663 by %c1_i32_387 dim 1 : vector<32x128xf32>, i32 -> vector<32x128xf32>
    %677 = arith.andi %662, %675 : vector<32x128xi1>
    %cst_388 = arith.constant 0.000000e+00 : f32
    %678 = vector.broadcast %cst_388 : f32 to vector<32x128xf32>
    %679 = arith.select %677, %676, %678 : vector<32x128xi1>, vector<32x128xf32>
    %c4_389 = arith.constant 4 : index
    %c1_390 = arith.constant 1 : index
    %680 = memref.load %arg5[%c4_389, %c1_390] : memref<5x5xf32, #tpu.memory_space<smem>>
    %681 = vector.broadcast %680 : f32 to vector<32x128xf32>
    %682 = arith.mulf %681, %679 : vector<32x128xf32>
    %683 = arith.addf %673, %682 : vector<32x128xf32>
    %cst_391 = arith.constant 0.000000e+00 : f32
    %684 = vector.broadcast %cst_391 : f32 to vector<32x128xf32>
    %685 = arith.select %662, %663, %684 : vector<32x128xi1>, vector<32x128xf32>
    %c4_392 = arith.constant 4 : index
    %c2_393 = arith.constant 2 : index
    %686 = memref.load %arg5[%c4_392, %c2_393] : memref<5x5xf32, #tpu.memory_space<smem>>
    %687 = vector.broadcast %686 : f32 to vector<32x128xf32>
    %688 = arith.mulf %687, %685 : vector<32x128xf32>
    %689 = arith.addf %683, %688 : vector<32x128xf32>
    %c127_i32_394 = arith.constant 127 : i32
    %690 = vector.broadcast %c127_i32_394 : i32 to vector<32x128xi32>
    %691 = arith.cmpi slt, %229, %690 : vector<32x128xi32>
    %c127_i32_395 = arith.constant 127 : i32
    %692 = tpu.dynamic_rotate %663 by %c127_i32_395 dim 1 : vector<32x128xf32>, i32 -> vector<32x128xf32>
    %693 = arith.andi %662, %691 : vector<32x128xi1>
    %cst_396 = arith.constant 0.000000e+00 : f32
    %694 = vector.broadcast %cst_396 : f32 to vector<32x128xf32>
    %695 = arith.select %693, %692, %694 : vector<32x128xi1>, vector<32x128xf32>
    %c4_397 = arith.constant 4 : index
    %c3_398 = arith.constant 3 : index
    %696 = memref.load %arg5[%c4_397, %c3_398] : memref<5x5xf32, #tpu.memory_space<smem>>
    %697 = vector.broadcast %696 : f32 to vector<32x128xf32>
    %698 = arith.mulf %697, %695 : vector<32x128xf32>
    %699 = arith.addf %689, %698 : vector<32x128xf32>
    %c126_i32_399 = arith.constant 126 : i32
    %700 = vector.broadcast %c126_i32_399 : i32 to vector<32x128xi32>
    %701 = arith.cmpi slt, %229, %700 : vector<32x128xi32>
    %c126_i32_400 = arith.constant 126 : i32
    %702 = tpu.dynamic_rotate %663 by %c126_i32_400 dim 1 : vector<32x128xf32>, i32 -> vector<32x128xf32>
    %703 = arith.andi %662, %701 : vector<32x128xi1>
    %cst_401 = arith.constant 0.000000e+00 : f32
    %704 = vector.broadcast %cst_401 : f32 to vector<32x128xf32>
    %705 = arith.select %703, %702, %704 : vector<32x128xi1>, vector<32x128xf32>
    %c4_402 = arith.constant 4 : index
    %c4_403 = arith.constant 4 : index
    %706 = memref.load %arg5[%c4_402, %c4_403] : memref<5x5xf32, #tpu.memory_space<smem>>
    %707 = vector.broadcast %706 : f32 to vector<32x128xf32>
    %708 = arith.mulf %707, %705 : vector<32x128xf32>
    %709 = arith.addf %699, %708 : vector<32x128xf32>
    %c0_404 = arith.constant 0 : index
    %710 = memref.load %arg6[%c0_404] : memref<1xf32, #tpu.memory_space<smem>>
    %711 = vector.broadcast %710 : f32 to vector<32x128xf32>
    %712 = arith.addf %709, %711 : vector<32x128xf32>
    %cst_405 = arith.constant 2.000000e-01 : f32
    %713 = vector.broadcast %cst_405 : f32 to vector<32x128xf32>
    %714 = arith.mulf %713, %712 : vector<32x128xf32>
    %715 = arith.maximumf %712, %714 : vector<32x128xf32>
    %cst_406 = arith.constant 0.000000e+00 : f32
    %716 = vector.broadcast %cst_406 : f32 to vector<32x128xf32>
    %c1_i32_407 = arith.constant 1 : i32
    %717 = vector.broadcast %c1_i32_407 : i32 to vector<32x128xi32>
    %718 = arith.cmpi sge, %228, %717 : vector<32x128xi32>
    %c1_i32_408 = arith.constant 1 : i32
    %719 = tpu.dynamic_rotate %715 by %c1_i32_408 dim 0 : vector<32x128xf32>, i32 -> vector<32x128xf32>
    %c1_i32_409 = arith.constant 1 : i32
    %720 = vector.broadcast %c1_i32_409 : i32 to vector<32x128xi32>
    %721 = arith.cmpi sge, %229, %720 : vector<32x128xi32>
    %c1_i32_410 = arith.constant 1 : i32
    %722 = tpu.dynamic_rotate %719 by %c1_i32_410 dim 1 : vector<32x128xf32>, i32 -> vector<32x128xf32>
    %723 = arith.andi %718, %721 : vector<32x128xi1>
    %cst_411 = arith.constant 0.000000e+00 : f32
    %724 = vector.broadcast %cst_411 : f32 to vector<32x128xf32>
    %725 = arith.select %723, %722, %724 : vector<32x128xi1>, vector<32x128xf32>
    %c0_412 = arith.constant 0 : index
    %c0_413 = arith.constant 0 : index
    %726 = memref.load %arg7[%c0_412, %c0_413] : memref<3x3xf32, #tpu.memory_space<smem>>
    %727 = vector.broadcast %726 : f32 to vector<32x128xf32>
    %728 = arith.mulf %727, %725 : vector<32x128xf32>
    %729 = arith.addf %716, %728 : vector<32x128xf32>
    %cst_414 = arith.constant 0.000000e+00 : f32
    %730 = vector.broadcast %cst_414 : f32 to vector<32x128xf32>
    %731 = arith.select %718, %719, %730 : vector<32x128xi1>, vector<32x128xf32>
    %c0_415 = arith.constant 0 : index
    %c1_416 = arith.constant 1 : index
    %732 = memref.load %arg7[%c0_415, %c1_416] : memref<3x3xf32, #tpu.memory_space<smem>>
    %733 = vector.broadcast %732 : f32 to vector<32x128xf32>
    %734 = arith.mulf %733, %731 : vector<32x128xf32>
    %735 = arith.addf %729, %734 : vector<32x128xf32>
    %c127_i32_417 = arith.constant 127 : i32
    %736 = vector.broadcast %c127_i32_417 : i32 to vector<32x128xi32>
    %737 = arith.cmpi slt, %229, %736 : vector<32x128xi32>
    %c127_i32_418 = arith.constant 127 : i32
    %738 = tpu.dynamic_rotate %719 by %c127_i32_418 dim 1 : vector<32x128xf32>, i32 -> vector<32x128xf32>
    %739 = arith.andi %718, %737 : vector<32x128xi1>
    %cst_419 = arith.constant 0.000000e+00 : f32
    %740 = vector.broadcast %cst_419 : f32 to vector<32x128xf32>
    %741 = arith.select %739, %738, %740 : vector<32x128xi1>, vector<32x128xf32>
    %c0_420 = arith.constant 0 : index
    %c2_421 = arith.constant 2 : index
    %742 = memref.load %arg7[%c0_420, %c2_421] : memref<3x3xf32, #tpu.memory_space<smem>>
    %743 = vector.broadcast %742 : f32 to vector<32x128xf32>
    %744 = arith.mulf %743, %741 : vector<32x128xf32>
    %745 = arith.addf %735, %744 : vector<32x128xf32>
    %c1_i32_422 = arith.constant 1 : i32
    %746 = vector.broadcast %c1_i32_422 : i32 to vector<32x128xi32>
    %747 = arith.cmpi sge, %229, %746 : vector<32x128xi32>
    %c1_i32_423 = arith.constant 1 : i32
    %748 = tpu.dynamic_rotate %715 by %c1_i32_423 dim 1 : vector<32x128xf32>, i32 -> vector<32x128xf32>
    %cst_424 = arith.constant 0.000000e+00 : f32
    %749 = vector.broadcast %cst_424 : f32 to vector<32x128xf32>
    %750 = arith.select %747, %748, %749 : vector<32x128xi1>, vector<32x128xf32>
    %c1_425 = arith.constant 1 : index
    %c0_426 = arith.constant 0 : index
    %751 = memref.load %arg7[%c1_425, %c0_426] : memref<3x3xf32, #tpu.memory_space<smem>>
    %752 = vector.broadcast %751 : f32 to vector<32x128xf32>
    %753 = arith.mulf %752, %750 : vector<32x128xf32>
    %754 = arith.addf %745, %753 : vector<32x128xf32>
    %c1_427 = arith.constant 1 : index
    %c1_428 = arith.constant 1 : index
    %755 = memref.load %arg7[%c1_427, %c1_428] : memref<3x3xf32, #tpu.memory_space<smem>>
    %756 = vector.broadcast %755 : f32 to vector<32x128xf32>
    %757 = arith.mulf %756, %715 : vector<32x128xf32>
    %758 = arith.addf %754, %757 : vector<32x128xf32>
    %c127_i32_429 = arith.constant 127 : i32
    %759 = vector.broadcast %c127_i32_429 : i32 to vector<32x128xi32>
    %760 = arith.cmpi slt, %229, %759 : vector<32x128xi32>
    %c127_i32_430 = arith.constant 127 : i32
    %761 = tpu.dynamic_rotate %715 by %c127_i32_430 dim 1 : vector<32x128xf32>, i32 -> vector<32x128xf32>
    %cst_431 = arith.constant 0.000000e+00 : f32
    %762 = vector.broadcast %cst_431 : f32 to vector<32x128xf32>
    %763 = arith.select %760, %761, %762 : vector<32x128xi1>, vector<32x128xf32>
    %c1_432 = arith.constant 1 : index
    %c2_433 = arith.constant 2 : index
    %764 = memref.load %arg7[%c1_432, %c2_433] : memref<3x3xf32, #tpu.memory_space<smem>>
    %765 = vector.broadcast %764 : f32 to vector<32x128xf32>
    %766 = arith.mulf %765, %763 : vector<32x128xf32>
    %767 = arith.addf %758, %766 : vector<32x128xf32>
    %c15_i32_434 = arith.constant 15 : i32
    %768 = vector.broadcast %c15_i32_434 : i32 to vector<32x128xi32>
    %769 = arith.cmpi slt, %228, %768 : vector<32x128xi32>
    %c31_i32_435 = arith.constant 31 : i32
    %770 = tpu.dynamic_rotate %715 by %c31_i32_435 dim 0 : vector<32x128xf32>, i32 -> vector<32x128xf32>
    %c1_i32_436 = arith.constant 1 : i32
    %771 = vector.broadcast %c1_i32_436 : i32 to vector<32x128xi32>
    %772 = arith.cmpi sge, %229, %771 : vector<32x128xi32>
    %c1_i32_437 = arith.constant 1 : i32
    %773 = tpu.dynamic_rotate %770 by %c1_i32_437 dim 1 : vector<32x128xf32>, i32 -> vector<32x128xf32>
    %774 = arith.andi %769, %772 : vector<32x128xi1>
    %cst_438 = arith.constant 0.000000e+00 : f32
    %775 = vector.broadcast %cst_438 : f32 to vector<32x128xf32>
    %776 = arith.select %774, %773, %775 : vector<32x128xi1>, vector<32x128xf32>
    %c2_439 = arith.constant 2 : index
    %c0_440 = arith.constant 0 : index
    %777 = memref.load %arg7[%c2_439, %c0_440] : memref<3x3xf32, #tpu.memory_space<smem>>
    %778 = vector.broadcast %777 : f32 to vector<32x128xf32>
    %779 = arith.mulf %778, %776 : vector<32x128xf32>
    %780 = arith.addf %767, %779 : vector<32x128xf32>
    %cst_441 = arith.constant 0.000000e+00 : f32
    %781 = vector.broadcast %cst_441 : f32 to vector<32x128xf32>
    %782 = arith.select %769, %770, %781 : vector<32x128xi1>, vector<32x128xf32>
    %c2_442 = arith.constant 2 : index
    %c1_443 = arith.constant 1 : index
    %783 = memref.load %arg7[%c2_442, %c1_443] : memref<3x3xf32, #tpu.memory_space<smem>>
    %784 = vector.broadcast %783 : f32 to vector<32x128xf32>
    %785 = arith.mulf %784, %782 : vector<32x128xf32>
    %786 = arith.addf %780, %785 : vector<32x128xf32>
    %c127_i32_444 = arith.constant 127 : i32
    %787 = vector.broadcast %c127_i32_444 : i32 to vector<32x128xi32>
    %788 = arith.cmpi slt, %229, %787 : vector<32x128xi32>
    %c127_i32_445 = arith.constant 127 : i32
    %789 = tpu.dynamic_rotate %770 by %c127_i32_445 dim 1 : vector<32x128xf32>, i32 -> vector<32x128xf32>
    %790 = arith.andi %769, %788 : vector<32x128xi1>
    %cst_446 = arith.constant 0.000000e+00 : f32
    %791 = vector.broadcast %cst_446 : f32 to vector<32x128xf32>
    %792 = arith.select %790, %789, %791 : vector<32x128xi1>, vector<32x128xf32>
    %c2_447 = arith.constant 2 : index
    %c2_448 = arith.constant 2 : index
    %793 = memref.load %arg7[%c2_447, %c2_448] : memref<3x3xf32, #tpu.memory_space<smem>>
    %794 = vector.broadcast %793 : f32 to vector<32x128xf32>
    %795 = arith.mulf %794, %792 : vector<32x128xf32>
    %796 = arith.addf %786, %795 : vector<32x128xf32>
    %c0_449 = arith.constant 0 : index
    %797 = memref.load %arg8[%c0_449] : memref<1xf32, #tpu.memory_space<smem>>
    %798 = vector.broadcast %797 : f32 to vector<32x128xf32>
    %799 = arith.addf %796, %798 : vector<32x128xf32>
    %800 = math.tanh %799 : vector<32x128xf32>
    %c0_450 = arith.constant 0 : index
    %c0_451 = arith.constant 0 : index
    %801 = vector.load %arg9[%c0_450, %c0_451] : memref<32x128xf32, #tpu.memory_space<vmem>>, vector<32x128xf32>
    tpu.vector_store %arg9[%c0_450, %c0_451], %800 {strides = array<i32>} : memref<32x128xf32, #tpu.memory_space<vmem>>, vector<32x128xf32>,
    return
  }
}

</mosaic_0001>

<bundles_post_ra>
// kernel: generator_forward.1
= control target key start
LH: loop header
LB: loop body
LE: loop exit
PB: predicated region body
PF: predicated region fallthrough
CT: control target
= control target key end

     0   :  { %17 = vsyncpa [#allocation8], 0  ;;  %s10323_s0 = inlined_call_operand.vmem [shape: f32[2,64], index: 0, kind: input, shape index: {}]   ;;  %s10324_s1 = inlined_call_operand.vmem [shape: f32[16,64,128], index: 1, kind: input, shape index: {}]   ;;  %s10325_s2 = inlined_call_operand.vmem [shape: f32[16,1,128], index: 2, kind: input, shape index: {}]   ;;  %s10326_s3 = inlined_call_operand.vmem [shape: f32[5,5], index: 3, kind: input, shape index: {}]   ;;  %s10327_s4 = inlined_call_operand.<no memory space> [shape: f32[1], index: 4, kind: input, shape index: {}]   ;;  %s10328_s5 = inlined_call_operand.vmem [shape: f32[5,5], index: 5, kind: input, shape index: {}]   ;;  %s10329_s6 = inlined_call_operand.<no memory space> [shape: f32[1], index: 6, kind: input, shape index: {}]   ;;  %s10330_s7 = inlined_call_operand.vmem [shape: f32[3,3], index: 7, kind: input, shape index: {}]   ;;  %s10331_s8 = inlined_call_operand.<no memory space> [shape: f32[1], index: 8, kind: input, shape index: {}]   ;;  %s10332_s9 = inlined_call_operand.hbm [shape: f32[32,128], index: 9, kind: output, shape index: {}]  }
   0x1   :  { %18 = vsyncpa [#allocation10], 0  ;;  %s42_s11 = sshll.u32 %s10328_s5, 4  ;;  %s43_s11 = int_to_ptr.vmem [resolvable:$true] %s42_s11 }
   0x2   :  { %19 = vsyncpa [#allocation7], 0  ;;  %s31_s14 = sshll.u32 %s10326_s3, 4  ;;  %s5875_s15 = smov [#allocation9]   ;;  %s32_s14 = int_to_ptr.vmem [resolvable:$true] %s31_s14 }
   0x3   :  { %45 = dma.vmem_to_smem %s43_s11, 128, %s5875_s15, [#allocation10]  }
   0x4   :  { %s5876_s16 = smov [#allocation6]   ;;  %s53_s19 = sshll.u32 %s10330_s7, 4  ;;  %s54_s19 = int_to_ptr.vmem [resolvable:$true] %s53_s19 }
   0x5   :  { %34 = dma.vmem_to_smem %s32_s14, 128, %s5876_s16, [#allocation8]  }
   0x6   :  { %s5877_s20 = smov [#allocation11]  }
   0x7   :  { %56 = dma.vmem_to_smem %s54_s19, 64, %s5877_s20, [#allocation10]  }
   0x8   :  { %5869 = dma.done.wait [#allocation8], 128  }
   0x9   :  { %5870 = vsyncadd [#allocation8], 4294967168 }
   0xa   :  { %5871 = dma.done.wait [#allocation10], 192  }
   0xb   :  { %5872 = vsyncadd [#allocation10], 4294967104 }
   0xc   :  { %71 = sfence }
   0xd   :  { %v80_v0 = vld [vmem:[%s10324_s1 + $0x38] sm:$0xff]  ;;  %v79_v1 = vld [vmem:[%s10324_s1 + $0x30] sm:$0xff]  ;;  %v78_v2 = vld [vmem:[%s10324_s1 + $0x28] sm:$0xff]  ;;  %vm85_vm0 = vcmask 523264   ;;  %s5878_s5 = smov 2   ;;  %s5879_s21 = smov 1  }
   0xe   :  { %v5953_v3 = vand.u32 4294901760, %v80_v0  ;;  %v5955_v4 = vand.u32 4294901760, %v79_v1  ;;  %v5957_v5 = vand.u32 4294901760, %v78_v2  ;;  %v77_v6 = vld [vmem:[%s10324_s1 + $0x20] sm:$0xff]  ;;  %v76_v7 = vld [vmem:[%s10324_s1 + $0x18] sm:$0xff]  ;;  %v75_v8 = vld [vmem:[%s10324_s1 + $0x10] sm:$0xff] }
   0xf   :  { %v5968_v9 = vand.u32 4294901760, %v77_v6  ;;  %v5970_v10 = vand.u32 4294901760, %v76_v7  ;;  %v5972_v11 = vand.u32 4294901760, %v75_v8  ;;  %v74_v12 = vld [vmem:[%s10324_s1 + $0x8] sm:$0xff]  ;;  %v73_v13 = vld [vmem:[%s10324_s1] sm:$0xff]  ;;  %v5589_v22 = vld [vmem:[%s10324_s1 + $0x78] sm:$0xff] }
  0x10   :  { %v5981_v14 = vsub.f32 %v80_v0, %v5953_v3  ;;  %98 = vmatpush.msra.mxu0 %v5953_v3  ;;  %v5985_v15 = vsub.f32 %v79_v1, %v5955_v4  ;;  %230 = vmatpush.msra.mxu3 %v5953_v3  ;;  %v5989_v16 = vsub.f32 %v78_v2, %v5957_v5  ;;  %v5991_v17 = vand.u32 4294901760, %v74_v12  ;;  %v5588_v27 = vld [vmem:[%s10324_s1 + $0x70] sm:$0xff]  ;;  %v5587_v31 = vld [vmem:[%s10324_s1 + $0x68] sm:$0xff]  ;;  %v5586_v36 = vld [vmem:[%s10324_s1 + $0x60] sm:$0xff]  ;;  %s5881_s7 = smov 126   ;;  %s4200_s15 = sld [smem:[#allocation6]] }
  0x11   :  { %v5994_v18 = vsub.f32 %v77_v6, %v5968_v9  ;;  %v5997_v19 = vsub.f32 %v76_v7, %v5970_v10  ;;  %v6000_v20 = vsub.f32 %v75_v8, %v5972_v11  ;;  %v6002_v21 = vand.u32 4294901760, %v73_v13  ;;  %v5585_v37 = vld [vmem:[%s10324_s1 + $0x58] sm:$0xff]  ;;  %v5584_v40 = vld [vmem:[%s10324_s1 + $0x50] sm:$0xff]  ;;  %v5583_v48 = vld [vmem:[%s10324_s1 + $0x48] sm:$0xff]  ;;  %s5718_s16 = sld [smem:[#allocation6 + $0x2]] }
  0x12   :  { %193 = vmatpush.msra.mxu2 %v5981_v14  ;;  %100 = vmatpush.msra.mxu0 %v5955_v4  ;;  %v132_v23 = vand.u32 4294901760, %v5981_v14  ;;  %v138_v24 = vand.u32 4294901760, %v5985_v15  ;;  %v144_v25 = vand.u32 4294901760, %v5989_v16  ;;  %v6013_v26 = vsub.f32 %v74_v12, %v5991_v17  ;;  %v72_v53 = vld [vmem:[%s10323_s0] sm:$0x3]  ;;  %s5719_s17 = sld [smem:[#allocation6 + $0x3]] }
  0x13   :  { %232 = vmatpush.msra.mxu3 %v5955_v4  ;;  %v150_v28 = vand.u32 4294901760, %v5994_v18  ;;  %v156_v29 = vand.u32 4294901760, %v5997_v19  ;;  %v162_v30 = vand.u32 4294901760, %v6000_v20  ;;  %v6036_v35 = vand.u32 4294901760, %v5589_v22  ;;  %v5582_v2 = vld [vmem:[%s10324_s1 + $0x40] sm:$0xff]  ;;  %s5720_s18 = sld [smem:[#allocation6 + $0x4]] }
  0x14   :  { %196 = vmatpush.msra.mxu2 %v5985_v15  ;;  %v133_v32 = vsub.f32 %v5981_v14, %v132_v23  ;;  %102 = vmatpush.msra.mxu0 %v5957_v5  ;;  %v139_v33 = vsub.f32 %v5985_v15, %v138_v24  ;;  %v145_v34 = vsub.f32 %v5989_v16, %v144_v25  ;;  %v168_v43 = vand.u32 4294901760, %v6013_v26  ;;  %s8757_s19 = sld [smem:[#allocation6 + $0x80]] }
  0x15   :  { %234 = vmatpush.msra.mxu3 %v5957_v5  ;;  %v151_v38 = vsub.f32 %v5994_v18, %v150_v28  ;;  %v6049_v39 = vsub.f32 %v73_v13, %v6002_v21  ;;  %v6057_v44 = vand.u32 4294901760, %v5588_v27  ;;  %v157_v46 = vsub.f32 %v5997_v19, %v156_v29  ;;  %s8769_s20 = sld [smem:[#allocation6 + $0x81]] }
  0x16   :  { %v134_v41 = vand.u32 4294901760, %v133_v32  ;;  %199 = vmatpush.msra.mxu2 %v5989_v16  ;;  %v140_v42 = vand.u32 4294901760, %v139_v33  ;;  %104 = vmatpush.msra.mxu0 %v5968_v9  ;;  %v146_v45 = vand.u32 4294901760, %v145_v34  ;;  %v163_v47 = vsub.f32 %v6000_v20, %v162_v30  ;;  %s5723_s3 = sld [smem:[#allocation6 + $0x82]] }
  0x17   :  { %236 = vmatpush.msra.mxu3 %v5968_v9  ;;  %v152_v49 = vand.u32 4294901760, %v151_v38  ;;  %v6071_v50 = vsub.f32 %v5589_v22, %v6036_v35  ;;  %v6073_v51 = vand.u32 4294901760, %v5587_v31  ;;  %v6076_v52 = vsub.f32 %v5588_v27, %v6057_v44  ;;  %s5724_s22 = sld [smem:[#allocation6 + $0x83]] }
  0x18   :  { %135 = vmatpush.msra.mxu1 %v134_v41  ;;  %202 = vmatpush.msra.mxu2 %v5994_v18  ;;  %v174_v54 = vand.u32 4294901760, %v6049_v39  ;;  %v6084_v55 = vand.u32 4294901760, %v5586_v36  ;;  %v6086_v56 = vand.u32 4294901760, %v5585_v37  ;;  %v6088_v57 = vand.u32 4294901760, %v5584_v40  ;;  %s5725_s23 = sld [smem:[#allocation6 + $0x84]] }
  0x19   :  { %106 = vmatpush.msra.mxu0 %v5970_v10  ;;  %238 = vmatpush.msra.mxu3 %v5970_v10  ;;  %v169_v58 = vsub.f32 %v6013_v26, %v168_v43  ;;  %v387_v59 = vand.u32 4294901760, %v6071_v50  ;;  %v393_v60 = vand.u32 4294901760, %v6076_v52  ;;  %v6097_v61 = vsub.f32 %v5587_v31, %v6073_v51  ;;  %s5726_s24 = sld [smem:[#allocation6 + $0x100]] }
  0x1a   :  { %141 = vmatpush.msra.mxu1 %v140_v42  ;;  %205 = vmatpush.msra.mxu2 %v5997_v19  ;;  %v158_v62 = vand.u32 4294901760, %v157_v46  ;;  %v6102_v63 = vsub.f32 %v5586_v36, %v6084_v55  ;;  %v6105_v0 = vsub.f32 %v5585_v37, %v6086_v56  ;;  %v6108_v1 = vsub.f32 %v5584_v40, %v6088_v57  ;;  %v5596_v19 = vld [vmem:[%s10324_s1 + $0xa8] sm:$0xff]  ;;  %s5727_s25 = sld [smem:[#allocation6 + $0x101]] }
  0x1b   :  { %108 = vmatpush.msra.mxu0 %v5972_v11  ;;  %240 = vmatpush.msra.mxu3 %v5972_v11  ;;  %v388_v6 = vsub.f32 %v6071_v50, %v387_v59  ;;  %v394_v7 = vsub.f32 %v6076_v52, %v393_v60  ;;  %v399_v8 = vand.u32 4294901760, %v6097_v61  ;;  %v6121_v12 = vand.u32 4294901760, %v5583_v48  ;;  %s5728_s0 = sld [smem:[#allocation6 + $0x102]] }
  0x1c   :  { %147 = vmatpush.msra.mxu1 %v146_v45  ;;  %208 = vmatpush.msra.mxu2 %v6000_v20  ;;  %v164_v13 = vand.u32 4294901760, %v163_v47  ;;  %v175_v22 = vsub.f32 %v6049_v39, %v174_v54  ;;  %v405_v27 = vand.u32 4294901760, %v6102_v63  ;;  %v87_v31 = vsel %vm85_vm0, %v72_v53, 0  ;;  %s5729_s26 = sld [smem:[#allocation6 + $0x103]] }
  0x1d   :  { %110 = vmatpush.msra.mxu0 %v5991_v17  ;;  %242 = vmatpush.msra.mxu3 %v5991_v17  ;;  %v389_v32 = vand.u32 4294901760, %v388_v6  ;;  %v400_v33 = vsub.f32 %v6097_v61, %v399_v8  ;;  %v411_v34 = vand.u32 4294901760, %v6105_v0  ;;  %v6135_v36 = vand.u32 4294901760, %v87_v31  ;;  %s5730_s27 = sld [smem:[#allocation6 + $0x104]] }
  0x1e   :  { %153 = vmatpush.msra.mxu1 %v152_v49  ;;  %211 = vmatpush.msra.mxu2 %v6013_v26  ;;  %v170_v37 = vand.u32 4294901760, %v169_v58  ;;  %v417_v38 = vand.u32 4294901760, %v6108_v1  ;;  %v6140_v40 = vand.u32 4294901760, %v5582_v2  ;;  %v395_v41 = vand.u32 4294901760, %v394_v7  ;;  %s5731_s28 = sld [smem:[#allocation6 + $0x180]] }
  0x1f   :  { %112 = vmatpush.msra.mxu0 %v6002_v21  ;;  %244 = vmatpush.msra.mxu3 %v6002_v21  ;;  %v406_v42 = vsub.f32 %v6102_v63, %v405_v27  ;;  %v6147_v45 = vsub.f32 %v87_v31, %v6135_v36  ;;  %v6150_v46 = vsub.f32 %v5583_v48, %v6121_v12  ;;  %v176_v47 = vand.u32 4294901760, %v175_v22  ;;  %s5732_s29 = sld [smem:[#allocation6 + $0x181]] }
  0x20   :  { %159 = vmatpush.msra.mxu1 %v158_v62  ;;  %214 = vmatpush.msra.mxu2 %v6049_v39  ;;  %v401_v49 = vand.u32 4294901760, %v400_v33  ;;  %v412_v53 = vsub.f32 %v6105_v0, %v411_v34  ;;  %v6162_v48 = vsub.f32 %v5582_v2, %v6140_v40  ;;  %v5593_v39 = vld [vmem:[%s10324_s1 + $0x90] sm:$0xff]  ;;  %s5733_s30 = sld [smem:[#allocation6 + $0x182]] }
  0x21   :  { %263 = vmatpush.msrb.mxu0 %v132_v23  ;;  %390 = vmatpush.msrb.mxu3 %v389_v32  ;;  %v407_v14 = vand.u32 4294901760, %v406_v42  ;;  %v418_v23 = vsub.f32 %v6108_v1, %v417_v38  ;;  %v423_v58 = vand.u32 4294901760, %v6150_v46  ;;  %v6169_v62 = vand.u32 4294901760, %v6147_v45  ;;  %v5605_v32 = vld [vmem:[%s10324_s1 + $0xe8] sm:$0xff]  ;;  %s5734_s10 = sld [smem:[#allocation6 + $0x183]] }
  0x22   :  { %353 = vmatpush.msrb.mxu2 %v6036_v35  ;;  %165 = vmatpush.msra.mxu1 %v164_v13  ;;  %v413_v15 = vand.u32 4294901760, %v412_v53  ;;  %v5603_v53 = vld [vmem:[%s10324_s1 + $0xd8] sm:$0xff]  ;;  %s5735_s11 = sld [smem:[#allocation6 + $0x184]] }
  0x23   :  { %267 = vmatpush.msrb.mxu0 %v138_v24  ;;  %396 = vmatpush.msrb.mxu3 %v395_v41  ;;  %v429_v24 = vand.u32 4294901760, %v6162_v48  ;;  %v419_v2 = vand.u32 4294901760, %v418_v23  ;;  %v424_v6 = vsub.f32 %v6150_v46, %v423_v58  ;;  %v116_v16 = vsub.f32 %v6147_v45, %v6169_v62  ;;  %s9237_s12 = sld [smem:[#allocation6 + $0x202]] }
  0x24   :  { %355 = vmatpush.msrb.mxu2 %v6057_v44  ;;  %171 = vmatpush.msra.mxu1 %v170_v37  ;;  %s9241_s13 = sld [smem:[#allocation6 + $0x200]] }
  0x25   :  { %271 = vmatpush.msrb.mxu0 %v144_v25  ;;  %402 = vmatpush.msrb.mxu3 %v401_v49  ;;  %v425_v18 = vand.u32 4294901760, %v424_v6  ;;  %v5595_v25 = vld [vmem:[%s10324_s1 + $0xa0] sm:$0xff]  ;;  %s9265_s14 = sld [smem:[#allocation6 + $0x201]] }
  0x26   :  { %357 = vmatpush.msrb.mxu2 %v6073_v51  ;;  %177 = vmatpush.msra.mxu1 %v176_v47 }
  0x27   :  { %275 = vmatpush.msrb.mxu0 %v150_v28  ;;  %408 = vmatpush.msrb.mxu3 %v407_v14  ;;  %v5594_v28 = vld [vmem:[%s10324_s1 + $0x98] sm:$0xff] }
  0x28   :  { %306 = vmatpush.msrb.mxu1 %v5953_v3  ;;  %359 = vmatpush.msrb.mxu2 %v6084_v55  ;;  %v430_v3 = vsub.f32 %v6162_v48, %v429_v24 }
  0x29   :  { %279 = vmatpush.msrb.mxu0 %v156_v29  ;;  %414 = vmatpush.msrb.mxu3 %v413_v15 }
  0x2a   :  { %308 = vmatpush.msrb.mxu1 %v5955_v4  ;;  %361 = vmatpush.msrb.mxu2 %v6086_v56  ;;  %v6195_v4 = vand.u32 4294901760, %v116_v16  ;;  %v6396_v16 = vand.u32 4294901760, %v5603_v53 }
  0x2b   :  { %283 = vmatpush.msrb.mxu0 %v162_v30  ;;  %420 = vmatpush.msrb.mxu3 %v419_v2  ;;  %v6264_v30 = vand.u32 4294901760, %v5595_v25 }
  0x2c   :  { %310 = vmatpush.msrb.mxu1 %v5957_v5  ;;  %363 = vmatpush.msrb.mxu2 %v6088_v57  ;;  %v431_v5 = vand.u32 4294901760, %v430_v3 }
  0x2d   :  { %217 = vmatmul.f32.vlgmr.msra.gmra.mxu2 %v6147_v45  ;;  %287 = vmatpush.msrb.mxu0 %v168_v43 }
  0x2e   :  { %312 = vmatpush.msrb.mxu1 %v5968_v9  ;;  %365 = vmatpush.msrb.mxu2 %v6121_v12  ;;  %v5598_v9 = vld [vmem:[%s10324_s1 + $0xb8] sm:$0xff] }
  0x2f   :  { %426 = vmatpush.msrb.mxu3 %v425_v18  ;;  %118 = vmatmul.f32.vlgmr.msra.gmra.mxu0 %v6195_v4 }
  0x30   :  { %314 = vmatpush.msrb.mxu1 %v5970_v10  ;;  %367 = vmatpush.msrb.mxu2 %v6140_v40  ;;  %v5597_v10 = vld [vmem:[%s10324_s1 + $0xb0] sm:$0xff] }
  0x31   :  { %248 = vmatmul.f32.vlgmr.msra.gmra.mxu3 %v6169_v62  ;;  %291 = vmatpush.msrb.mxu0 %v174_v54  ;;  %v6294_v54 = vand.u32 4294901760, %v5593_v39 }
  0x32   :  { %316 = vmatpush.msrb.mxu1 %v5972_v11  ;;  %518 = vmatpush.msra.mxu2 %v387_v59  ;;  %v6223_v11 = vand.u32 4294901760, %v5598_v9 }
  0x33   :  { %432 = vmatpush.msrb.mxu3 %v431_v5  ;;  %179 = vmatmul.f32.vlgmr.msra.gmra.mxu1 %v6135_v36  ;;  %v5601_v5 = vld [vmem:[%s10324_s1 + $0xc8] sm:$0xff] }
  0x34   :  { %318 = vmatpush.msrb.mxu1 %v5991_v17  ;;  %448 = vmatpush.msra.mxu0 %v6071_v50  ;;  %v6230_v17 = vand.u32 4294901760, %v5597_v10  ;;  %v6241_v20 = vsub.f32 %v5598_v9, %v6223_v11  ;;  %v5592_v50 = vld [vmem:[%s10324_s1 + $0x88] sm:$0xff] }
  0x35   :  { %522 = vmatpush.msra.mxu2 %v393_v60  ;;  %561 = vmatpush.msra.mxu3 %v6036_v35 }
  0x36   :  { %320 = vmatpush.msrb.mxu1 %v6002_v21  ;;  %451 = vmatpush.msra.mxu0 %v6076_v52  ;;  %v6245_v21 = vand.u32 4294901760, %v5596_v19  ;;  %v6253_v26 = vsub.f32 %v5597_v10, %v6230_v17  ;;  %v642_v29 = vand.u32 4294901760, %v6241_v20  ;;  %v6292_v52 = vsub.f32 %v5595_v25, %v6264_v30 }
  0x37   :  { %526 = vmatpush.msra.mxu2 %v399_v8  ;;  %563 = vmatpush.msra.mxu3 %v6057_v44  ;;  %v5606_v8 = vld [vmem:[%s10324_s1 + $0xf0] sm:$0xff] }
  0x38   :  { %485 = vmatpush.msra.mxu1 %v6036_v35  ;;  %454 = vmatpush.msra.mxu0 %v6097_v61  ;;  %v6270_v35 = vsub.f32 %v5596_v19, %v6245_v21  ;;  %v648_v43 = vand.u32 4294901760, %v6253_v26  ;;  %v6311_v61 = vand.u32 4294901760, %v5592_v50  ;;  %v6347_v33 = vand.u32 4294901760, %v5606_v8 }
  0x39   :  { %530 = vmatpush.msra.mxu2 %v405_v27  ;;  %565 = vmatpush.msra.mxu3 %v6073_v51 }
  0x3a   :  { %487 = vmatpush.msra.mxu1 %v6057_v44  ;;  %293 = vmatmul.f32.vlgmr.msrb.gmra.mxu0 %v6135_v36  ;;  %v6278_v44 = vand.u32 4294901760, %v5594_v28  ;;  %v649_v59 = vsub.f32 %v6253_v26, %v648_v43  ;;  %v6340_v31 = vsub.f32 %v5592_v50, %v6311_v61 }
  0x3b   :  { %457 = vmatpush.msra.mxu0 %v6102_v63  ;;  %534 = vmatpush.msra.mxu2 %v411_v34 }
  0x3c   :  { %489 = vmatpush.msra.mxu1 %v6073_v51  ;;  %567 = vmatpush.msra.mxu3 %v6084_v55  ;;  %v643_v51 = vsub.f32 %v6241_v20, %v642_v29  ;;  %v6309_v60 = vsub.f32 %v5594_v28, %v6278_v44  ;;  %v650_v22 = vand.u32 4294901760, %v649_v59  ;;  %v678_v49 = vand.u32 4294901760, %v6340_v31  ;;  %v5600_v59 = vld [vmem:[%s10324_s1 + $0xc0] sm:$0xff] }
  0x3d   :  { %322 = vmatmul.f32.vlgmr.msrb.gmra.mxu1 %v6135_v36  ;;  %460 = vmatpush.msra.mxu0 %v6105_v0  ;;  %v660_v0 = vand.u32 4294901760, %v6292_v52 }
  0x3e   :  { %491 = vmatpush.msra.mxu1 %v6084_v55  ;;  %538 = vmatpush.msra.mxu2 %v417_v38  ;;  %v654_v55 = vand.u32 4294901760, %v6270_v35  ;;  %v644_v63 = vand.u32 4294901760, %v643_v51  ;;  %v666_v27 = vand.u32 4294901760, %v6309_v60  ;;  %v679_v18 = vsub.f32 %v6340_v31, %v678_v49 }
  0x3f   :  { %569 = vmatpush.msra.mxu3 %v6086_v56  ;;  %463 = vmatpush.msra.mxu0 %v6108_v1  ;;  %v6322_v1 = vsub.f32 %v5593_v39, %v6294_v54  ;;  %v661_v34 = vsub.f32 %v6292_v52, %v660_v0  ;;  %v6425_v51 = vsub.f32 %v5603_v53, %v6396_v16 }
  0x40   :  { %493 = vmatpush.msra.mxu1 %v6086_v56  ;;  %542 = vmatpush.msra.mxu2 %v423_v58  ;;  %v5607_v56 = vld [vmem:[%s10324_s1 + $0xf8] sm:$0xff]  ;;  %v667_v47 = vsub.f32 %v6309_v60, %v666_v27 }
  0x41   :  { %571 = vmatpush.msra.mxu3 %v6088_v57  ;;  %373 = vmatmul.f32.vlgmr.msrb.gmra.mxu2 %v6195_v4  ;;  %v6324_v7 = vand.u32 4294901760, %v5607_v56  ;;  %v672_v37 = vand.u32 4294901760, %v6322_v1  ;;  %v662_v23 = vand.u32 4294901760, %v661_v34 }
  0x42   :  { %466 = vmatpush.msra.mxu0 %v6150_v46  ;;  %495 = vmatpush.msra.mxu1 %v6088_v57  ;;  %v5591_v57 = vld [vmem:[%s10324_s1 + $0x80] sm:$0xff]  ;;  %v6365_v46 = vand.u32 4294901760, %v5605_v32  ;;  %v668_v3 = vand.u32 4294901760, %v667_v47 }
  0x43   :  { %546 = vmatpush.msra.mxu2 %v429_v24  ;;  %573 = vmatpush.msra.mxu3 %v6121_v12  ;;  %v6334_v13 = vand.u32 4294901760, %v5591_v57  ;;  %v6355_v38 = vsub.f32 %v5607_v56, %v6324_v7  ;;  %v673_v58 = vsub.f32 %v6322_v1, %v672_v37  ;;  %v5602_v24 = vld [vmem:[%s10324_s1 + $0xd0] sm:$0xff]  ;;  %v6427_v56 = vand.u32 4294901760, %v5601_v5 }
  0x44   :  { %434 = vmatmul.f32.vlgmr.msrb.gmra.mxu3 %v6135_v36  ;;  %469 = vmatpush.msra.mxu0 %v6162_v48  ;;  %v6378_v48 = vsub.f32 %v5606_v8, %v6347_v33  ;;  %v6394_v6 = vsub.f32 %v5605_v32, %v6365_v46  ;;  %v6412_v19 = vand.u32 4294901760, %v5602_v24  ;;  %v6443_v32 = vand.u32 4294901760, %v5600_v59 }
  0x45   :  { %703 = vmatpush.msrb.mxu2 %v6241_v20  ;;  %497 = vmatpush.msra.mxu1 %v6121_v12  ;;  %v655_v12 = vsub.f32 %v6270_v35, %v654_v55  ;;  %v6363_v42 = vsub.f32 %v5591_v57, %v6334_v13  ;;  %v897_v15 = vand.u32 4294901760, %v6355_v38  ;;  %v674_v25 = vand.u32 4294901760, %v673_v58 }
  0x46   :  { %575 = vmatpush.msra.mxu3 %v6140_v40  ;;  %608 = vmatpush.msrb.mxu0 %v6223_v11  ;;  %v903_v9 = vand.u32 4294901760, %v6378_v48  ;;  %v909_v50 = vand.u32 4294901760, %v6394_v6  ;;  %v680_v57 = vand.u32 4294901760, %v679_v18  ;;  %v6452_v47 = vsub.f32 %v5601_v5, %v6427_v56 }
  0x47   :  { %706 = vmatpush.msrb.mxu2 %v6253_v26  ;;  %499 = vmatpush.msra.mxu1 %v6140_v40  ;;  %v5604_v40 = vld [vmem:[%s10324_s1 + $0xe0] sm:$0xff]  ;;  %v656_v41 = vand.u32 4294901760, %v655_v12  ;;  %v684_v2 = vand.u32 4294901760, %v6363_v42  ;;  %v898_v28 = vsub.f32 %v6355_v38, %v897_v15  ;;  %v6440_v12 = vsub.f32 %v5602_v24, %v6412_v19 }
  0x48   :  { %740 = vmatpush.msrb.mxu3 %v6223_v11  ;;  %610 = vmatpush.msrb.mxu0 %v6230_v17  ;;  %v6380_v14 = vand.u32 4294901760, %v5604_v40  ;;  %v6464_v24 = vsub.f32 %v5600_v59, %v6443_v32 }
  0x49   :  { %645 = vmatpush.msrb.mxu1 %v644_v63  ;;  %709 = vmatpush.msrb.mxu2 %v6270_v35  ;;  %v685_v39 = vsub.f32 %v6363_v42, %v684_v2  ;;  %v904_v63 = vsub.f32 %v6378_v48, %v903_v9  ;;  %v927_v58 = vand.u32 4294901760, %v6440_v12 }
  0x4a   :  { %742 = vmatpush.msrb.mxu3 %v6230_v17  ;;  %548 = vmatmul.f32.vlgmr.msra.gmra.mxu2 %v6135_v36  ;;  %v6410_v10 = vsub.f32 %v5604_v40, %v6380_v14  ;;  %v910_v40 = vsub.f32 %v6394_v6, %v909_v50 }
  0x4b   :  { %612 = vmatpush.msrb.mxu0 %v6245_v21  ;;  %651 = vmatpush.msrb.mxu1 %v650_v22  ;;  %v899_v22 = vand.u32 4294901760, %v898_v28  ;;  %v686_v34 = vand.u32 4294901760, %v685_v39  ;;  %v905_v53 = vand.u32 4294901760, %v904_v63  ;;  %v928_v26 = vsub.f32 %v6440_v12, %v927_v58 }
  0x4c   :  { %712 = vmatpush.msrb.mxu2 %v6292_v52  ;;  %744 = vmatpush.msrb.mxu3 %v6245_v21  ;;  %v915_v8 = vand.u32 4294901760, %v6410_v10 }
  0x4d   :  { %472 = vmatmul.f32.vlgmr.msra.gmra.mxu0 %v6147_v45  ;;  %577 = vmatmul.f32.vlgmr.msra.gmra.mxu3 %v6135_v36 }
  0x4e   :  { %614 = vmatpush.msrb.mxu0 %v6264_v30  ;;  %657 = vmatpush.msrb.mxu1 %v656_v41  ;;  %v921_v41 = vand.u32 4294901760, %v6425_v51 }
  0x4f   :  { %715 = vmatpush.msrb.mxu2 %v6309_v60  ;;  %746 = vmatpush.msrb.mxu3 %v6264_v30 }
  0x50   :  { %503 = vmatmul.f32.vlgmr.msra.gmra.mxu1 %v6169_v62  ;;  %616 = vmatpush.msrb.mxu0 %v6278_v44  ;;  %v922_v20 = vsub.f32 %v6425_v51, %v921_v41 }
  0x51   :  { %663 = vmatpush.msrb.mxu1 %v662_v23  ;;  %718 = vmatpush.msrb.mxu2 %v6322_v1  ;;  %v916_v23 = vsub.f32 %v6410_v10, %v915_v8 }
  0x52   :  { %748 = vmatpush.msrb.mxu3 %v6278_v44  ;;  %618 = vmatpush.msrb.mxu0 %v6294_v54 }
  0x53   :  { %669 = vmatpush.msrb.mxu1 %v668_v3  ;;  %721 = vmatpush.msrb.mxu2 %v6340_v31  ;;  %v911_v3 = vand.u32 4294901760, %v910_v40  ;;  %v917_v18 = vand.u32 4294901760, %v916_v23 }
  0x54   :  { %750 = vmatpush.msrb.mxu3 %v6294_v54  ;;  %620 = vmatpush.msrb.mxu0 %v6311_v61 }
  0x55   :  { %675 = vmatpush.msrb.mxu1 %v674_v25  ;;  %724 = vmatpush.msrb.mxu2 %v6363_v42 }
  0x56   :  { %752 = vmatpush.msrb.mxu3 %v6311_v61  ;;  %622 = vmatpush.msrb.mxu0 %v6334_v13 }
  0x57   :  { %863 = vmatpush.msra.mxu2 %v6324_v7  ;;  %681 = vmatpush.msrb.mxu1 %v680_v57 }
  0x58   :  { %754 = vmatpush.msrb.mxu3 %v6334_v13  ;;  %773 = vmatpush.msra.mxu0 %v642_v29  ;;  %v933_v29 = vand.u32 4294901760, %v6452_v47 }
  0x59   :  { %865 = vmatpush.msra.mxu2 %v6347_v33  ;;  %687 = vmatpush.msrb.mxu1 %v686_v34 }
  0x5a   :  { %900 = vmatpush.msra.mxu3 %v899_v22  ;;  %777 = vmatpush.msra.mxu0 %v648_v43  ;;  %v939_v43 = vand.u32 4294901760, %v6464_v24  ;;  %v934_v35 = vsub.f32 %v6452_v47, %v933_v29 }
  0x5b   :  { %816 = vmatpush.msra.mxu1 %v6223_v11  ;;  %867 = vmatpush.msra.mxu2 %v6365_v46  ;;  %v923_v11 = vand.u32 4294901760, %v922_v20 }
  0x5c   :  { %906 = vmatpush.msra.mxu3 %v905_v53  ;;  %781 = vmatpush.msra.mxu0 %v654_v55  ;;  %v940_v52 = vsub.f32 %v6464_v24, %v939_v43 }
  0x5d   :  { %818 = vmatpush.msra.mxu1 %v6230_v17  ;;  %869 = vmatpush.msra.mxu2 %v6380_v14  ;;  %v929_v17 = vand.u32 4294901760, %v928_v26 }
  0x5e   :  { %912 = vmatpush.msra.mxu3 %v911_v3  ;;  %785 = vmatpush.msra.mxu0 %v660_v0 }
  0x5f   :  { %820 = vmatpush.msra.mxu1 %v6245_v21  ;;  %871 = vmatpush.msra.mxu2 %v6396_v16  ;;  %v935_v21 = vand.u32 4294901760, %v934_v35 }
  0x60   :  { %918 = vmatpush.msra.mxu3 %v917_v18  ;;  %789 = vmatpush.msra.mxu0 %v666_v27  ;;  %v5612_v27 = vld [vmem:[%s10324_s1 + $0x118] sm:$0xff] }
  0x61   :  { %822 = vmatpush.msra.mxu1 %v6264_v30  ;;  %873 = vmatpush.msra.mxu2 %v6412_v19  ;;  %v941_v30 = vand.u32 4294901760, %v940_v52 }
  0x62   :  { %924 = vmatpush.msra.mxu3 %v923_v11  ;;  %793 = vmatpush.msra.mxu0 %v672_v37 }
  0x63   :  { %824 = vmatpush.msra.mxu1 %v6278_v44  ;;  %875 = vmatpush.msra.mxu2 %v6427_v56  ;;  %v5616_v44 = vld [vmem:[%s10324_s1 + $0x138] sm:$0xff] }
  0x64   :  { %930 = vmatpush.msra.mxu3 %v929_v17  ;;  %727 = vmatmul.f32.vlgmr.msrb.gmra.mxu2 %v6147_v45  ;;  %v6523_v55 = vand.u32 4294901760, %v5616_v44 }
  0x65   :  { %797 = vmatpush.msra.mxu0 %v678_v49  ;;  %826 = vmatpush.msra.mxu1 %v6294_v54  ;;  %v5615_v54 = vld [vmem:[%s10324_s1 + $0x130] sm:$0xff]  ;;  %v5610_v49 = vld [vmem:[%s10324_s1 + $0x108] sm:$0xff] }
  0x66   :  { %877 = vmatpush.msra.mxu2 %v6443_v32  ;;  %936 = vmatpush.msra.mxu3 %v935_v21  ;;  %v6530_v60 = vand.u32 4294901760, %v5615_v54  ;;  %v6541_v0 = vsub.f32 %v5616_v44, %v6523_v55 }
  0x67   :  { %628 = vmatmul.f32.vlgmr.msrb.gmra.mxu0 %v6195_v4  ;;  %758 = vmatmul.f32.vlgmr.msrb.gmra.mxu3 %v6169_v62 }
  0x68   :  { %1028 = vmatpush.msrb.mxu2 %v897_v15  ;;  %801 = vmatpush.msra.mxu0 %v684_v2  ;;  %v1152_v31 = vand.u32 4294901760, %v6541_v0 }
  0x69   :  { %828 = vmatpush.msra.mxu1 %v6311_v61  ;;  %942 = vmatpush.msra.mxu3 %v941_v30  ;;  %v5614_v61 = vld [vmem:[%s10324_s1 + $0x128] sm:$0xff] }
  0x6a   :  { %689 = vmatmul.f32.vlgmr.msrb.gmra.mxu1 %v6135_v36  ;;  %958 = vmatpush.msrb.mxu0 %v6355_v38  ;;  %v6545_v1 = vand.u32 4294901760, %v5614_v61  ;;  %v5611_v38 = vld [vmem:[%s10324_s1 + $0x110] sm:$0xff]  ;;  %v5619_v30 = vld [vmem:[%s10324_s1 + $0x148] sm:$0xff] }
  0x6b   :  { %1032 = vmatpush.msrb.mxu2 %v903_v9  ;;  %1071 = vmatpush.msrb.mxu3 %v6324_v7  ;;  %v6594_v15 = vand.u32 4294901760, %v5611_v38  ;;  %v6611_v9 = vand.u32 4294901760, %v5610_v49 }
  0x6c   :  { %830 = vmatpush.msra.mxu1 %v6334_v13  ;;  %961 = vmatpush.msrb.mxu0 %v6378_v48  ;;  %v6553_v13 = vsub.f32 %v5615_v54, %v6530_v60  ;;  %v6570_v37 = vsub.f32 %v5614_v61, %v6545_v1  ;;  %v1153_v48 = vsub.f32 %v6541_v0, %v1152_v31 }
  0x6d   :  { %1036 = vmatpush.msrb.mxu2 %v909_v50  ;;  %1073 = vmatpush.msrb.mxu3 %v6347_v33  ;;  %v6622_v28 = vsub.f32 %v5611_v38, %v6594_v15  ;;  %v5624_v50 = vld [vmem:[%s10324_s1 + $0x170] sm:$0xff]  ;;  %v6640_v63 = vsub.f32 %v5610_v49, %v6611_v9 }
  0x6e   :  { %995 = vmatpush.msrb.mxu1 %v6324_v7  ;;  %964 = vmatpush.msrb.mxu0 %v6394_v6  ;;  %v5613_v7 = vld [vmem:[%s10324_s1 + $0x120] sm:$0xff]  ;;  %v1158_v42 = vand.u32 4294901760, %v6553_v13  ;;  %v1164_v2 = vand.u32 4294901760, %v6570_v37  ;;  %v5625_v6 = vld [vmem:[%s10324_s1 + $0x178] sm:$0xff] }
  0x6f   :  { %1040 = vmatpush.msrb.mxu2 %v915_v8  ;;  %1075 = vmatpush.msrb.mxu3 %v6365_v46  ;;  %v6624_v39 = vand.u32 4294901760, %v5625_v6  ;;  %v5623_v8 = vld [vmem:[%s10324_s1 + $0x168] sm:$0xff]  ;;  %v1182_v34 = vand.u32 4294901760, %v6622_v28 }
  0x70   :  { %997 = vmatpush.msrb.mxu1 %v6347_v33  ;;  %803 = vmatmul.f32.vlgmr.msra.gmra.mxu0 %v6135_v36  ;;  %v6564_v33 = vand.u32 4294901760, %v5613_v7  ;;  %v6665_v53 = vand.u32 4294901760, %v5623_v8 }
  0x71   :  { %967 = vmatpush.msrb.mxu0 %v6410_v10  ;;  %1044 = vmatpush.msrb.mxu2 %v921_v41  ;;  %v5609_v10 = vld [vmem:[%s10324_s1 + $0x100] sm:$0xff]  ;;  %v6655_v40 = vsub.f32 %v5625_v6, %v6624_v39  ;;  %v1183_v18 = vsub.f32 %v6622_v28, %v1182_v34  ;;  %v6727_v6 = vand.u32 4294901760, %v5619_v30 }
  0x72   :  { %999 = vmatpush.msrb.mxu1 %v6365_v46  ;;  %1077 = vmatpush.msrb.mxu3 %v6380_v14  ;;  %v6578_v46 = vand.u32 4294901760, %v5612_v27  ;;  %v6694_v35 = vsub.f32 %v5623_v8, %v6665_v53 }
  0x73   :  { %832 = vmatmul.f32.vlgmr.msra.gmra.mxu1 %v6135_v36  ;;  %970 = vmatpush.msrb.mxu0 %v6425_v51  ;;  %v1165_v51 = vsub.f32 %v6570_v37, %v1164_v2  ;;  %v1407_v26 = vand.u32 4294901760, %v6655_v40 }
  0x74   :  { %1001 = vmatpush.msrb.mxu1 %v6380_v14  ;;  %1048 = vmatpush.msrb.mxu2 %v927_v58  ;;  %v6592_v14 = vsub.f32 %v5613_v7, %v6564_v33  ;;  %v6609_v5 = vsub.f32 %v5612_v27, %v6578_v46  ;;  %v1188_v58 = vand.u32 4294901760, %v6640_v63  ;;  %v1184_v7 = vand.u32 4294901760, %v1183_v18 }
  0x75   :  { %1079 = vmatpush.msrb.mxu3 %v6396_v16  ;;  %973 = vmatpush.msrb.mxu0 %v6440_v12  ;;  %v6647_v12 = vand.u32 4294901760, %v5624_v50  ;;  %v1166_v41 = vand.u32 4294901760, %v1165_v51  ;;  %v1408_v27 = vsub.f32 %v6655_v40, %v1407_v26  ;;  %v1419_v49 = vand.u32 4294901760, %v6694_v35 }
  0x76   :  { %1003 = vmatpush.msrb.mxu1 %v6396_v16  ;;  %1052 = vmatpush.msrb.mxu2 %v933_v29  ;;  %v1159_v16 = vsub.f32 %v6553_v13, %v1158_v42  ;;  %v1170_v25 = vand.u32 4294901760, %v6592_v14  ;;  %v1176_v57 = vand.u32 4294901760, %v6609_v5  ;;  %v1189_v21 = vsub.f32 %v6640_v63, %v1188_v58 }
  0x77   :  { %1081 = vmatpush.msrb.mxu3 %v6412_v19  ;;  %883 = vmatmul.f32.vlgmr.msra.gmra.mxu2 %v6195_v4  ;;  %v6678_v3 = vsub.f32 %v5624_v50, %v6647_v12 }
  0x78   :  { %976 = vmatpush.msrb.mxu0 %v6452_v47  ;;  %1005 = vmatpush.msrb.mxu1 %v6412_v19  ;;  %v1154_v19 = vand.u32 4294901760, %v1153_v48  ;;  %v1160_v59 = vand.u32 4294901760, %v1159_v16  ;;  %v1171_v22 = vsub.f32 %v6592_v14, %v1170_v25  ;;  %v1177_v23 = vsub.f32 %v6609_v5, %v1176_v57  ;;  %v5618_v16 = vld [vmem:[%s10324_s1 + $0x140] sm:$0xff] }
  0x79   :  { %1056 = vmatpush.msrb.mxu2 %v939_v43  ;;  %1083 = vmatpush.msrb.mxu3 %v6427_v56  ;;  %v5620_v43 = vld [vmem:[%s10324_s1 + $0x150] sm:$0xff]  ;;  %v1413_v44 = vand.u32 4294901760, %v6678_v3  ;;  %v6743_v8 = vand.u32 4294901760, %v5618_v16 }
  0x7a   :  { %944 = vmatmul.f32.vlgmr.msra.gmra.mxu3 %v6135_v36  ;;  %979 = vmatpush.msrb.mxu0 %v6464_v24  ;;  %v5621_v24 = vld [vmem:[%s10324_s1 + $0x158] sm:$0xff]  ;;  %v1172_v29 = vand.u32 4294901760, %v1171_v22  ;;  %v1178_v52 = vand.u32 4294901760, %v1177_v23  ;;  %v6712_v61 = vand.u32 4294901760, %v5620_v43  ;;  %v6752_v23 = vsub.f32 %v5619_v30, %v6727_v6 }
  0x7b   :  { %1213 = vmatpush.msra.mxu2 %v6541_v0  ;;  %1007 = vmatpush.msrb.mxu1 %v6427_v56  ;;  %v6634_v56 = vand.u32 4294901760, %v5609_v10  ;;  %v6696_v17 = vand.u32 4294901760, %v5621_v24  ;;  %v5643_v30 = vld [vmem:[%s10324_s1 + $0x1f8] sm:$0xff] }
  0x7c   :  { %1085 = vmatpush.msrb.mxu3 %v6443_v32  ;;  %1118 = vmatpush.msra.mxu0 %v6523_v55  ;;  %v6740_v51 = vsub.f32 %v5620_v43, %v6712_v61  ;;  %v6764_v43 = vsub.f32 %v5618_v16, %v6743_v8  ;;  %v6927_v16 = vand.u32 4294901760, %v5643_v30 }
  0x7d   :  { %1216 = vmatpush.msra.mxu2 %v6553_v13  ;;  %1009 = vmatpush.msrb.mxu1 %v6443_v32  ;;  %v5622_v32 = vld [vmem:[%s10324_s1 + $0x160] sm:$0xff]  ;;  %v6663_v47 = vsub.f32 %v5609_v10, %v6634_v56  ;;  %v6725_v48 = vsub.f32 %v5621_v24, %v6696_v17  ;;  %v1190_v10 = vand.u32 4294901760, %v1189_v21 }
  0x7e   :  { %1250 = vmatpush.msra.mxu3 %v6523_v55  ;;  %1120 = vmatpush.msra.mxu0 %v6530_v60  ;;  %v6680_v20 = vand.u32 4294901760, %v5622_v32  ;;  %v1437_v18 = vand.u32 4294901760, %v6740_v51 }
  0x7f   :  { %1155 = vmatpush.msra.mxu1 %v1154_v19  ;;  %1219 = vmatpush.msra.mxu2 %v6570_v37  ;;  %v1194_v11 = vand.u32 4294901760, %v6663_v47  ;;  %v1414_v19 = vsub.f32 %v6678_v3, %v1413_v44 }
  0x80   :  { %1252 = vmatpush.msra.mxu3 %v6530_v60  ;;  %1058 = vmatmul.f32.vlgmr.msrb.gmra.mxu2 %v6135_v36  ;;  %v6710_v54 = vsub.f32 %v5622_v32, %v6680_v20  ;;  %v1420_v32 = vsub.f32 %v6694_v35, %v1419_v49  ;;  %v1438_v13 = vsub.f32 %v6740_v51, %v1437_v18 }
  0x81   :  { %1122 = vmatpush.msra.mxu0 %v6545_v1  ;;  %1161 = vmatpush.msra.mxu1 %v1160_v59  ;;  %v1195_v38 = vsub.f32 %v6663_v47, %v1194_v11  ;;  %v1409_v59 = vand.u32 4294901760, %v1408_v27  ;;  %v1415_v24 = vand.u32 4294901760, %v1414_v19  ;;  %v5627_v27 = vld [vmem:[%s10324_s1 + $0x180] sm:$0xff] }
  0x82   :  { %1222 = vmatpush.msra.mxu2 %v6592_v14  ;;  %1254 = vmatpush.msra.mxu3 %v6545_v1  ;;  %v1425_v50 = vand.u32 4294901760, %v6710_v54 }
  0x83   :  { %982 = vmatmul.f32.vlgmr.msrb.gmra.mxu0 %v6147_v45  ;;  %1087 = vmatmul.f32.vlgmr.msrb.gmra.mxu3 %v6135_v36  ;;  %v1196_v22 = vand.u32 4294901760, %v1195_v38 }
  0x84   :  { %1124 = vmatpush.msra.mxu0 %v6564_v33  ;;  %1167 = vmatpush.msra.mxu1 %v1166_v41  ;;  %v1431_v41 = vand.u32 4294901760, %v6725_v48 }
  0x85   :  { %1225 = vmatpush.msra.mxu2 %v6609_v5  ;;  %1256 = vmatpush.msra.mxu3 %v6564_v33 }
  0x86   :  { %1013 = vmatmul.f32.vlgmr.msrb.gmra.mxu1 %v6169_v62  ;;  %1126 = vmatpush.msra.mxu0 %v6578_v46  ;;  %v1432_v0 = vsub.f32 %v6725_v48, %v1431_v41 }
  0x87   :  { %1173 = vmatpush.msra.mxu1 %v1172_v29  ;;  %1228 = vmatpush.msra.mxu2 %v6622_v28  ;;  %v1426_v29 = vsub.f32 %v6710_v54, %v1425_v50 }
  0x88   :  { %1258 = vmatpush.msra.mxu3 %v6578_v46  ;;  %1128 = vmatpush.msra.mxu0 %v6594_v15 }
  0x89   :  { %1179 = vmatpush.msra.mxu1 %v1178_v52  ;;  %1231 = vmatpush.msra.mxu2 %v6640_v63  ;;  %v1421_v52 = vand.u32 4294901760, %v1420_v32  ;;  %v1427_v21 = vand.u32 4294901760, %v1426_v29 }
  0x8a   :  { %1260 = vmatpush.msra.mxu3 %v6594_v15  ;;  %1130 = vmatpush.msra.mxu0 %v6611_v9 }
  0x8b   :  { %1185 = vmatpush.msra.mxu1 %v1184_v7  ;;  %1234 = vmatpush.msra.mxu2 %v6663_v47  ;;  %v5783_v47 = vld [vmem:[%s10325_s2] ss:$0 sm:$0xff] }
  0x8c   :  { %1262 = vmatpush.msra.mxu3 %v6611_v9  ;;  %1132 = vmatpush.msra.mxu0 %v6634_v56 }
  0x8d   :  { %1373 = vmatpush.msrb.mxu2 %v6624_v39  ;;  %1191 = vmatpush.msra.mxu1 %v1190_v10  ;;  %v5642_v10 = vld [vmem:[%s10324_s1 + $0x1f0] sm:$0xff] }
  0x8e   :  { %1264 = vmatpush.msra.mxu3 %v6634_v56  ;;  %1283 = vmatpush.msrb.mxu0 %v1152_v31  ;;  %v1443_v31 = vand.u32 4294901760, %v6752_v23 }
  0x8f   :  { %1375 = vmatpush.msrb.mxu2 %v6647_v12  ;;  %1197 = vmatpush.msra.mxu1 %v1196_v22 }
  0x90   :  { %1410 = vmatpush.msrb.mxu3 %v1409_v59  ;;  %1287 = vmatpush.msrb.mxu0 %v1158_v42  ;;  %v1449_v42 = vand.u32 4294901760, %v6764_v43  ;;  %v1444_v37 = vsub.f32 %v6752_v23, %v1443_v31 }
  0x91   :  { %1326 = vmatpush.msrb.mxu1 %v6523_v55  ;;  %1377 = vmatpush.msrb.mxu2 %v6665_v53  ;;  %v1433_v55 = vand.u32 4294901760, %v1432_v0  ;;  %v6958_v0 = vsub.f32 %v5643_v30, %v6927_v16 }
  0x92   :  { %1416 = vmatpush.msrb.mxu3 %v1415_v24  ;;  %1291 = vmatpush.msrb.mxu0 %v1164_v2  ;;  %v1450_v14 = vsub.f32 %v6764_v43, %v1449_v42  ;;  %v6950_v24 = vand.u32 4294901760, %v5642_v10 }
  0x93   :  { %1328 = vmatpush.msrb.mxu1 %v6530_v60  ;;  %1379 = vmatpush.msrb.mxu2 %v6680_v20  ;;  %v1439_v60 = vand.u32 4294901760, %v1438_v13 }
  0x94   :  { %1422 = vmatpush.msrb.mxu3 %v1421_v52  ;;  %1295 = vmatpush.msrb.mxu0 %v1170_v25 }
  0x95   :  { %1330 = vmatpush.msrb.mxu1 %v6545_v1  ;;  %1381 = vmatpush.msrb.mxu2 %v6696_v17  ;;  %v1445_v1 = vand.u32 4294901760, %v1444_v37 }
  0x96   :  { %1428 = vmatpush.msrb.mxu3 %v1427_v21  ;;  %1299 = vmatpush.msrb.mxu0 %v1176_v57  ;;  %v5630_v57 = vld [vmem:[%s10324_s1 + $0x198] sm:$0xff] }
  0x97   :  { %1332 = vmatpush.msrb.mxu1 %v6564_v33  ;;  %1383 = vmatpush.msrb.mxu2 %v6712_v61  ;;  %v1451_v33 = vand.u32 4294901760, %v1450_v14 }
  0x98   :  { %1434 = vmatpush.msrb.mxu3 %v1433_v55  ;;  %1303 = vmatpush.msrb.mxu0 %v1182_v34 }
  0x99   :  { %1334 = vmatpush.msrb.mxu1 %v6578_v46  ;;  %1385 = vmatpush.msrb.mxu2 %v6727_v6  ;;  %v5634_v46 = vld [vmem:[%s10324_s1 + $0x1b8] sm:$0xff] }
  0x9a   :  { %1440 = vmatpush.msrb.mxu3 %v1439_v60  ;;  %1237 = vmatmul.f32.vlgmr.msra.gmra.mxu2 %v6147_v45  ;;  %v6823_v2 = vand.u32 4294901760, %v5634_v46  ;;  %v5639_v60 = vld [vmem:[%s10324_s1 + $0x1d8] sm:$0xff] }
  0x9b   :  { %1307 = vmatpush.msrb.mxu0 %v1188_v58  ;;  %1336 = vmatpush.msrb.mxu1 %v6594_v15  ;;  %v5633_v15 = vld [vmem:[%s10324_s1 + $0x1b0] sm:$0xff]  ;;  %v6881_v58 = vand.u32 4294901760, %v5630_v57 }
  0x9c   :  { %1387 = vmatpush.msrb.mxu2 %v6743_v8  ;;  %1446 = vmatpush.msrb.mxu3 %v1445_v1  ;;  %v6830_v5 = vand.u32 4294901760, %v5633_v15  ;;  %v6841_v25 = vsub.f32 %v5634_v46, %v6823_v2  ;;  %v6981_v1 = vsub.f32 %v5642_v10, %v6950_v24 }
  0x9d   :  { %1138 = vmatmul.f32.vlgmr.msra.gmra.mxu0 %v6195_v4  ;;  %1268 = vmatmul.f32.vlgmr.msra.gmra.mxu3 %v6169_v62  ;;  %v6912_v7 = vsub.f32 %v5630_v57, %v6881_v58  ;;  %v5638_v57 = vld [vmem:[%s10324_s1 + $0x1d0] sm:$0xff] }
  0x9e   :  { %1538 = vmatpush.msra.mxu2 %v1407_v26  ;;  %1311 = vmatpush.msrb.mxu0 %v1194_v11  ;;  %v1662_v63 = vand.u32 4294901760, %v6841_v25  ;;  %v7015_v10 = vand.u32 4294901760, %v5638_v57 }
  0x9f   :  { %1338 = vmatpush.msrb.mxu1 %v6611_v9  ;;  %1452 = vmatpush.msrb.mxu3 %v1451_v33  ;;  %v5632_v9 = vld [vmem:[%s10324_s1 + $0x1a8] sm:$0xff]  ;;  %v1686_v32 = vand.u32 4294901760, %v6912_v7 }
  0xa0   :  { %1199 = vmatmul.f32.vlgmr.msra.gmra.mxu1 %v6135_v36  ;;  %1468 = vmatpush.msra.mxu0 %v6655_v40  ;;  %v6845_v28 = vand.u32 4294901760, %v5632_v9  ;;  %v5629_v40 = vld [vmem:[%s10324_s1 + $0x190] sm:$0xff] }
  0xa1   :  { %1542 = vmatpush.msra.mxu2 %v1413_v44  ;;  %1581 = vmatpush.msra.mxu3 %v6624_v39  ;;  %v6897_v11 = vand.u32 4294901760, %v5629_v40  ;;  %v1687_v55 = vsub.f32 %v6912_v7, %v1686_v32 }
  0xa2   :  { %1340 = vmatpush.msrb.mxu1 %v6634_v56  ;;  %1471 = vmatpush.msra.mxu0 %v6678_v3  ;;  %v6853_v56 = vsub.f32 %v5633_v15, %v6830_v5  ;;  %v6870_v34 = vsub.f32 %v5632_v9, %v6845_v28  ;;  %v5628_v3 = vld [vmem:[%s10324_s1 + $0x188] sm:$0xff] }
  0xa3   :  { %1546 = vmatpush.msra.mxu2 %v1419_v49  ;;  %1583 = vmatpush.msra.mxu3 %v6647_v12 }
  0xa4   :  { %1505 = vmatpush.msra.mxu1 %v6624_v39  ;;  %1474 = vmatpush.msra.mxu0 %v6694_v35  ;;  %v5631_v39 = vld [vmem:[%s10324_s1 + $0x1a0] sm:$0xff] }
  0xa5   :  { %1550 = vmatpush.msra.mxu2 %v1425_v50  ;;  %1585 = vmatpush.msra.mxu3 %v6665_v53 }
  0xa6   :  { %1507 = vmatpush.msra.mxu1 %v6647_v12  ;;  %1313 = vmatmul.f32.vlgmr.msrb.gmra.mxu0 %v6135_v36  ;;  %v6864_v12 = vand.u32 4294901760, %v5631_v39 }
  0xa7   :  { %1477 = vmatpush.msra.mxu0 %v6710_v54  ;;  %1554 = vmatpush.msra.mxu2 %v1431_v41 }
  0xa8   :  { %1509 = vmatpush.msra.mxu1 %v6665_v53  ;;  %1587 = vmatpush.msra.mxu3 %v6680_v20  ;;  %v1668_v53 = vand.u32 4294901760, %v6853_v56  ;;  %v6895_v26 = vsub.f32 %v5631_v39, %v6864_v12  ;;  %v1917_v39 = vand.u32 4294901760, %v6958_v0 }
  0xa9   :  { %1342 = vmatmul.f32.vlgmr.msrb.gmra.mxu1 %v6135_v36  ;;  %1480 = vmatpush.msra.mxu0 %v6725_v48  ;;  %v6925_v48 = vsub.f32 %v5629_v40, %v6897_v11 }
  0xaa   :  { %1511 = vmatpush.msra.mxu1 %v6680_v20  ;;  %1558 = vmatpush.msra.mxu2 %v1437_v18  ;;  %v1663_v20 = vsub.f32 %v6841_v25, %v1662_v63  ;;  %v1669_v54 = vsub.f32 %v6853_v56, %v1668_v53  ;;  %v1680_v49 = vand.u32 4294901760, %v6895_v26 }
  0xab   :  { %1589 = vmatpush.msra.mxu3 %v6696_v17  ;;  %1483 = vmatpush.msra.mxu0 %v6740_v51  ;;  %v6937_v51 = vand.u32 4294901760, %v5627_v27  ;;  %v1692_v52 = vand.u32 4294901760, %v6925_v48 }
  0xac   :  { %1513 = vmatpush.msra.mxu1 %v6696_v17  ;;  %1562 = vmatpush.msra.mxu2 %v1443_v31  ;;  %v119_v35 = vpop.f32.mrf.mxu0  ;;  %v1674_v17 = vand.u32 4294901760, %v6870_v34  ;;  %v1664_v38 = vand.u32 4294901760, %v1663_v20  ;;  %v1670_v22 = vand.u32 4294901760, %v1669_v54 }
  0xad   :  { %1591 = vmatpush.msra.mxu3 %v6712_v61  ;;  %1393 = vmatmul.f32.vlgmr.msrb.gmra.mxu2 %v6195_v4  ;;  %v120_v44 = vadd.f32 %v5783_v47, %v119_v35  ;;  %v6966_v21 = vsub.f32 %v5627_v27, %v6937_v51  ;;  %v1693_v9 = vsub.f32 %v6925_v48, %v1692_v52  ;;  %v1688_v35 = vand.u32 4294901760, %v1687_v55 }
  0xae   :  { %1486 = vmatpush.msra.mxu0 %v6752_v23  ;;  %1515 = vmatpush.msra.mxu1 %v6712_v61  ;;  %v6914_v61 = vand.u32 4294901760, %v5628_v3  ;;  %v5641_v23 = vld [vmem:[%s10324_s1 + $0x1e8] sm:$0xff]  ;;  %v1923_v27 = vand.u32 4294901760, %v6981_v1  ;;  %v7043_v55 = vsub.f32 %v5638_v57, %v7015_v10 }
  0xaf   :  { %1566 = vmatpush.msra.mxu2 %v1449_v42  ;;  %1593 = vmatpush.msra.mxu3 %v6727_v6  ;;  %v6968_v13 = vand.u32 4294901760, %v5641_v23  ;;  %v1704_v40 = vand.u32 4294901760, %v6966_v21 }
  0xb0   :  { %1454 = vmatmul.f32.vlgmr.msrb.gmra.mxu3 %v6135_v36  ;;  %1489 = vmatpush.msra.mxu0 %v6764_v43  ;;  %v180_v19 = vpop.f32.mrf.mxu1  ;;  %v218_v50 = vpop.f32.mrf.mxu2  ;;  %v6943_v41 = vsub.f32 %v5628_v3, %v6914_v61  ;;  %v1681_v43 = vsub.f32 %v6895_v26, %v1680_v49  ;;  %v6999_v3 = vand.u32 4294901760, %v5639_v60 }
  0xb1   :  { %1723 = vmatpush.msrb.mxu2 %v6841_v25  ;;  %1517 = vmatpush.msra.mxu1 %v6727_v6  ;;  %v1675_v6 = vsub.f32 %v6870_v34, %v1674_v17  ;;  %v181_v59 = vadd.f32 %v180_v19, %v120_v44  ;;  %v6997_v47 = vsub.f32 %v5641_v23, %v6968_v13  ;;  %v5637_v44 = vld [vmem:[%s10324_s1 + $0x1c8] sm:$0xff]  ;;  %v1694_v19 = vand.u32 4294901760, %v1693_v9 }
  0xb2   :  { %1595 = vmatpush.msra.mxu3 %v6743_v8  ;;  %1628 = vmatpush.msrb.mxu0 %v6823_v2  ;;  %v1698_v37 = vand.u32 4294901760, %v6943_v41  ;;  %v1682_v15 = vand.u32 4294901760, %v1681_v43  ;;  %v7028_v23 = vsub.f32 %v5639_v60, %v6999_v3 }
  0xb3   :  { %1726 = vmatpush.msrb.mxu2 %v6853_v56  ;;  %1519 = vmatpush.msra.mxu1 %v6743_v8  ;;  %v219_v29 = vadd.f32 %v218_v50, %v181_v59  ;;  %v5640_v8 = vld [vmem:[%s10324_s1 + $0x1e0] sm:$0xff]  ;;  %v1676_v31 = vand.u32 4294901760, %v1675_v6  ;;  %v1918_v50 = vsub.f32 %v6958_v0, %v1917_v39  ;;  %v1705_v59 = vsub.f32 %v6966_v21, %v1704_v40 }
  0xb4   :  { %1760 = vmatpush.msrb.mxu3 %v6823_v2  ;;  %1630 = vmatpush.msrb.mxu0 %v6830_v5  ;;  %v249_v18 = vpop.f32.mrf.mxu3  ;;  %v6983_v33 = vand.u32 4294901760, %v5640_v8  ;;  %v1699_v30 = vsub.f32 %v6943_v41, %v1698_v37  ;;  %v1941_v57 = vand.u32 4294901760, %v7028_v23 }
  0xb5   :  { %1665 = vmatpush.msrb.mxu1 %v1664_v38  ;;  %1729 = vmatpush.msrb.mxu2 %v6870_v34  ;;  %v250_v42 = vadd.f32 %v249_v18, %v219_v29  ;;  %v7030_v29 = vand.u32 4294901760, %v5637_v44  ;;  %v5636_v18 = vld [vmem:[%s10324_s1 + $0x1c0] sm:$0xff]  ;;  %v1919_v60 = vand.u32 4294901760, %v1918_v50 }
  0xb6   :  { %1762 = vmatpush.msrb.mxu3 %v6830_v5  ;;  %1568 = vmatmul.f32.vlgmr.msra.gmra.mxu2 %v6135_v36  ;;  %v7013_v38 = vsub.f32 %v5640_v8, %v6983_v33  ;;  %v1700_v43 = vand.u32 4294901760, %v1699_v30 }
  0xb7   :  { %1632 = vmatpush.msrb.mxu0 %v6845_v28  ;;  %1671 = vmatpush.msrb.mxu1 %v1670_v22  ;;  %v294_v14 = vpop.f32.mrf.mxu0  ;;  %v1929_v22 = vand.u32 4294901760, %v6997_v47 }
  0xb8   :  { %1732 = vmatpush.msrb.mxu2 %v6895_v26  ;;  %1764 = vmatpush.msrb.mxu3 %v6845_v28  ;;  %v295_v46 = vadd.f32 %v294_v14, %v250_v42  ;;  %v1935_v42 = vand.u32 4294901760, %v7013_v38  ;;  %v7046_v14 = vand.u32 4294901760, %v5636_v18 }
  0xb9   :  { %1492 = vmatmul.f32.vlgmr.msra.gmra.mxu0 %v6147_v45  ;;  %1597 = vmatmul.f32.vlgmr.msra.gmra.mxu3 %v6135_v36  ;;  %v1930_v9 = vsub.f32 %v6997_v47, %v1929_v22 }
  0xba   :  { %1634 = vmatpush.msrb.mxu0 %v6864_v12  ;;  %1677 = vmatpush.msrb.mxu1 %v1676_v31  ;;  %v323_v20 = vpop.f32.mrf.mxu1  ;;  %v1924_v31 = vsub.f32 %v6981_v1, %v1923_v27  ;;  %v1936_v30 = vsub.f32 %v7013_v38, %v1935_v42 }
  0xbb   :  { %1735 = vmatpush.msrb.mxu2 %v6912_v7  ;;  %1766 = vmatpush.msrb.mxu3 %v6864_v12  ;;  %v324_v54 = vadd.f32 %v323_v20, %v295_v46  ;;  %v5784_v46 = vld [vmem:[%s10325_s2 + $0x1] ss:$0 sm:$0xff]  ;;  %v7058_v20 = vsub.f32 %v5637_v44, %v7030_v29  ;;  %v7070_v44 = vsub.f32 %v5636_v18, %v7046_v14  ;;  %v1931_v25 = vand.u32 4294901760, %v1930_v9 }
  0xbc   :  { %1523 = vmatmul.f32.vlgmr.msra.gmra.mxu1 %v6169_v62  ;;  %1636 = vmatpush.msrb.mxu0 %v6881_v58  ;;  %v1937_v18 = vand.u32 4294901760, %v1936_v30 }
  0xbd   :  { %1683 = vmatpush.msrb.mxu1 %v1682_v15  ;;  %1738 = vmatpush.msrb.mxu2 %v6925_v48  ;;  %v326_v6 = vmul.f32 0.2, %v324_v54  ;;  %v1706_v15 = vand.u32 4294901760, %v1705_v59 }
  0xbe   :  { %1768 = vmatpush.msrb.mxu3 %v6881_v58  ;;  %1638 = vmatpush.msrb.mxu0 %v6897_v11 }
  0xbf   :  { %1689 = vmatpush.msrb.mxu1 %v1688_v35  ;;  %1741 = vmatpush.msrb.mxu2 %v6943_v41  ;;  %v327_v8 = vmax.f32 %v324_v54, %v326_v6  ;;  %v1925_v35 = vand.u32 4294901760, %v1924_v31  ;;  %v1947_v54 = vand.u32 4294901760, %v7043_v55  ;;  %v1953_v6 = vand.u32 4294901760, %v7058_v20 }
  0xc0   :  { %1770 = vmatpush.msrb.mxu3 %v6897_v11  ;;  %1640 = vmatpush.msrb.mxu0 %v6914_v61 }
  0xc1   :  { %1695 = vmatpush.msrb.mxu1 %v1694_v19  ;;  %1744 = vmatpush.msrb.mxu2 %v6966_v21  ;;  %328 = vst [vmem:[#allocation2] sm:$0x1] %v327_v8  ;;  %v1948_v56 = vsub.f32 %v7043_v55, %v1947_v54  ;;  %v1954_v34 = vsub.f32 %v7058_v20, %v1953_v6  ;;  %v5649_v21 = vld [vmem:[%s10324_s1 + $0x220] sm:$0xff] }
  0xc2   :  { %1772 = vmatpush.msrb.mxu3 %v6914_v61  ;;  %329 = vst [vmem:[#allocation2 + $0xf] sm:$0x2] %v327_v8  ;;  %1642 = vmatpush.msrb.mxu0 %v6937_v51 }
  0xc3   :  { %1883 = vmatpush.msra.mxu2 %v6927_v16  ;;  %1701 = vmatpush.msrb.mxu1 %v1700_v43  ;;  %v1959_v43 = vand.u32 4294901760, %v7070_v44 }
  0xc4   :  { %1774 = vmatpush.msrb.mxu3 %v6937_v51  ;;  %1793 = vmatpush.msra.mxu0 %v1662_v63  ;;  %v374_v19 = vpop.f32.mrf.mxu2  ;;  %v1942_v63 = vsub.f32 %v7028_v23, %v1941_v57 }
  0xc5   :  { %1885 = vmatpush.msra.mxu2 %v6950_v24  ;;  %v375_v50 = vadd.f32 %v5784_v46, %v374_v19  ;;  %1707 = vmatpush.msrb.mxu1 %v1706_v15  ;;  %v1960_v26 = vsub.f32 %v7070_v44, %v1959_v43 }
  0xc6   :  { %1920 = vmatpush.msra.mxu3 %v1919_v60  ;;  %1797 = vmatpush.msra.mxu0 %v1668_v53 }
  0xc7   :  { %1836 = vmatpush.msra.mxu1 %v6823_v2  ;;  %1887 = vmatpush.msra.mxu2 %v6968_v13  ;;  %v435_v59 = vpop.f32.mrf.mxu3  ;;  %v1943_v2 = vand.u32 4294901760, %v1942_v63 }
  0xc8   :  { %1926 = vmatpush.msra.mxu3 %v1925_v35  ;;  %1801 = vmatpush.msra.mxu0 %v1674_v17  ;;  %v436_v53 = vadd.f32 %v435_v59, %v375_v50  ;;  %v5660_v50 = vld [vmem:[%s10324_s1 + $0x270] sm:$0xff] }
  0xc9   :  { %1838 = vmatpush.msra.mxu1 %v6830_v5  ;;  %1889 = vmatpush.msra.mxu2 %v6983_v33  ;;  %v1949_v5 = vand.u32 4294901760, %v1948_v56 }
  0xca   :  { %1932 = vmatpush.msra.mxu3 %v1931_v25  ;;  %1805 = vmatpush.msra.mxu0 %v1680_v49  ;;  %v473_v17 = vpop.f32.mrf.mxu0 }
  0xcb   :  { %1840 = vmatpush.msra.mxu1 %v6845_v28  ;;  %1891 = vmatpush.msra.mxu2 %v6999_v3  ;;  %v474_v8 = vadd.f32 %v473_v17, %v436_v53  ;;  %v1955_v28 = vand.u32 4294901760, %v1954_v34 }
  0xcc   :  { %1938 = vmatpush.msra.mxu3 %v1937_v18  ;;  %1809 = vmatpush.msra.mxu0 %v1686_v32  ;;  %v1961_v32 = vand.u32 4294901760, %v1960_v26 }
  0xcd   :  { %1842 = vmatpush.msra.mxu1 %v6864_v12  ;;  %1893 = vmatpush.msra.mxu2 %v7015_v10  ;;  %v504_v49 = vpop.f32.mrf.mxu1  ;;  %v549_v31 = vpop.f32.mrf.mxu2 }
  0xce   :  { %1944 = vmatpush.msra.mxu3 %v1943_v2  ;;  %1813 = vmatpush.msra.mxu0 %v1692_v52  ;;  %v505_v60 = vadd.f32 %v504_v49, %v474_v8  ;;  %v5651_v52 = vld [vmem:[%s10324_s1 + $0x230] sm:$0xff]  ;;  %v5658_v49 = vld [vmem:[%s10324_s1 + $0x260] sm:$0xff] }
  0xcf   :  { %1844 = vmatpush.msra.mxu1 %v6881_v58  ;;  %1895 = vmatpush.msra.mxu2 %v7030_v29 }
  0xd0   :  { %1950 = vmatpush.msra.mxu3 %v1949_v5  ;;  %1747 = vmatmul.f32.vlgmr.msrb.gmra.mxu2 %v6147_v45  ;;  %v550_v12 = vadd.f32 %v549_v31, %v505_v60  ;;  %v578_v7 = vpop.f32.mrf.mxu3 }
  0xd1   :  { %1817 = vmatpush.msra.mxu0 %v1698_v37  ;;  %1846 = vmatpush.msra.mxu1 %v6897_v11  ;;  %v5652_v11 = vld [vmem:[%s10324_s1 + $0x238] sm:$0xff] }
  0xd2   :  { %1897 = vmatpush.msra.mxu2 %v7046_v14  ;;  %1956 = vmatpush.msra.mxu3 %v1955_v28  ;;  %v579_v48 = vadd.f32 %v578_v7, %v550_v12  ;;  %v5648_v37 = vld [vmem:[%s10324_s1 + $0x218] sm:$0xff] }
  0xd3   :  { %1648 = vmatmul.f32.vlgmr.msrb.gmra.mxu0 %v6195_v4  ;;  %1778 = vmatmul.f32.vlgmr.msrb.gmra.mxu3 %v6169_v62 }
  0xd4   :  { %2048 = vmatpush.msrb.mxu2 %v1917_v39  ;;  %1821 = vmatpush.msra.mxu0 %v1704_v40  ;;  %v581_v58 = vmul.f32 0.2, %v579_v48  ;;  %v7169_v39 = vand.u32 4294901760, %v5649_v21  ;;  %v5647_v40 = vld [vmem:[%s10324_s1 + $0x210] sm:$0xff] }
  0xd5   :  { %1848 = vmatpush.msra.mxu1 %v6914_v61  ;;  %1962 = vmatpush.msra.mxu3 %v1961_v32  ;;  %v7128_v61 = vand.u32 4294901760, %v5652_v11  ;;  %v5657_v32 = vld [vmem:[%s10324_s1 + $0x258] sm:$0xff] }
  0xd6   :  { %1709 = vmatmul.f32.vlgmr.msrb.gmra.mxu1 %v6135_v36  ;;  %1978 = vmatpush.msrb.mxu0 %v6958_v0  ;;  %v582_v41 = vmax.f32 %v579_v48, %v581_v58  ;;  %v7144_v0 = vand.u32 4294901760, %v5651_v52 }
  0xd7   :  { %2052 = vmatpush.msrb.mxu2 %v1923_v27  ;;  %2091 = vmatpush.msrb.mxu3 %v6927_v16  ;;  %v7183_v27 = vand.u32 4294901760, %v5648_v37 }
  0xd8   :  { %1850 = vmatpush.msra.mxu1 %v6937_v51  ;;  %1981 = vmatpush.msrb.mxu0 %v6981_v1  ;;  %583 = vst [vmem:[#allocation2 + $0x1] sm:$0x1] %v582_v41  ;;  %v5650_v51 = vld [vmem:[%s10324_s1 + $0x228] sm:$0xff]  ;;  %v7167_v1 = vsub.f32 %v5651_v52, %v7144_v0 }
  0xd9   :  { %2056 = vmatpush.msrb.mxu2 %v1929_v22  ;;  %584 = vst [vmem:[#allocation2 + $0x10] sm:$0x2] %v582_v41  ;;  %2093 = vmatpush.msrb.mxu3 %v6950_v24  ;;  %v7215_v9 = vsub.f32 %v5648_v37, %v7183_v27  ;;  %v5656_v37 = vld [vmem:[%s10324_s1 + $0x250] sm:$0xff] }
  0xda   :  { %2015 = vmatpush.msrb.mxu1 %v6927_v16  ;;  %1984 = vmatpush.msrb.mxu0 %v6997_v47  ;;  %v7149_v16 = vsub.f32 %v5652_v11, %v7128_v61  ;;  %v2178_v22 = vand.u32 4294901760, %v7167_v1  ;;  %v7290_v11 = vand.u32 4294901760, %v5658_v49 }
  0xdb   :  { %2060 = vmatpush.msrb.mxu2 %v1935_v42  ;;  %2095 = vmatpush.msrb.mxu3 %v6968_v13  ;;  %v7200_v42 = vand.u32 4294901760, %v5647_v40  ;;  %v2196_v56 = vand.u32 4294901760, %v7215_v9 }
  0xdc   :  { %2017 = vmatpush.msrb.mxu1 %v6950_v24  ;;  %1903 = vmatmul.f32.vlgmr.msra.gmra.mxu2 %v6195_v4  ;;  %v7156_v24 = vand.u32 4294901760, %v5650_v51 }
  0xdd   :  { %1823 = vmatmul.f32.vlgmr.msra.gmra.mxu0 %v6135_v36  ;;  %2064 = vmatpush.msrb.mxu2 %v1941_v57  ;;  %v2197_v12 = vsub.f32 %v7215_v9, %v2196_v56 }
  0xde   :  { %2019 = vmatpush.msrb.mxu1 %v6968_v13  ;;  %1987 = vmatpush.msrb.mxu0 %v7013_v38  ;;  %v2172_v13 = vand.u32 4294901760, %v7149_v16  ;;  %v7181_v47 = vsub.f32 %v5650_v51, %v7156_v24  ;;  %v5785_v38 = vld [vmem:[%s10325_s2 + $0x2] ss:$0 sm:$0xff] }
  0xdf   :  { %2097 = vmatpush.msrb.mxu3 %v6983_v33  ;;  %1852 = vmatmul.f32.vlgmr.msra.gmra.mxu1 %v6135_v36 }
  0xe0   :  { %1964 = vmatmul.f32.vlgmr.msra.gmra.mxu3 %v6135_v36  ;;  %1990 = vmatpush.msrb.mxu0 %v7028_v23  ;;  %v7198_v23 = vsub.f32 %v5649_v21, %v7169_v39  ;;  %v2184_v15 = vand.u32 4294901760, %v7181_v47 }
  0xe1   :  { %2021 = vmatpush.msrb.mxu1 %v6983_v33  ;;  %2068 = vmatpush.msrb.mxu2 %v1947_v54  ;;  %v5646_v33 = vld [vmem:[%s10324_s1 + $0x208] sm:$0xff]  ;;  %v7231_v54 = vsub.f32 %v5647_v40, %v7200_v42 }
  0xe2   :  { %2099 = vmatpush.msrb.mxu3 %v6999_v3  ;;  %1993 = vmatpush.msrb.mxu0 %v7043_v55  ;;  %v2173_v55 = vsub.f32 %v7149_v16, %v2172_v13  ;;  %v7217_v57 = vand.u32 4294901760, %v5646_v33  ;;  %v2190_v30 = vand.u32 4294901760, %v7198_v23  ;;  %v2185_v18 = vsub.f32 %v7181_v47, %v2184_v15 }
  0xe3   :  { %2023 = vmatpush.msrb.mxu1 %v6999_v3  ;;  %2072 = vmatpush.msrb.mxu2 %v1953_v6  ;;  %v5661_v3 = vld [vmem:[%s10324_s1 + $0x278] sm:$0xff]  ;;  %v2202_v5 = vand.u32 4294901760, %v7231_v54 }
  0xe4   :  { %2101 = vmatpush.msrb.mxu3 %v7015_v10  ;;  %1996 = vmatpush.msrb.mxu0 %v7058_v20  ;;  %v629_v46 = vpop.f32.mrf.mxu0  ;;  %v5645_v20 = vld [vmem:[%s10324_s1 + $0x200] sm:$0xff]  ;;  %v7233_v19 = vand.u32 4294901760, %v5661_v3  ;;  %v2174_v59 = vand.u32 4294901760, %v2173_v55  ;;  %v7249_v53 = vsub.f32 %v5646_v33, %v7217_v57  ;;  %v2191_v8 = vsub.f32 %v7198_v23, %v2190_v30 }
  0xe5   :  { %2025 = vmatpush.msrb.mxu1 %v7015_v10  ;;  %2076 = vmatpush.msrb.mxu2 %v1959_v43  ;;  %v630_v35 = vadd.f32 %v5785_v38, %v629_v46  ;;  %v2179_v10 = vsub.f32 %v7167_v1, %v2178_v22  ;;  %v7256_v43 = vand.u32 4294901760, %v5660_v50  ;;  %v2186_v60 = vand.u32 4294901760, %v2185_v18 }
  0xe6   :  { %2103 = vmatpush.msrb.mxu3 %v7030_v29  ;;  %2078 = vmatmul.f32.vlgmr.msrb.gmra.mxu2 %v6135_v36  ;;  %v7265_v26 = vsub.f32 %v5661_v3, %v7233_v19  ;;  %v2208_v7 = vand.u32 4294901760, %v7249_v53  ;;  %v2192_v52 = vand.u32 4294901760, %v2191_v8  ;;  %v2203_v51 = vsub.f32 %v7231_v54, %v2202_v5 }
  0xe7   :  { %2233 = vmatpush.msra.mxu2 %v7149_v16  ;;  %1999 = vmatpush.msrb.mxu0 %v7070_v44  ;;  %v690_v25 = vpop.f32.mrf.mxu1  ;;  %v728_v63 = vpop.f32.mrf.mxu2  ;;  %v7240_v44 = vand.u32 4294901760, %v5645_v20  ;;  %v2180_v17 = vand.u32 4294901760, %v2179_v10  ;;  %v7288_v58 = vsub.f32 %v5660_v50, %v7256_v43  ;;  %v7306_v33 = vand.u32 4294901760, %v5657_v32 }
  0xe8   :  { %2027 = vmatpush.msrb.mxu1 %v7030_v29  ;;  %2105 = vmatpush.msrb.mxu3 %v7046_v14  ;;  %v691_v6 = vadd.f32 %v690_v25, %v630_v35  ;;  %v5659_v29 = vld [vmem:[%s10324_s1 + $0x268] sm:$0xff]  ;;  %v2427_v21 = vand.u32 4294901760, %v7265_v26  ;;  %v2198_v3 = vand.u32 4294901760, %v2197_v12  ;;  %v2209_v46 = vsub.f32 %v7249_v53, %v2208_v7 }
  0xe9   :  { %2002 = vmatmul.f32.vlgmr.msrb.gmra.mxu0 %v6147_v45  ;;  %2107 = vmatmul.f32.vlgmr.msrb.gmra.mxu3 %v6135_v36  ;;  %v7275_v31 = vand.u32 4294901760, %v5659_v29  ;;  %v2433_v10 = vand.u32 4294901760, %v7288_v58  ;;  %v7319_v50 = vsub.f32 %v5658_v49, %v7290_v11  ;;  %v7321_v25 = vand.u32 4294901760, %v5656_v37 }
  0xea   :  { %2138 = vmatpush.msra.mxu0 %v7128_v61  ;;  %2236 = vmatpush.msra.mxu2 %v7167_v1  ;;  %v729_v2 = vadd.f32 %v728_v63, %v691_v6  ;;  %v759_v34 = vpop.f32.mrf.mxu3  ;;  %v2204_v63 = vand.u32 4294901760, %v2203_v51  ;;  %v2428_v6 = vsub.f32 %v7265_v26, %v2427_v21  ;;  %v2210_v8 = vand.u32 4294901760, %v2209_v46 }
  0xeb   :  { %2270 = vmatpush.msra.mxu3 %v7128_v61  ;;  %2029 = vmatpush.msrb.mxu1 %v7046_v14  ;;  %v7273_v14 = vsub.f32 %v5645_v20, %v7240_v44  ;;  %v7304_v38 = vsub.f32 %v5659_v29, %v7275_v31  ;;  %v5655_v20 = vld [vmem:[%s10324_s1 + $0x248] sm:$0xff]  ;;  %v7349_v12 = vsub.f32 %v5656_v37, %v7321_v25 }
  0xec   :  { %2033 = vmatmul.f32.vlgmr.msrb.gmra.mxu1 %v6169_v62  ;;  %2140 = vmatpush.msra.mxu0 %v7144_v0  ;;  %v760_v28 = vadd.f32 %v759_v34, %v729_v2  ;;  %v7334_v2 = vsub.f32 %v5657_v32, %v7306_v33  ;;  %v7336_v34 = vand.u32 4294901760, %v5655_v20  ;;  %v2429_v32 = vand.u32 4294901760, %v2428_v6 }
  0xed   :  { %2175 = vmatpush.msra.mxu1 %v2174_v59  ;;  %2239 = vmatpush.msra.mxu2 %v7181_v47  ;;  %v804_v48 = vpop.f32.mrf.mxu0  ;;  %v2214_v40 = vand.u32 4294901760, %v7273_v14  ;;  %v2439_v29 = vand.u32 4294901760, %v7304_v38 }
  0xee   :  { %2272 = vmatpush.msra.mxu3 %v7144_v0  ;;  %2142 = vmatpush.msra.mxu0 %v7156_v24  ;;  %v805_v41 = vadd.f32 %v804_v48, %v760_v28  ;;  %v2434_v28 = vsub.f32 %v7288_v58, %v2433_v10  ;;  %v2451_v37 = vand.u32 4294901760, %v7334_v2 }
  0xef   :  { %2181 = vmatpush.msra.mxu1 %v2180_v17  ;;  %2242 = vmatpush.msra.mxu2 %v7198_v23  ;;  %v2215_v18 = vsub.f32 %v7273_v14, %v2214_v40  ;;  %v5654_v17 = vld [vmem:[%s10324_s1 + $0x240] sm:$0xff]  ;;  %v2440_v51 = vsub.f32 %v7304_v38, %v2439_v29 }
  0xf0   :  { %2274 = vmatpush.msra.mxu3 %v7156_v24  ;;  %2144 = vmatpush.msra.mxu0 %v7169_v39  ;;  %v833_v55 = vpop.f32.mrf.mxu1  ;;  %v7352_v48 = vand.u32 4294901760, %v5654_v17 }
  0xf1   :  { %2187 = vmatpush.msra.mxu1 %v2186_v60  ;;  %2245 = vmatpush.msra.mxu2 %v7215_v9  ;;  %v834_v35 = vadd.f32 %v833_v55, %v805_v41  ;;  %v2445_v60 = vand.u32 4294901760, %v7319_v50  ;;  %v5786_v41 = vld [vmem:[%s10325_s2 + $0x3] ss:$0 sm:$0xff]  ;;  %v7364_v55 = vsub.f32 %v5655_v20, %v7336_v34  ;;  %v2441_v16 = vand.u32 4294901760, %v2440_v51 }
  0xf2   :  { %2276 = vmatpush.msra.mxu3 %v7169_v39  ;;  %2146 = vmatpush.msra.mxu0 %v7183_v27  ;;  %v7376_v20 = vsub.f32 %v5654_v17, %v7352_v48 }
  0xf3   :  { %2193 = vmatpush.msra.mxu1 %v2192_v52  ;;  %2248 = vmatpush.msra.mxu2 %v7231_v54  ;;  %v836_v59 = vmul.f32 0.2, %v834_v35  ;;  %v2216_v52 = vand.u32 4294901760, %v2215_v18  ;;  %v2446_v46 = vsub.f32 %v7319_v50, %v2445_v60 }
  0xf4   :  { %2278 = vmatpush.msra.mxu3 %v7183_v27  ;;  %2148 = vmatpush.msra.mxu0 %v7200_v42 }
  0xf5   :  { %2199 = vmatpush.msra.mxu1 %v2198_v3  ;;  %2251 = vmatpush.msra.mxu2 %v7249_v53  ;;  %v837_v49 = vmax.f32 %v834_v35, %v836_v59  ;;  %v2435_v3 = vand.u32 4294901760, %v2434_v28  ;;  %v2457_v35 = vand.u32 4294901760, %v7349_v12  ;;  %v2463_v59 = vand.u32 4294901760, %v7364_v55  ;;  %v5669_v53 = vld [vmem:[%s10324_s1 + $0x2b0] sm:$0xff] }
  0xf6   :  { %2280 = vmatpush.msra.mxu3 %v7200_v42  ;;  %2150 = vmatpush.msra.mxu0 %v7217_v57  ;;  %v2447_v17 = vand.u32 4294901760, %v2446_v46 }
  0xf7   :  { %2205 = vmatpush.msra.mxu1 %v2204_v63  ;;  %2254 = vmatpush.msra.mxu2 %v7273_v14  ;;  %838 = vst [vmem:[#allocation2 + $0x2] sm:$0x1] %v837_v49  ;;  %v2458_v1 = vsub.f32 %v7349_v12, %v2457_v35  ;;  %v2464_v47 = vsub.f32 %v7364_v55, %v2463_v59 }
  0xf8   :  { %2282 = vmatpush.msra.mxu3 %v7217_v57  ;;  %839 = vst [vmem:[#allocation2 + $0x11] sm:$0x2] %v837_v49  ;;  %2152 = vmatpush.msra.mxu0 %v7240_v44 }
  0xf9   :  { %2393 = vmatpush.msrb.mxu2 %v7233_v19  ;;  %2211 = vmatpush.msra.mxu1 %v2210_v8  ;;  %v2469_v8 = vand.u32 4294901760, %v7376_v20 }
  0xfa   :  { %2284 = vmatpush.msra.mxu3 %v7240_v44  ;;  %2303 = vmatpush.msrb.mxu0 %v2172_v13  ;;  %v884_v63 = vpop.f32.mrf.mxu2  ;;  %v2452_v13 = vsub.f32 %v7334_v2, %v2451_v37 }
  0xfb   :  { %2395 = vmatpush.msrb.mxu2 %v7256_v43  ;;  %v885_v6 = vadd.f32 %v5786_v41, %v884_v63  ;;  %2217 = vmatpush.msra.mxu1 %v2216_v52  ;;  %v2470_v23 = vsub.f32 %v7376_v20, %v2469_v8  ;;  %v5679_v41 = vld [vmem:[%s10324_s1 + $0x2f8] sm:$0xff] }
  0xfc   :  { %2430 = vmatpush.msrb.mxu3 %v2429_v32  ;;  %2307 = vmatpush.msrb.mxu0 %v2178_v22 }
  0xfd   :  { %2346 = vmatpush.msrb.mxu1 %v7128_v61  ;;  %2397 = vmatpush.msrb.mxu2 %v7275_v31  ;;  %v945_v18 = vpop.f32.mrf.mxu3  ;;  %v2453_v61 = vand.u32 4294901760, %v2452_v13 }
  0xfe   :  { %2436 = vmatpush.msrb.mxu3 %v2435_v3  ;;  %2311 = vmatpush.msrb.mxu0 %v2184_v15  ;;  %v946_v22 = vadd.f32 %v945_v18, %v885_v6  ;;  %v7539_v6 = vand.u32 4294901760, %v5679_v41 }
  0xff   :  { %2348 = vmatpush.msrb.mxu1 %v7144_v0  ;;  %2399 = vmatpush.msrb.mxu2 %v7290_v11  ;;  %v2459_v0 = vand.u32 4294901760, %v2458_v1 }
 0x100   :  { %2442 = vmatpush.msrb.mxu3 %v2441_v16  ;;  %2315 = vmatpush.msrb.mxu0 %v2190_v30  ;;  %v983_v15 = vpop.f32.mrf.mxu0  ;;  %v5678_v16 = vld [vmem:[%s10324_s1 + $0x2f0] sm:$0xff] }
 0x101   :  { %2350 = vmatpush.msrb.mxu1 %v7156_v24  ;;  %2401 = vmatpush.msrb.mxu2 %v7306_v33  ;;  %v984_v49 = vadd.f32 %v983_v15, %v946_v22  ;;  %v2465_v24 = vand.u32 4294901760, %v2464_v47 }
 0x102   :  { %2448 = vmatpush.msrb.mxu3 %v2447_v17  ;;  %2319 = vmatpush.msrb.mxu0 %v2196_v56  ;;  %v2471_v56 = vand.u32 4294901760, %v2470_v23  ;;  %v7570_v23 = vsub.f32 %v5679_v41, %v7539_v6 }
 0x103   :  { %2352 = vmatpush.msrb.mxu1 %v7169_v39  ;;  %2403 = vmatpush.msrb.mxu2 %v7321_v25  ;;  %v1014_v30 = vpop.f32.mrf.mxu1  ;;  %v1059_v28 = vpop.f32.mrf.mxu2 }
 0x104   :  { %2454 = vmatpush.msrb.mxu3 %v2453_v61  ;;  %2323 = vmatpush.msrb.mxu0 %v2202_v5  ;;  %v1015_v32 = vadd.f32 %v1014_v30, %v984_v49  ;;  %v7562_v61 = vand.u32 4294901760, %v5678_v16 }
 0x105   :  { %2354 = vmatpush.msrb.mxu1 %v7183_v27  ;;  %2405 = vmatpush.msrb.mxu2 %v7336_v34  ;;  %v5670_v27 = vld [vmem:[%s10324_s1 + $0x2b8] sm:$0xff] }
 0x106   :  { %2460 = vmatpush.msrb.mxu3 %v2459_v0  ;;  %2257 = vmatmul.f32.vlgmr.msra.gmra.mxu2 %v6147_v45  ;;  %v1060_v39 = vadd.f32 %v1059_v28, %v1015_v32  ;;  %v1088_v9 = vpop.f32.mrf.mxu3  ;;  %v7435_v14 = vand.u32 4294901760, %v5670_v27 }
 0x107   :  { %2327 = vmatpush.msrb.mxu0 %v2208_v7  ;;  %2356 = vmatpush.msrb.mxu1 %v7200_v42  ;;  %v5667_v7 = vld [vmem:[%s10324_s1 + $0x2a0] sm:$0xff] }
 0x108   :  { %2407 = vmatpush.msrb.mxu2 %v7352_v48  ;;  %2466 = vmatpush.msrb.mxu3 %v2465_v24  ;;  %v1089_v54 = vadd.f32 %v1088_v9, %v1060_v39 }
 0x109   :  { %2158 = vmatmul.f32.vlgmr.msra.gmra.mxu0 %v6195_v4  ;;  %2288 = vmatmul.f32.vlgmr.msra.gmra.mxu3 %v6169_v62 }
 0x10a   :  { %2558 = vmatpush.msra.mxu2 %v2427_v21  ;;  %2331 = vmatpush.msrb.mxu0 %v2214_v40  ;;  %v1091_v42 = vmul.f32 0.2, %v1089_v54  ;;  %v7476_v40 = vand.u32 4294901760, %v5667_v7 }
 0x10b   :  { %2358 = vmatpush.msrb.mxu1 %v7217_v57  ;;  %2472 = vmatpush.msrb.mxu3 %v2471_v56  ;;  %v7442_v57 = vand.u32 4294901760, %v5669_v53  ;;  %v5675_v56 = vld [vmem:[%s10324_s1 + $0x2d8] sm:$0xff] }
 0x10c   :  { %2219 = vmatmul.f32.vlgmr.msra.gmra.mxu1 %v6135_v36  ;;  %2488 = vmatpush.msra.mxu0 %v7265_v26  ;;  %v1092_v5 = vmax.f32 %v1089_v54, %v1091_v42  ;;  %v5668_v26 = vld [vmem:[%s10324_s1 + $0x2a8] sm:$0xff] }
 0x10d   :  { %2562 = vmatpush.msra.mxu2 %v2433_v10  ;;  %2601 = vmatpush.msra.mxu3 %v7233_v19 }
 0x10e   :  { %2360 = vmatpush.msrb.mxu1 %v7240_v44  ;;  %2491 = vmatpush.msra.mxu0 %v7288_v58  ;;  %1093 = vst [vmem:[#allocation2 + $0x3] sm:$0x1] %v1092_v5  ;;  %v7457_v44 = vand.u32 4294901760, %v5668_v26  ;;  %v5666_v58 = vld [vmem:[%s10324_s1 + $0x298] sm:$0xff] }
 0x10f   :  { %2566 = vmatpush.msra.mxu2 %v2439_v29  ;;  %1094 = vst [vmem:[#allocation2 + $0x12] sm:$0x2] %v1092_v5  ;;  %2603 = vmatpush.msra.mxu3 %v7256_v43  ;;  %v5664_v29 = vld [vmem:[%s10324_s1 + $0x288] sm:$0xff] }
 0x110   :  { %2525 = vmatpush.msra.mxu1 %v7233_v19  ;;  %2494 = vmatpush.msra.mxu0 %v7304_v38  ;;  %v7453_v19 = vsub.f32 %v5670_v27, %v7435_v14  ;;  %v5665_v38 = vld [vmem:[%s10324_s1 + $0x290] sm:$0xff]  ;;  %v7593_v27 = vsub.f32 %v5678_v16, %v7562_v61 }
 0x111   :  { %2570 = vmatpush.msra.mxu2 %v2445_v60  ;;  %2605 = vmatpush.msra.mxu3 %v7275_v31  ;;  %v7507_v60 = vsub.f32 %v5667_v7, %v7476_v40  ;;  %v2937_v7 = vand.u32 4294901760, %v7570_v23 }
 0x112   :  { %2527 = vmatpush.msra.mxu1 %v7256_v43  ;;  %2333 = vmatmul.f32.vlgmr.msrb.gmra.mxu0 %v6135_v36  ;;  %v7465_v43 = vsub.f32 %v5669_v53, %v7442_v57  ;;  %v2682_v21 = vand.u32 4294901760, %v7453_v19 }
 0x113   :  { %2497 = vmatpush.msra.mxu0 %v7319_v50  ;;  %2574 = vmatpush.msra.mxu2 %v2451_v37  ;;  %v7490_v50 = vand.u32 4294901760, %v5666_v58 }
 0x114   :  { %2529 = vmatpush.msra.mxu1 %v7275_v31  ;;  %2607 = vmatpush.msra.mxu3 %v7290_v11  ;;  %v7482_v31 = vsub.f32 %v5668_v26, %v7457_v44  ;;  %v2688_v10 = vand.u32 4294901760, %v7465_v43 }
 0x115   :  { %2362 = vmatmul.f32.vlgmr.msrb.gmra.mxu1 %v6135_v36  ;;  %2500 = vmatpush.msra.mxu0 %v7334_v2  ;;  %v2683_v2 = vsub.f32 %v7453_v19, %v2682_v21  ;;  %v7524_v37 = vsub.f32 %v5666_v58, %v7490_v50  ;;  %v5674_v58 = vld [vmem:[%s10324_s1 + $0x2d0] sm:$0xff] }
 0x116   :  { %2531 = vmatpush.msra.mxu1 %v7290_v11  ;;  %2578 = vmatpush.msra.mxu2 %v2457_v35  ;;  %v5787_v11 = vld [vmem:[%s10325_s2 + $0x4] ss:$0 sm:$0xff]  ;;  %v2689_v51 = vsub.f32 %v7465_v43, %v2688_v10  ;;  %v2700_v35 = vand.u32 4294901760, %v7507_v60  ;;  %v7627_v16 = vand.u32 4294901760, %v5674_v58 }
 0x117   :  { %2609 = vmatpush.msra.mxu3 %v7306_v33  ;;  %2503 = vmatpush.msra.mxu0 %v7349_v12  ;;  %v7509_v12 = vand.u32 4294901760, %v5665_v38  ;;  %v2684_v46 = vand.u32 4294901760, %v2683_v2  ;;  %v2706_v1 = vand.u32 4294901760, %v7524_v37 }
 0x118   :  { %2533 = vmatpush.msra.mxu1 %v7306_v33  ;;  %2582 = vmatpush.msra.mxu2 %v2463_v59  ;;  %v2694_v33 = vand.u32 4294901760, %v7482_v31  ;;  %v2690_v17 = vand.u32 4294901760, %v2689_v51  ;;  %v2701_v49 = vsub.f32 %v7507_v60, %v2700_v35  ;;  %v5673_v51 = vld [vmem:[%s10324_s1 + $0x2c8] sm:$0xff] }
 0x119   :  { %2611 = vmatpush.msra.mxu3 %v7321_v25  ;;  %2413 = vmatmul.f32.vlgmr.msrb.gmra.mxu2 %v6195_v4  ;;  %v7537_v63 = vsub.f32 %v5665_v38, %v7509_v12  ;;  %v2707_v39 = vsub.f32 %v7524_v37, %v2706_v1 }
 0x11a   :  { %2506 = vmatpush.msra.mxu0 %v7364_v55  ;;  %2535 = vmatpush.msra.mxu1 %v7321_v25  ;;  %v1139_v52 = vpop.f32.mrf.mxu0  ;;  %v7526_v25 = vand.u32 4294901760, %v5664_v29  ;;  %v5663_v55 = vld [vmem:[%s10324_s1 + $0x280] sm:$0xff]  ;;  %v2702_v5 = vand.u32 4294901760, %v2701_v49 }
 0x11b   :  { %2586 = vmatpush.msra.mxu2 %v2469_v8  ;;  %2613 = vmatpush.msra.mxu3 %v7336_v34  ;;  %v1140_v3 = vadd.f32 %v5787_v11, %v1139_v52  ;;  %v5677_v8 = vld [vmem:[%s10324_s1 + $0x2e8] sm:$0xff]  ;;  %v2712_v0 = vand.u32 4294901760, %v7537_v63  ;;  %v2708_v41 = vand.u32 4294901760, %v2707_v39  ;;  %v7655_v39 = vsub.f32 %v5674_v58, %v7627_v16 }
 0x11c   :  { %2474 = vmatmul.f32.vlgmr.msrb.gmra.mxu3 %v6135_v36  ;;  %2509 = vmatpush.msra.mxu0 %v7376_v20  ;;  %v7549_v20 = vand.u32 4294901760, %v5663_v55  ;;  %v7555_v22 = vsub.f32 %v5664_v29, %v7526_v25  ;;  %v7580_v24 = vand.u32 4294901760, %v5677_v8  ;;  %v7611_v29 = vand.u32 4294901760, %v5675_v56 }
 0x11d   :  { %2743 = vmatpush.msrb.mxu2 %v7453_v19  ;;  %2537 = vmatpush.msra.mxu1 %v7336_v34  ;;  %v1200_v13 = vpop.f32.mrf.mxu1  ;;  %v1238_v59 = vpop.f32.mrf.mxu2  ;;  %v2695_v34 = vsub.f32 %v7482_v31, %v2694_v33  ;;  %v2713_v26 = vsub.f32 %v7537_v63, %v2712_v0 }
 0x11e   :  { %2615 = vmatpush.msra.mxu3 %v7352_v48  ;;  %2648 = vmatpush.msrb.mxu0 %v7435_v14  ;;  %v1201_v18 = vadd.f32 %v1200_v13, %v1140_v3  ;;  %v7578_v28 = vsub.f32 %v5663_v55, %v7549_v20  ;;  %v2718_v9 = vand.u32 4294901760, %v7555_v22  ;;  %v7609_v11 = vsub.f32 %v5677_v8, %v7580_v24 }
 0x11f   :  { %2746 = vmatpush.msrb.mxu2 %v7465_v43  ;;  %2539 = vmatpush.msra.mxu1 %v7352_v48  ;;  %v5676_v48 = vld [vmem:[%s10324_s1 + $0x2e0] sm:$0xff]  ;;  %v2696_v30 = vand.u32 4294901760, %v2695_v34  ;;  %v2943_v3 = vand.u32 4294901760, %v7593_v27  ;;  %v2714_v13 = vand.u32 4294901760, %v2713_v26  ;;  %v7640_v8 = vsub.f32 %v5675_v56, %v7611_v29 }
 0x120   :  { %2780 = vmatpush.msrb.mxu3 %v7435_v14  ;;  %2650 = vmatpush.msrb.mxu0 %v7442_v57  ;;  %v1239_v47 = vadd.f32 %v1238_v59, %v1201_v18  ;;  %v1269_v15 = vpop.f32.mrf.mxu3  ;;  %v7595_v42 = vand.u32 4294901760, %v5676_v48  ;;  %v2724_v38 = vand.u32 4294901760, %v7578_v28  ;;  %v2719_v52 = vsub.f32 %v7555_v22, %v2718_v9 }
 0x121   :  { %2685 = vmatpush.msrb.mxu1 %v2684_v46  ;;  %2749 = vmatpush.msrb.mxu2 %v7482_v31  ;;  %v2938_v59 = vsub.f32 %v7570_v23, %v2937_v7  ;;  %v2961_v58 = vand.u32 4294901760, %v7640_v8 }
 0x122   :  { %2782 = vmatpush.msrb.mxu3 %v7442_v57  ;;  %2588 = vmatmul.f32.vlgmr.msra.gmra.mxu2 %v6135_v36  ;;  %v1270_v32 = vadd.f32 %v1269_v15, %v1239_v47  ;;  %v7625_v46 = vsub.f32 %v5676_v48, %v7595_v42  ;;  %v2725_v18 = vsub.f32 %v7578_v28, %v2724_v38  ;;  %v7642_v47 = vand.u32 4294901760, %v5673_v51  ;;  %v5672_v15 = vld [vmem:[%s10324_s1 + $0x2c0] sm:$0xff] }
 0x123   :  { %2652 = vmatpush.msrb.mxu0 %v7457_v44  ;;  %2691 = vmatpush.msrb.mxu1 %v2690_v17  ;;  %v1314_v54 = vpop.f32.mrf.mxu0  ;;  %v2949_v17 = vand.u32 4294901760, %v7609_v11  ;;  %v2720_v49 = vand.u32 4294901760, %v2719_v52  ;;  %v2939_v56 = vand.u32 4294901760, %v2938_v59 }
 0x124   :  { %2752 = vmatpush.msrb.mxu2 %v7507_v60  ;;  %2784 = vmatpush.msrb.mxu3 %v7457_v44  ;;  %v1315_v53 = vadd.f32 %v1314_v54, %v1270_v32  ;;  %v2955_v32 = vand.u32 4294901760, %v7625_v46  ;;  %v7658_v54 = vand.u32 4294901760, %v5672_v15 }
 0x125   :  { %2512 = vmatmul.f32.vlgmr.msra.gmra.mxu0 %v6147_v45  ;;  %2617 = vmatmul.f32.vlgmr.msra.gmra.mxu3 %v6135_v36  ;;  %v2950_v26 = vsub.f32 %v7609_v11, %v2949_v17 }
 0x126   :  { %2654 = vmatpush.msrb.mxu0 %v7476_v40  ;;  %2697 = vmatpush.msrb.mxu1 %v2696_v30  ;;  %v1343_v2 = vpop.f32.mrf.mxu1  ;;  %v2944_v30 = vsub.f32 %v7593_v27, %v2943_v3  ;;  %v2956_v52 = vsub.f32 %v7625_v46, %v2955_v32 }
 0x127   :  { %2755 = vmatpush.msrb.mxu2 %v7524_v37  ;;  %2786 = vmatpush.msrb.mxu3 %v7476_v40  ;;  %v1344_v55 = vadd.f32 %v1343_v2, %v1315_v53  ;;  %v5788_v53 = vld [vmem:[%s10325_s2 + $0x5] ss:$0 sm:$0xff]  ;;  %v7670_v2 = vsub.f32 %v5673_v51, %v7642_v47  ;;  %v7682_v51 = vsub.f32 %v5672_v15, %v7658_v54  ;;  %v2951_v19 = vand.u32 4294901760, %v2950_v26 }
 0x128   :  { %2543 = vmatmul.f32.vlgmr.msra.gmra.mxu1 %v6169_v62  ;;  %2656 = vmatpush.msrb.mxu0 %v7490_v50  ;;  %v2957_v15 = vand.u32 4294901760, %v2956_v52 }
 0x129   :  { %2703 = vmatpush.msrb.mxu1 %v2702_v5  ;;  %2758 = vmatpush.msrb.mxu2 %v7537_v63  ;;  %v1346_v34 = vmul.f32 0.2, %v1344_v55  ;;  %v2726_v5 = vand.u32 4294901760, %v2725_v18 }
 0x12a   :  { %2788 = vmatpush.msrb.mxu3 %v7490_v50  ;;  %2658 = vmatpush.msrb.mxu0 %v7509_v12 }
 0x12b   :  { %2709 = vmatpush.msrb.mxu1 %v2708_v41  ;;  %2761 = vmatpush.msrb.mxu2 %v7555_v22  ;;  %v1347_v48 = vmax.f32 %v1344_v55, %v1346_v34  ;;  %v2945_v41 = vand.u32 4294901760, %v2944_v30  ;;  %v2967_v55 = vand.u32 4294901760, %v7655_v39  ;;  %v2973_v34 = vand.u32 4294901760, %v7670_v2  ;;  %v5687_v22 = vld [vmem:[%s10324_s1 + $0x330] sm:$0xff] }
 0x12c   :  { %2790 = vmatpush.msrb.mxu3 %v7509_v12  ;;  %2660 = vmatpush.msrb.mxu0 %v7526_v25 }
 0x12d   :  { %2715 = vmatpush.msrb.mxu1 %v2714_v13  ;;  %2764 = vmatpush.msrb.mxu2 %v7578_v28  ;;  %1348 = vst [vmem:[#allocation2 + $0x4] sm:$0x1] %v1347_v48  ;;  %v2968_v43 = vsub.f32 %v7655_v39, %v2967_v55  ;;  %v2974_v31 = vsub.f32 %v7670_v2, %v2973_v34 }
 0x12e   :  { %2792 = vmatpush.msrb.mxu3 %v7526_v25  ;;  %1349 = vst [vmem:[#allocation2 + $0x13] sm:$0x2] %v1347_v48  ;;  %2662 = vmatpush.msrb.mxu0 %v7549_v20 }
 0x12f   :  { %2903 = vmatpush.msra.mxu2 %v7539_v6  ;;  %2721 = vmatpush.msrb.mxu1 %v2720_v49  ;;  %v2979_v49 = vand.u32 4294901760, %v7682_v51 }
 0x130   :  { %2794 = vmatpush.msrb.mxu3 %v7549_v20  ;;  %2813 = vmatpush.msra.mxu0 %v2682_v21  ;;  %v1394_v13 = vpop.f32.mrf.mxu2  ;;  %v2962_v21 = vsub.f32 %v7640_v8, %v2961_v58 }
 0x131   :  { %2905 = vmatpush.msra.mxu2 %v7562_v61  ;;  %v1395_v59 = vadd.f32 %v5788_v53, %v1394_v13  ;;  %2727 = vmatpush.msrb.mxu1 %v2726_v5  ;;  %v2980_v60 = vsub.f32 %v7682_v51, %v2979_v49  ;;  %v5697_v53 = vld [vmem:[%s10324_s1 + $0x378] sm:$0xff] }
 0x132   :  { %2940 = vmatpush.msra.mxu3 %v2939_v56  ;;  %2817 = vmatpush.msra.mxu0 %v2688_v10 }
 0x133   :  { %2856 = vmatpush.msra.mxu1 %v7435_v14  ;;  %2907 = vmatpush.msra.mxu2 %v7580_v24  ;;  %v1455_v18 = vpop.f32.mrf.mxu3  ;;  %v2963_v14 = vand.u32 4294901760, %v2962_v21 }
 0x134   :  { %2946 = vmatpush.msra.mxu3 %v2945_v41  ;;  %2821 = vmatpush.msra.mxu0 %v2694_v33  ;;  %v1456_v10 = vadd.f32 %v1455_v18, %v1395_v59  ;;  %v7845_v59 = vand.u32 4294901760, %v5697_v53  ;;  %v5695_v18 = vld [vmem:[%s10324_s1 + $0x368] sm:$0xff] }
 0x135   :  { %2858 = vmatpush.msra.mxu1 %v7442_v57  ;;  %2909 = vmatpush.msra.mxu2 %v7595_v42  ;;  %v2969_v57 = vand.u32 4294901760, %v2968_v43 }
 0x136   :  { %2952 = vmatpush.msra.mxu3 %v2951_v19  ;;  %2825 = vmatpush.msra.mxu0 %v2700_v35  ;;  %v1493_v33 = vpop.f32.mrf.mxu0  ;;  %v5696_v19 = vld [vmem:[%s10324_s1 + $0x370] sm:$0xff] }
 0x137   :  { %2860 = vmatpush.msra.mxu1 %v7457_v44  ;;  %2911 = vmatpush.msra.mxu2 %v7611_v29  ;;  %v1494_v48 = vadd.f32 %v1493_v33, %v1456_v10  ;;  %v2975_v44 = vand.u32 4294901760, %v2974_v31  ;;  %v7871_v31 = vand.u32 4294901760, %v5696_v19 }
 0x138   :  { %2958 = vmatpush.msra.mxu3 %v2957_v15  ;;  %2829 = vmatpush.msra.mxu0 %v2706_v1  ;;  %v2981_v1 = vand.u32 4294901760, %v2980_v60  ;;  %v7876_v60 = vsub.f32 %v5697_v53, %v7845_v59  ;;  %v5790_v53 = vld [vmem:[%s10325_s2 + $0x7] ss:$0 sm:$0xff] }
 0x139   :  { %2862 = vmatpush.msra.mxu1 %v7476_v40  ;;  %2913 = vmatpush.msra.mxu2 %v7627_v16  ;;  %v1524_v35 = vpop.f32.mrf.mxu1  ;;  %v1569_v30 = vpop.f32.mrf.mxu2 }
 0x13a   :  { %2964 = vmatpush.msra.mxu3 %v2963_v14  ;;  %2833 = vmatpush.msra.mxu0 %v2712_v0  ;;  %v1525_v56 = vadd.f32 %v1524_v35, %v1494_v48  ;;  %v7878_v35 = vand.u32 4294901760, %v5695_v18 }
 0x13b   :  { %2864 = vmatpush.msra.mxu1 %v7490_v50  ;;  %2915 = vmatpush.msra.mxu2 %v7642_v47  ;;  %v5688_v50 = vld [vmem:[%s10324_s1 + $0x338] sm:$0xff] }
 0x13c   :  { %2970 = vmatpush.msra.mxu3 %v2969_v57  ;;  %2767 = vmatmul.f32.vlgmr.msrb.gmra.mxu2 %v6147_v45  ;;  %v1570_v40 = vadd.f32 %v1569_v30, %v1525_v56  ;;  %v1598_v37 = vpop.f32.mrf.mxu3  ;;  %v7741_v28 = vand.u32 4294901760, %v5688_v50 }
 0x13d   :  { %2837 = vmatpush.msra.mxu0 %v2718_v9  ;;  %2866 = vmatpush.msra.mxu1 %v7509_v12 }
 0x13e   :  { %2917 = vmatpush.msra.mxu2 %v7658_v54  ;;  %2976 = vmatpush.msra.mxu3 %v2975_v44  ;;  %v1599_v63 = vadd.f32 %v1598_v37, %v1570_v40 }
 0x13f   :  { %2668 = vmatmul.f32.vlgmr.msrb.gmra.mxu0 %v6195_v4  ;;  %2798 = vmatmul.f32.vlgmr.msrb.gmra.mxu3 %v6169_v62 }
 0x140   :  { %3068 = vmatpush.msrb.mxu2 %v2937_v7  ;;  %2841 = vmatpush.msra.mxu0 %v2724_v38  ;;  %v1601_v12 = vmul.f32 0.2, %v1599_v63  ;;  %v5684_v7 = vld [vmem:[%s10324_s1 + $0x318] sm:$0xff] }
 0x141   :  { %2868 = vmatpush.msra.mxu1 %v7526_v25  ;;  %2982 = vmatpush.msra.mxu3 %v2981_v1  ;;  %v7748_v25 = vand.u32 4294901760, %v5687_v22  ;;  %v5693_v1 = vld [vmem:[%s10324_s1 + $0x358] sm:$0xff] }
 0x142   :  { %2729 = vmatmul.f32.vlgmr.msrb.gmra.mxu1 %v6135_v36  ;;  %2998 = vmatpush.msrb.mxu0 %v7570_v23  ;;  %v1602_v0 = vmax.f32 %v1599_v63, %v1601_v12  ;;  %v5686_v23 = vld [vmem:[%s10324_s1 + $0x328] sm:$0xff] }
 0x143   :  { %3072 = vmatpush.msrb.mxu2 %v2943_v3  ;;  %3111 = vmatpush.msrb.mxu3 %v7539_v6  ;;  %v7766_v9 = vand.u32 4294901760, %v5686_v23 }
 0x144   :  { %2870 = vmatpush.msra.mxu1 %v7549_v20  ;;  %3001 = vmatpush.msrb.mxu0 %v7593_v27  ;;  %1603 = vst [vmem:[#allocation2 + $0x5] sm:$0x1] %v1602_v0  ;;  %v5685_v20 = vld [vmem:[%s10324_s1 + $0x320] sm:$0xff] }
 0x145   :  { %3076 = vmatpush.msrb.mxu2 %v2949_v17  ;;  %1604 = vst [vmem:[#allocation2 + $0x14] sm:$0x2] %v1602_v0  ;;  %3113 = vmatpush.msrb.mxu3 %v7562_v61  ;;  %v7776_v27 = vand.u32 4294901760, %v5685_v20  ;;  %v7788_v38 = vsub.f32 %v5686_v23, %v7766_v9  ;;  %v3447_v23 = vand.u32 4294901760, %v7876_v60 }
 0x146   :  { %3035 = vmatpush.msrb.mxu1 %v7539_v6  ;;  %3004 = vmatpush.msrb.mxu0 %v7609_v11  ;;  %v7759_v6 = vsub.f32 %v5688_v50, %v7741_v28  ;;  %v5683_v11 = vld [vmem:[%s10324_s1 + $0x310] sm:$0xff]  ;;  %v7899_v50 = vsub.f32 %v5696_v19, %v7871_v31 }
 0x147   :  { %3080 = vmatpush.msrb.mxu2 %v2955_v32  ;;  %3115 = vmatpush.msrb.mxu3 %v7580_v24  ;;  %v7805_v17 = vsub.f32 %v5685_v20, %v7776_v27  ;;  %v7910_v20 = vsub.f32 %v5695_v18, %v7878_v35 }
 0x148   :  { %3037 = vmatpush.msrb.mxu1 %v7562_v61  ;;  %2843 = vmatmul.f32.vlgmr.msra.gmra.mxu0 %v6135_v36  ;;  %v7771_v61 = vsub.f32 %v5687_v22, %v7748_v25 }
 0x149   :  { %3007 = vmatpush.msrb.mxu0 %v7625_v46  ;;  %3084 = vmatpush.msrb.mxu2 %v2961_v58  ;;  %v7796_v46 = vand.u32 4294901760, %v5684_v7  ;;  %v3210_v52 = vand.u32 4294901760, %v7805_v17  ;;  %v3459_v18 = vand.u32 4294901760, %v7910_v20 }
 0x14a   :  { %3039 = vmatpush.msrb.mxu1 %v7580_v24  ;;  %3117 = vmatpush.msrb.mxu3 %v7595_v42  ;;  %v3192_v24 = vand.u32 4294901760, %v7759_v6  ;;  %v3198_v3 = vand.u32 4294901760, %v7771_v61 }
 0x14b   :  { %2872 = vmatmul.f32.vlgmr.msra.gmra.mxu1 %v6135_v36  ;;  %3010 = vmatpush.msrb.mxu0 %v7640_v8  ;;  %v5682_v8 = vld [vmem:[%s10324_s1 + $0x308] sm:$0xff]  ;;  %v7830_v58 = vsub.f32 %v5684_v7, %v7796_v46  ;;  %v3211_v14 = vsub.f32 %v7805_v17, %v3210_v52  ;;  %v5692_v7 = vld [vmem:[%s10324_s1 + $0x350] sm:$0xff] }
 0x14c   :  { %3041 = vmatpush.msrb.mxu1 %v7595_v42  ;;  %3088 = vmatpush.msrb.mxu2 %v2967_v55  ;;  %v5789_v42 = vld [vmem:[%s10325_s2 + $0x6] ss:$0 sm:$0xff]  ;;  %v3193_v32 = vsub.f32 %v7759_v6, %v3192_v24  ;;  %v3199_v26 = vsub.f32 %v7771_v61, %v3198_v3 }
 0x14d   :  { %3119 = vmatpush.msrb.mxu3 %v7611_v29  ;;  %3013 = vmatpush.msrb.mxu0 %v7655_v39  ;;  %v7815_v39 = vand.u32 4294901760, %v5683_v11  ;;  %v3216_v10 = vand.u32 4294901760, %v7830_v58  ;;  %v3212_v63 = vand.u32 4294901760, %v3211_v14 }
 0x14e   :  { %3043 = vmatpush.msrb.mxu1 %v7611_v29  ;;  %3092 = vmatpush.msrb.mxu2 %v2973_v34  ;;  %v3204_v29 = vand.u32 4294901760, %v7788_v38  ;;  %v3194_v55 = vand.u32 4294901760, %v3193_v32  ;;  %v3200_v43 = vand.u32 4294901760, %v3199_v26 }
 0x14f   :  { %3121 = vmatpush.msrb.mxu3 %v7627_v16  ;;  %2923 = vmatmul.f32.vlgmr.msra.gmra.mxu2 %v6195_v4  ;;  %v7843_v13 = vsub.f32 %v5683_v11, %v7815_v39  ;;  %v3217_v40 = vsub.f32 %v7830_v58, %v3216_v10 }
 0x150   :  { %3016 = vmatpush.msrb.mxu0 %v7670_v2  ;;  %3045 = vmatpush.msrb.mxu1 %v7627_v16  ;;  %v1649_v5 = vpop.f32.mrf.mxu0  ;;  %v7832_v16 = vand.u32 4294901760, %v5682_v8  ;;  %v5681_v2 = vld [vmem:[%s10324_s1 + $0x300] sm:$0xff] }
 0x151   :  { %3096 = vmatpush.msrb.mxu2 %v2979_v49  ;;  %3123 = vmatpush.msrb.mxu3 %v7642_v47  ;;  %v1650_v41 = vadd.f32 %v5789_v42, %v1649_v5  ;;  %v3222_v57 = vand.u32 4294901760, %v7843_v13  ;;  %v3218_v5 = vand.u32 4294901760, %v3217_v40 }
 0x152   :  { %2984 = vmatmul.f32.vlgmr.msra.gmra.mxu3 %v6135_v36  ;;  %3019 = vmatpush.msrb.mxu0 %v7682_v51  ;;  %v7855_v51 = vand.u32 4294901760, %v5681_v2  ;;  %v7864_v49 = vsub.f32 %v5682_v8, %v7832_v16  ;;  %v7917_v8 = vand.u32 4294901760, %v5693_v1 }
 0x153   :  { %3253 = vmatpush.msra.mxu2 %v7759_v6  ;;  %3047 = vmatpush.msrb.mxu1 %v7642_v47  ;;  %v1710_v21 = vpop.f32.mrf.mxu1  ;;  %v1748_v34 = vpop.f32.mrf.mxu2  ;;  %v3205_v47 = vsub.f32 %v7788_v38, %v3204_v29  ;;  %v3223_v0 = vsub.f32 %v7843_v13, %v3222_v57 }
 0x154   :  { %3125 = vmatpush.msrb.mxu3 %v7658_v54  ;;  %3158 = vmatpush.msra.mxu0 %v7741_v28  ;;  %v1711_v15 = vadd.f32 %v1710_v21, %v1650_v41  ;;  %v7886_v44 = vsub.f32 %v5681_v2, %v7855_v51  ;;  %v3228_v37 = vand.u32 4294901760, %v7864_v49  ;;  %v5691_v2 = vld [vmem:[%s10324_s1 + $0x348] sm:$0xff]  ;;  %v7936_v21 = vand.u32 4294901760, %v5692_v7 }
 0x155   :  { %3256 = vmatpush.msra.mxu2 %v7771_v61  ;;  %3049 = vmatpush.msrb.mxu1 %v7658_v54  ;;  %v5694_v54 = vld [vmem:[%s10324_s1 + $0x360] sm:$0xff]  ;;  %v3206_v30 = vand.u32 4294901760, %v3205_v47  ;;  %v3448_v47 = vsub.f32 %v7876_v60, %v3447_v23 }
 0x156   :  { %3290 = vmatpush.msra.mxu3 %v7741_v28  ;;  %3160 = vmatpush.msra.mxu0 %v7748_v25  ;;  %v1749_v33 = vadd.f32 %v1748_v34, %v1711_v15  ;;  %v1779_v48 = vpop.f32.mrf.mxu3  ;;  %v7901_v12 = vand.u32 4294901760, %v5694_v54  ;;  %v3234_v42 = vand.u32 4294901760, %v7886_v44  ;;  %v3229_v26 = vsub.f32 %v7864_v49, %v3228_v37 }
 0x157   :  { %3195 = vmatpush.msra.mxu1 %v3194_v55  ;;  %3259 = vmatpush.msra.mxu2 %v7788_v38  ;;  %v3453_v55 = vand.u32 4294901760, %v7899_v50  ;;  %v3224_v34 = vand.u32 4294901760, %v3223_v0  ;;  %v3449_v0 = vand.u32 4294901760, %v3448_v47 }
 0x158   :  { %3292 = vmatpush.msra.mxu3 %v7748_v25  ;;  %3098 = vmatmul.f32.vlgmr.msrb.gmra.mxu2 %v6135_v36  ;;  %v1780_v56 = vadd.f32 %v1779_v48, %v1749_v33  ;;  %v7934_v19 = vsub.f32 %v5694_v54, %v7901_v12  ;;  %v3235_v14 = vsub.f32 %v7886_v44, %v3234_v42  ;;  %v7951_v48 = vand.u32 4294901760, %v5691_v2  ;;  %v5690_v54 = vld [vmem:[%s10324_s1 + $0x340] sm:$0xff] }
 0x159   :  { %3162 = vmatpush.msra.mxu0 %v7766_v9  ;;  %3201 = vmatpush.msra.mxu1 %v3200_v43  ;;  %v7949_v33 = vsub.f32 %v5693_v1, %v7917_v8  ;;  %v3454_v1 = vsub.f32 %v7899_v50, %v3453_v55 }
 0x15a   :  { %3262 = vmatpush.msra.mxu2 %v7805_v17  ;;  %3294 = vmatpush.msra.mxu3 %v7766_v9  ;;  %v1824_v22 = vpop.f32.mrf.mxu0 }
 0x15b   :  { %3022 = vmatmul.f32.vlgmr.msrb.gmra.mxu0 %v6147_v45  ;;  %3127 = vmatmul.f32.vlgmr.msrb.gmra.mxu3 %v6135_v36  ;;  %v1825_v11 = vadd.f32 %v1824_v22, %v1780_v56  ;;  %v3230_v56 = vand.u32 4294901760, %v3229_v26  ;;  %v7964_v22 = vsub.f32 %v5692_v7, %v7936_v21  ;;  %v3471_v7 = vand.u32 4294901760, %v7949_v33 }
 0x15c   :  { %3164 = vmatpush.msra.mxu0 %v7776_v27  ;;  %3207 = vmatpush.msra.mxu1 %v3206_v30  ;;  %v1853_v32 = vpop.f32.mrf.mxu1  ;;  %v7976_v26 = vsub.f32 %v5691_v2, %v7951_v48 }
 0x15d   :  { %3265 = vmatpush.msra.mxu2 %v7830_v58  ;;  %3296 = vmatpush.msra.mxu3 %v7776_v27  ;;  %v1854_v41 = vadd.f32 %v1853_v32, %v1825_v11  ;;  %v3460_v11 = vsub.f32 %v7910_v20, %v3459_v18  ;;  %v7970_v32 = vand.u32 4294901760, %v5690_v54 }
 0x15e   :  { %3053 = vmatmul.f32.vlgmr.msrb.gmra.mxu1 %v6169_v62  ;;  %3166 = vmatpush.msra.mxu0 %v7796_v46 }
 0x15f   :  { %3213 = vmatpush.msra.mxu1 %v3212_v63  ;;  %3268 = vmatpush.msra.mxu2 %v7843_v13  ;;  %v1856_v15 = vmul.f32 0.2, %v1854_v41  ;;  %v1904_v43 = vpop.f32.mrf.mxu2  ;;  %v3465_v63 = vand.u32 4294901760, %v7934_v19  ;;  %v7988_v2 = vsub.f32 %v5690_v54, %v7970_v32  ;;  %v3461_v6 = vand.u32 4294901760, %v3460_v11 }
 0x160   :  { %3298 = vmatpush.msra.mxu3 %v7796_v46  ;;  %3168 = vmatpush.msra.mxu0 %v7815_v39  ;;  %v1905_v30 = vadd.f32 %v5790_v53, %v1904_v43 }
 0x161   :  { %3219 = vmatpush.msra.mxu1 %v3218_v5  ;;  %3271 = vmatpush.msra.mxu2 %v7864_v49  ;;  %v1857_v40 = vmax.f32 %v1854_v41, %v1856_v15  ;;  %v3236_v5 = vand.u32 4294901760, %v3235_v14  ;;  %v3466_v47 = vsub.f32 %v7934_v19, %v3465_v63  ;;  %v3477_v15 = vand.u32 4294901760, %v7964_v22 }
 0x162   :  { %3300 = vmatpush.msra.mxu3 %v7815_v39  ;;  %3170 = vmatpush.msra.mxu0 %v7832_v16 }
 0x163   :  { %3225 = vmatpush.msra.mxu1 %v3224_v34  ;;  %3274 = vmatpush.msra.mxu2 %v7886_v44  ;;  %1858 = vst [vmem:[#allocation2 + $0x6] sm:$0x1] %v1857_v40  ;;  %v1965_v53 = vpop.f32.mrf.mxu3  ;;  %v3455_v34 = vand.u32 4294901760, %v3454_v1  ;;  %v3467_v54 = vand.u32 4294901760, %v3466_v47  ;;  %v3478_v61 = vsub.f32 %v7964_v22, %v3477_v15 }
 0x164   :  { %3302 = vmatpush.msra.mxu3 %v7832_v16  ;;  %1859 = vst [vmem:[#allocation2 + $0x15] sm:$0x2] %v1857_v40  ;;  %v1966_v41 = vadd.f32 %v1965_v53, %v1905_v30  ;;  %3172 = vmatpush.msra.mxu0 %v7855_v51  ;;  %v3483_v30 = vand.u32 4294901760, %v7976_v26 }
 0x165   :  { %3413 = vmatpush.msrb.mxu2 %v7845_v59  ;;  %3231 = vmatpush.msra.mxu1 %v3230_v56 }
 0x166   :  { %3304 = vmatpush.msra.mxu3 %v7855_v51  ;;  %3323 = vmatpush.msrb.mxu0 %v3192_v24  ;;  %v2003_v43 = vpop.f32.mrf.mxu0  ;;  %v3472_v24 = vsub.f32 %v7949_v33, %v3471_v7  ;;  %v3484_v38 = vsub.f32 %v7976_v26, %v3483_v30 }
 0x167   :  { %3415 = vmatpush.msrb.mxu2 %v7871_v31  ;;  %v2004_v14 = vadd.f32 %v2003_v43, %v1966_v41  ;;  %3237 = vmatpush.msra.mxu1 %v3236_v5 }
 0x168   :  { %3450 = vmatpush.msrb.mxu3 %v3449_v0  ;;  %3327 = vmatpush.msrb.mxu0 %v3198_v3  ;;  %v3473_v1 = vand.u32 4294901760, %v3472_v24 }
 0x169   :  { %3366 = vmatpush.msrb.mxu1 %v7741_v28  ;;  %3417 = vmatpush.msrb.mxu2 %v7878_v35  ;;  %v2034_v56 = vpop.f32.mrf.mxu1  ;;  %v2079_v40 = vpop.f32.mrf.mxu2  ;;  %v3489_v28 = vand.u32 4294901760, %v7988_v2 }
 0x16a   :  { %3456 = vmatpush.msrb.mxu3 %v3455_v34  ;;  %3331 = vmatpush.msrb.mxu0 %v3204_v29  ;;  %v2035_v3 = vadd.f32 %v2034_v56, %v2004_v14 }
 0x16b   :  { %3368 = vmatpush.msrb.mxu1 %v7748_v25  ;;  %3419 = vmatpush.msrb.mxu2 %v7901_v12  ;;  %v3479_v25 = vand.u32 4294901760, %v3478_v61  ;;  %v3490_v17 = vsub.f32 %v7988_v2, %v3489_v28 }
 0x16c   :  { %3462 = vmatpush.msrb.mxu3 %v3461_v6  ;;  %3335 = vmatpush.msrb.mxu0 %v3210_v52  ;;  %v2080_v29 = vadd.f32 %v2079_v40, %v2035_v3  ;;  %v2108_v0 = vpop.f32.mrf.mxu3 }
 0x16d   :  { %3370 = vmatpush.msrb.mxu1 %v7766_v9  ;;  %3421 = vmatpush.msrb.mxu2 %v7917_v8  ;;  %v3485_v9 = vand.u32 4294901760, %v3484_v38  ;;  %v3491_v58 = vand.u32 4294901760, %v3490_v17  ;;  %v5712_v17 = vld [vmem:[%s10324_s1 + $0x3e0] sm:$0xff] }
 0x16e   :  { %3468 = vmatpush.msrb.mxu3 %v3467_v54  ;;  %3339 = vmatpush.msrb.mxu0 %v3216_v10  ;;  %v2109_v11 = vadd.f32 %v2108_v0, %v2080_v29 }
 0x16f   :  { %3372 = vmatpush.msrb.mxu1 %v7776_v27  ;;  %3423 = vmatpush.msrb.mxu2 %v7936_v21 }
 0x170   :  { %3474 = vmatpush.msrb.mxu3 %v3473_v1  ;;  %3343 = vmatpush.msrb.mxu0 %v3222_v57  ;;  %v2111_v52 = vmul.f32 0.2, %v2109_v11  ;;  %v5702_v57 = vld [vmem:[%s10324_s1 + $0x398] sm:$0xff] }
 0x171   :  { %3374 = vmatpush.msrb.mxu1 %v7796_v46  ;;  %3425 = vmatpush.msrb.mxu2 %v7951_v48  ;;  %v5706_v46 = vld [vmem:[%s10324_s1 + $0x3b8] sm:$0xff] }
 0x172   :  { %3480 = vmatpush.msrb.mxu3 %v3479_v25  ;;  %3277 = vmatmul.f32.vlgmr.msra.gmra.mxu2 %v6147_v45  ;;  %v2112_v27 = vmax.f32 %v2109_v11, %v2111_v52  ;;  %v8047_v13 = vand.u32 4294901760, %v5706_v46 }
 0x173   :  { %3347 = vmatpush.msrb.mxu0 %v3228_v37  ;;  %3376 = vmatpush.msrb.mxu1 %v7815_v39  ;;  %v5705_v39 = vld [vmem:[%s10324_s1 + $0x3b0] sm:$0xff] }
 0x174   :  { %3427 = vmatpush.msrb.mxu2 %v7970_v32  ;;  %3486 = vmatpush.msrb.mxu3 %v3485_v9  ;;  %2113 = vst [vmem:[#allocation2 + $0x7] sm:$0x1] %v2112_v27  ;;  %v8057_v10 = vand.u32 4294901760, %v5705_v39 }
 0x175   :  { %3178 = vmatmul.f32.vlgmr.msra.gmra.mxu0 %v6195_v4  ;;  %3308 = vmatmul.f32.vlgmr.msra.gmra.mxu3 %v6169_v62  ;;  %2114 = vst [vmem:[#allocation2 + $0x16] sm:$0x2] %v2112_v27 }
 0x176   :  { %3578 = vmatpush.msra.mxu2 %v3447_v23  ;;  %3351 = vmatpush.msrb.mxu0 %v3234_v42  ;;  %v5701_v23 = vld [vmem:[%s10324_s1 + $0x390] sm:$0xff] }
 0x177   :  { %3378 = vmatpush.msrb.mxu1 %v7832_v16  ;;  %3492 = vmatpush.msrb.mxu3 %v3491_v58  ;;  %v5704_v16 = vld [vmem:[%s10324_s1 + $0x3a8] sm:$0xff] }
 0x178   :  { %3239 = vmatmul.f32.vlgmr.msra.gmra.mxu1 %v6135_v36  ;;  %3508 = vmatpush.msra.mxu0 %v7876_v60  ;;  %v8067_v49 = vand.u32 4294901760, %v5704_v16 }
 0x179   :  { %3582 = vmatpush.msra.mxu2 %v3453_v55  ;;  %3621 = vmatpush.msra.mxu3 %v7845_v59 }
 0x17a   :  { %3380 = vmatpush.msrb.mxu1 %v7855_v51  ;;  %3511 = vmatpush.msra.mxu0 %v7899_v50  ;;  %v8065_v51 = vsub.f32 %v5706_v46, %v8047_v13  ;;  %v8099_v50 = vand.u32 4294901760, %v5702_v57 }
 0x17b   :  { %3586 = vmatpush.msra.mxu2 %v3459_v18  ;;  %3623 = vmatpush.msra.mxu3 %v7871_v31 }
 0x17c   :  { %3545 = vmatpush.msra.mxu1 %v7845_v59  ;;  %3514 = vmatpush.msra.mxu0 %v7910_v20  ;;  %v5703_v59 = vld [vmem:[%s10324_s1 + $0x3a0] sm:$0xff]  ;;  %v3702_v60 = vand.u32 4294901760, %v8065_v51  ;;  %v5791_v20 = vld [vmem:[%s10325_s2 + $0x8] ss:$0 sm:$0xff] }
 0x17d   :  { %3590 = vmatpush.msra.mxu2 %v3465_v63  ;;  %3625 = vmatpush.msra.mxu3 %v7878_v35  ;;  %v8091_v44 = vand.u32 4294901760, %v5703_v59  ;;  %v8133_v63 = vsub.f32 %v5702_v57, %v8099_v50 }
 0x17e   :  { %3547 = vmatpush.msra.mxu1 %v7871_v31  ;;  %3353 = vmatmul.f32.vlgmr.msrb.gmra.mxu0 %v6135_v36  ;;  %v8077_v31 = vsub.f32 %v5705_v39, %v8057_v10 }
 0x17f   :  { %3517 = vmatpush.msra.mxu0 %v7934_v19  ;;  %3594 = vmatpush.msra.mxu2 %v3471_v7  ;;  %v8116_v42 = vsub.f32 %v5703_v59, %v8091_v44  ;;  %v5700_v19 = vld [vmem:[%s10324_s1 + $0x388] sm:$0xff]  ;;  %v3726_v24 = vand.u32 4294901760, %v8133_v63  ;;  %v5711_v59 = vld [vmem:[%s10324_s1 + $0x3d8] sm:$0xff] }
 0x180   :  { %3549 = vmatpush.msra.mxu1 %v7878_v35  ;;  %3627 = vmatpush.msra.mxu3 %v7901_v12  ;;  %v8089_v35 = vsub.f32 %v5704_v16, %v8067_v49  ;;  %v3708_v37 = vand.u32 4294901760, %v8077_v31  ;;  %v8149_v41 = vand.u32 4294901760, %v5700_v19 }
 0x181   :  { %3382 = vmatmul.f32.vlgmr.msrb.gmra.mxu1 %v6135_v36  ;;  %3520 = vmatpush.msra.mxu0 %v7949_v33  ;;  %v3727_v0 = vsub.f32 %v8133_v63, %v3726_v24 }
 0x182   :  { %3551 = vmatpush.msra.mxu1 %v7901_v12  ;;  %3598 = vmatpush.msra.mxu2 %v3477_v15  ;;  %v3703_v12 = vsub.f32 %v8065_v51, %v3702_v60  ;;  %v3714_v55 = vand.u32 4294901760, %v8089_v35  ;;  %v3709_v33 = vsub.f32 %v8077_v31, %v3708_v37  ;;  %v8176_v3 = vsub.f32 %v5700_v19, %v8149_v41 }
 0x183   :  { %3629 = vmatpush.msra.mxu3 %v7917_v8  ;;  %3523 = vmatpush.msra.mxu0 %v7964_v22  ;;  %v5715_v22 = vld [vmem:[%s10324_s1 + $0x3f8] sm:$0xff] }
 0x184   :  { %3553 = vmatpush.msra.mxu1 %v7917_v8  ;;  %3602 = vmatpush.msra.mxu2 %v3483_v30  ;;  %v8121_v8 = vand.u32 4294901760, %v5701_v23  ;;  %v3704_v5 = vand.u32 4294901760, %v3703_v12  ;;  %v3715_v7 = vsub.f32 %v8089_v35, %v3714_v55  ;;  %v3710_v6 = vand.u32 4294901760, %v3709_v33  ;;  %v5713_v30 = vld [vmem:[%s10324_s1 + $0x3e8] sm:$0xff]  ;;  %v8228_v33 = vld [vmem:[#allocation2 + $0x10] sm:$0xff] }
 0x185   :  { %3631 = vmatpush.msra.mxu3 %v7936_v21  ;;  %3433 = vmatmul.f32.vlgmr.msrb.gmra.mxu2 %v6195_v4  ;;  %v8193_v25 = vand.u32 4294901760, %v5713_v30  ;;  %v3738_v27 = vand.u32 4294901760, %v8176_v3 }
 0x186   :  { %3526 = vmatpush.msra.mxu0 %v7976_v26  ;;  %3555 = vmatpush.msra.mxu1 %v7936_v21  ;;  %v2159_v18 = vpop.f32.mrf.mxu0  ;;  %v5699_v21 = vld [vmem:[%s10324_s1 + $0x380] sm:$0xff]  ;;  %v3720_v26 = vand.u32 4294901760, %v8116_v42  ;;  %v8154_v15 = vsub.f32 %v5701_v23, %v8121_v8  ;;  %v3716_v54 = vand.u32 4294901760, %v3715_v7  ;;  %v3728_v23 = vand.u32 4294901760, %v3727_v0 }
 0x187   :  { %3606 = vmatpush.msra.mxu2 %v3489_v28  ;;  %3633 = vmatpush.msra.mxu3 %v7951_v48  ;;  %v2160_v53 = vadd.f32 %v5791_v20, %v2159_v18  ;;  %v8156_v43 = vand.u32 4294901760, %v5699_v21  ;;  %v8217_v20 = vand.u32 4294901760, %v5712_v17  ;;  %v8220_v12 = vsub.f32 %v5713_v30, %v8193_v25  ;;  %v5710_v18 = vld [vmem:[%s10324_s1 + $0x3d0] sm:$0xff]  ;;  %v8238_v7 = vld [vmem:[#allocation2] sm:$0xff] }
 0x188   :  { %3494 = vmatmul.f32.vlgmr.msrb.gmra.mxu3 %v6135_v36  ;;  %3529 = vmatpush.msra.mxu0 %v7988_v2  ;;  %v5714_v2 = vld [vmem:[%s10324_s1 + $0x3f0] sm:$0xff]  ;;  %v3721_v61 = vsub.f32 %v8116_v42, %v3720_v26  ;;  %v3732_v28 = vand.u32 4294901760, %v8154_v15  ;;  %v8251_v30 = vand.u32 4294901760, %v5710_v18 }
 0x189   :  { %3763 = vmatpush.msrb.mxu2 %v8065_v51  ;;  %3557 = vmatpush.msra.mxu1 %v7951_v48  ;;  %v2220_v34 = vpop.f32.mrf.mxu1  ;;  %v2258_v47 = vpop.f32.mrf.mxu2  ;;  %v8158_v48 = vand.u32 4294901760, %v5715_v22  ;;  %v8184_v1 = vsub.f32 %v5699_v21, %v8156_v43  ;;  %v3739_v21 = vsub.f32 %v8176_v3, %v3738_v27 }
 0x18a   :  { %3635 = vmatpush.msra.mxu3 %v7970_v32  ;;  %3668 = vmatpush.msrb.mxu0 %v8047_v13  ;;  %v2221_v14 = vadd.f32 %v2220_v34, %v2160_v53  ;;  %v3722_v52 = vand.u32 4294901760, %v3721_v61  ;;  %v3733_v46 = vsub.f32 %v8154_v15, %v3732_v28  ;;  %v8234_v53 = vand.u32 4294901760, %v5711_v59 }
 0x18b   :  { %3766 = vmatpush.msrb.mxu2 %v8077_v31  ;;  %3559 = vmatpush.msra.mxu1 %v7970_v32  ;;  %v8178_v32 = vand.u32 4294901760, %v5714_v2  ;;  %v8187_v38 = vsub.f32 %v5715_v22, %v8158_v48  ;;  %v3744_v16 = vand.u32 4294901760, %v8184_v1 }
 0x18c   :  { %3800 = vmatpush.msrb.mxu3 %v8047_v13  ;;  %3670 = vmatpush.msrb.mxu0 %v8057_v10  ;;  %v2259_v56 = vadd.f32 %v2258_v47, %v2221_v14  ;;  %v2289_v40 = vpop.f32.mrf.mxu3  ;;  %v3734_v34 = vand.u32 4294901760, %v3733_v46  ;;  %v3969_v14 = vand.u32 4294901760, %v8220_v12  ;;  %v8279_v46 = vsub.f32 %v5710_v18, %v8251_v30 }
 0x18d   :  { %3705 = vmatpush.msrb.mxu1 %v3704_v5  ;;  %3769 = vmatpush.msrb.mxu2 %v8089_v35  ;;  %v8204_v58 = vsub.f32 %v5714_v2, %v8178_v32  ;;  %v3957_v39 = vand.u32 4294901760, %v8187_v38  ;;  %v3745_v2 = vsub.f32 %v8184_v1, %v3744_v16 }
 0x18e   :  { %3802 = vmatpush.msrb.mxu3 %v8057_v10  ;;  %3608 = vmatmul.f32.vlgmr.msra.gmra.mxu2 %v6135_v36  ;;  %v2290_v29 = vadd.f32 %v2289_v40, %v2259_v56  ;;  %v5709_v56 = vld [vmem:[%s10324_s1 + $0x3c8] sm:$0xff] }
 0x18f   :  { %3672 = vmatpush.msrb.mxu0 %v8067_v49  ;;  %3711 = vmatpush.msrb.mxu1 %v3710_v6  ;;  %v2334_v11 = vpop.f32.mrf.mxu0  ;;  %v3963_v22 = vand.u32 4294901760, %v8204_v58  ;;  %v3958_v47 = vsub.f32 %v8187_v38, %v3957_v39  ;;  %v8249_v6 = vsub.f32 %v5712_v17, %v8217_v20  ;;  %v3746_v17 = vand.u32 4294901760, %v3745_v2 }
 0x190   :  { %3772 = vmatpush.msrb.mxu2 %v8116_v42  ;;  %3804 = vmatpush.msrb.mxu3 %v8067_v49  ;;  %v2335_v9 = vadd.f32 %v2334_v11, %v2290_v29  ;;  %v8267_v29 = vsub.f32 %v5711_v59, %v8234_v53  ;;  %v8270_v11 = vand.u32 4294901760, %v5709_v56  ;;  %v5708_v59 = vld [vmem:[%s10324_s1 + $0x3c0] sm:$0xff]  ;;  %s5880_s1 = smov 127  }
 0x191   :  { %3532 = vmatmul.f32.vlgmr.msra.gmra.mxu0 %v6147_v45  ;;  %3637 = vmatmul.f32.vlgmr.msra.gmra.mxu3 %v6135_v36  ;;  %v3964_v61 = vsub.f32 %v8204_v58, %v3963_v22  ;;  %v3959_v0 = vand.u32 4294901760, %v3958_v47 }
 0x192   :  { %3674 = vmatpush.msrb.mxu0 %v8091_v44  ;;  %3717 = vmatpush.msrb.mxu1 %v3716_v54  ;;  %v2363_v57 = vpop.f32.mrf.mxu1  ;;  %v3740_v54 = vand.u32 4294901760, %v3739_v21  ;;  %v3981_v18 = vand.u32 4294901760, %v8267_v29 }
 0x193   :  { %3775 = vmatpush.msrb.mxu2 %v8133_v63  ;;  %3806 = vmatpush.msrb.mxu3 %v8091_v44  ;;  %v2364_v19 = vadd.f32 %v2363_v57, %v2335_v9  ;;  %v3970_v9 = vsub.f32 %v8220_v12, %v3969_v14  ;;  %v5792_v57 = vld [vmem:[%s10325_s2 + $0x9] ss:$0 sm:$0xff] }
 0x194   :  { %3563 = vmatmul.f32.vlgmr.msra.gmra.mxu1 %v6169_v62  ;;  %3676 = vmatpush.msrb.mxu0 %v8099_v50 }
 0x195   :  { %3723 = vmatpush.msrb.mxu1 %v3722_v52  ;;  %3778 = vmatpush.msrb.mxu2 %v8154_v15  ;;  %v2366_v5 = vmul.f32 0.2, %v2364_v19  ;;  %v3975_v52 = vand.u32 4294901760, %v8249_v6  ;;  %v3971_v47 = vand.u32 4294901760, %v3970_v9 }
 0x196   :  { %3808 = vmatpush.msrb.mxu3 %v8099_v50  ;;  %3678 = vmatpush.msrb.mxu0 %v8121_v8 }
 0x197   :  { %3729 = vmatpush.msrb.mxu1 %v3728_v23  ;;  %3781 = vmatpush.msrb.mxu2 %v8176_v3  ;;  %v2367_v40 = vmax.f32 %v2364_v19, %v2366_v5  ;;  %v3965_v19 = vand.u32 4294901760, %v3964_v61  ;;  %v8294_v5 = vand.u32 4294901760, %v5708_v59  ;;  %v3976_v2 = vsub.f32 %v8249_v6, %v3975_v52 }
 0x198   :  { %3810 = vmatpush.msrb.mxu3 %v8121_v8  ;;  %4440 = vrot.lane.b32.xlu1 %v8228_v33, %s5878_s5 }
 0x199   :  { %4458 = vrot.lane.b32.xlu0 %v8238_v7, %s5879_s21  ;;  %4436 = vrot.lane.b32.xlu2 %v8238_v7, %s5878_s5  ;;  %2368 = vst [vmem:[#allocation2 + $0x8] sm:$0x1] %v2367_v40  ;;  %v8315_v31 = vsub.f32 %v5708_v59, %v8294_v5 }
 0x19a   :  { %3680 = vmatpush.msrb.mxu0 %v8149_v41  ;;  %3735 = vmatpush.msrb.mxu1 %v3734_v34  ;;  %2369 = vst [vmem:[#allocation2 + $0x17] sm:$0x2] %v2367_v40  ;;  %v8297_v34 = vsub.f32 %v5709_v56, %v8270_v11  ;;  %v3987_v40 = vand.u32 4294901760, %v8279_v46 }
 0x19b   :  { %3784 = vmatpush.msrb.mxu2 %v8184_v1  ;;  %3812 = vmatpush.msrb.mxu3 %v8149_v41  ;;  %v3999_v9 = vand.u32 4294901760, %v8315_v31 }
 0x19c   :  { %3682 = vmatpush.msrb.mxu0 %v8156_v43  ;;  %v2414_v23 = vpop.f32.mrf.mxu2  ;;  %3741 = vmatpush.msrb.mxu1 %v3740_v54  ;;  %v3993_v56 = vand.u32 4294901760, %v8297_v34  ;;  %v3988_v61 = vsub.f32 %v8279_v46, %v3987_v40 }
 0x19d   :  { %3923 = vmatpush.msra.mxu2 %v8158_v48  ;;  %3814 = vmatpush.msrb.mxu3 %v8156_v43  ;;  %v2415_v21 = vadd.f32 %v5792_v57, %v2414_v23  ;;  %v4000_v63 = vsub.f32 %v8315_v31, %v3999_v9 }
 0x19e   :  { %3833 = vmatpush.msra.mxu0 %v3702_v60  ;;  %3747 = vmatpush.msrb.mxu1 %v3746_v17  ;;  %v3982_v60 = vsub.f32 %v8267_v29, %v3981_v18  ;;  %v3994_v17 = vsub.f32 %v8297_v34, %v3993_v56  ;;  %v3989_v42 = vand.u32 4294901760, %v3988_v61  ;;  %v5796_v61 = vld [vmem:[%s10325_s2 + $0xd] ss:$0 sm:$0xff] }
 0x19f   :  { %3925 = vmatpush.msra.mxu2 %v8178_v32  ;;  %3960 = vmatpush.msra.mxu3 %v3959_v0  ;;  %v2475_v54 = vpop.f32.mrf.mxu3 }
 0x1a0   :  { %3837 = vmatpush.msra.mxu0 %v3708_v37  ;;  %3876 = vmatpush.msra.mxu1 %v8047_v13  ;;  %v2476_v51 = vadd.f32 %v2475_v54, %v2415_v21  ;;  %v3977_v13 = vand.u32 4294901760, %v3976_v2  ;;  %v3995_v57 = vand.u32 4294901760, %v3994_v17 }
 0x1a1   :  { %3927 = vmatpush.msra.mxu2 %v8193_v25  ;;  %3966 = vmatpush.msra.mxu3 %v3965_v19  ;;  %v5795_v19 = vld [vmem:[%s10325_s2 + $0xc] ss:$0 sm:$0xff] }
 0x1a2   :  { %3841 = vmatpush.msra.mxu0 %v3714_v55  ;;  %3878 = vmatpush.msra.mxu1 %v8057_v10  ;;  %v2513_v37 = vpop.f32.mrf.mxu0  ;;  %v3983_v10 = vand.u32 4294901760, %v3982_v60 }
 0x1a3   :  { %3929 = vmatpush.msra.mxu2 %v8217_v20  ;;  %3972 = vmatpush.msra.mxu3 %v3971_v47  ;;  %v2514_v0 = vadd.f32 %v2513_v37, %v2476_v51 }
 0x1a4   :  { %4490 = vrot.lane.b32.xlu1 %v8238_v7, %s5880_s1  ;;  %4494 = vrot.lane.b32.xlu0 %v8228_v33, %s5880_s1 }
 0x1a5   :  { %4462 = vrot.lane.b32.xlu2 %v8228_v33, %s5879_s21  ;;  %3845 = vmatpush.msra.mxu0 %v3720_v26  ;;  %v2544_v35 = vpop.f32.mrf.mxu1  ;;  %v2589_v55 = vpop.f32.mrf.mxu2 }
 0x1a6   :  { %3880 = vmatpush.msra.mxu1 %v8067_v49  ;;  %3931 = vmatpush.msra.mxu2 %v8234_v53  ;;  %v2545_v59 = vadd.f32 %v2544_v35, %v2514_v0 }
 0x1a7   :  { %3978 = vmatpush.msra.mxu3 %v3977_v13  ;;  %3849 = vmatpush.msra.mxu0 %v3726_v24 }
 0x1a8   :  { %3882 = vmatpush.msra.mxu1 %v8091_v44  ;;  %3933 = vmatpush.msra.mxu2 %v8251_v30  ;;  %v2590_v26 = vadd.f32 %v2589_v55, %v2545_v59  ;;  %v2618_v49 = vpop.f32.mrf.mxu3 }
 0x1a9   :  { %3984 = vmatpush.msra.mxu3 %v3983_v10  ;;  %3787 = vmatmul.f32.vlgmr.msrb.gmra.mxu2 %v6147_v45 }
 0x1aa   :  { %3853 = vmatpush.msra.mxu0 %v3732_v28  ;;  %3884 = vmatpush.msra.mxu1 %v8099_v50  ;;  %v2619_v24 = vadd.f32 %v2618_v49, %v2590_v26  ;;  %v4001_v50 = vand.u32 4294901760, %v4000_v63 }
 0x1ab   :  { %3935 = vmatpush.msra.mxu2 %v8270_v11  ;;  %3990 = vmatpush.msra.mxu3 %v3989_v42 }
 0x1ac   :  { %3688 = vmatmul.f32.vlgmr.msrb.gmra.mxu0 %v6195_v4  ;;  %3818 = vmatmul.f32.vlgmr.msrb.gmra.mxu3 %v6169_v62  ;;  %v2621_v44 = vmul.f32 0.2, %v2619_v24 }
 0x1ad   :  { %3857 = vmatpush.msra.mxu0 %v3738_v27  ;;  %3886 = vmatpush.msra.mxu1 %v8121_v8  ;;  %v5793_v8 = vld [vmem:[%s10325_s2 + $0xa] ss:$0 sm:$0xff] }
 0x1ae   :  { %3937 = vmatpush.msra.mxu2 %v8294_v5  ;;  %3996 = vmatpush.msra.mxu3 %v3995_v57  ;;  %v2622_v15 = vmax.f32 %v2619_v24, %v2621_v44 }
 0x1af   :  { %4516 = vrot.lane.b32.xlu1 %v8228_v33, %s5881_s7  ;;  %4512 = vrot.lane.b32.xlu2 %v8238_v7, %s5881_s7 }
 0x1b0   :  { %4088 = vmatpush.msrb.mxu2 %v3957_v39  ;;  %3749 = vmatmul.f32.vlgmr.msrb.gmra.mxu1 %v6135_v36  ;;  %2623 = vst [vmem:[#allocation2 + $0x9] sm:$0x1] %v2622_v15 }
 0x1b1   :  { %3861 = vmatpush.msra.mxu0 %v3744_v16  ;;  %3888 = vmatpush.msra.mxu1 %v8149_v41  ;;  %2624 = vst [vmem:[#allocation2 + $0x18] sm:$0x2] %v2622_v15 }
 0x1b2   :  { %4002 = vmatpush.msra.mxu3 %v4001_v50  ;;  %4092 = vmatpush.msrb.mxu2 %v3963_v22  ;;  %v5797_v50 = vld [vmem:[%s10325_s2 + $0xe] ss:$0 sm:$0xff] }
 0x1b3   :  { %4018 = vmatpush.msrb.mxu0 %v8187_v38  ;;  %3890 = vmatpush.msra.mxu1 %v8156_v43 }
 0x1b4   :  { %4131 = vmatpush.msrb.mxu3 %v8158_v48  ;;  %4096 = vmatpush.msrb.mxu2 %v3969_v14 }
 0x1b5   :  { %4021 = vmatpush.msrb.mxu0 %v8204_v58  ;;  %4055 = vmatpush.msrb.mxu1 %v8158_v48 }
 0x1b6   :  { %4133 = vmatpush.msrb.mxu3 %v8178_v32  ;;  %4100 = vmatpush.msrb.mxu2 %v3975_v52 }
 0x1b7   :  { %4024 = vmatpush.msrb.mxu0 %v8220_v12  ;;  %4057 = vmatpush.msrb.mxu1 %v8178_v32 }
 0x1b8   :  { %4135 = vmatpush.msrb.mxu3 %v8193_v25  ;;  %3863 = vmatmul.f32.vlgmr.msra.gmra.mxu0 %v6135_v36 }
 0x1b9   :  { %3943 = vmatmul.f32.vlgmr.msra.gmra.mxu2 %v6195_v4  ;;  %4027 = vmatpush.msrb.mxu0 %v8249_v6 }
 0x1ba   :  { %4059 = vmatpush.msrb.mxu1 %v8193_v25  ;;  %4104 = vmatpush.msrb.mxu2 %v3981_v18 }
 0x1bb   :  { %4137 = vmatpush.msrb.mxu3 %v8217_v20  ;;  %3892 = vmatmul.f32.vlgmr.msra.gmra.mxu1 %v6135_v36 }
 0x1bc   :  { %4004 = vmatmul.f32.vlgmr.msra.gmra.mxu3 %v6135_v36  ;;  %4030 = vmatpush.msrb.mxu0 %v8267_v29  ;;  %v2669_v4 = vpop.f32.mrf.mxu0 }
 0x1bd   :  { %4061 = vmatpush.msrb.mxu1 %v8217_v20  ;;  %4108 = vmatpush.msrb.mxu2 %v3987_v40  ;;  %v2670_v41 = vadd.f32 %v5793_v8, %v2669_v4  ;;  %v5794_v20 = vld [vmem:[%s10325_s2 + $0xb] ss:$0 sm:$0xff] }
 0x1be   :  { %4139 = vmatpush.msrb.mxu3 %v8234_v53  ;;  %4033 = vmatpush.msrb.mxu0 %v8279_v46 }
 0x1bf   :  { %4063 = vmatpush.msrb.mxu1 %v8234_v53  ;;  %4112 = vmatpush.msrb.mxu2 %v3993_v56  ;;  %v2730_v43 = vpop.f32.mrf.mxu1  ;;  %v2768_v48 = vpop.f32.mrf.mxu2 }
 0x1c0   :  { %4141 = vmatpush.msrb.mxu3 %v8251_v30  ;;  %4036 = vmatpush.msrb.mxu0 %v8297_v34  ;;  %v2731_v3 = vadd.f32 %v2730_v43, %v2670_v41 }
 0x1c1   :  { %4065 = vmatpush.msrb.mxu1 %v8251_v30  ;;  %4116 = vmatpush.msrb.mxu2 %v3999_v9 }
 0x1c2   :  { %4143 = vmatpush.msrb.mxu3 %v8270_v11  ;;  %4118 = vmatmul.f32.vlgmr.msrb.gmra.mxu2 %v6135_v36  ;;  %v2769_v32 = vadd.f32 %v2768_v48, %v2731_v3  ;;  %v2799_v28 = vpop.f32.mrf.mxu3 }
 0x1c3   :  { %4039 = vmatpush.msrb.mxu0 %v8315_v31  ;;  %4067 = vmatpush.msrb.mxu1 %v8270_v11 }
 0x1c4   :  { %4145 = vmatpush.msrb.mxu3 %v8294_v5  ;;  %4042 = vmatmul.f32.vlgmr.msrb.gmra.mxu0 %v6147_v45  ;;  %v2800_v1 = vadd.f32 %v2799_v28, %v2769_v32 }
 0x1c5   :  { %4147 = vmatmul.f32.vlgmr.msrb.gmra.mxu3 %v6135_v36  ;;  %4069 = vmatpush.msrb.mxu1 %v8294_v5  ;;  %v2844_v38 = vpop.f32.mrf.mxu0 }
 0x1c6   :  { %4073 = vmatmul.f32.vlgmr.msrb.gmra.mxu1 %v6169_v62  ;;  %v2845_v25 = vadd.f32 %v2844_v38, %v2800_v1 }
 0x1c8   :  { %v2873_v27 = vpop.f32.mrf.mxu1 }
 0x1c9   :  { %v2874_v58 = vadd.f32 %v2873_v27, %v2845_v25  ;;  %v5798_v27 = vld [vmem:[%s10325_s2 + $0xf] ss:$0 sm:$0xff]  ;;  %s5717_s2 = sld [smem:[#allocation6 + $0x1]] }
 0x1cb   :  { %v2876_v39 = vmul.f32 0.2, %v2874_v58 }
 0x1cd   :  { %v2877_v16 = vmax.f32 %v2874_v58, %v2876_v39 }
 0x1cf   :  { %2878 = vst [vmem:[#allocation2 + $0xa] sm:$0x1] %v2877_v16 }
 0x1d0   :  { %2879 = vst [vmem:[#allocation2 + $0x19] sm:$0x2] %v2877_v16 }
 0x1d2   :  { %v2924_v45 = vpop.f32.mrf.mxu2 }
 0x1d3   :  { %v2925_v12 = vadd.f32 %v5794_v20, %v2924_v45 }
 0x1d5   :  { %v2985_v22 = vpop.f32.mrf.mxu3 }
 0x1d6   :  { %v2986_v36 = vadd.f32 %v2985_v22, %v2925_v12 }
 0x1d8   :  { %v3023_v53 = vpop.f32.mrf.mxu0 }
 0x1d9   :  { %v3024_v14 = vadd.f32 %v3023_v53, %v2986_v36 }
 0x1db   :  { %v3054_v6 = vpop.f32.mrf.mxu1  ;;  %v3099_v30 = vpop.f32.mrf.mxu2 }
 0x1dc   :  { %v3055_v62 = vadd.f32 %v3054_v6, %v3024_v14 }
 0x1de   :  { %v3100_v29 = vadd.f32 %v3099_v30, %v3055_v62  ;;  %v3128_v11 = vpop.f32.mrf.mxu3 }
 0x1e0   :  { %v3129_v52 = vadd.f32 %v3128_v11, %v3100_v29 }
 0x1e2   :  { %v3131_v46 = vmul.f32 0.2, %v3129_v52 }
 0x1e4   :  { %v3132_v23 = vmax.f32 %v3129_v52, %v3131_v46  ;;  %v4159_v46 = vlaneseq }
 0x1e6   :  { %3133 = vst [vmem:[#allocation2 + $0xb] sm:$0x1] %v3132_v23 }
 0x1e7   :  { %3134 = vst [vmem:[#allocation2 + $0x1a] sm:$0x2] %v3132_v23 }
 0x1f2   :  { %v3179_v18 = vpop.f32.mrf.mxu0 }
 0x1f3   :  { %v3180_v21 = vadd.f32 %v5795_v19, %v3179_v18  ;;  %v8431_v19 = vshrl.u32 %v4159_v46, 7 }
 0x1f5   :  { %v3240_v5 = vpop.f32.mrf.mxu1  ;;  %v3278_v34 = vpop.f32.mrf.mxu2  ;;  %10430 = vst [vmem:[#allocation16_spill] sm:$0xff] %v8431_v19  ;;  %vm10341_vm1 = vcmp.lt.s32.totalorder %v8431_v19, 7  ;;  %vm10338_vm2 = vcmp.lt.s32.totalorder %v8431_v19, 6  ;;  %vm10347_vm3 = vcmp.lt.s32.totalorder %v8431_v19, 2  ;;  %vm10342_vm4 = vcmp.lt.s32.totalorder %v8431_v19, 1 }
 0x1f6   :  { %v3241_v47 = vadd.f32 %v3240_v5, %v3180_v21 }
 0x1f8   :  { %v3279_v2 = vadd.f32 %v3278_v34, %v3241_v47  ;;  %v3309_v40 = vpop.f32.mrf.mxu3  ;;  %v4540_v47 = vrot.slane %v8228_v33, 1 }
 0x1fa   :  { %v3310_v54 = vadd.f32 %v3309_v40, %v3279_v2  ;;  %v4538_v2 = vrot.slane %v8238_v7, 1  ;;  %v4669_v40 = vrot.slane %v8238_v7, 2 }
 0x1fb   :  { %v3354_v51 = vpop.f32.mrf.mxu0 }
 0x1fc   :  { %v3355_v60 = vadd.f32 %v3354_v51, %v3310_v54  ;;  %v4671_v54 = vrot.slane %v8228_v33, 2 }
 0x1fe   :  { %v3383_v56 = vpop.f32.mrf.mxu1 }
 0x1ff   :  { %v3384_v31 = vadd.f32 %v3383_v56, %v3355_v60 }
 0x201   :  { %v3386_v37 = vmul.f32 0.2, %v3384_v31 }
 0x203   :  { %v3387_v13 = vmax.f32 %v3384_v31, %v3386_v37 }
 0x205   :  { %3388 = vst [vmem:[#allocation2 + $0xc] sm:$0x1] %v3387_v13 }
 0x206   :  { %3389 = vst [vmem:[#allocation2 + $0x1b] sm:$0x2] %v3387_v13 }
 0x208   :  { %v3434_v0 = vpop.f32.mrf.mxu2 }
 0x209   :  { %v3435_v10 = vadd.f32 %v5796_v61, %v3434_v0 }
 0x20b   :  { %v3495_v35 = vpop.f32.mrf.mxu3 }
 0x20c   :  { %v3496_v55 = vadd.f32 %v3495_v35, %v3435_v10 }
 0x20e   :  { %v3533_v17 = vpop.f32.mrf.mxu0 }
 0x20f   :  { %v3534_v9 = vadd.f32 %v3533_v17, %v3496_v55  ;;  %v4176_v55 = vrot.slane %v8228_v33, 6 }
 0x211   :  { %v3564_v59 = vpop.f32.mrf.mxu1  ;;  %v3609_v42 = vpop.f32.mrf.mxu2 }
 0x212   :  { %v3565_v26 = vadd.f32 %v3564_v59, %v3534_v9  ;;  %v4174_v59 = vrot.slane %v8238_v7, 6 }
 0x214   :  { %v3610_v49 = vadd.f32 %v3609_v42, %v3565_v26  ;;  %v3638_v57 = vpop.f32.mrf.mxu3 }
 0x216   :  { %v3639_v63 = vadd.f32 %v3638_v57, %v3610_v49 }
 0x218   :  { %v3641_v24 = vmul.f32 0.2, %v3639_v63 }
 0x21a   :  { %v3642_v44 = vmax.f32 %v3639_v63, %v3641_v24  ;;  %v4309_v63 = vrot.slane %v8238_v7, 7 }
 0x21c   :  { %3643 = vst [vmem:[#allocation2 + $0xd] sm:$0x1] %v3642_v44 }
 0x21d   :  { %3644 = vst [vmem:[#allocation2 + $0x1c] sm:$0x2] %v3642_v44 }
 0x229   :  { %v3689_v15 = vpop.f32.mrf.mxu0 }
 0x22a   :  { %v3690_v8 = vadd.f32 %v5797_v50, %v3689_v15  ;;  %v4311_v50 = vrot.slane %v8228_v33, 7  ;;  %v8555_v15 = vpop.permute.xlu2 %4436 }
 0x22c   :  { %v3788_v41 = vpop.f32.mrf.mxu2 }
 0x22d   :  { %v3750_v4 = vpop.f32.mrf.mxu1 }
 0x22e   :  { %v3751_v43 = vadd.f32 %v3750_v4, %v3690_v8 }
 0x22f   :  { %v3819_v48 = vpop.f32.mrf.mxu3 }
 0x230   :  { %v3789_v3 = vadd.f32 %v3788_v41, %v3751_v43  ;;  %v8591_v43 = vpop.permute.xlu1 %4440 }
 0x232   :  { %v3820_v32 = vadd.f32 %v3819_v48, %v3789_v3  ;;  %v8579_v4 = vpop.permute.xlu2 %4462  ;;  %v8601_v3 = vpop.permute.xlu0 %4458 }
 0x235   :  { %v3864_v28 = vpop.f32.mrf.mxu0 }
 0x236   :  { %v3865_v1 = vadd.f32 %v3864_v28, %v3820_v32 }
 0x238   :  { %v3893_v38 = vpop.f32.mrf.mxu1  ;;  %v8603_v32 = vpop.permute.xlu1 %4490 }
 0x239   :  { %v3894_v25 = vadd.f32 %v3893_v38, %v3865_v1 }
 0x23a   :  { %v8589_v41 = vpop.permute.xlu2 %4512  ;;  %v8619_v1 = vpop.permute.xlu0 %4494 }
 0x23b   :  { %v3896_v58 = vmul.f32 0.2, %v3894_v25  ;;  %10435 = vst [vmem:[#allocation21_spill] sm:$0xff] %v8589_v41  ;;  %v8840_v41 = vstv %s8757_s19  ;;  %s5742_s19 = sld [smem:[#allocation9 + $0x2]] }
 0x23c   :  { %v3944_v39 = vpop.f32.mrf.mxu2 }
 0x23d   :  { %v3897_v16 = vmax.f32 %v3894_v25, %v3896_v58  ;;  %v3945_v20 = vadd.f32 %v5798_v27, %v3944_v39 }
 0x23f   :  { %3898 = vst [vmem:[#allocation2 + $0xe] sm:$0x1] %v3897_v16  ;;  %v4005_v45 = vpop.f32.mrf.mxu3 }
 0x240   :  { %3899 = vst [vmem:[#allocation2 + $0x1d] sm:$0x2] %v3897_v16  ;;  %v4006_v12 = vadd.f32 %v4005_v45, %v3945_v20  ;;  %v8621_v38 = vpop.permute.xlu1 %4516 }
 0x241   :  { %v4043_v22 = vpop.f32.mrf.mxu0 }
 0x242   :  { %v4044_v36 = vadd.f32 %v4043_v22, %v4006_v12 }
 0x243   :  { %v4074_v53 = vpop.f32.mrf.mxu1 }
 0x244   :  { %v4075_v14 = vadd.f32 %v4074_v53, %v4044_v36 }
 0x245   :  { %v4119_v6 = vpop.f32.mrf.mxu2 }
 0x246   :  { %v4120_v30 = vadd.f32 %v4119_v6, %v4075_v14 }
 0x248   :  { %v4148_v62 = vpop.f32.mrf.mxu3 }
 0x249   :  { %v4149_v29 = vadd.f32 %v4148_v62, %v4120_v30 }
 0x24b   :  { %v4151_v11 = vmul.f32 0.2, %v4149_v29 }
 0x24d   :  { %v4152_v52 = vmax.f32 %v4149_v29, %v4151_v11  ;;  %v8678_v11 = vand.u32 127, %v4159_v46  ;;  %v10443_v46 = vmov 0 }
 0x24f   :  { %4153 = vst [vmem:[#allocation2 + $0xf] sm:$0x1] %v4152_v52  ;;  %vm10349_vm5 = vcmp.ge.s32.totalorder %v8678_v11, 2  ;;  %vm10348_vm8 = vcmp.ge.s32.totalorder %v8678_v11, 1  ;;  %vm10351_vm10 = vcmp.lt.s32.totalorder %v8678_v11, 127  ;;  %vm10350_vm0 = vcmp.lt.s32.totalorder %v8678_v11, 126 }
 0x250   :  { %4154 = vst [vmem:[#allocation2 + $0x1e] sm:$0x2] %v4152_v52  ;;  %v4164_v52 = vand.u32 15, %v8431_v19 }
 0x252   :  { %vm8686_vm6 = vcmp.ge.s32.totalorder %v4164_v52, 2  ;;  %vm8780_vm15 = vcmp.ge.s32.totalorder %v4164_v52, 1  ;;  %v10462_v52 = vmov 0 }
 0x253   :  { %vm8696_vm7 = vmand %vm8686_vm6, %vm10349_vm5 }
 0x254   :  { %v10444_v46 = vsel %vm8696_vm7, 4294967295, %v10443_v46  ;;  %vm8709_vm9 = vmand %vm8686_vm6, %vm10348_vm8 }
 0x255   :  { %10445 = vst [vmem:[#allocation27_spill] sm:$0xff] %v10444_v46  ;;  %vm8753_vm12 = vmand %vm8686_vm6, %vm10351_vm10  ;;  %v8785_v46 = vstv %s5719_s17 }
 0x256   :  { %v8428_v23 = vld [vmem:[#allocation2 + $0x8] sm:$0xff] }
 0x257   :  { %4460 = vrot.lane.b32.xlu1 %v8428_v23, %s5879_s21  ;;  %4438 = vrot.lane.b32.xlu0 %v8428_v23, %s5878_s5  ;;  %v8437_v18 = vld [vmem:[#allocation2 + $0x18] sm:$0xff]  ;;  %v4539_v21 = vrot.slane %v8428_v23, 1  ;;  %v4670_v34 = vrot.slane %v8428_v23, 2  ;;  %v4175_v35 = vrot.slane %v8428_v23, 6  ;;  %v4310_v44 = vrot.slane %v8428_v23, 7 }
 0x258   :  { %4442 = vrot.lane.b32.xlu2 %v8437_v18, %s5878_s5  ;;  %v4541_v5 = vrot.slane %v8437_v18, 1  ;;  %v4672_v61 = vrot.slane %v8437_v18, 2  ;;  %v4177_v9 = vrot.slane %v8437_v18, 6  ;;  %v4312_v57 = vrot.slane %v8437_v18, 7 }
 0x259   :  { %v8452_v51 = vsel %vm10341_vm1, %v4539_v21, %v4540_v47  ;;  %v8460_v56 = vsel %vm10341_vm1, %v4538_v2, %v4539_v21  ;;  %v8468_v37 = vsel %vm10338_vm2, %v4669_v40, %v4670_v34  ;;  %v8472_v13 = vsel %vm10338_vm2, %v4670_v34, %v4671_v54 }
 0x25a   :  { %10431 = vst [vmem:[#allocation17_spill] sm:$0xff] %v8452_v51  ;;  %v8456_v60 = vsel %vm10341_vm1, %v4540_v47, %v4541_v5  ;;  %v8464_v31 = vsel %vm10341_vm1, %v4541_v5, %v4538_v2  ;;  %v8481_v0 = vsel %vm10338_vm2, %v4672_v61, %v4669_v40  ;;  %v8485_v10 = vsel %vm10338_vm2, %v4671_v54, %v4672_v61  ;;  %vm8796_vm2 = vmand %vm8780_vm15, %vm10349_vm5 }
 0x25b   :  { %10432 = vst [vmem:[#allocation18_spill] sm:$0xff] %v8456_v60  ;;  %v8494_v17 = vsel %vm10347_vm3, %v4175_v35, %v4176_v55  ;;  %v8506_v42 = vsel %vm10347_vm3, %v4176_v55, %v4177_v9  ;;  %v8510_v26 = vsel %vm10347_vm3, %v4177_v9, %v4174_v59  ;;  %v8520_v49 = vsel %vm10347_vm3, %v4174_v59, %v4175_v35  ;;  %vm8811_vm1 = vmand %vm8686_vm6, %vm10350_vm0 }
 0x25c   :  { %10433 = vst [vmem:[#allocation19_spill] sm:$0xff] %v8460_v56  ;;  %v8545_v24 = vsel %vm10342_vm4, %v4312_v57, %v4309_v63  ;;  %v8559_v7 = vsel %vm10342_vm4, %v4311_v50, %v4312_v57  ;;  %v8565_v8 = vsel %vm10342_vm4, %v4309_v63, %v4310_v44  ;;  %v8573_v33 = vsel %vm10342_vm4, %v4310_v44, %v4311_v50  ;;  %vm8826_vm4 = vmand %vm8780_vm15, %vm10348_vm8 }
 0x25d   :  { %10434 = vst [vmem:[#allocation20_spill] sm:$0xff] %v8464_v31  ;;  %v10440_v21 = vmov 0  ;;  %v10446_v2 = vmov 0  ;;  %v8714_v40 = vadd.s32 16, %v8431_v19  ;;  %v8718_v61 = vstv %s5717_s2  ;;  %s9301_s2 = sld [smem:[#allocation6 + $0x203]] }
 0x25e   :  { %v10441_v21 = vsel %vm8686_vm6, 4294967295, %v10440_v21  ;;  %v10447_v2 = vsel %vm8709_vm9, 4294967295, %v10446_v2  ;;  %v8722_v55 = vstv %s4200_s15  ;;  %v8738_v50 = vstv %s5718_s16  ;;  %s9316_s15 = sld [smem:[#allocation6 + $0x204]] }
 0x25f   :  { %4496 = vrot.lane.b32.xlu1 %v8437_v18, %s5880_s1  ;;  %4464 = vrot.lane.b32.xlu0 %v8437_v18, %s5879_s21  ;;  %10442 = vst [vmem:[#allocation26_spill] sm:$0xff] %v10441_v21  ;;  %v10334_v9 = vand.u32 15, %v8714_v40  ;;  %v10463_v52 = vsel %vm8796_vm2, 4294967295, %v10462_v52  ;;  %v8830_v21 = vstv %s5720_s18  ;;  %s4830_s18 = sld [smem:[#allocation9]] }
 0x260   :  { %4492 = vrot.lane.b32.xlu2 %v8428_v23, %s5880_s1  ;;  %10448 = vst [vmem:[#allocation28_spill] sm:$0xff] %v10447_v2  ;;  %s10033_s16 = sld [smem:[#allocation9 + $0x204]] }
 0x261   :  { %vm8745_vm11 = vcmp.ge.s32.totalorder %v10334_v9, 2  ;;  %v10454_v9 = vmov 0 }
 0x262   :  { %vm8765_vm13 = vmand %vm8745_vm11, %vm10348_vm8 }
 0x263   :  { %v10455_v9 = vsel %vm8765_vm13, 4294967295, %v10454_v9  ;;  %vm8775_vm14 = vmand %vm8745_vm11, %vm10349_vm5 }
 0x264   :  { %10456 = vst [vmem:[#allocation30_spill] sm:$0xff] %v10455_v9  ;;  %vm8863_vm3 = vmand %vm8745_vm11, %vm10351_vm10 }
 0x267   :  { %4188 = vrot.lane.b32.xlu1 %v8494_v17, %s5878_s5  ;;  %4514 = vrot.lane.b32.xlu0 %v8428_v23, %s5881_s7 }
 0x268   :  { %4518 = vrot.lane.b32.xlu2 %v8437_v18, %s5881_s7 }
 0x26f   :  { %4190 = vrot.lane.b32.xlu1 %v8506_v42, %s5878_s5  ;;  %4184 = vrot.lane.b32.xlu0 %v8510_v26, %s5878_s5 }
 0x270   :  { %4211 = vrot.lane.b32.xlu2 %v8510_v26, %s5879_s21 }
 0x277   :  { %4217 = vrot.lane.b32.xlu1 %v8506_v42, %s5879_s21  ;;  %4186 = vrot.lane.b32.xlu0 %v8520_v49, %s5878_s5 }
 0x278   :  { %4213 = vrot.lane.b32.xlu2 %v8520_v49, %s5879_s21 }
 0x27f   :  { %4256 = vrot.lane.b32.xlu1 %v8494_v17, %s5880_s1  ;;  %4215 = vrot.lane.b32.xlu0 %v8494_v17, %s5879_s21 }
 0x280   :  { %4252 = vrot.lane.b32.xlu2 %v8510_v26, %s5880_s1 }
 0x287   :  { %4281 = vrot.lane.b32.xlu1 %v8520_v49, %s5881_s7  ;;  %4254 = vrot.lane.b32.xlu0 %v8520_v49, %s5880_s1 }
 0x288   :  { %4258 = vrot.lane.b32.xlu2 %v8506_v42, %s5880_s1 }
 0x28f   :  { %4318 = vrot.lane.b32.xlu1 %v8545_v24, %s5878_s5  ;;  %4279 = vrot.lane.b32.xlu0 %v8510_v26, %s5881_s7 }
 0x290   :  { %4283 = vrot.lane.b32.xlu2 %v8494_v17, %s5881_s7 }
 0x297   :  { %4324 = vrot.lane.b32.xlu1 %v8559_v7, %s5878_s5  ;;  %4285 = vrot.lane.b32.xlu0 %v8506_v42, %s5881_s7 }
 0x298   :  { %4320 = vrot.lane.b32.xlu2 %v8565_v8, %s5878_s5 }
 0x29f   :  { %4348 = vrot.lane.b32.xlu1 %v8573_v33, %s5879_s21  ;;  %4322 = vrot.lane.b32.xlu0 %v8573_v33, %s5878_s5 }
 0x2a0   :  { %4344 = vrot.lane.b32.xlu2 %v8545_v24, %s5879_s21 }
 0x2a7   :  { %4386 = vrot.lane.b32.xlu1 %v8565_v8, %s5880_s1  ;;  %4346 = vrot.lane.b32.xlu0 %v8565_v8, %s5879_s21 }
 0x2a8   :  { %4350 = vrot.lane.b32.xlu2 %v8559_v7, %s5879_s21 }
 0x2af   :  { %4410 = vrot.lane.b32.xlu1 %v8545_v24, %s5881_s7  ;;  %4384 = vrot.lane.b32.xlu0 %v8545_v24, %s5880_s1 }
 0x2b0   :  { %4388 = vrot.lane.b32.xlu2 %v8573_v33, %s5880_s1 }
 0x2b2   :  { %v8599_v48 = vpop.permute.xlu2 %4442 }
 0x2b7   :  { %4416 = vrot.lane.b32.xlu1 %v8559_v7, %s5881_s7  ;;  %4390 = vrot.lane.b32.xlu0 %v8559_v7, %s5880_s1 }
 0x2b8   :  { %4412 = vrot.lane.b32.xlu2 %v8565_v8, %s5881_s7 }
 0x2ba   :  { %v8611_v28 = vpop.permute.xlu2 %4492 }
 0x2bb   :  { %10436 = vst [vmem:[#allocation22_spill] sm:$0xff] %v8611_v28  ;;  %v8843_v28 = vstv %s8769_s20  ;;  %s5743_s20 = sld [smem:[#allocation9 + $0x3]] }
 0x2bf   :  { %4549 = vrot.lane.b32.xlu1 %v8452_v51, %s5878_s5  ;;  %4414 = vrot.lane.b32.xlu0 %v8573_v33, %s5881_s7 }
 0x2c0   :  { %4551 = vrot.lane.b32.xlu2 %v8456_v60, %s5878_s5 }
 0x2c2   :  { %v8623_v25 = vpop.permute.xlu2 %4518 }
 0x2c3   :  { %10437 = vst [vmem:[#allocation23_spill] sm:$0xff] %v8623_v25 }
 0x2c7   :  { %4573 = vrot.lane.b32.xlu1 %v8460_v56, %s5879_s21  ;;  %4547 = vrot.lane.b32.xlu0 %v8460_v56, %s5878_s5 }
 0x2c8   :  { %4575 = vrot.lane.b32.xlu2 %v8452_v51, %s5879_s21 }
 0x2c9   :  { %v8631_v27 = vpop.permute.xlu1 %4460  ;;  %v8633_v58 = vpop.permute.xlu0 %4438 }
 0x2ca   :  { %v4212_v39 = vpop.permute.xlu2 %4211 }
 0x2cb   :  { %v4223_v35 = vsel %vm8709_vm9, %v4212_v39, 0.0  ;;  %v4237_v39 = vsel %vm8686_vm6, %v8510_v26, 0.0 }
 0x2cc   :  { %v4229_v57 = vmul.f32 %v8718_v61, %v4223_v35  ;;  %v10451_v35 = vmov 0 }
 0x2cd   :  { %v10452_v35 = vsel %vm8753_vm12, 4294967295, %v10451_v35 }
 0x2ce   :  { %10453 = vst [vmem:[#allocation29_spill] sm:$0xff] %v10452_v35 }
 0x2cf   :  { %4579 = vrot.lane.b32.xlu1 %v8464_v31, %s5879_s21  ;;  %4553 = vrot.lane.b32.xlu0 %v8464_v31, %s5878_s5 }
 0x2d0   :  { %4613 = vrot.lane.b32.xlu2 %v8460_v56, %s5880_s1 }
 0x2d1   :  { %v8641_v16 = vpop.permute.xlu1 %4496  ;;  %v8643_v20 = vpop.permute.xlu0 %4464 }
 0x2d2   :  { %10438 = vst [vmem:[#allocation24_spill] sm:$0xff] %v8641_v16  ;;  %v8645_v45 = vpop.permute.xlu2 %4213 }
 0x2d7   :  { %4617 = vrot.lane.b32.xlu1 %v8456_v60, %s5880_s1  ;;  %4577 = vrot.lane.b32.xlu0 %v8456_v60, %s5879_s21 }
 0x2d8   :  { %4619 = vrot.lane.b32.xlu2 %v8464_v31, %s5880_s1 }
 0x2d9   :  { %v8653_v12 = vpop.permute.xlu1 %4188  ;;  %v8655_v22 = vpop.permute.xlu0 %4514 }
 0x2da   :  { %10439 = vst [vmem:[#allocation25_spill] sm:$0xff] %v8655_v22  ;;  %v8657_v36 = vpop.permute.xlu2 %4252 }
 0x2df   :  { %4641 = vrot.lane.b32.xlu1 %v8452_v51, %s5881_s7  ;;  %4615 = vrot.lane.b32.xlu0 %v8452_v51, %s5880_s1 }
 0x2e0   :  { %4643 = vrot.lane.b32.xlu2 %v8456_v60, %s5881_s7  ;;  %v4264_v60 = vsel %vm8753_vm12, %v8657_v36, 0.0  ;;  %v10464_v36 = vmov 0 }
 0x2e1   :  { %v4191_v53 = vpop.permute.xlu1 %4190  ;;  %v4185_v14 = vpop.permute.xlu0 %4184  ;;  %v10465_v36 = vsel %vm8811_vm1, 4294967295, %v10464_v36 }
 0x2e2   :  { %v8665_v6 = vpop.permute.xlu2 %4258  ;;  %v4196_v54 = vsel %vm8696_vm7, %v4185_v14, 0.0 }
 0x2e3   :  { %v4202_v59 = vmul.f32 %v8722_v55, %v4196_v54 }
 0x2e5   :  { %v4233_v2 = vadd.f32 %v4229_v57, %v4202_v59  ;;  %v10457_v59 = vmov 0  ;;  %v10460_v57 = vmov 0 }
 0x2e6   :  { %v10458_v59 = vsel %vm8775_vm14, 4294967295, %v10457_v59  ;;  %v10461_v57 = vsel %vm8780_vm15, 4294967295, %v10460_v57 }
 0x2e7   :  { %4678 = vrot.lane.b32.xlu1 %v8468_v37, %s5878_s5  ;;  %4639 = vrot.lane.b32.xlu0 %v8460_v56, %s5881_s7  ;;  %10459 = vst [vmem:[#allocation31_spill] sm:$0xff] %v10458_v59 }
 0x2e8   :  { %4680 = vrot.lane.b32.xlu2 %v8472_v13, %s5878_s5 }
 0x2e9   :  { %v4218_v30 = vpop.permute.xlu1 %4217  ;;  %v8673_v62 = vpop.permute.xlu0 %4186 }
 0x2ea   :  { %v8675_v29 = vpop.permute.xlu2 %4283  ;;  %v4226_v26 = vsel %vm10348_vm8, %v4218_v30, 0.0  ;;  %v4243_v30 = vmul.f32 %v8738_v50, %v4237_v39 }
 0x2eb   :  { %v4232_v56 = vmul.f32 %v8718_v61, %v4226_v26  ;;  %v10466_v26 = vmov 0 }
 0x2ec   :  { %v4247_v39 = vadd.f32 %v4243_v30, %v4233_v2  ;;  %v10467_v26 = vsel %vm8826_vm4, 4294967295, %v10466_v26 }
 0x2ef   :  { %4684 = vrot.lane.b32.xlu1 %v8481_v0, %s5878_s5  ;;  %4645 = vrot.lane.b32.xlu0 %v8464_v31, %s5881_s7  ;;  %v4199_v31 = vsel %vm10349_vm5, %v4191_v53, 0.0  ;;  %v4198_v53 = vsel %vm8775_vm14, %v8653_v12, 0.0 }
 0x2f0   :  { %4704 = vrot.lane.b32.xlu2 %v8468_v37, %s5879_s21  ;;  %v4205_v2 = vmul.f32 %v8722_v55, %v4199_v31  ;;  %v4204_v22 = vmul.f32 %v8722_v55, %v4198_v53  ;;  %v4267_v53 = vsel %vm10351_vm10, %v8665_v6, 0.0  ;;  %v4224_v6 = vsel %vm10348_vm8, %v8645_v45, 0.0  ;;  %vm8894_vm8 = vmand %vm8745_vm11, %vm10350_vm0 }
 0x2f1   :  { %v8700_v5 = vpop.permute.xlu1 %4256  ;;  %v4216_v34 = vpop.permute.xlu0 %4215 }
 0x2f2   :  { %v8703_v47 = vpop.permute.xlu2 %4320  ;;  %v4225_v51 = vsel %vm8765_vm13, %v4216_v34, 0.0  ;;  %v4270_v34 = vmul.f32 %v8785_v46, %v4264_v60  ;;  %v4236_v9 = vadd.f32 %v4232_v56, %v4205_v2 }
 0x2f3   :  { %v4231_v59 = vmul.f32 %v8718_v61, %v4225_v51 }
 0x2f4   :  { %v4274_v25 = vadd.f32 %v4270_v34, %v4247_v39  ;;  %v4197_v34 = vsel %vm10349_vm5, %v8673_v62, 0.0 }
 0x2f7   :  { %4708 = vrot.lane.b32.xlu1 %v8485_v10, %s5879_s21  ;;  %4682 = vrot.lane.b32.xlu0 %v8485_v10, %s5878_s5 }
 0x2f8   :  { %4710 = vrot.lane.b32.xlu2 %v8481_v0, %s5879_s21 }
 0x2f9   :  { %v8733_v63 = vpop.permute.xlu1 %4281  ;;  %v8735_v44 = vpop.permute.xlu0 %4254 }
 0x2fa   :  { %v4345_v14 = vpop.permute.xlu2 %4344 }
 0x2fb   :  { %v4356_v51 = vsel %vm8826_vm4, %v4345_v14, 0.0  ;;  %vm10478_vm4 = vcmp.ge.s32.totalorder %v8678_v11, 2 }
 0x2ff   :  { %4746 = vrot.lane.b32.xlu1 %v8472_v13, %s5880_s1  ;;  %4706 = vrot.lane.b32.xlu0 %v8472_v13, %s5879_s21 }
 0x300   :  { %4748 = vrot.lane.b32.xlu2 %v8485_v10, %s5880_s1 }
 0x301   :  { %v4319_v30 = vpop.permute.xlu1 %4318  ;;  %v4280_v35 = vpop.permute.xlu0 %4279 }
 0x302   :  { %v4330_v12 = vsel %vm8796_vm2, %v4319_v30, 0.0  ;;  %v4351_v60 = vpop.permute.xlu2 %4350  ;;  %v4291_v31 = vsel %vm8811_vm1, %v4280_v35, 0.0  ;;  %v4246_v30 = vmul.f32 %v8738_v50, %v8506_v42  ;;  %v4239_v35 = vsel %vm8745_vm11, %v8494_v17, 0.0 }
 0x303   :  { %v4297_v16 = vmul.f32 %v8830_v21, %v4291_v31  ;;  %v4336_v56 = vmul.f32 %v8840_v41, %v4330_v12  ;;  %v10468_v42 = vmov 0  ;;  %v4235_v17 = vadd.f32 %v4231_v59, %v4204_v22 }
 0x304   :  { %v10469_v42 = vsel %vm8863_vm3, 4294967295, %v10468_v42  ;;  %v4250_v14 = vadd.f32 %v4246_v30, %v4236_v9  ;;  %v4245_v62 = vmul.f32 %v8738_v50, %v4239_v35  ;;  %v4273_v22 = vmul.f32 %v8785_v46, %v4267_v53 }
 0x305   :  { %v4301_v39 = vadd.f32 %v4297_v16, %v4274_v25  ;;  %v4362_v25 = vmul.f32 %v8843_v28, %v4356_v51  ;;  %v4203_v9 = vmul.f32 %v8722_v55, %v4197_v34  ;;  %v4266_v59 = vsel %vm8863_vm3, %v8700_v5, 0.0 }
 0x306   :  { %v4249_v51 = vadd.f32 %v4245_v62, %v4235_v17  ;;  %v10470_v5 = vmov 0  ;;  %v4277_v55 = vadd.f32 %v4273_v22, %v4250_v14  ;;  %v4272_v53 = vmul.f32 %v8785_v46, %v4266_v59 }
 0x307   :  { %v4340_v16 = vadd.f32 %v4336_v56, %v4301_v39  ;;  %4770 = vrot.lane.b32.xlu1 %v8468_v37, %s5881_s7  ;;  %4744 = vrot.lane.b32.xlu0 %v8468_v37, %s5880_s1  ;;  %v4230_v56 = vmul.f32 %v8718_v61, %v4224_v6  ;;  %v10471_v5 = vsel %vm8894_vm8, 4294967295, %v10470_v5  ;;  %v4265_v34 = vsel %vm10351_vm10, %v8735_v44, 0.0 }
 0x308   :  { %4772 = vrot.lane.b32.xlu2 %v8472_v13, %s5881_s7  ;;  %v10474_v6 = vmov 0  ;;  %v4293_v62 = vsel %vm8894_vm8, %v8675_v29, 0.0  ;;  %v4244_v44 = vmul.f32 %v8738_v50, %v8520_v49  ;;  %v4271_v22 = vmul.f32 %v8785_v46, %v4265_v34 }
 0x309   :  { %v4325_v2 = vpop.permute.xlu1 %4324  ;;  %v4286_v12 = vpop.permute.xlu0 %4285  ;;  %v8883_v31 = vadd.f32 %v4362_v25, %v4340_v16  ;;  %v4234_v17 = vadd.f32 %v4230_v56, %v4203_v9  ;;  %v10473_v16 = vand.u32 15, %v8714_v40  ;;  %v4276_v40 = vadd.f32 %v4272_v53, %v4249_v51 }
 0x30a   :  { %v4333_v45 = vsel %vm10349_vm5, %v4325_v2, 0.0  ;;  %v4389_v30 = vpop.permute.xlu2 %4388  ;;  %v4294_v35 = vsel %vm10350_vm0, %v4286_v12, 0.0  ;;  %vm10472_vm5 = vcmp.ge.s32.totalorder %v8678_v11, 1  ;;  %v10479_v49 = vmov 0 }
 0x30b   :  { %v4300_v39 = vmul.f32 %v8830_v21, %v4294_v35  ;;  %v4359_v61 = vsel %vm10472_vm5, %v4351_v60, 0.0  ;;  %v4339_v25 = vmul.f32 %v8840_v41, %v4333_v45  ;;  %vm8908_vm0 = vcmp.ge.s32.totalorder %v10473_v16, 1 }
 0x30c   :  { %v10475_v6 = vsel %vm8908_vm0, 4294967295, %v10474_v6  ;;  %vm8921_vm10 = vmand %vm8908_vm0, %vm10472_vm5  ;;  %v10476_v60 = vmov 0  ;;  %v4365_v9 = vmul.f32 %v8843_v28, %v4359_v61  ;;  %v4299_v29 = vmul.f32 %v8830_v21, %v4293_v62 }
 0x30d   :  { %v4304_v14 = vadd.f32 %v4300_v39, %v4277_v55  ;;  %v10477_v60 = vsel %vm8921_vm10, 4294967295, %v10476_v60  ;;  %vm8935_vm5 = vmand %vm8908_vm0, %vm10478_vm4  ;;  %v4248_v46 = vadd.f32 %v4244_v44, %v4234_v17  ;;  %vm10481_vm2 = vcmp.lt.s32.totalorder %v8678_v11, 126 }
 0x30e   :  { %v10480_v49 = vsel %vm8935_vm5, 4294967295, %v10479_v49  ;;  %v4292_v51 = vsel %vm10481_vm2, %v8733_v63, 0.0  ;;  %vm10482_vm4 = vcmp.lt.s32.totalorder %v8678_v11, 127  ;;  %v10483_v39 = vmov 0 }
 0x30f   :  { %v4343_v59 = vadd.f32 %v4339_v25, %v4304_v14  ;;  %4776 = vrot.lane.b32.xlu1 %v8481_v0, %s5881_s7  ;;  %4750 = vrot.lane.b32.xlu0 %v8481_v0, %s5880_s1  ;;  %v4275_v55 = vadd.f32 %v4271_v22, %v4248_v46  ;;  %vm8953_vm8 = vmand %vm8908_vm0, %vm10482_vm4  ;;  %v4303_v53 = vadd.f32 %v4299_v29, %v4276_v40  ;;  %v8958_v63 = vstv %s5723_s3  ;;  %s5744_s3 = sld [smem:[#allocation9 + $0x4]] }
 0x310   :  { %v10484_v39 = vsel %vm8953_vm8, 4294967295, %v10483_v39  ;;  %v4372_v61 = vsel %vm8908_vm0, %v8573_v33, 0.0  ;;  %v4298_v17 = vmul.f32 %v8830_v21, %v4292_v51  ;;  %vm10485_vm2 = vcmp.ge.s32.totalorder %v8678_v11, 2 }
 0x311   :  { %v4349_v50 = vpop.permute.xlu1 %4348  ;;  %v4323_v2 = vpop.permute.xlu0 %4322  ;;  %v8940_v12 = vadd.f32 %v4365_v9, %v4343_v59  ;;  %v4331_v14 = vsel %vm10485_vm2, %v8703_v47, 0.0  ;;  %v8968_v62 = vstv %s5724_s22  ;;  %v4398_v44 = vsel %vm8953_vm8, %v4389_v30, 0.0  ;;  %s5745_s22 = sld [smem:[#allocation9 + $0x80]] }
 0x312   :  { %v4358_v45 = vsel %vm8921_vm10, %v4349_v50, 0.0  ;;  %v4413_v35 = vpop.permute.xlu2 %4412  ;;  %v4332_v56 = vsel %vm8935_vm5, %v4323_v2, 0.0  ;;  %v4302_v40 = vadd.f32 %v4298_v17, %v4275_v55  ;;  %v4378_v33 = vmul.f32 %v8958_v63, %v4372_v61 }
 0x313   :  { %v4338_v34 = vmul.f32 %v8840_v41, %v4332_v56  ;;  %v4364_v25 = vmul.f32 %v8843_v28, %v4358_v45  ;;  %v4337_v21 = vmul.f32 %v8840_v41, %v4331_v14  ;;  %v4404_v9 = vmul.f32 %v8968_v62, %v4398_v44 }
 0x314   :  { %vm10486_vm4 = vcmp.ge.s32.totalorder %v8678_v11, 1  ;;  %vm10487_vm2 = vcmp.lt.s32.totalorder %v8678_v11, 127  ;;  %v4377_v45 = vmul.f32 %v8958_v63, %v8565_v8  ;;  %v8988_v55 = vstv %s5725_s23  ;;  %s5746_s23 = sld [smem:[#allocation9 + $0x81]] }
 0x315   :  { %v4342_v16 = vadd.f32 %v4338_v34, %v4303_v53  ;;  %v4341_v50 = vadd.f32 %v4337_v21, %v4302_v40  ;;  %vm10488_vm8 = vcmp.lt.s32.totalorder %v8678_v11, 126  ;;  %v4370_v34 = vsel %vm8780_vm15, %v8545_v24, 0.0 }
 0x316   :  { %v4423_v53 = vsel %vm10488_vm8, %v4413_v35, 0.0  ;;  %v10492_v35 = vmov 0  ;;  %v4376_v14 = vmul.f32 %v8958_v63, %v4370_v34  ;;  %v4449_v40 = vstv %s5726_s24  ;;  %s5748_s24 = sld [smem:[#allocation9 + $0x83]] }
 0x317   :  { %v4368_v22 = vadd.f32 %v4364_v25, %v4342_v16  ;;  %4774 = vrot.lane.b32.xlu0 %v8485_v10, %s5881_s7  ;;  %v4429_v25 = vmul.f32 %v8988_v55, %v4423_v53  ;;  %vm10495_vm5 = vcmp.ge.s32.totalorder %v8678_v11, 1  ;;  %v4481_v53 = vstv %s5728_s0  ;;  %s5750_s0 = sld [smem:[#allocation9 + $0x100]] }
 0x319   :  { %v4387_v59 = vpop.permute.xlu1 %4386  ;;  %v4347_v29 = vpop.permute.xlu0 %4346  ;;  %v4382_v47 = vadd.f32 %v4378_v33, %v4368_v22  ;;  %v4467_v22 = vsel %vm10495_vm5, %v8631_v27, 0.0 }
 0x31a   :  { %v8977_v46 = vpop.permute.xlu2 %4551  ;;  %v4357_v30 = vsel %vm10486_vm4, %v4347_v29, 0.0  ;;  %v4397_v41 = vsel %vm10487_vm2, %v4387_v59, 0.0  ;;  %vm10489_vm4 = vmmov %vm10488_vm8  ;;  %v4380_v29 = vadd.f32 %v4376_v14, %v8883_v31  ;;  %v4483_v31 = vmul.f32 %v4481_v53, %v8428_v23 }
 0x31b   :  { %v4363_v2 = vmul.f32 %v8843_v28, %v4357_v30  ;;  %v8982_v51 = vadd.f32 %v4404_v9, %v4382_v47  ;;  %vm8996_vm10 = vmand %vm8780_vm15, %vm10489_vm4  ;;  %v10490_v28 = vmov 0  ;;  %v4403_v8 = vmul.f32 %v8968_v62, %v4397_v41 }
 0x31c   :  { %v10491_v28 = vsel %vm8996_vm10, 4294967295, %v10490_v28  ;;  %vm9008_vm8 = vmand %vm8780_vm15, %vm10487_vm2  ;;  %vm10494_vm4 = vcmp.ge.s32.totalorder %v8678_v11, 2 }
 0x31d   :  { %v4367_v56 = vadd.f32 %v4363_v2, %v4341_v50  ;;  %v10493_v35 = vsel %vm9008_vm8, 4294967295, %v10492_v35  ;;  %v4445_v17 = vsel %vm10494_vm4, %v8633_v58, 0.0  ;;  %vm10496_vm2 = vmmov %vm10494_vm4  ;;  %v4471_v50 = vstv %s5727_s25  ;;  %s5749_s25 = sld [smem:[#allocation9 + $0x84]] }
 0x31e   :  { %v4451_v9 = vmul.f32 %v4449_v40, %v4445_v17  ;;  %v4444_v30 = vsel %vm10496_vm2, %v8555_v15, 0.0  ;;  %v4473_v27 = vmul.f32 %v4471_v50, %v4467_v22  ;;  %v4379_v15 = vmul.f32 %v8958_v63, %v8559_v7 }
 0x31f   :  { %v4381_v61 = vadd.f32 %v4377_v45, %v4367_v56  ;;  %v4466_v56 = vsel %vm10495_vm5, %v8601_v3, 0.0  ;;  %v4450_v34 = vmul.f32 %v4449_v40, %v4444_v30  ;;  %vm10497_vm4 = vcmp.lt.s32.totalorder %v8678_v11, 126 }
 0x320   :  { %v4472_v17 = vmul.f32 %v4471_v50, %v4466_v56  ;;  %vm10498_vm2 = vcmp.lt.s32.totalorder %v8678_v11, 127  ;;  %vm10499_vm5 = vcmp.ge.s32.totalorder %v8678_v11, 2 }
 0x321   :  { %v4407_v16 = vadd.f32 %v4403_v8, %v4381_v61  ;;  %v4411_v24 = vpop.permute.xlu1 %4410  ;;  %v4385_v44 = vpop.permute.xlu0 %4384  ;;  %v4447_v7 = vsel %vm10499_vm5, %v8599_v48, 0.0 }
 0x322   :  { %v4422_v33 = vsel %vm8996_vm10, %v4411_v24, 0.0  ;;  %v9022_v21 = vpop.permute.xlu2 %4575  ;;  %v4396_v58 = vsel %vm9008_vm8, %v4385_v44, 0.0  ;;  %vm10530_vm8 = vcmp.ge.s32.totalorder %v8678_v11, 2 }
 0x323   :  { %v4433_v59 = vadd.f32 %v4429_v25, %v4407_v16  ;;  %v4402_v47 = vmul.f32 %v8968_v62, %v4396_v58  ;;  %v4428_v41 = vmul.f32 %v8988_v55, %v4422_v33  ;;  %v4383_v33 = vadd.f32 %v4379_v15, %v8940_v12  ;;  %v5807_v58 = vld [vmem:[#allocation2] sm:$0xff] }
 0x324   :  { %v4453_v12 = vmul.f32 %v4449_v40, %v4447_v7 }
 0x325   :  { %v4455_v2 = vadd.f32 %v4451_v9, %v4433_v59  ;;  %v4406_v45 = vadd.f32 %v4402_v47, %v4380_v29  ;;  %v4482_v9 = vmul.f32 %v5807_v58, %v4481_v53  ;;  %v9093_v58 = vstv %s5731_s28  ;;  %s5754_s28 = sld [smem:[#allocation9 + $0x104]] }
 0x327   :  { %v4432_v8 = vadd.f32 %v4428_v41, %v4406_v45  ;;  %v4477_v61 = vadd.f32 %v4473_v27, %v4455_v2 }
 0x329   :  { %v4454_v25 = vadd.f32 %v4450_v34, %v4432_v8  ;;  %v4417_v16 = vpop.permute.xlu1 %4416  ;;  %v4391_v24 = vpop.permute.xlu0 %4390  ;;  %v9038_v14 = vadd.f32 %v4483_v31, %v4477_v61  ;;  %v4485_v31 = vmul.f32 %v4481_v53, %v8437_v18 }
 0x32a   :  { %v4425_v44 = vsel %vm10497_vm4, %v4417_v16, 0.0  ;;  %v4399_v3 = vsel %vm10498_vm2, %v4391_v24, 0.0  ;;  %v9049_v63 = vpop.permute.xlu2 %4613  ;;  %vm10500_vm4 = vcmp.ge.s32.totalorder %v8678_v11, 1  ;;  %vm10501_vm2 = vcmp.lt.s32.totalorder %v8678_v11, 126 }
 0x32b   :  { %v4476_v22 = vadd.f32 %v4472_v17, %v4454_v25  ;;  %v4405_v23 = vmul.f32 %v8968_v62, %v4399_v3  ;;  %v4431_v59 = vmul.f32 %v8988_v55, %v4425_v44  ;;  %v4469_v30 = vsel %vm10500_vm4, %v8643_v20, 0.0  ;;  %vm9061_vm10 = vmand %vm8908_vm0, %vm10501_vm2 }
 0x32c   :  { %v10502_v62 = vmov 0  ;;  %v4475_v48 = vmul.f32 %v4471_v50, %v4469_v30  ;;  %v4446_v20 = vsel %vm10499_vm5, %v8591_v43, 0.0  ;;  %v4468_v61 = vsel %vm10500_vm4, %v8579_v4, 0.0 }
 0x32d   :  { %v4409_v29 = vadd.f32 %v4405_v23, %v4383_v33  ;;  %v9052_v47 = vadd.f32 %v4482_v9, %v4476_v22  ;;  %v10503_v62 = vsel %vm9061_vm10, 4294967295, %v10502_v62  ;;  %v4452_v17 = vmul.f32 %v4449_v40, %v4446_v20 }
 0x32e   :  { %v4474_v15 = vmul.f32 %v4471_v50, %v4468_v61  ;;  %v9082_v44 = vstv %s5729_s26  ;;  %vm10504_vm2 = vcmp.lt.s32.totalorder %v8678_v11, 127  ;;  %vm10505_vm5 = vcmp.lt.s32.totalorder %v8678_v11, 126  ;;  %s5751_s26 = sld [smem:[#allocation9 + $0x101]] }
 0x32f   :  { %v4435_v27 = vadd.f32 %v4431_v59, %v4409_v29  ;;  %v4500_v18 = vsel %vm10504_vm2, %v8619_v1, 0.0  ;;  %v9091_v50 = vstv %s5730_s27  ;;  %vm10506_vm4 = vcmp.ge.s32.totalorder %v8678_v11, 2  ;;  %s5753_s27 = sld [smem:[#allocation9 + $0x103]] }
 0x330   :  { %v4506_v40 = vmul.f32 %v9082_v44, %v4500_v18  ;;  %v4561_v1 = vsel %vm10506_vm4, %v8977_v46, 0.0  ;;  %v9115_v46 = vadd.s32 8, %v8431_v19 }
 0x331   :  { %v4457_v2 = vadd.f32 %v4453_v12, %v4435_v27  ;;  %v9065_v41 = vpop.permute.xlu1 %4549  ;;  %v4415_v45 = vpop.permute.xlu0 %4414  ;;  %v4567_v7 = vmul.f32 %v9093_v58, %v4561_v1 }
 0x332   :  { %v4424_v56 = vsel %vm9061_vm10, %v4415_v45, 0.0  ;;  %v9080_v43 = vpop.permute.xlu2 %4619  ;;  %vm10512_vm10 = vcmp.ge.s32.totalorder %v8678_v11, 2 }
 0x333   :  { %v4479_v34 = vadd.f32 %v4475_v48, %v4457_v2  ;;  %v4430_v8 = vmul.f32 %v8988_v55, %v4424_v56  ;;  %v5808_v55 = vld [vmem:[#allocation2 + $0x10] sm:$0xff]  ;;  %v10371_v56 = vand.u32 15, %v9115_v46 }
 0x334   :  { %v4484_v3 = vmul.f32 %v5808_v55, %v4481_v53 }
 0x335   :  { %v4434_v25 = vadd.f32 %v4430_v8, %v8982_v51  ;;  %v9078_v16 = vadd.f32 %v4485_v31, %v4479_v34  ;;  %v4522_v51 = vsel %vm10505_vm5, %v8621_v38, 0.0  ;;  %v4498_v8 = vsel %vm10504_vm2, %v8603_v32, 0.0  ;;  %v10507_v31 = vld [vmem:[#allocation22_spill] sm:$0xff]  ;;  %vm10508_vm5 = vmmov %vm10504_vm2 }
 0x336   :  { %v4528_v53 = vmul.f32 %v9091_v50, %v4522_v51  ;;  %v4499_v61 = vsel %vm10508_vm5, %v10507_v31, 0.0  ;;  %vm9132_vm4 = vcmp.lt.s32.totalorder %v10371_v56, 15  ;;  %v4504_v32 = vmul.f32 %v9082_v44, %v4498_v8  ;;  %vm10518_vm5 = vmmov %vm10512_vm10 }
 0x337   :  { %v4456_v24 = vadd.f32 %v4452_v17, %v4434_v25  ;;  %v10509_v17 = vmov 0  ;;  %v9137_v25 = vadd.s32 24, %v8431_v19  ;;  %vm9143_vm0 = vmand %vm9132_vm4, %vm10512_vm10  ;;  %vm10517_vm2 = vcmp.lt.s32.totalorder %v8678_v11, 126 }
 0x338   :  { %v10510_v17 = vsel %vm9132_vm4, 4294967295, %v10509_v17  ;;  %v4505_v55 = vmul.f32 %v9082_v44, %v4499_v61  ;;  %vm10520_vm10 = vmmov %vm10517_vm2  ;;  %v4560_v1 = vsel %vm9143_vm0, %v9065_v41, 0.0  ;;  %v10522_v31 = vmov 0 }
 0x339   :  { %v4478_v22 = vadd.f32 %v4474_v15, %v4456_v24  ;;  %v4574_v4 = vpop.permute.xlu1 %4573  ;;  %v4548_v33 = vpop.permute.xlu0 %4547  ;;  %10511 = vst [vmem:[#allocation22_spill] sm:$0xff] %v10510_v17  ;;  %v10513_v15 = vmov 0  ;;  %v10516_v24 = vld [vmem:[#allocation21_spill] sm:$0xff]  ;;  %v4566_v41 = vmul.f32 %v9093_v58, %v4560_v1  ;;  %v10527_v61 = vmov 0 }
 0x33a   :  { %v9100_v29 = vpop.permute.xlu2 %4643  ;;  %v10514_v15 = vsel %vm9143_vm0, 4294967295, %v10513_v15  ;;  %v4520_v18 = vsel %vm10517_vm2, %v10516_v24, 0.0  ;;  %vm10521_vm2 = vcmp.ge.s32.totalorder %v8678_v11, 1 }
 0x33b   :  { %v4488_v23 = vadd.f32 %v4484_v3, %v4478_v22  ;;  %10515 = vst [vmem:[#allocation32_spill] sm:$0xff] %v10514_v15  ;;  %v4559_v3 = vsel %vm10518_vm5, %v4548_v33, 0.0  ;;  %v4526_v33 = vmul.f32 %v9091_v50, %v4520_v18  ;;  %vm9172_vm5 = vmand %vm9132_vm4, %vm10521_vm2 }
 0x33c   :  { %v10523_v31 = vsel %vm9172_vm5, 4294967295, %v10522_v31 }
 0x33d   :  { %v4510_v9 = vadd.f32 %v4506_v40, %v4488_v23  ;;  %v10519_v40 = vld [vmem:[#allocation25_spill] sm:$0xff]  ;;  %10524 = vst [vmem:[#allocation21_spill] sm:$0xff] %v10523_v31 }
 0x33e   :  { %v4521_v23 = vsel %vm10520_vm10, %v10519_v40, 0.0  ;;  %vm10526_vm10 = vcmp.lt.s32.totalorder %v8678_v11, 127  ;;  %v4590_v40 = vstv %s5732_s29  ;;  %s5755_s29 = sld [smem:[#allocation9 + $0x180]] }
 0x33f   :  { %v4532_v59 = vadd.f32 %v4528_v53, %v4510_v9  ;;  %v10370_v53 = vand.u32 15, %v9137_v25  ;;  %v4508_v9 = vadd.f32 %v4504_v32, %v9052_v47  ;;  %v4527_v8 = vmul.f32 %v9091_v50, %v4521_v23  ;;  %v10525_v47 = vld [vmem:[#allocation24_spill] sm:$0xff] }
 0x340   :  { %v4586_v23 = vsel %vm9172_vm5, %v9022_v21, 0.0 }
 0x341   :  { %v9102_v38 = vpop.permute.xlu1 %4579  ;;  %v9104_v30 = vpop.permute.xlu0 %4553  ;;  %v9106_v12 = vadd.f32 %v4567_v7, %v4532_v59  ;;  %v4509_v7 = vadd.f32 %v4505_v55, %v9038_v14  ;;  %v4565_v59 = vmul.f32 %v9093_v58, %v4559_v3  ;;  %v4501_v14 = vsel %vm10526_vm10, %v10525_v47, 0.0  ;;  %v10537_v47 = vld [vmem:[#allocation23_spill] sm:$0xff] }
 0x342   :  { %v9112_v2 = vpop.permute.xlu2 %4680  ;;  %vm9182_vm0 = vcmp.lt.s32.totalorder %v10370_v53, 15  ;;  %v4530_v32 = vadd.f32 %v4526_v33, %v4508_v9  ;;  %v4585_v55 = vsel %vm10521_vm2, %v4574_v4, 0.0  ;;  %v10531_v3 = vmov 0  ;;  %vm9206_vm2 = vmand %vm9132_vm4, %vm10526_vm10 }
 0x343   :  { %v10528_v61 = vsel %vm9182_vm0, 4294967295, %v10527_v61  ;;  %v4531_v18 = vadd.f32 %v4527_v8, %v4509_v7  ;;  %vm9194_vm15 = vmand %vm9182_vm0, %vm10530_vm8  ;;  %v4507_v9 = vmul.f32 %v9082_v44, %v4501_v14  ;;  %v10534_v4 = vmov 0 }
 0x344   :  { %10529 = vst [vmem:[#allocation25_spill] sm:$0xff] %v10528_v61  ;;  %v10532_v3 = vsel %vm9194_vm15, 4294967295, %v10531_v3  ;;  %v4569_v1 = vadd.f32 %v4565_v59, %v4530_v32  ;;  %v10535_v4 = vsel %vm9206_vm2, 4294967295, %v10534_v4  ;;  %vm10538_vm8 = vcmp.lt.s32.totalorder %v8678_v11, 126 }
 0x345   :  { %10533 = vst [vmem:[#allocation24_spill] sm:$0xff] %v10532_v3  ;;  %v4570_v7 = vadd.f32 %v4566_v41, %v4531_v18  ;;  %v4523_v21 = vsel %vm10538_vm8, %v10537_v47, 0.0  ;;  %v4591_v59 = vmul.f32 %v4590_v40, %v4585_v55  ;;  %v4562_v44 = vsel %vm9194_vm15, %v9104_v30, 0.0  ;;  %v10539_v18 = vld [vmem:[#allocation17_spill] sm:$0xff] }
 0x346   :  { %10536 = vst [vmem:[#allocation33_spill] sm:$0xff] %v10535_v4  ;;  %v4592_v41 = vmul.f32 %v4590_v40, %v4586_v23  ;;  %v4511_v14 = vadd.f32 %v4507_v9, %v9078_v16  ;;  %v4604_v32 = vstv %s5733_s30  ;;  %v4600_v53 = vsel %vm9132_vm4, %v10539_v18, 0.0  ;;  %s5756_s30 = sld [smem:[#allocation9 + $0x181]] }
 0x347   :  { %v4595_v56 = vadd.f32 %v4591_v59, %v4569_v1  ;;  %v4529_v47 = vmul.f32 %v9091_v50, %v4523_v21  ;;  %vm10540_vm10 = vcmp.ge.s32.totalorder %v8678_v11, 1  ;;  %v10541_v30 = vmov 0  ;;  %v10544_v1 = vld [vmem:[#allocation19_spill] sm:$0xff] }
 0x348   :  { %v4596_v55 = vadd.f32 %v4592_v41, %v4570_v7  ;;  %vm9232_vm8 = vmand %vm9182_vm0, %vm10540_vm10  ;;  %v4568_v16 = vmul.f32 %v9093_v58, %v4562_v44  ;;  %v9239_v23 = vstv %s5734_s10  ;;  %v4605_v50 = vmul.f32 %v4604_v32, %v10544_v1  ;;  %s5757_s10 = sld [smem:[#allocation9 + $0x182]] }
 0x349   :  { %v9108_v27 = vpop.permute.xlu1 %4617  ;;  %v9110_v48 = vpop.permute.xlu0 %4577  ;;  %v10542_v30 = vsel %vm9232_vm8, 4294967295, %v10541_v30  ;;  %v4533_v7 = vadd.f32 %v4529_v47, %v4511_v14  ;;  %vm10546_vm10 = vcmp.lt.s32.totalorder %v8678_v11, 126  ;;  %v10547_v58 = vmov 0 }
 0x34a   :  { %v9122_v34 = vpop.permute.xlu2 %4704  ;;  %10543 = vst [vmem:[#allocation23_spill] sm:$0xff] %v10542_v30  ;;  %vm9251_vm5 = vmand %vm9132_vm4, %vm10546_vm10  ;;  %v4588_v59 = vsel %vm9232_vm8, %v9102_v38, 0.0  ;;  %v9263_v41 = vstv %s5735_s11  ;;  %v10552_v38 = vand.u32 15, %v9115_v46  ;;  %vm10560_vm8 = vcmp.lt.s32.totalorder %v8678_v11, 127  ;;  %s5758_s11 = sld [smem:[#allocation9 + $0x183]] }
 0x34b   :  { %v10548_v58 = vsel %vm9251_vm5, 4294967295, %v10547_v58  ;;  %vm10550_vm15 = vmmov %vm10546_vm10  ;;  %v4572_v14 = vadd.f32 %v4568_v16, %v4533_v7  ;;  %vm10556_vm10 = vcmp.ge.s32.totalorder %v8678_v11, 2  ;;  %v10564_v7 = vld [vmem:[#allocation20_spill] sm:$0xff]  ;;  %v4831_v4 = vstv %s4830_s18  ;;  %s5766_s18 = sld [smem:[#allocation11 + $0x2]] }
 0x34c   :  { %10549 = vst [vmem:[#allocation17_spill] sm:$0xff] %v10548_v58  ;;  %vm9297_vm4 = vmand %vm9182_vm0, %vm10560_vm8  ;;  %vm10569_vm8 = vcmp.ge.s32.totalorder %v8678_v11, 2 }
 0x351   :  { %v9117_v45 = vpop.permute.xlu1 %4641  ;;  %v9119_v20 = vpop.permute.xlu0 %4615 }
 0x352   :  { %v9186_v24 = vpop.permute.xlu2 %4710  ;;  %v4626_v31 = vsel %vm9206_vm2, %v9119_v20, 0.0  ;;  %v4606_v20 = vmul.f32 %v4604_v32, %v4600_v53  ;;  %vm10545_vm2 = vcmp.lt.s32.totalorder %v8678_v11, 127  ;;  %v4652_v16 = vsel %vm9251_vm5, %v9117_v45, 0.0 }
 0x353   :  { %v4625_v9 = vsel %vm10545_vm2, %v9049_v63, 0.0  ;;  %v4632_v21 = vmul.f32 %v9239_v23, %v4626_v31  ;;  %v4609_v63 = vadd.f32 %v4605_v50, %v4595_v56  ;;  %vm10551_vm2 = vcmp.ge.s32.totalorder %v8678_v11, 1 }
 0x354   :  { %v4587_v18 = vsel %vm10551_vm2, %v9110_v48, 0.0  ;;  %v4610_v31 = vadd.f32 %v4606_v20, %v4596_v55  ;;  %v4631_v1 = vmul.f32 %v9239_v23, %v4625_v9  ;;  %v10553_v56 = vmov 0 }
 0x355   :  { %v4594_v55 = vmul.f32 %v4590_v40, %v4588_v59  ;;  %v10557_v20 = vmov 0  ;;  %v10561_v45 = vmov 0  ;;  %v4593_v50 = vmul.f32 %v4590_v40, %v4587_v18 }
 0x356   :  { %v4636_v46 = vadd.f32 %v4632_v21, %v4610_v31  ;;  %v10562_v45 = vsel %vm9297_vm4, 4294967295, %v10561_v45  ;;  %v4635_v9 = vadd.f32 %v4631_v1, %v4609_v63  ;;  %v10565_v21 = vand.u32 15, %v9137_v25 }
 0x357   :  { %10563 = vst [vmem:[#allocation35_spill] sm:$0xff] %v10562_v45  ;;  %v4598_v59 = vadd.f32 %v4594_v55, %v4572_v14  ;;  %v10566_v31 = vmov 0  ;;  %vm10570_vm5 = vcmp.lt.s32.totalorder %v8678_v11, 126  ;;  %v10571_v63 = vmov 0 }
 0x358   :  { %vm9322_vm3 = vmand %vm9182_vm0, %vm10570_vm5  ;;  %v4695_v25 = vstv %s9241_s13  ;;  %v9331_v1 = vstv %s9237_s12  ;;  %s5759_s12 = sld [smem:[#allocation9 + $0x184]] }
 0x359   :  { %v9154_v22 = vpop.permute.xlu1 %4678  ;;  %v4640_v51 = vpop.permute.xlu0 %4639  ;;  %v10572_v63 = vsel %vm9322_vm3, 4294967295, %v10571_v63  ;;  %s9995_s13 = sld [smem:[#allocation9 + $0x202]] }
 0x35a   :  { %v4651_v53 = vsel %vm10550_vm15, %v4640_v51, 0.0  ;;  %v9261_v44 = vpop.permute.xlu2 %4748  ;;  %vm9277_vm15 = vcmp.lt.s32.totalorder %v10552_v38, 14  ;;  %v4658_v38 = vmul.f32 %v9263_v41, %v4652_v16  ;;  %v4690_v40 = vsel %vm10569_vm8, %v9154_v22, 0.0  ;;  %10573 = vst [vmem:[#allocation36_spill] sm:$0xff] %v10572_v63 }
 0x35b   :  { %v10554_v56 = vsel %vm9277_vm15, 4294967295, %v10553_v56  ;;  %v4657_v48 = vmul.f32 %v9263_v41, %v4651_v53  ;;  %vm9289_vm2 = vmand %vm9277_vm15, %vm10556_vm10  ;;  %v4602_v53 = vsel %vm9182_vm0, %v10564_v7, 0.0  ;;  %vm9309_vm10 = vcmp.lt.s32.totalorder %v10565_v21, 14 }
 0x35c   :  { %10555 = vst [vmem:[#allocation19_spill] sm:$0xff] %v10554_v56  ;;  %v10558_v20 = vsel %vm9289_vm2, 4294967295, %v10557_v20  ;;  %v10567_v31 = vsel %vm9309_vm10, 4294967295, %v10566_v31  ;;  %v4691_v14 = vsel %vm9289_vm2, %v9112_v2, 0.0  ;;  %v4628_v22 = vsel %vm9297_vm4, %v9080_v43, 0.0 }
 0x35d   :  { %10559 = vst [vmem:[#allocation34_spill] sm:$0xff] %v10558_v20  ;;  %v4661_v18 = vadd.f32 %v4657_v48, %v4635_v9  ;;  %v4662_v16 = vadd.f32 %v4658_v38, %v4636_v46  ;;  %v4608_v55 = vmul.f32 %v4604_v32, %v4602_v53  ;;  %vm10574_vm8 = vcmp.ge.s32.totalorder %v8678_v11, 1  ;;  %v10578_v48 = vld [vmem:[#allocation18_spill] sm:$0xff] }
 0x35e   :  { %10568 = vst [vmem:[#allocation20_spill] sm:$0xff] %v10567_v31  ;;  %vm9340_vm5 = vmand %vm9277_vm15, %vm10574_vm8  ;;  %v10575_v7 = vmov 0  ;;  %v4731_v2 = vsel %vm9277_vm15, %v8472_v13, 0.0  ;;  %v4607_v9 = vmul.f32 %v4604_v32, %v10578_v48  ;;  %v4597_v21 = vadd.f32 %v4593_v50, %v9106_v12 }
 0x35f   :  { %v10576_v7 = vsel %vm9340_vm5, 4294967295, %v10575_v7  ;;  %v4696_v45 = vmul.f32 %v4695_v25, %v4690_v40  ;;  %v4697_v46 = vmul.f32 %v4695_v25, %v4691_v14  ;;  %v9353_v53 = vstv %s9265_s14  ;;  %s5760_s14 = sld [smem:[#allocation9 + $0x200]] }
 0x360   :  { %10577 = vst [vmem:[#allocation37_spill] sm:$0xff] %v10576_v7  ;;  %v4716_v38 = vsel %vm10574_vm8, %v9122_v34, 0.0  ;;  %v4612_v20 = vadd.f32 %v4608_v55, %v4598_v59  ;;  %vm10579_vm4 = vcmp.lt.s32.totalorder %v8678_v11, 127  ;;  %v10580_v13 = vmov 0 }
 0x361   :  { %v9210_v33 = vpop.permute.xlu1 %4684  ;;  %v9212_v8 = vpop.permute.xlu0 %4645  ;;  %vm9362_vm2 = vmand %vm9277_vm15, %vm10579_vm4  ;;  %v4700_v50 = vadd.f32 %v4696_v45, %v4661_v18  ;;  %v10584_v34 = vmov 0  ;;  %v4737_v59 = vmul.f32 %v9331_v1, %v4731_v2  ;;  %v4627_v14 = vsel %vm10579_vm4, %v9108_v27, 0.0 }
 0x362   :  { %v4654_v43 = vsel %vm9322_vm3, %v9212_v8, 0.0  ;;  %v10581_v13 = vsel %vm9362_vm2, 4294967295, %v10580_v13  ;;  %v4634_v8 = vmul.f32 %v9239_v23, %v4628_v22  ;;  %vm10583_vm3 = vcmp.ge.s32.totalorder %v8678_v11, 2  ;;  %v4773_v18 = vpop.permute.xlu2 %4772 }
 0x363   :  { %10582 = vst [vmem:[#allocation18_spill] sm:$0xff] %v10581_v13  ;;  %vm9371_vm8 = vmand %vm9309_vm10, %vm10583_vm3  ;;  %vm10587_vm0 = vcmp.lt.s32.totalorder %v8678_v11, 126  ;;  %v10588_v45 = vmov 0  ;;  %v4660_v22 = vmul.f32 %v9263_v41, %v4654_v43  ;;  %v4701_v55 = vadd.f32 %v4697_v46, %v4662_v16 }
 0x364   :  { %v10585_v34 = vsel %vm9371_vm8, 4294967295, %v10584_v34  ;;  %vm9385_vm1 = vmand %vm9277_vm15, %vm10587_vm0  ;;  %v4722_v27 = vmul.f32 %v9353_v53, %v4716_v38  ;;  %v9398_v56 = vstv %s9301_s2  ;;  %v9401_v7 = vstv %s9316_s15  ;;  %s10008_s2 = sld [smem:[#allocation9 + $0x201]] }
 0x365   :  { %10586 = vst [vmem:[#allocation38_spill] sm:$0xff] %v10585_v34  ;;  %v10589_v45 = vsel %vm9385_vm1, 4294967295, %v10588_v45  ;;  %vm10591_vm3 = vmmov %vm10587_vm0  ;;  %v4638_v61 = vadd.f32 %v4634_v8, %v4612_v20  ;;  %v4633_v16 = vmul.f32 %v9239_v23, %v4627_v14  ;;  %vm10592_vm0 = vcmp.ge.s32.totalorder %v8678_v11, 1  ;;  %s10027_s15 = sld [smem:[#allocation9 + $0x203]] }
 0x366   :  { %10590 = vst [vmem:[#allocation39_spill] sm:$0xff] %v10589_v45  ;;  %v4653_v48 = vsel %vm10591_vm3, %v9100_v29, 0.0  ;;  %vm9408_vm4 = vmand %vm9309_vm10, %vm10592_vm0  ;;  %v10593_v29 = vmov 0  ;;  %v4726_v43 = vadd.f32 %v4722_v27, %v4700_v50  ;;  %vm10596_vm3 = vcmp.ge.s32.totalorder %v8678_v11, 2 }
 0x367   :  { %v10594_v29 = vsel %vm9408_vm4, 4294967295, %v10593_v29  ;;  %v4664_v20 = vadd.f32 %v4660_v22, %v4638_v61  ;;  %vm10597_vm0 = vcmp.lt.s32.totalorder %v8678_v11, 126 }
 0x368   :  { %10595 = vst [vmem:[#allocation40_spill] sm:$0xff] %v10594_v29 }
 0x369   :  { %v9270_v47 = vpop.permute.xlu1 %4708  ;;  %v9272_v51 = vpop.permute.xlu0 %4682 }
 0x36a   :  { %v4692_v23 = vsel %vm10596_vm3, %v9272_v51, 0.0  ;;  %vm10598_vm3 = vcmp.lt.s32.totalorder %v8678_v11, 127 }
 0x36b   :  { %v4698_v51 = vmul.f32 %v4695_v25, %v4692_v23 }
 0x371   :  { %v4747_v12 = vpop.permute.xlu1 %4746  ;;  %v4707_v32 = vpop.permute.xlu0 %4706 }
 0x372   :  { %v4717_v40 = vsel %vm9340_vm5, %v4707_v32, 0.0  ;;  %v4611_v32 = vadd.f32 %v4607_v9, %v4597_v21  ;;  %v4757_v63 = vsel %vm9362_vm2, %v4747_v12, 0.0  ;;  %v4693_v9 = vsel %vm9371_vm8, %v9210_v33, 0.0 }
 0x373   :  { %v4723_v2 = vmul.f32 %v9353_v53, %v4717_v40  ;;  %v4783_v21 = vsel %vm9385_vm1, %v4773_v18, 0.0  ;;  %v4763_v46 = vmul.f32 %v9398_v56, %v4757_v63  ;;  %v4659_v12 = vmul.f32 %v9263_v41, %v4653_v48 }
 0x374   :  { %v4637_v8 = vadd.f32 %v4633_v16, %v4611_v32  ;;  %v4736_v40 = vmul.f32 %v9331_v1, %v8468_v37  ;;  %v4719_v33 = vsel %vm9408_vm4, %v9186_v24, 0.0  ;;  %v4699_v14 = vmul.f32 %v4695_v25, %v4693_v9 }
 0x375   :  { %v4727_v30 = vadd.f32 %v4723_v2, %v4701_v55  ;;  %v4789_v61 = vmul.f32 %v9401_v7, %v4783_v21  ;;  %v4725_v2 = vmul.f32 %v9353_v53, %v4719_v33  ;;  %vm10599_vm4 = vcmp.ge.s32.totalorder %v8678_v11, 1 }
 0x376   :  { %v4703_v63 = vadd.f32 %v4699_v14, %v4664_v20  ;;  %v4663_v48 = vadd.f32 %v4659_v12, %v4637_v8  ;;  %v4718_v25 = vsel %vm10599_vm4, %v9270_v47, 0.0  ;;  %v10600_v21 = vmov 0 }
 0x377   :  { %v4741_v38 = vadd.f32 %v4737_v59, %v4727_v30  ;;  %v9431_v30 = vstv %s10327_s4  ;;  %v4740_v59 = vadd.f32 %v4736_v40, %v4726_v43  ;;  %v4733_v43 = vsel %vm9309_vm10, %v8481_v0, 0.0  ;;  %s5741_s4 = sld [smem:[#allocation9 + $0x1]] }
 0x378   :  { %v4702_v9 = vadd.f32 %v4698_v51, %v4663_v48  ;;  %v4729_v23 = vadd.f32 %v4725_v2, %v4703_v63  ;;  %vm10603_vm4 = vcmp.lt.s32.totalorder %v8678_v11, 127  ;;  %v4739_v0 = vmul.f32 %v9331_v1, %v4733_v43 }
 0x379   :  { %v4767_v50 = vadd.f32 %v4763_v46, %v4741_v38  ;;  %v4771_v18 = vpop.permute.xlu1 %4770  ;;  %v4745_v22 = vpop.permute.xlu0 %4744  ;;  %vm9459_vm2 = vmand %vm9309_vm10, %vm10603_vm4  ;;  %v10604_v46 = vmov 0  ;;  %v4724_v38 = vmul.f32 %v9353_v53, %v4718_v25  ;;  %v4738_v53 = vmul.f32 %v9331_v1, %v8485_v10 }
 0x37a   :  { %v4782_v41 = vsel %vm10597_vm0, %v4771_v18, 0.0  ;;  %v4756_v37 = vsel %vm10598_vm3, %v4745_v22, 0.0  ;;  %vm9448_vm3 = vmand %vm9309_vm10, %vm10597_vm0  ;;  %v10605_v46 = vsel %vm9459_vm2, 4294967295, %v10604_v46  ;;  %v4743_v22 = vadd.f32 %v4739_v0, %v4729_v23 }
 0x37b   :  { %v4793_v24 = vadd.f32 %v4789_v61, %v4767_v50  ;;  %v4762_v55 = vmul.f32 %v9398_v56, %v4756_v37  ;;  %v4788_v32 = vmul.f32 %v9401_v7, %v4782_v41  ;;  %v10601_v21 = vsel %vm9448_vm3, 4294967295, %v10600_v21  ;;  %10606 = vst [vmem:[#allocation42_spill] sm:$0xff] %v10605_v46  ;;  %vm10607_vm0 = vmmov %vm10603_vm4 }
 0x37c   :  { %10602 = vst [vmem:[#allocation41_spill] sm:$0xff] %v10601_v21  ;;  %v4728_v14 = vadd.f32 %v4724_v38, %v4702_v9  ;;  %v4758_v41 = vsel %vm10607_vm0, %v9261_v44, 0.0  ;;  %vm10609_vm4 = vcmp.lt.s32.totalorder %v8431_v19, 2  ;;  %vm10610_vm0 = vcmp.lt.s32.totalorder %v8431_v19, 1 }
 0x37d   :  { %v4799_v27 = vadd.f32 %v9431_v30, %v4793_v24  ;;  %v4766_v16 = vadd.f32 %v4762_v55, %v4740_v59  ;;  %vm10614_vm10 = vcmp.lt.s32.totalorder %v8431_v19, 6  ;;  %v4853_v13 = vstv %s5741_s4 }
 0x37e   :  { %v4742_v59 = vadd.f32 %v4738_v53, %v4728_v14 }
 0x37f   :  { %v4803_v20 = vmul.f32 0.2, %v4799_v27  ;;  %v4792_v47 = vadd.f32 %v4788_v32, %v4766_v16 }
 0x381   :  { %v9464_v12 = vmax.f32 %v4799_v27, %v4803_v20  ;;  %v4798_v8 = vadd.f32 %v9431_v30, %v4792_v47  ;;  %v4777_v40 = vpop.permute.xlu1 %4776  ;;  %v4751_v33 = vpop.permute.xlu0 %4750  ;;  %v4764_v27 = vmul.f32 %v9398_v56, %v4758_v41 }
 0x382   :  { %v4785_v61 = vsel %vm9448_vm3, %v4777_v40, 0.0  ;;  %v4759_v50 = vsel %vm9459_vm2, %v4751_v33, 0.0  ;;  %vm10611_vm3 = vcmp.lt.s32.totalorder %v8431_v19, 7  ;;  %vm10613_vm2 = vcmp.lt.s32.totalorder %v8678_v11, 126 }
 0x383   :  { %v4802_v18 = vmul.f32 0.2, %v4798_v8  ;;  %v4765_v51 = vmul.f32 %v9398_v56, %v4759_v50  ;;  %5032 = vrot.lane.b32.xlu2 %v9464_v12, %s5878_s5  ;;  %v4791_v63 = vmul.f32 %v9401_v7, %v4785_v61  ;;  %v4811_v55 = vrot.slane %v9464_v12, 6 }
 0x384   :  { %v4921_v2 = vrot.slane %v9464_v12, 7  ;;  %v5129_v48 = vrot.slane %v9464_v12, 1  ;;  %v5239_v32 = vrot.slane %v9464_v12, 2  ;;  %v4768_v40 = vadd.f32 %v4764_v27, %v4742_v59 }
 0x385   :  { %v9480_v37 = vmax.f32 %v4798_v8, %v4802_v18  ;;  %v4769_v24 = vadd.f32 %v4765_v51, %v4743_v22 }
 0x387   :  { %10608 = vst [vmem:[#allocation43_spill] sm:$0xff] %v9480_v37  ;;  %v4795_v25 = vadd.f32 %v4791_v63, %v4769_v24  ;;  %5030 = vrot.lane.b32.xlu1 %v9480_v37, %s5878_s5  ;;  %v4810_v10 = vrot.slane %v9480_v37, 6  ;;  %v4920_v44 = vrot.slane %v9480_v37, 7  ;;  %v5128_v1 = vrot.slane %v9480_v37, 1 }
 0x388   :  { %v5238_v16 = vrot.slane %v9480_v37, 2 }
 0x389   :  { %v4801_v9 = vadd.f32 %v9431_v30, %v4795_v25  ;;  %v4775_v43 = vpop.permute.xlu0 %4774  ;;  %v9497_v20 = vsel %vm10609_vm4, %v4810_v10, %v4811_v55  ;;  %v9501_v47 = vsel %vm10610_vm0, %v4920_v44, %v4921_v2  ;;  %v9505_v23 = vsel %vm10611_vm3, %v5128_v1, %v5129_v48 }
 0x38a   :  { %10612 = vst [vmem:[#allocation44_spill] sm:$0xff] %v9505_v23  ;;  %v4784_v56 = vsel %vm10613_vm2, %v4775_v43, 0.0  ;;  %v9511_v38 = vsel %vm10614_vm10, %v5238_v16, %v5239_v32  ;;  %vm10616_vm2 = vmmov %vm10609_vm4  ;;  %vm10619_vm4 = vcmp.lt.s32.totalorder %v8431_v19, 6 }
 0x38b   :  { %v4805_v8 = vmul.f32 0.2, %v4801_v9  ;;  %v4790_v0 = vmul.f32 %v9401_v7, %v4784_v56  ;;  %5052 = vrot.lane.b32.xlu2 %v9480_v37, %s5879_s21  ;;  %vm10617_vm10 = vmmov %vm10610_vm0 }
 0x38c   :  { %vm10620_vm0 = vmmov %vm10616_vm2 }
 0x38d   :  { %v9516_v33 = vmax.f32 %v4801_v9, %v4805_v8  ;;  %v4794_v14 = vadd.f32 %v4790_v0, %v4768_v40 }
 0x38f   :  { %10615 = vst [vmem:[#allocation45_spill] sm:$0xff] %v9516_v33  ;;  %v4800_v61 = vadd.f32 %v9431_v30, %v4794_v14  ;;  %5036 = vrot.lane.b32.xlu1 %v9516_v33, %s5878_s5  ;;  %v4813_v50 = vrot.slane %v9516_v33, 6  ;;  %v4923_v18 = vrot.slane %v9516_v33, 7  ;;  %v5131_v22 = vrot.slane %v9516_v33, 1 }
 0x390   :  { %v5241_v51 = vrot.slane %v9516_v33, 2 }
 0x391   :  { %v4804_v7 = vmul.f32 0.2, %v4800_v61  ;;  %v9527_v53 = vsel %vm10616_vm2, %v4813_v50, %v4810_v10  ;;  %v9531_v41 = vsel %vm10617_vm10, %v4923_v18, %v4920_v44  ;;  %v9535_v30 = vsel %vm10611_vm3, %v5131_v22, %v5128_v1  ;;  %vm10621_vm2 = vmmov %vm10620_vm0 }
 0x392   :  { %10618 = vst [vmem:[#allocation46_spill] sm:$0xff] %v9535_v30  ;;  %v9539_v63 = vsel %vm10619_vm4, %v5241_v51, %v5238_v16  ;;  %vm10622_vm3 = vmmov %vm10617_vm10  ;;  %vm10623_vm4 = vcmp.lt.s32.totalorder %v8431_v19, 7 }
 0x393   :  { %v9541_v24 = vmax.f32 %v4800_v61, %v4804_v7  ;;  %5058 = vrot.lane.b32.xlu2 %v9516_v33, %s5879_s21  ;;  %vm10625_vm1 = vmmov %vm10623_vm4 }
 0x395   :  { %5034 = vrot.lane.b32.xlu0 %v9541_v24, %s5878_s5  ;;  %v4812_v59 = vrot.slane %v9541_v24, 6  ;;  %v4922_v25 = vrot.slane %v9541_v24, 7  ;;  %v5130_v10 = vrot.slane %v9541_v24, 1  ;;  %v5240_v44 = vrot.slane %v9541_v24, 2 }
 0x397   :  { %5056 = vrot.lane.b32.xlu1 %v9541_v24, %s5879_s21  ;;  %v9555_v1 = vsel %vm10620_vm0, %v4812_v59, %v4813_v50  ;;  %v9559_v27 = vsel %vm10621_vm2, %v4811_v55, %v4812_v59  ;;  %v9563_v16 = vsel %vm10617_vm10, %v4921_v2, %v4922_v25  ;;  %v9567_v9 = vsel %vm10622_vm3, %v4922_v25, %v4923_v18 }
 0x398   :  { %v9571_v43 = vsel %vm10623_vm4, %v5130_v10, %v5131_v22  ;;  %v9575_v56 = vsel %vm10625_vm1, %v5129_v48, %v5130_v10  ;;  %vm10627_vm0 = vcmp.lt.s32.totalorder %v8431_v19, 6  ;;  %vm10636_vm1 = vcmp.ge.s32.totalorder %v8678_v11, 2 }
 0x399   :  { %10624 = vst [vmem:[#allocation47_spill] sm:$0xff] %v9571_v43  ;;  %v9579_v55 = vsel %vm10627_vm0, %v5239_v32, %v5240_v44  ;;  %vm10628_vm2 = vmmov %vm10627_vm0  ;;  %vm10648_vm10 = vnez %v10469_v42  ;;  %vm10649_vm3 = vnez %v10480_v49  ;;  %vm10650_vm4 = vnez %v10471_v5 }
 0x39a   :  { %10626 = vst [vmem:[#allocation48_spill] sm:$0xff] %v9575_v56  ;;  %v9583_v2 = vsel %vm10628_vm2, %v5240_v44, %v5241_v51 }
 0x39b   :  { %5088 = vrot.lane.b32.xlu2 %v9541_v24, %s5880_s1 }
 0x39d   :  { %5054 = vrot.lane.b32.xlu0 %v9464_v12, %s5879_s21 }
 0x39f   :  { %5086 = vrot.lane.b32.xlu1 %v9464_v12, %s5880_s1 }
 0x3a3   :  { %5108 = vrot.lane.b32.xlu2 %v9464_v12, %s5881_s7 }
 0x3a5   :  { %5084 = vrot.lane.b32.xlu0 %v9480_v37, %s5880_s1 }
 0x3a7   :  { %5106 = vrot.lane.b32.xlu1 %v9480_v37, %s5881_s7 }
 0x3ab   :  { %4818 = vrot.lane.b32.xlu2 %v9527_v53, %s5878_s5 }
 0x3ad   :  { %5090 = vrot.lane.b32.xlu0 %v9516_v33, %s5880_s1 }
 0x3af   :  { %5112 = vrot.lane.b32.xlu1 %v9516_v33, %s5881_s7  ;;  %v4867_v33 = vstv %s5742_s19  ;;  %s5767_s19 = sld [smem:[#allocation11 + $0x80]] }
 0x3b3   :  { %4824 = vrot.lane.b32.xlu2 %v9555_v1, %s5878_s5 }
 0x3b5   :  { %5110 = vrot.lane.b32.xlu0 %v9541_v24, %s5881_s7 }
 0x3b7   :  { %4822 = vrot.lane.b32.xlu1 %v9559_v27, %s5878_s5 }
 0x3bb   :  { %4844 = vrot.lane.b32.xlu2 %v9559_v27, %s5879_s21 }
 0x3bd   :  { %4820 = vrot.lane.b32.xlu0 %v9497_v20, %s5878_s5 }
 0x3bf   :  { %4842 = vrot.lane.b32.xlu1 %v9497_v20, %s5879_s21 }
 0x3c3   :  { %4878 = vrot.lane.b32.xlu2 %v9497_v20, %s5880_s1 }
 0x3c5   :  { %4840 = vrot.lane.b32.xlu0 %v9527_v53, %s5879_s21 }
 0x3c7   :  { %4876 = vrot.lane.b32.xlu1 %v9527_v53, %s5880_s1 }
 0x3cb   :  { %4898 = vrot.lane.b32.xlu2 %v9527_v53, %s5881_s7 }
 0x3cd   :  { %4846 = vrot.lane.b32.xlu0 %v9555_v1, %s5879_s21 }
 0x3cf   :  { %4882 = vrot.lane.b32.xlu1 %v9555_v1, %s5880_s1 }
 0x3d3   :  { %4904 = vrot.lane.b32.xlu2 %v9555_v1, %s5881_s7 }
 0x3d5   :  { %4880 = vrot.lane.b32.xlu0 %v9559_v27, %s5880_s1 }
 0x3d7   :  { %4902 = vrot.lane.b32.xlu1 %v9559_v27, %s5881_s7 }
 0x3db   :  { %4932 = vrot.lane.b32.xlu2 %v9563_v16, %s5878_s5 }
 0x3dd   :  { %v9635_v48 = vpop.permute.xlu2 %5032  ;;  %4900 = vrot.lane.b32.xlu0 %v9497_v20, %s5881_s7 }
 0x3df   :  { %4930 = vrot.lane.b32.xlu1 %v9501_v47, %s5878_s5 }
 0x3e3   :  { %4952 = vrot.lane.b32.xlu2 %v9501_v47, %s5879_s21 }
 0x3e5   :  { %v9643_v32 = vpop.permute.xlu2 %5052  ;;  %4928 = vrot.lane.b32.xlu0 %v9531_v41, %s5878_s5 }
 0x3e7   :  { %4950 = vrot.lane.b32.xlu1 %v9531_v41, %s5879_s21 }
 0x3eb   :  { %4986 = vrot.lane.b32.xlu2 %v9531_v41, %s5880_s1 }
 0x3ed   :  { %v9651_v8 = vpop.permute.xlu2 %5058  ;;  %4934 = vrot.lane.b32.xlu0 %v9567_v9, %s5878_s5 }
 0x3ee   :  { %10629 = vst [vmem:[#allocation49_spill] sm:$0xff] %v9651_v8 }
 0x3ef   :  { %4956 = vrot.lane.b32.xlu1 %v9567_v9, %s5879_s21 }
 0x3f3   :  { %4992 = vrot.lane.b32.xlu2 %v9567_v9, %s5880_s1 }
 0x3f5   :  { %v9659_v40 = vpop.permute.xlu2 %5088  ;;  %4954 = vrot.lane.b32.xlu0 %v9563_v16, %s5879_s21 }
 0x3f7   :  { %4990 = vrot.lane.b32.xlu1 %v9563_v16, %s5880_s1 }
 0x3f9   :  { %v9665_v0 = vpop.permute.xlu1 %5030 }
 0x3fb   :  { %5012 = vrot.lane.b32.xlu2 %v9563_v16, %s5881_s7 }
 0x3fd   :  { %v9669_v14 = vpop.permute.xlu2 %5108  ;;  %4988 = vrot.lane.b32.xlu0 %v9501_v47, %s5880_s1 }
 0x3ff   :  { %5010 = vrot.lane.b32.xlu1 %v9501_v47, %s5881_s7 }
 0x401   :  { %v9675_v61 = vpop.permute.xlu1 %5036 }
 0x402   :  { %10630 = vst [vmem:[#allocation50_spill] sm:$0xff] %v9675_v61 }
 0x403   :  { %5136 = vrot.lane.b32.xlu2 %v9505_v23, %s5878_s5 }
 0x405   :  { %v9679_v50 = vpop.permute.xlu2 %4818  ;;  %5008 = vrot.lane.b32.xlu0 %v9531_v41, %s5881_s7 }
 0x407   :  { %v9683_v18 = vpop.permute.xlu0 %5034  ;;  %5140 = vrot.lane.b32.xlu1 %v9571_v43, %s5878_s5 }
 0x409   :  { %v9687_v22 = vpop.permute.xlu1 %5056 }
 0x40b   :  { %5142 = vrot.lane.b32.xlu2 %v9535_v30, %s5878_s5 }
 0x40d   :  { %v9691_v51 = vpop.permute.xlu2 %4824  ;;  %5014 = vrot.lane.b32.xlu0 %v9567_v9, %s5881_s7 }
 0x40f   :  { %v9695_v7 = vpop.permute.xlu0 %5054  ;;  %5160 = vrot.lane.b32.xlu1 %v9575_v56, %s5879_s21 }
 0x411   :  { %v9699_v59 = vpop.permute.xlu1 %5086 }
 0x413   :  { %5162 = vrot.lane.b32.xlu2 %v9571_v43, %s5879_s21 }
 0x415   :  { %5138 = vrot.lane.b32.xlu0 %v9575_v56, %s5878_s5  ;;  %v4845_v25 = vpop.permute.xlu2 %4844 }
 0x416   :  { %v4850_v34 = vsel %vm8765_vm13, %v4845_v25, 0.0  ;;  %vm10638_vm13 = vcmp.lt.s32.totalorder %v8678_v11, 127 }
 0x417   :  { %v9705_v10 = vpop.permute.xlu0 %5084  ;;  %5194 = vrot.lane.b32.xlu1 %v9505_v23, %s5880_s1  ;;  %v4856_v3 = vmul.f32 %v4853_v13, %v4850_v34 }
 0x419   :  { %v9709_v44 = vpop.permute.xlu1 %5106 }
 0x41a   :  { %10631 = vst [vmem:[#allocation51_spill] sm:$0xff] %v9709_v44 }
 0x41b   :  { %5196 = vrot.lane.b32.xlu2 %v9575_v56, %s5880_s1 }
 0x41d   :  { %5158 = vrot.lane.b32.xlu0 %v9505_v23, %s5879_s21  ;;  %v4879_v21 = vpop.permute.xlu2 %4878 }
 0x41f   :  { %v9715_v19 = vpop.permute.xlu0 %5090  ;;  %5200 = vrot.lane.b32.xlu1 %v9535_v30, %s5880_s1 }
 0x420   :  { %10632 = vst [vmem:[#allocation52_spill] sm:$0xff] %v9715_v19 }
 0x421   :  { %v9719_v46 = vpop.permute.xlu1 %5112 }
 0x422   :  { %10633 = vst [vmem:[#allocation53_spill] sm:$0xff] %v9719_v46 }
 0x423   :  { %5216 = vrot.lane.b32.xlu2 %v9505_v23, %s5881_s7  ;;  %v4864_v23 = vsel %vm8745_vm11, %v9559_v27, 0.0  ;;  %vm10637_vm11 = vcmp.ge.s32.totalorder %v8678_v11, 1 }
 0x424   :  { %v4870_v25 = vmul.f32 %v4867_v33, %v4864_v23  ;;  %v4885_v23 = vsel %vm10638_vm13, %v4879_v21, 0.0 }
 0x425   :  { %5164 = vrot.lane.b32.xlu0 %v9535_v30, %s5879_s21  ;;  %v4899_v31 = vpop.permute.xlu2 %4898 }
 0x427   :  { %v9725_v29 = vpop.permute.xlu0 %5110  ;;  %5220 = vrot.lane.b32.xlu1 %v9571_v43, %s5881_s7 }
 0x429   :  { %v4823_v58 = vpop.permute.xlu1 %4822 }
 0x42a   :  { %v4828_v15 = vsel %vm8775_vm14, %v4823_v58, 0.0  ;;  %vm10647_vm14 = vcmp.lt.s32.totalorder %v8678_v11, 126 }
 0x42b   :  { %v4834_v46 = vmul.f32 %v4831_v4, %v4828_v15  ;;  %5222 = vrot.lane.b32.xlu2 %v9535_v30, %s5881_s7  ;;  %vm10651_vm0 = vmmov %vm10647_vm14 }
 0x42d   :  { %v4860_v19 = vadd.f32 %v4856_v3, %v4834_v46  ;;  %5198 = vrot.lane.b32.xlu0 %v9571_v43, %s5880_s1  ;;  %v4905_v45 = vpop.permute.xlu2 %4904  ;;  %v4889_v46 = vstv %s5743_s20  ;;  %s5768_s20 = sld [smem:[#allocation11 + $0x81]] }
 0x42f   :  { %v4821_v8 = vpop.permute.xlu0 %4820  ;;  %5248 = vrot.lane.b32.xlu1 %v9579_v55, %s5878_s5  ;;  %v9742_v17 = vadd.f32 %v4870_v25, %v4860_v19  ;;  %v4869_v19 = vmul.f32 %v4867_v33, %v9497_v20 }
 0x430   :  { %v4827_v54 = vsel %vm10636_vm1, %v4821_v8, 0.0 }
 0x431   :  { %v4843_v15 = vpop.permute.xlu1 %4842  ;;  %v4833_v34 = vmul.f32 %v4831_v4, %v4827_v54  ;;  %v4826_v54 = vsel %vm8696_vm7, %v9679_v50, 0.0  ;;  %vm10643_vm7 = vnez %v10465_v36 }
 0x432   :  { %v4849_v58 = vsel %vm10637_vm11, %v4843_v15, 0.0  ;;  %v4891_v15 = vmul.f32 %v4889_v46, %v4885_v23 }
 0x433   :  { %v4855_v3 = vmul.f32 %v4853_v13, %v4849_v58  ;;  %5250 = vrot.lane.b32.xlu2 %v9583_v2, %s5878_s5 }
 0x435   :  { %v4859_v27 = vadd.f32 %v4855_v3, %v4833_v34  ;;  %5218 = vrot.lane.b32.xlu0 %v9575_v56, %s5881_s7  ;;  %v4933_v8 = vpop.permute.xlu2 %4932  ;;  %v4862_v34 = vsel %vm8686_vm6, %v9527_v53, 0.0  ;;  %v4832_v3 = vmul.f32 %v4831_v4, %v4826_v54  ;;  %vm10644_vm6 = vmmov %vm10636_vm1 }
 0x436   :  { %v4829_v37 = vsel %vm10644_vm6, %v9691_v51, 0.0  ;;  %v4871_v51 = vmul.f32 %v4867_v33, %v9555_v1  ;;  %vm10656_vm6 = vnez %v10493_v35 }
 0x437   :  { %v4873_v58 = vadd.f32 %v4869_v19, %v4859_v27  ;;  %v4841_v30 = vpop.permute.xlu0 %4840  ;;  %5268 = vrot.lane.b32.xlu1 %v9511_v38, %s5879_s21  ;;  %v4868_v19 = vmul.f32 %v4867_v33, %v4862_v34  ;;  %v4911_v27 = vstv %s5744_s3  ;;  %s5770_s3 = sld [smem:[#allocation11 + $0x100]] }
 0x438   :  { %v4848_v21 = vsel %vm8709_vm9, %v4841_v30, 0.0  ;;  %v4906_v30 = vsel %vm10643_vm7, %v4899_v31, 0.0  ;;  %vm10645_vm9 = vmmov %vm10637_vm11  ;;  %v4835_v31 = vmul.f32 %v4831_v4, %v4829_v37  ;;  %v4941_v37 = vstv %s5745_s22  ;;  %s5771_s22 = sld [smem:[#allocation11 + $0x101]] }
 0x439   :  { %v4854_v56 = vmul.f32 %v4853_v13, %v4848_v21  ;;  %v4877_v44 = vpop.permute.xlu1 %4876  ;;  %v4895_v61 = vadd.f32 %v4891_v15, %v4873_v58  ;;  %vm10652_vm2 = vmmov %vm10645_vm9  ;;  %vm10653_vm11 = vnez %v10463_v52  ;;  %vm10655_vm7 = vnez %v10467_v26 }
 0x43a   :  { %v4884_v50 = vsel %vm8753_vm12, %v4877_v44, 0.0  ;;  %v4912_v44 = vmul.f32 %v4911_v27, %v4906_v30  ;;  %vm10646_vm12 = vmmov %vm10638_vm13  ;;  %vm10654_vm13 = vnez %v10461_v57 }
 0x43b   :  { %v4858_v23 = vadd.f32 %v4854_v56, %v4832_v3  ;;  %5270 = vrot.lane.b32.xlu2 %v9579_v55, %s5879_s21  ;;  %v4890_v25 = vmul.f32 %v4889_v46, %v4884_v50  ;;  %v4909_v3 = vsel %vm10647_vm14, %v4905_v45, 0.0  ;;  %v4938_v45 = vsel %vm10649_vm3, %v4933_v8, 0.0 }
 0x43c   :  { %vm10659_vm14 = vcmp.lt.s32.totalorder %v8678_v11, 127  ;;  %vm10661_vm3 = vnez %v10475_v6 }
 0x43d   :  { %v4872_v43 = vadd.f32 %v4868_v19, %v4858_v23  ;;  %5246 = vrot.lane.b32.xlu0 %v9511_v38, %s5878_s5  ;;  %v4953_v53 = vpop.permute.xlu2 %4952  ;;  %v10244_v6 = vstv %s5770_s3 }
 0x43f   :  { %v4894_v56 = vadd.f32 %v4890_v25, %v4872_v43  ;;  %v4847_v54 = vpop.permute.xlu0 %4846  ;;  %5274 = vrot.lane.b32.xlu1 %v9539_v63, %s5879_s21 }
 0x440   :  { %v4851_v36 = vsel %vm10645_vm9, %v4847_v54, 0.0  ;;  %vm10657_vm9 = vmmov %vm10636_vm1 }
 0x441   :  { %v4857_v15 = vmul.f32 %v4853_v13, %v4851_v36  ;;  %v4883_v58 = vpop.permute.xlu1 %4882  ;;  %v4916_v21 = vadd.f32 %v4912_v44, %v4894_v56  ;;  %v4915_v13 = vmul.f32 %v4911_v27, %v4909_v3  ;;  %v4944_v36 = vmul.f32 %v4941_v37, %v4938_v45 }
 0x442   :  { %v4887_v20 = vsel %vm10646_vm12, %v4883_v58, 0.0  ;;  %v4959_v58 = vsel %vm10652_vm2, %v4953_v53, 0.0  ;;  %v4999_v45 = vstv %s5748_s24  ;;  %vm10658_vm12 = vmmov %vm10652_vm2 }
 0x443   :  { %v4861_v34 = vadd.f32 %v4857_v15, %v4835_v31  ;;  %5304 = vrot.lane.b32.xlu2 %v9511_v38, %s5880_s1  ;;  %v4893_v23 = vmul.f32 %v4889_v46, %v4887_v20  ;;  %v4963_v15 = vstv %s5746_s23  ;;  %vm10664_vm2 = vmmov %vm10636_vm1  ;;  %s5772_s23 = sld [smem:[#allocation11 + $0x102]] }
 0x444   :  { %v4965_v3 = vmul.f32 %v4963_v15, %v4959_v58 }
 0x445   :  { %v4875_v50 = vadd.f32 %v4871_v51, %v4861_v34  ;;  %5252 = vrot.lane.b32.xlu0 %v9539_v63, %s5878_s5  ;;  %v4987_v4 = vpop.permute.xlu2 %4986  ;;  %s5747_s5 = sld [smem:[#allocation9 + $0x82]] }
 0x447   :  { %v4897_v19 = vadd.f32 %v4893_v23, %v4875_v50  ;;  %v4881_v30 = vpop.permute.xlu0 %4880  ;;  %5308 = vrot.lane.b32.xlu1 %v9583_v2, %s5880_s1 }
 0x448   :  { %v4886_v33 = vsel %vm10648_vm10, %v4881_v30, 0.0  ;;  %v4972_v30 = vsel %vm10654_vm13, %v9531_v41, 0.0  ;;  %vm10660_vm10 = vnez %v10477_v60 }
 0x449   :  { %v4892_v1 = vmul.f32 %v4889_v46, %v4886_v33  ;;  %v4903_v43 = vpop.permute.xlu1 %4902  ;;  %v4919_v25 = vadd.f32 %v4915_v13, %v4897_v19 }
 0x44a   :  { %v4908_v44 = vsel %vm10650_vm4, %v4903_v43, 0.0  ;;  %vm10662_vm4 = vnez %v10484_v39 }
 0x44b   :  { %v4896_v56 = vadd.f32 %v4892_v1, %v9742_v17  ;;  %v4914_v54 = vmul.f32 %v4911_v27, %v4908_v44  ;;  %5310 = vrot.lane.b32.xlu2 %v9539_v63, %s5880_s1  ;;  %v4994_v44 = vsel %vm10656_vm6, %v4987_v4, 0.0 }
 0x44d   :  { %v4918_v42 = vadd.f32 %v4914_v54, %v4896_v56  ;;  %5272 = vrot.lane.b32.xlu0 %v9583_v2, %s5879_s21  ;;  %v4993_v46 = vpop.permute.xlu2 %4992  ;;  %v4977_v56 = vstv %s5747_s5 }
 0x44e   :  { %v4978_v54 = vmul.f32 %v4977_v56, %v4972_v30 }
 0x44f   :  { %v4901_v31 = vpop.permute.xlu0 %4900  ;;  %5328 = vrot.lane.b32.xlu1 %v9579_v55, %s5881_s7  ;;  %v4948_v49 = vadd.f32 %v4944_v36, %v4918_v42  ;;  %v5000_v42 = vmul.f32 %v4999_v45, %v4994_v44 }
 0x450   :  { %v4907_v5 = vsel %vm10651_vm0, %v4901_v31, 0.0  ;;  %vm10663_vm0 = vnez %v10503_v62 }
 0x451   :  { %v4913_v8 = vmul.f32 %v4911_v27, %v4907_v5  ;;  %v4931_v17 = vpop.permute.xlu1 %4930 }
 0x452   :  { %v4937_v20 = vsel %vm10636_vm1, %v4931_v17, 0.0  ;;  %vm10665_vm1 = vmmov %vm10658_vm12 }
 0x453   :  { %v4917_v34 = vadd.f32 %v4913_v8, %v4895_v61  ;;  %v4943_v51 = vmul.f32 %v4941_v37, %v4937_v20  ;;  %5330 = vrot.lane.b32.xlu2 %v9583_v2, %s5881_s7  ;;  %v5062_v62 = vsel %vm10665_vm1, %v9687_v22, 0.0 }
 0x455   :  { %v4947_v50 = vadd.f32 %v4943_v51, %v4917_v34  ;;  %5306 = vrot.lane.b32.xlu0 %v9579_v55, %s5880_s1  ;;  %v5013_v27 = vpop.permute.xlu2 %5012  ;;  %v4997_v34 = vsel %vm10659_vm14, %v4993_v46, 0.0  ;;  %v4981_v51 = vmul.f32 %v4977_v56, %v9567_v9  ;;  %v4974_v46 = vsel %vm10661_vm3, %v9563_v16, 0.0 }
 0x456   :  { %v5018_v44 = vsel %vm10663_vm0, %v5013_v27, 0.0  ;;  %v5040_v16 = vsel %vm10664_vm2, %v9683_v18, 0.0  ;;  %vm10670_vm0 = vmmov %vm10665_vm1 }
 0x457   :  { %v9814_v23 = vadd.f32 %v4965_v3, %v4947_v50  ;;  %v4929_v13 = vpop.permute.xlu0 %4928 }
 0x458   :  { %v4936_v53 = vsel %vm10653_vm11, %v4929_v13, 0.0  ;;  %vm10666_vm11 = vmmov %vm10659_vm14  ;;  %vm10669_vm14 = vcmp.lt.s32.totalorder %v8678_v11, 126 }
 0x459   :  { %v4942_v19 = vmul.f32 %v4941_v37, %v4936_v53  ;;  %v4951_v61 = vpop.permute.xlu1 %4950 }
 0x45a   :  { %v4958_v33 = vsel %vm10655_vm7, %v4951_v61, 0.0 }
 0x45b   :  { %v4946_v1 = vadd.f32 %v4942_v19, %v4916_v21  ;;  %v4964_v43 = vmul.f32 %v4963_v15, %v4958_v33 }
 0x45d   :  { %v4968_v36 = vadd.f32 %v4964_v43, %v4946_v1  ;;  %5326 = vrot.lane.b32.xlu0 %v9511_v38, %s5881_s7  ;;  %v9827_v52 = vpop.permute.xlu2 %5136  ;;  %v4980_v1 = vmul.f32 %v4977_v56, %v4974_v46  ;;  %v9851_v43 = vstv %s5749_s25 }
 0x45f   :  { %v4982_v31 = vadd.f32 %v4978_v54, %v4968_v36  ;;  %v4935_v41 = vpop.permute.xlu0 %4934 }
 0x460   :  { %v4939_v5 = vsel %vm10657_vm9, %v4935_v41, 0.0  ;;  %vm10667_vm9 = vmmov %vm10664_vm2 }
 0x461   :  { %v4945_v21 = vmul.f32 %v4941_v37, %v4939_v5  ;;  %v4957_v8 = vpop.permute.xlu1 %4956  ;;  %v9831_v17 = vadd.f32 %v5000_v42, %v4982_v31  ;;  %v5003_v37 = vmul.f32 %v4999_v45, %v4997_v34  ;;  %v4979_v31 = vmul.f32 %v4977_v56, %v9501_v47  ;;  %vm10671_vm2 = vmmov %vm10669_vm14 }
 0x462   :  { %v4961_v4 = vsel %vm10658_vm12, %v4957_v8, 0.0  ;;  %v9862_v5 = vstv %s5751_s26  ;;  %vm10668_vm12 = vmmov %vm10666_vm11 }
 0x463   :  { %v4949_v58 = vadd.f32 %v4945_v21, %v4919_v25  ;;  %v4967_v20 = vmul.f32 %v4963_v15, %v4961_v4  ;;  %v4983_v47 = vadd.f32 %v4979_v31, %v9814_v23  ;;  %v5094_v22 = vsel %vm10668_vm12, %v9659_v40, 0.0  ;;  %vm10672_vm1 = vmmov %vm10667_vm9 }
 0x464   :  { %vm10674_vm12 = vmmov %vm10670_vm0 }
 0x465   :  { %v4971_v3 = vadd.f32 %v4967_v20, %v4949_v58  ;;  %5332 = vrot.lane.b32.xlu0 %v9539_v63, %s5881_s7  ;;  %v9840_v13 = vpop.permute.xlu2 %5142  ;;  %s5752_s7 = sld [smem:[#allocation9 + $0x102]]  ;;  %v5039_v58 = vsel %vm10667_vm9, %v9635_v48, 0.0  ;;  %v9876_v20 = vstv %s5753_s27  ;;  %vm10673_vm9 = vnez %v10491_v28  ;;  %s5568_s27 = sshll.u32 %s10332_s9, 4  ;;  %s5569_s27 = int_to_ptr.hbm [resolvable:$true] %s5568_s27 }
 0x466   :  { %v5100_v46 = vmul.f32 %v9876_v20, %v5094_v22  ;;  %v5060_v31 = vsel %vm10674_vm12, %v9643_v32, 0.0 }
 0x467   :  { %v4985_v50 = vadd.f32 %v4981_v51, %v4971_v3  ;;  %v4955_v53 = vpop.permute.xlu0 %4954  ;;  %v5068_v51 = vmul.f32 %v9862_v5, %v5062_v62 }
 0x468   :  { %v4960_v25 = vsel %vm10660_vm10, %v4955_v53, 0.0 }
 0x469   :  { %v4966_v19 = vmul.f32 %v4963_v15, %v4960_v25  ;;  %v4991_v9 = vpop.permute.xlu1 %4990  ;;  %v9847_v61 = vadd.f32 %v5003_v37, %v4985_v50  ;;  %v5024_v15 = vmul.f32 %v9851_v43, %v5018_v44  ;;  %v5119_v44 = vstv %s5754_s28  ;;  %s5884_s28 = smov 8  }
 0x46a   :  { %v4996_v30 = vsel %vm10662_vm4, %v4991_v9, 0.0  ;;  %v5038_v9 = vsel %vm10672_vm1, %v9665_v0, 0.0 }
 0x46b   :  { %v4970_v33 = vadd.f32 %v4966_v19, %v4948_v49  ;;  %v5002_v36 = vmul.f32 %v4999_v45, %v4996_v30  ;;  %v9860_v49 = vstv %s5750_s0  ;;  %v5075_v48 = vstv %s5752_s7  ;;  %s5883_s7 = smov 128  }
 0x46c   :  { %v5046_v18 = vmul.f32 %v9860_v49, %v5040_v16  ;;  %v5045_v50 = vmul.f32 %v9860_v49, %v5039_v58  ;;  %v5078_v40 = vmul.f32 %v5075_v48, %v9541_v24  ;;  %v5116_v19 = vsel %vm10671_vm2, %v9725_v29, 0.0 }
 0x46d   :  { %v4984_v54 = vadd.f32 %v4980_v1, %v4970_v33  ;;  %v9870_v8 = vpop.permute.xlu2 %5162  ;;  %v5093_v24 = vsel %vm10666_vm11, %v9699_v59, 0.0  ;;  %v5122_v29 = vmul.f32 %v5119_v44, %v5116_v19  ;;  %v5149_v19 = vstv %s5755_s29 }
 0x46f   :  { %v5006_v42 = vadd.f32 %v5002_v36, %v4984_v54  ;;  %v4989_v41 = vpop.permute.xlu0 %4988  ;;  %v5077_v36 = vmul.f32 %v5075_v48, %v9464_v12  ;;  %v5099_v12 = vmul.f32 %v9876_v20, %v5093_v24 }
 0x470   :  { %v4995_v27 = vsel %vm10666_vm11, %v4989_v41, 0.0  ;;  %v5044_v41 = vmul.f32 %v9860_v49, %v5038_v9 }
 0x471   :  { %v5028_v21 = vadd.f32 %v5024_v15, %v5006_v42  ;;  %v5001_v56 = vmul.f32 %v4999_v45, %v4995_v27  ;;  %v5011_v4 = vpop.permute.xlu1 %5010  ;;  %v5061_v45 = vsel %vm10670_vm0, %v9695_v7, 0.0  ;;  %vm10676_vm0 = vmmov %vm10666_vm11 }
 0x472   :  { %v5017_v34 = vsel %vm10669_vm14, %v5011_v4, 0.0  ;;  %v5067_v30 = vmul.f32 %v9862_v5, %v5061_v45  ;;  %vm10675_vm14 = vmmov %vm10671_vm2  ;;  %v5092_v4 = vsel %vm10676_vm0, %v9705_v10, 0.0 }
 0x473   :  { %v5050_v3 = vadd.f32 %v5046_v18, %v5028_v21  ;;  %v5005_v37 = vadd.f32 %v5001_v56, %v4983_v47  ;;  %v5023_v23 = vmul.f32 %v9851_v43, %v5017_v34  ;;  %v5115_v28 = vsel %vm10675_vm14, %v9669_v14, 0.0  ;;  %v10677_v14 = vld [vmem:[#allocation43_spill] sm:$0xff]  ;;  %vm10679_vm2 = vmmov %vm10672_vm1 }
 0x474   :  { %v5066_v21 = vmul.f32 %v9862_v5, %v5060_v31  ;;  %v5121_v47 = vmul.f32 %v5119_v44, %v5115_v28  ;;  %v5076_v58 = vmul.f32 %v5075_v48, %v10677_v14  ;;  %vm10681_vm1 = vmmov %vm10675_vm14  ;;  %v10689_v28 = vld [vmem:[#allocation53_spill] sm:$0xff] }
 0x475   :  { %v5072_v53 = vadd.f32 %v5068_v51, %v5050_v3  ;;  %v5027_v25 = vadd.f32 %v5023_v23, %v5005_v37  ;;  %v9915_v59 = vpop.permute.xlu2 %5196  ;;  %v10678_v3 = vld [vmem:[#allocation50_spill] sm:$0xff]  ;;  %v10680_v37 = vld [vmem:[#allocation51_spill] sm:$0xff]  ;;  %vm10682_vm11 = vmmov %vm10681_vm1 }
 0x476   :  { %v5114_v23 = vsel %vm10681_vm1, %v10680_v37, 0.0  ;;  %vm10687_vm14 = vmmov %vm10676_vm0 }
 0x477   :  { %v5049_v7 = vadd.f32 %v5045_v50, %v5027_v25  ;;  %v5009_v33 = vpop.permute.xlu0 %5008  ;;  %v5082_v1 = vadd.f32 %v5078_v40, %v5072_v53  ;;  %v5098_v50 = vmul.f32 %v9876_v20, %v5092_v4  ;;  %v10683_v40 = vld [vmem:[#allocation49_spill] sm:$0xff]  ;;  %vm10690_vm0 = vmmov %vm10681_vm1 }
 0x478   :  { %v5016_v54 = vsel %vm10673_vm9, %v5009_v33, 0.0  ;;  %vm10684_vm9 = vmmov %vm10674_vm12 }
 0x479   :  { %v5071_v16 = vadd.f32 %v5067_v30, %v5049_v7  ;;  %v5022_v15 = vmul.f32 %v9851_v43, %v5016_v54  ;;  %v9905_v0 = vpop.permute.xlu1 %5140  ;;  %v5104_v42 = vadd.f32 %v5100_v46, %v5082_v1  ;;  %v5063_v46 = vsel %vm10684_vm9, %v10683_v40, 0.0  ;;  %vm10685_vm12 = vmmov %vm10679_vm2 }
 0x47a   :  { %v5144_v9 = vsel %vm10685_vm12, %v9827_v52, 0.0  ;;  %v5120_v7 = vmul.f32 %v5119_v44, %v5114_v23  ;;  %v5069_v24 = vmul.f32 %v9862_v5, %v5063_v46  ;;  %v10696_v46 = vld [vmem:[#allocation21_spill] sm:$0xff] }
 0x47b   :  { %v5026_v62 = vadd.f32 %v5022_v15, %v9831_v17  ;;  %v9918_v27 = vadd.f32 %v5122_v29, %v5104_v42  ;;  %v5081_v18 = vadd.f32 %v5077_v36, %v5071_v16  ;;  %v5041_v17 = vsel %vm10679_vm2, %v10678_v3, 0.0  ;;  %v10686_v16 = vld [vmem:[#allocation52_spill] sm:$0xff]  ;;  %v10688_v42 = vld [vmem:[#allocation45_spill] sm:$0xff] }
 0x47c   :  { %v5047_v30 = vmul.f32 %v9860_v49, %v5041_v17  ;;  %v5150_v54 = vmul.f32 %v5149_v19, %v5144_v9  ;;  %v5095_v15 = vsel %vm10687_vm14, %v10686_v16, 0.0  ;;  %v5079_v31 = vmul.f32 %v5075_v48, %v10688_v42  ;;  %v10701_v16 = vld [vmem:[#allocation22_spill] sm:$0xff] }
 0x47d   :  { %v5048_v32 = vadd.f32 %v5044_v41, %v5026_v62  ;;  %v5103_v56 = vadd.f32 %v5099_v12, %v5081_v18  ;;  %v5101_v5 = vmul.f32 %v9876_v20, %v5095_v15  ;;  %v10691_v18 = vld [vmem:[#allocation24_spill] sm:$0xff]  ;;  %vm10697_vm9 = vnez %v10696_v46 }
 0x47e   :  { %vm10692_vm2 = vnez %v10691_v18 }
 0x47f   :  { %v5070_v22 = vadd.f32 %v5066_v21, %v5048_v32  ;;  %v5015_v34 = vpop.permute.xlu0 %5014  ;;  %v5125_v51 = vadd.f32 %v5121_v47, %v5103_v56  ;;  %v5147_v21 = vsel %vm10692_vm2, %v9840_v13, 0.0  ;;  %v10693_v13 = vld [vmem:[#allocation32_spill] sm:$0xff]  ;;  %vm10703_vm2 = vcmp.lt.s32.totalorder %v8678_v11, 127 }
 0x480   :  { %v5019_v45 = vsel %vm10682_vm11, %v5015_v34, 0.0  ;;  %v5153_v56 = vmul.f32 %v5149_v19, %v5147_v21  ;;  %vm10694_vm1 = vnez %v10693_v13  ;;  %vm10695_vm11 = vmmov %vm10685_vm12  ;;  %vm10698_vm12 = vcmp.ge.s32.totalorder %v8678_v11, 1  ;;  %v10707_v21 = vld [vmem:[#allocation17_spill] sm:$0xff] }
 0x481   :  { %v5080_v53 = vadd.f32 %v5076_v58, %v5070_v22  ;;  %v5025_v10 = vmul.f32 %v9851_v43, %v5019_v45  ;;  %v5161_v25 = vpop.permute.xlu1 %5160  ;;  %v9944_v43 = vpop.permute.xlu2 %5216  ;;  %vm10699_vm14 = vmmov %vm10698_vm12 }
 0x482   :  { %v5167_v9 = vsel %vm10697_vm9, %v5161_v25, 0.0 }
 0x483   :  { %v5029_v33 = vadd.f32 %v5025_v10, %v9847_v61  ;;  %v5102_v1 = vadd.f32 %v5098_v50, %v5080_v53  ;;  %v5117_v61 = vsel %vm10690_vm0, %v10689_v28, 0.0  ;;  %v5146_v50 = vsel %vm10695_vm11, %v9905_v0, 0.0  ;;  %v10704_v28 = vld [vmem:[#allocation33_spill] sm:$0xff] }
 0x484   :  { %v5123_v47 = vmul.f32 %v5119_v44, %v5117_v61  ;;  %v5152_v40 = vmul.f32 %v5149_v19, %v5146_v50  ;;  %vm10702_vm0 = vnez %v10701_v16  ;;  %vm10708_vm11 = vnez %v10707_v21 }
 0x485   :  { %v5051_v36 = vadd.f32 %v5047_v30, %v5029_v33  ;;  %v5124_v29 = vadd.f32 %v5120_v7, %v5102_v1  ;;  %v5171_v7 = vstv %s5756_s30  ;;  %v5168_v33 = vsel %vm10698_vm12, %v9870_v8, 0.0 }
 0x487   :  { %v5073_v52 = vadd.f32 %v5069_v24, %v5051_v36  ;;  %v5139_v41 = vpop.permute.xlu0 %5138  ;;  %v5154_v49 = vadd.f32 %v5150_v54, %v5124_v29  ;;  %v5156_v24 = vadd.f32 %v5152_v40, %v9918_v27  ;;  %v5173_v54 = vmul.f32 %v5171_v7, %v5167_v9  ;;  %v10700_v29 = vld [vmem:[#allocation48_spill] sm:$0xff] }
 0x488   :  { %v5145_v44 = vsel %vm10694_vm1, %v5139_v41, 0.0  ;;  %v5174_v36 = vmul.f32 %v5171_v7, %v5168_v33  ;;  %v5181_v25 = vsel %vm10702_vm0, %v10700_v29, 0.0  ;;  %vm10705_vm1 = vnez %v10704_v28  ;;  %v10712_v40 = vld [vmem:[#allocation44_spill] sm:$0xff]  ;;  %v10713_v33 = vld [vmem:[#allocation46_spill] sm:$0xff] }
 0x489   :  { %v5083_v12 = vadd.f32 %v5079_v31, %v5073_v52  ;;  %v9954_v62 = vpop.permute.xlu1 %5194  ;;  %v9959_v4 = vpop.permute.xlu2 %5222  ;;  %v5151_v10 = vmul.f32 %v5149_v19, %v5145_v44  ;;  %v5185_v31 = vstv %s5757_s10  ;;  %v9997_v52 = vstv %s5758_s11  ;;  %v10716_v29 = vld [vmem:[#allocation34_spill] sm:$0xff] }
 0x48a   :  { %v5187_v41 = vmul.f32 %v5185_v31, %v5181_v25  ;;  %v5203_v61 = vsel %vm10705_vm1, %v9915_v59, 0.0  ;;  %vm10719_vm1 = vcmp.lt.s32.totalorder %v8678_v11, 126 }
 0x48b   :  { %v5105_v32 = vadd.f32 %v5101_v5, %v5083_v12  ;;  %v5155_v1 = vadd.f32 %v5151_v10, %v5125_v51  ;;  %v5178_v51 = vadd.f32 %v5174_v36, %v5156_v24  ;;  %v10706_v5 = vld [vmem:[#allocation47_spill] sm:$0xff]  ;;  %v5209_v50 = vmul.f32 %v9997_v52, %v5203_v61 }
 0x48c   :  { %v5188_v12 = vmul.f32 %v5185_v31, %v10706_v5 }
 0x48d   :  { %v5127_v48 = vadd.f32 %v5123_v47, %v5105_v32  ;;  %v5177_v42 = vadd.f32 %v5173_v54, %v5155_v1  ;;  %v10714_v1 = vld [vmem:[#allocation25_spill] sm:$0xff] }
 0x48e   :  { %v5192_v13 = vadd.f32 %v5188_v12, %v5178_v51  ;;  %v10039_v51 = vstv %s9995_s13 }
 0x48f   :  { %v5159_v14 = vpop.permute.xlu0 %5158  ;;  %v9961_v58 = vadd.f32 %v5153_v56, %v5127_v48  ;;  %v5191_v32 = vadd.f32 %v5187_v41, %v5177_v42  ;;  %v10006_v56 = vstv %s5759_s12 }
 0x490   :  { %v5166_v19 = vsel %vm10699_vm14, %v5159_v14, 0.0  ;;  %v10709_v14 = vld [vmem:[#allocation23_spill] sm:$0xff]  ;;  %vm10711_vm14 = vcmp.lt.s32.totalorder %v8678_v11, 126 }
 0x491   :  { %v9963_v22 = vpop.permute.xlu1 %5200  ;;  %v9965_v20 = vpop.permute.xlu2 %5250  ;;  %v5172_v27 = vmul.f32 %v5171_v7, %v5166_v19  ;;  %vm10710_vm12 = vnez %v10709_v14  ;;  %v5213_v19 = vadd.f32 %v5209_v50, %v5191_v32  ;;  %v10724_v50 = vld [vmem:[#allocation35_spill] sm:$0xff] }
 0x493   :  { %v5176_v48 = vadd.f32 %v5172_v27, %v5154_v49  ;;  %v5186_v49 = vmul.f32 %v5185_v31, %v10712_v40  ;;  %v5224_v27 = vsel %vm10719_vm1, %v9944_v43, 0.0  ;;  %vm10722_vm1 = vcmp.ge.s32.totalorder %v8678_v11, 1 }
 0x495   :  { %v5190_v36 = vadd.f32 %v5186_v49, %v5176_v48 }
 0x497   :  { %v5165_v34 = vpop.permute.xlu0 %5164 }
 0x499   :  { %v5221_v3 = vpop.permute.xlu1 %5220  ;;  %v9969_v23 = vpop.permute.xlu2 %5270 }
 0x49a   :  { %v5226_v10 = vsel %vm10711_vm14, %v5221_v3, 0.0  ;;  %vm10717_vm14 = vnez %v10716_v29  ;;  %v5277_v43 = vsel %vm9340_vm5, %v9969_v23, 0.0  ;;  %vm10726_vm5 = vcmp.lt.s32.totalorder %v8678_v11, 127 }
 0x49b   :  { %v5232_v3 = vmul.f32 %v10006_v56, %v5226_v10 }
 0x49f   :  { %v5199_v17 = vpop.permute.xlu0 %5198 }
 0x4a0   :  { %v5204_v8 = vsel %vm10703_vm2, %v5199_v17, 0.0  ;;  %v5169_v17 = vsel %vm10710_vm12, %v5165_v34, 0.0  ;;  %v5202_v34 = vsel %vm10703_vm2, %v9954_v62, 0.0  ;;  %v5259_v62 = vstv %s5760_s14 }
 0x4a1   :  { %v9967_v37 = vpop.permute.xlu1 %5248  ;;  %v9980_v30 = vpop.permute.xlu2 %5304  ;;  %v5210_v18 = vmul.f32 %v9997_v52, %v5204_v8  ;;  %v5175_v54 = vmul.f32 %v5171_v7, %v5169_v17  ;;  %vm10718_vm2 = vcmp.ge.s32.totalorder %v8678_v11, 2  ;;  %v5208_v41 = vmul.f32 %v9997_v52, %v5202_v34 }
 0x4a2   :  { %v5255_v25 = vsel %vm10717_vm14, %v9967_v37, 0.0  ;;  %v5256_v8 = vsel %vm10718_vm2, %v9965_v20, 0.0  ;;  %vm10720_vm14 = vmmov %vm10718_vm2  ;;  %v5298_v20 = vmul.f32 %v10039_v51, %v9583_v2  ;;  %v5230_v17 = vmul.f32 %v10006_v56, %v5224_v27 }
 0x4a3   :  { %v5214_v9 = vadd.f32 %v5210_v18, %v5192_v13  ;;  %v5179_v5 = vadd.f32 %v5175_v54, %v9961_v58  ;;  %v5261_v12 = vmul.f32 %v5259_v62, %v5255_v25  ;;  %v5262_v21 = vmul.f32 %v5259_v62, %v5256_v8  ;;  %v10727_v54 = vld [vmem:[#allocation36_spill] sm:$0xff] }
 0x4a4   :  { %v5212_v48 = vadd.f32 %v5208_v41, %v5190_v36  ;;  %v5291_v2 = vsel %vm9277_vm15, %v9579_v55, 0.0  ;;  %vm10725_vm2 = vnez %v10724_v50  ;;  %v10072_v55 = vstv %s10033_s16  ;;  %vm10729_vm15 = vmmov %vm10722_vm1 }
 0x4a5   :  { %v5236_v37 = vadd.f32 %v5232_v3, %v5214_v9  ;;  %v5205_v10 = vsel %vm10725_vm2, %v9963_v22, 0.0 }
 0x4a6   :  { %v5234_v36 = vadd.f32 %v5230_v17, %v5212_v48  ;;  %v5211_v22 = vmul.f32 %v9997_v52, %v5205_v10  ;;  %v5297_v52 = vmul.f32 %v10039_v51, %v5291_v2  ;;  %v5296_v2 = vmul.f32 %v10039_v51, %v9511_v38 }
 0x4a7   :  { %v5219_v45 = vpop.permute.xlu0 %5218  ;;  %v5266_v23 = vadd.f32 %v5262_v21, %v5236_v37 }
 0x4a8   :  { %v5225_v47 = vsel %vm10708_vm11, %v5219_v45, 0.0  ;;  %vm10715_vm11 = vnez %v10714_v1 }
 0x4a9   :  { %v9976_v53 = vpop.permute.xlu1 %5268  ;;  %v10012_v44 = vpop.permute.xlu2 %5310  ;;  %v5231_v45 = vmul.f32 %v10006_v56, %v5225_v47  ;;  %v5183_v24 = vsel %vm10715_vm11, %v10713_v33, 0.0  ;;  %v5281_v47 = vstv %s10008_s2  ;;  %v10064_v33 = vstv %s10027_s15 }
 0x4aa   :  { %v5189_v61 = vmul.f32 %v5185_v31, %v5183_v24  ;;  %v5283_v9 = vmul.f32 %v5281_v47, %v5277_v43  ;;  %v5276_v29 = vsel %vm10729_vm15, %v9976_v53, 0.0  ;;  %v10732_v43 = vld [vmem:[#allocation39_spill] sm:$0xff]  ;;  %vm10738_vm15 = vcmp.lt.s32.totalorder %v8678_v11, 127 }
 0x4ab   :  { %v5235_v7 = vadd.f32 %v5231_v45, %v5213_v19 }
 0x4ac   :  { %v5193_v34 = vadd.f32 %v5189_v61, %v5179_v5 }
 0x4ad   :  { %v5265_v58 = vadd.f32 %v5261_v12, %v5235_v7  ;;  %v5282_v12 = vmul.f32 %v5281_v47, %v5276_v29 }
 0x4ae   :  { %v5215_v37 = vadd.f32 %v5211_v22, %v5193_v34 }
 0x4af   :  { %v5247_v0 = vpop.permute.xlu0 %5246  ;;  %v5287_v8 = vadd.f32 %v5283_v9, %v5265_v58 }
 0x4b0   :  { %v5254_v18 = vsel %vm10720_vm14, %v5247_v0, 0.0  ;;  %vm10728_vm14 = vnez %v10727_v54 }
 0x4b1   :  { %v9991_v15 = vpop.permute.xlu1 %5274  ;;  %v5331_v45 = vpop.permute.xlu2 %5330  ;;  %v5260_v40 = vmul.f32 %v5259_v62, %v5254_v18  ;;  %v5227_v19 = vsel %vm10728_vm14, %v9959_v4, 0.0 }
 0x4b2   :  { %v5233_v5 = vmul.f32 %v10006_v56, %v5227_v19 }
 0x4b3   :  { %v5264_v7 = vadd.f32 %v5260_v40, %v5234_v36 }
 0x4b4   :  { %v5237_v0 = vadd.f32 %v5233_v5, %v5215_v37 }
 0x4b5   :  { %v5286_v17 = vadd.f32 %v5282_v12, %v5264_v7 }
 0x4b7   :  { %v10014_v59 = vpop.permute.xlu0 %5252 }
 0x4b8   :  { %v5257_v27 = vsel %vm9371_vm8, %v10014_v59, 0.0  ;;  %v5349_v59 = vstv %s10329_s6  ;;  %s5765_s6 = sld [smem:[#allocation11 + $0x1]] }
 0x4b9   :  { %v5309_v42 = vpop.permute.xlu1 %5308  ;;  %v5263_v32 = vmul.f32 %v5259_v62, %v5257_v27  ;;  %v10736_v62 = vld [vmem:[#allocation40_spill] sm:$0xff] }
 0x4ba   :  { %v5314_v24 = vsel %vm10726_vm5, %v5309_v42, 0.0  ;;  %vm10733_vm5 = vnez %v10732_v43  ;;  %vm10737_vm14 = vnez %v10736_v62 }
 0x4bb   :  { %v5320_v4 = vmul.f32 %v10064_v33, %v5314_v24  ;;  %v5279_v10 = vsel %vm10737_vm14, %v9991_v15, 0.0  ;;  %v5267_v9 = vadd.f32 %v5263_v32, %v5237_v0  ;;  %v5300_v24 = vadd.f32 %v5296_v2, %v5286_v17  ;;  %v10739_v15 = vld [vmem:[#allocation20_spill] sm:$0xff] }
 0x4bc   :  { %v5285_v19 = vmul.f32 %v5281_v47, %v5279_v10  ;;  %v10744_v32 = vld [vmem:[#allocation16_spill] sm:$0xff] }
 0x4bd   :  { %vm10745_vm14 = vcmp.lt.s32.totalorder %v10744_v32, 1 }
 0x4bf   :  { %v5273_v31 = vpop.permute.xlu0 %5272 }
 0x4c0   :  { %v5278_v13 = vsel %vm10722_vm1, %v5273_v31, 0.0  ;;  %vm10730_vm1 = vcmp.lt.s32.totalorder %v8678_v11, 126 }
 0x4c1   :  { %v5284_v49 = vmul.f32 %v5281_v47, %v5278_v13  ;;  %v5336_v25 = vsel %vm10730_vm1, %v5331_v45, 0.0  ;;  %v5329_v61 = vpop.permute.xlu1 %5328  ;;  %v5301_v13 = vadd.f32 %v5297_v52, %v5287_v8  ;;  %vm10740_vm1 = vnez %v10739_v15 }
 0x4c2   :  { %v5342_v53 = vmul.f32 %v10072_v55, %v5336_v25  ;;  %v5335_v48 = vsel %vm10733_vm5, %v5329_v61, 0.0  ;;  %v5293_v29 = vsel %vm10740_vm1, %v9539_v63, 0.0  ;;  %v5289_v25 = vadd.f32 %v5285_v19, %v5267_v9 }
 0x4c3   :  { %v5288_v3 = vadd.f32 %v5284_v49, %v5266_v23  ;;  %v5341_v45 = vmul.f32 %v10072_v55, %v5335_v48  ;;  %v5312_v49 = vsel %vm10738_vm15, %v9980_v30, 0.0  ;;  %vm10741_vm5 = vcmp.lt.s32.totalorder %v8678_v11, 126  ;;  %v10747_v48 = vld [vmem:[#allocation41_spill] sm:$0xff] }
 0x4c4   :  { %v5318_v36 = vmul.f32 %v10064_v33, %v5312_v49  ;;  %v5299_v47 = vmul.f32 %v10039_v51, %v5293_v29  ;;  %vm10746_vm15 = vcmp.lt.s32.totalorder %v10744_v32, 7  ;;  %vm10748_vm1 = vnez %v10747_v48 }
 0x4c5   :  { %v5302_v41 = vadd.f32 %v5298_v20, %v5288_v3  ;;  %v10734_v20 = vld [vmem:[#allocation18_spill] sm:$0xff] }
 0x4c6   :  { %vm10735_vm8 = vnez %v10734_v20  ;;  %v5322_v7 = vadd.f32 %v5318_v36, %v5300_v24  ;;  %v5303_v61 = vadd.f32 %v5299_v47, %v5289_v25 }
 0x4c7   :  { %v5324_v18 = vadd.f32 %v5320_v4, %v5302_v41  ;;  %v5307_v21 = vpop.permute.xlu0 %5306  ;;  %v10742_v41 = vld [vmem:[#allocation42_spill] sm:$0xff] }
 0x4c8   :  { %v5313_v31 = vsel %vm10735_vm8, %v5307_v21, 0.0  ;;  %vm10743_vm8 = vnez %v10742_v41 }
 0x4c9   :  { %v5346_v58 = vadd.f32 %v5342_v53, %v5324_v18  ;;  %v5319_v56 = vmul.f32 %v10064_v33, %v5313_v31  ;;  %v5315_v63 = vsel %vm10743_vm8, %v10012_v44, 0.0  ;;  %vm10750_vm8 = vmmov %vm10746_vm15 }
 0x4ca   :  { %v5321_v53 = vmul.f32 %v10064_v33, %v5315_v63 }
 0x4cb   :  { %v5323_v40 = vadd.f32 %v5319_v56, %v5301_v13  ;;  %v5352_v23 = vadd.f32 %v5349_v59, %v5346_v58 }
 0x4cc   :  { %v5325_v17 = vadd.f32 %v5321_v53, %v5303_v61 }
 0x4cd   :  { %v5345_v34 = vadd.f32 %v5341_v45, %v5323_v40  ;;  %v5356_v54 = vmul.f32 0.2, %v5352_v23 }
 0x4cf   :  { %v5351_v38 = vadd.f32 %v5349_v59, %v5345_v34  ;;  %v5327_v3 = vpop.permute.xlu0 %5326  ;;  %v10105_v22 = vmax.f32 %v5352_v23, %v5356_v54 }
 0x4d0   :  { %v5334_v8 = vsel %vm10741_vm5, %v5327_v3, 0.0  ;;  %vm10749_vm5 = vmmov %vm10745_vm14 }
 0x4d1   :  { %v5355_v30 = vmul.f32 0.2, %v5351_v38  ;;  %v5340_v42 = vmul.f32 %v10072_v55, %v5334_v8  ;;  %5432 = vrot.lane.b32.xlu2 %v10105_v22, %s5879_s21  ;;  %v5364_v37 = vrot.slane %v10105_v22, 7  ;;  %v5484_v51 = vrot.slane %v10105_v22, 1 }
 0x4d3   :  { %v10116_v27 = vmax.f32 %v5351_v38, %v5355_v30  ;;  %v5344_v4 = vadd.f32 %v5340_v42, %v5322_v7  ;;  %v5397_v7 = vstv %s5765_s6 }
 0x4d5   :  { %v5350_v52 = vadd.f32 %v5349_v59, %v5344_v4  ;;  %5430 = vrot.lane.b32.xlu1 %v10116_v27, %s5879_s21  ;;  %v5363_v5 = vrot.slane %v10116_v27, 7  ;;  %v5483_v12 = vrot.slane %v10116_v27, 1  ;;  %v10219_v4 = vstv %s5766_s18 }
 0x4d7   :  { %v5354_v18 = vmul.f32 0.2, %v5350_v52  ;;  %v5333_v21 = vpop.permute.xlu0 %5332  ;;  %v10130_v44 = vsel %vm10745_vm14, %v5363_v5, %v5364_v37  ;;  %v10134_v43 = vsel %vm10746_vm15, %v5483_v12, %v5484_v51  ;;  %vm10751_vm14 = vmmov %vm10749_vm5 }
 0x4d8   :  { %v5337_v20 = vsel %vm10748_vm1, %v5333_v21, 0.0  ;;  %vm10752_vm15 = vmmov %vm10749_vm5  ;;  %v5394_v26 = vsel %vm10661_vm3, %v10130_v44, 0.0 }
 0x4d9   :  { %v10138_v31 = vmax.f32 %v5350_v52, %v5354_v18  ;;  %v5343_v58 = vmul.f32 %v10072_v55, %v5337_v20  ;;  %5462 = vrot.lane.b32.xlu2 %v10116_v27, %s5880_s1  ;;  %vm10753_vm1 = vmmov %vm10750_vm8  ;;  %v10228_v18 = vstv %s5768_s20 }
 0x4da   :  { %v5453_v1 = vmul.f32 %v10228_v18, %v10116_v27  ;;  %v5513_v27 = vsel %vm10702_vm0, %v10134_v43, 0.0 }
 0x4db   :  { %v5347_v33 = vadd.f32 %v5343_v58, %v5325_v17  ;;  %5428 = vrot.lane.b32.xlu0 %v10138_v31, %s5879_s21  ;;  %v5362_v13 = vrot.slane %v10138_v31, 7  ;;  %v5482_v56 = vrot.slane %v10138_v31, 1  ;;  %v5452_v48 = vmul.f32 %v10228_v18, %v10138_v31 }
 0x4dd   :  { %v5353_v0 = vadd.f32 %v5349_v59, %v5347_v33  ;;  %5460 = vrot.lane.b32.xlu1 %v10138_v31, %s5880_s1  ;;  %v10151_v2 = vsel %vm10749_vm5, %v5362_v13, %v5363_v5  ;;  %v10155_v55 = vsel %vm10750_vm8, %v5482_v56, %v5483_v12  ;;  %vm10754_vm5 = vmmov %vm10753_vm1  ;;  %vm10755_vm8 = vcmp.ge.s32.totalorder %v8678_v11, 1 }
 0x4df   :  { %v5357_v62 = vmul.f32 0.2, %v5353_v0 }
 0x4e1   :  { %v10157_v10 = vmax.f32 %v5353_v0, %v5357_v62  ;;  %5372 = vrot.lane.b32.xlu2 %v10151_v2, %s5879_s21 }
 0x4e3   :  { %5434 = vrot.lane.b32.xlu0 %v10157_v10, %s5879_s21  ;;  %v5365_v59 = vrot.slane %v10157_v10, 7  ;;  %v5485_v45 = vrot.slane %v10157_v10, 1 }
 0x4e5   :  { %5466 = vrot.lane.b32.xlu1 %v10157_v10, %s5880_s1  ;;  %v5369_v40 = vsel %vm10751_vm14, %v5365_v59, %v5362_v13  ;;  %v10171_v23 = vsel %vm10752_vm15, %v5364_v37, %v5365_v59  ;;  %v10175_v49 = vsel %vm10753_vm1, %v5485_v45, %v5482_v56  ;;  %v10179_v9 = vsel %vm10754_vm5, %v5484_v51, %v5485_v45 }
 0x4e6   :  { %v5392_v30 = vsel %vm10654_vm13, %v5369_v40, 0.0  ;;  %v5441_v51 = vstv %s5767_s19  ;;  %vm10756_vm13 = vcmp.lt.s32.totalorder %v8678_v11, 127  ;;  %v5401_v13 = vmul.f32 %v5397_v7, %v10171_v23 }
 0x4e7   :  { %v5398_v61 = vmul.f32 %v5397_v7, %v5392_v30 }
 0x4e9   :  { %5406 = vrot.lane.b32.xlu2 %v5369_v40, %s5880_s1 }
 0x4eb   :  { %5464 = vrot.lane.b32.xlu0 %v10105_v22, %s5880_s1 }
 0x4ed   :  { %5370 = vrot.lane.b32.xlu1 %v5369_v40, %s5879_s21  ;;  %v10253_v40 = vstv %s5771_s22 }
 0x4f1   :  { %5412 = vrot.lane.b32.xlu2 %v10171_v23, %s5880_s1 }
 0x4f3   :  { %5374 = vrot.lane.b32.xlu0 %v10130_v44, %s5879_s21 }
 0x4f5   :  { %5376 = vrot.lane.b32.xlu1 %v10171_v23, %s5879_s21 }
 0x4f9   :  { %5490 = vrot.lane.b32.xlu2 %v10155_v55, %s5879_s21 }
 0x4fb   :  { %5408 = vrot.lane.b32.xlu0 %v10151_v2, %s5880_s1 }
 0x4fd   :  { %5410 = vrot.lane.b32.xlu1 %v10130_v44, %s5880_s1 }
 0x501   :  { %5496 = vrot.lane.b32.xlu2 %v10175_v49, %s5879_s21 }
 0x503   :  { %5492 = vrot.lane.b32.xlu0 %v10134_v43, %s5879_s21 }
 0x505   :  { %5494 = vrot.lane.b32.xlu1 %v10179_v9, %s5879_s21  ;;  %s5382_s21 = sld [smem:[#allocation11]] }
 0x509   :  { %5530 = vrot.lane.b32.xlu2 %v10179_v9, %s5880_s1 }
 0x50b   :  { %5526 = vrot.lane.b32.xlu0 %v10155_v55, %s5880_s1  ;;  %v5383_v47 = vstv %s5382_s21 }
 0x50d   :  { %5528 = vrot.lane.b32.xlu1 %v10134_v43, %s5880_s1 }
 0x513   :  { %5532 = vrot.lane.b32.xlu0 %v10175_v49, %s5880_s1  ;;  %s5769_s1 = sld [smem:[#allocation11 + $0x82]] }
 0x519   :  { %v10237_v20 = vstv %s5769_s1 }
 0x52b   :  { %v10211_v34 = vpop.permute.xlu2 %5432 }
 0x533   :  { %v10213_v24 = vpop.permute.xlu2 %5462 }
 0x53b   :  { %v5373_v54 = vpop.permute.xlu2 %5372 }
 0x543   :  { %v5407_v38 = vpop.permute.xlu2 %5406 }
 0x544   :  { %v5414_v41 = vsel %vm10656_vm6, %v5407_v38, 0.0  ;;  %vm10758_vm6 = vmmov %vm10756_vm13 }
 0x545   :  { %v5420_v5 = vmul.f32 %v10219_v4, %v5414_v41  ;;  %vm10763_vm5 = vmmov %vm10758_vm6 }
 0x546   :  { %vm10769_vm0 = vmmov %vm10763_vm5 }
 0x547   :  { %v5431_v19 = vpop.permute.xlu1 %5430 }
 0x54b   :  { %v5413_v25 = vpop.permute.xlu2 %5412 }
 0x54c   :  { %v5417_v56 = vsel %vm10758_vm6, %v5413_v25, 0.0 }
 0x54d   :  { %v5429_v36 = vpop.permute.xlu0 %5428  ;;  %v5423_v38 = vmul.f32 %v10219_v4, %v5417_v56 }
 0x54e   :  { %v5436_v57 = vsel %vm10755_vm8, %v5429_v36, 0.0  ;;  %v5400_v36 = vmul.f32 %v5397_v7, %v5394_v26 }
 0x54f   :  { %v5461_v3 = vpop.permute.xlu1 %5460  ;;  %v5442_v53 = vmul.f32 %v5441_v51, %v5436_v57 }
 0x550   :  { %v5468_v32 = vsel %vm10756_vm13, %v5461_v3, 0.0  ;;  %vm10771_vm13 = vnez %v10704_v28 }
 0x551   :  { %v5474_v0 = vmul.f32 %v10237_v20, %v5468_v32 }
 0x553   :  { %v5491_v52 = vpop.permute.xlu2 %5490 }
 0x555   :  { %v5435_v15 = vpop.permute.xlu0 %5434 }
 0x557   :  { %v5467_v29 = vpop.permute.xlu1 %5466 }
 0x558   :  { %v5471_v60 = vsel %vm10763_vm5, %v5467_v29, 0.0 }
 0x559   :  { %v5477_v26 = vmul.f32 %v10237_v20, %v5471_v60 }
 0x55d   :  { %v10215_v8 = vpop.permute.xlu0 %5464 }
 0x55f   :  { %v5371_v42 = vpop.permute.xlu1 %5370 }
 0x560   :  { %v5378_v63 = vsel %vm10655_vm7, %v5371_v42, 0.0  ;;  %vm10757_vm7 = vmmov %vm10755_vm8  ;;  %v5518_v42 = vmul.f32 %v10253_v40, %v10155_v55 }
 0x561   :  { %v5384_v37 = vmul.f32 %v5383_v47, %v5378_v63  ;;  %v5379_v17 = vsel %vm10757_vm7, %v5373_v54, 0.0  ;;  %vm10759_vm3 = vmmov %vm10757_vm7 }
 0x562   :  { %v5498_v44 = vsel %vm10759_vm3, %v5491_v52, 0.0  ;;  %vm10760_vm14 = vmmov %vm10759_vm3  ;;  %v5385_v23 = vmul.f32 %v5383_v47, %v5379_v17 }
 0x563   :  { %v5402_v12 = vadd.f32 %v5398_v61, %v5384_v37  ;;  %vm10761_vm15 = vmmov %vm10759_vm3  ;;  %v5504_v3 = vmul.f32 %v10244_v6, %v5498_v44  ;;  %v5497_v61 = vpop.permute.xlu2 %5496 }
 0x564   :  { %v5439_v62 = vsel %vm10761_vm15, %v5435_v15, 0.0  ;;  %v5399_v15 = vmul.f32 %v5397_v7, %v10151_v2  ;;  %vm10762_vm1 = vmmov %vm10759_vm3  ;;  %v5455_v2 = vmul.f32 %v10228_v18, %v10157_v10 }
 0x565   :  { %v5424_v35 = vadd.f32 %v5420_v5, %v5402_v12  ;;  %v5375_v21 = vpop.permute.xlu0 %5374  ;;  %v5437_v41 = vsel %vm10762_vm1, %v5431_v19, 0.0  ;;  %v5445_v63 = vmul.f32 %v5441_v51, %v5439_v62  ;;  %vm10765_vm8 = vmmov %vm10763_vm5  ;;  %v5501_v19 = vsel %vm10710_vm12, %v5497_v61, 0.0 }
 0x566   :  { %v5380_v54 = vsel %vm10660_vm10, %v5375_v21, 0.0  ;;  %vm10764_vm10 = vmmov %vm10762_vm1  ;;  %v5515_v21 = vsel %vm10715_vm11, %v10175_v49, 0.0 }
 0x567   :  { %v5446_v58 = vadd.f32 %v5442_v53, %v5424_v35  ;;  %v5377_v33 = vpop.permute.xlu1 %5376  ;;  %v5386_v37 = vmul.f32 %v5383_v47, %v5380_v54  ;;  %v5438_v12 = vsel %vm10764_vm10, %v10211_v34, 0.0  ;;  %v5403_v53 = vadd.f32 %v5399_v15, %v5385_v23  ;;  %vm10766_vm12 = vmmov %vm10763_vm5 }
 0x568   :  { %v5381_v31 = vsel %vm10760_vm14, %v5377_v33, 0.0  ;;  %v5443_v34 = vmul.f32 %v5441_v51, %v5437_v41  ;;  %v5469_v33 = vsel %vm10766_vm12, %v10213_v24, 0.0  ;;  %vm10767_vm11 = vmmov %vm10763_vm5 }
 0x569   :  { %v5456_v59 = vadd.f32 %v5452_v48, %v5446_v58  ;;  %v5387_v45 = vmul.f32 %v5383_v47, %v5381_v31  ;;  %v5404_v32 = vadd.f32 %v5400_v36, %v5386_v37  ;;  %v5444_v58 = vmul.f32 %v5441_v51, %v5438_v12 }
 0x56a   :  { %v5470_v39 = vsel %vm10767_vm11, %v10215_v8, 0.0  ;;  %v5454_v51 = vmul.f32 %v10228_v18, %v10105_v22  ;;  %v5475_v24 = vmul.f32 %v10237_v20, %v5469_v33  ;;  %v5549_v37 = vstv %s10331_s8  ;;  %s5882_s8 = smov [#allocation12]  }
 0x56b   :  { %v5405_v25 = vadd.f32 %v5401_v13, %v5387_v45  ;;  %v5478_v30 = vadd.f32 %v5474_v0, %v5456_v59  ;;  %v5507_v13 = vmul.f32 %v10244_v6, %v5501_v19  ;;  %v5476_v8 = vmul.f32 %v10237_v20, %v5470_v39  ;;  %v5531_v23 = vpop.permute.xlu2 %5530  ;;  %s5566_s25 = sshll.u32 %s5882_s8, 4  ;;  %s5567_s25 = int_to_ptr.vmem [resolvable:$true] %s5566_s25 }
 0x56c   :  { %v5539_v20 = vstv %s5772_s23  ;;  %v5536_v46 = vsel %vm10769_vm0, %v5531_v23, 0.0 }
 0x56d   :  { %v5427_v57 = vadd.f32 %v5423_v38, %v5405_v25  ;;  %v5409_v52 = vpop.permute.xlu0 %5408  ;;  %v5508_v5 = vadd.f32 %v5504_v3, %v5478_v30  ;;  %v5519_v25 = vmul.f32 %v10253_v40, %v5513_v27 }
 0x56e   :  { %v5415_v55 = vsel %vm10765_vm8, %v5409_v52, 0.0 }
 0x56f   :  { %v5449_v7 = vadd.f32 %v5445_v63, %v5427_v57  ;;  %v5421_v29 = vmul.f32 %v10219_v4, %v5415_v55  ;;  %v5411_v47 = vpop.permute.xlu1 %5410  ;;  %v5522_v35 = vadd.f32 %v5518_v42, %v5508_v5  ;;  %v5520_v42 = vmul.f32 %v10253_v40, %v10179_v9 }
 0x570   :  { %v5416_v10 = vsel %vm10662_vm4, %v5411_v47, 0.0  ;;  %vm10768_vm4 = vmmov %vm10762_vm1  ;;  %v5542_v63 = vmul.f32 %v5539_v20, %v5536_v46 }
 0x571   :  { %v5459_v48 = vadd.f32 %v5455_v2, %v5449_v7  ;;  %v5425_v17 = vadd.f32 %v5421_v29, %v5403_v53  ;;  %v5422_v14 = vmul.f32 %v10219_v4, %v5416_v10  ;;  %v5521_v4 = vmul.f32 %v10253_v40, %v5515_v21 }
 0x573   :  { %v5447_v49 = vadd.f32 %v5443_v34, %v5425_v17  ;;  %v5426_v56 = vadd.f32 %v5422_v14, %v5404_v32  ;;  %v5481_v44 = vadd.f32 %v5477_v26, %v5459_v48 }
 0x575   :  { %v5448_v31 = vadd.f32 %v5444_v58, %v5426_v56  ;;  %v5457_v0 = vadd.f32 %v5453_v1, %v5447_v49  ;;  %v5493_v62 = vpop.permute.xlu0 %5492  ;;  %v5511_v59 = vadd.f32 %v5507_v13, %v5481_v44 }
 0x576   :  { %v5499_v45 = vsel %vm10697_vm9, %v5493_v62, 0.0  ;;  %vm10770_vm9 = vmmov %vm10769_vm0 }
 0x577   :  { %v5479_v54 = vadd.f32 %v5475_v24, %v5457_v0  ;;  %v5505_v36 = vmul.f32 %v10244_v6, %v5499_v45  ;;  %v5458_v22 = vadd.f32 %v5454_v51, %v5448_v31  ;;  %v5495_v18 = vpop.permute.xlu1 %5494  ;;  %v5525_v38 = vadd.f32 %v5521_v4, %v5511_v59 }
 0x578   :  { %v5500_v3 = vsel %vm10768_vm4, %v5495_v18, 0.0 }
 0x579   :  { %v5509_v30 = vadd.f32 %v5505_v36, %v5479_v54  ;;  %v5480_v16 = vadd.f32 %v5476_v8, %v5458_v22  ;;  %v5506_v43 = vmul.f32 %v10244_v6, %v5500_v3 }
 0x57b   :  { %v5510_v15 = vadd.f32 %v5506_v43, %v5480_v16  ;;  %v5523_v41 = vadd.f32 %v5519_v25, %v5509_v30 }
 0x57d   :  { %v5524_v61 = vadd.f32 %v5520_v42, %v5510_v15  ;;  %v5527_v60 = vpop.permute.xlu0 %5526 }
 0x57e   :  { %v5534_v57 = vsel %vm10770_vm9, %v5527_v60, 0.0 }
 0x57f   :  { %v5546_v6 = vadd.f32 %v5542_v63, %v5524_v61  ;;  %v5540_v52 = vmul.f32 %v5539_v20, %v5534_v57  ;;  %v5529_v5 = vpop.permute.xlu1 %5528 }
 0x580   :  { %v5535_v12 = vsel %vm10771_vm13, %v5529_v5, 0.0 }
 0x581   :  { %v5552_v53 = vadd.f32 %v5549_v37, %v5546_v6  ;;  %v5544_v9 = vadd.f32 %v5540_v52, %v5522_v35  ;;  %v5541_v40 = vmul.f32 %v5539_v20, %v5535_v12 }
 0x583   :  { %5799 = vtanh.f32 %v5552_v53  ;;  %v5550_v2 = vadd.f32 %v5549_v37, %v5544_v9  ;;  %v5545_v55 = vadd.f32 %v5541_v40, %v5523_v41 }
 0x585   :  { %5801 = vtanh.f32 %v5550_v2  ;;  %v5551_v19 = vadd.f32 %v5549_v37, %v5545_v55  ;;  %v5533_v7 = vpop.permute.xlu0 %5532 }
 0x586   :  { %v5537_v29 = vsel %vm10725_vm2, %v5533_v7, 0.0 }
 0x587   :  { %5803 = vtanh.f32 %v5551_v19  ;;  %v5543_v11 = vmul.f32 %v5539_v20, %v5537_v29 }
 0x589   :  { %v5800_v47 = vpop.eup %5799  ;;  %v5547_v21 = vadd.f32 %v5543_v11, %v5525_v38 }
 0x58a   :  { %5560 = vst [vmem:[#allocation12 + $0x10] sm:$0xff] %v5800_v47 }
 0x58b   :  { %v5802_v34 = vpop.eup %5801  ;;  %v5553_v28 = vadd.f32 %v5549_v37, %v5547_v21 }
 0x58c   :  { %5558 = vst [vmem:[#allocation12] sm:$0xff] %v5802_v34 }
 0x58d   :  { %v5804_v26 = vpop.eup %5803  ;;  %5805 = vtanh.f32 %v5553_v28 }
 0x58e   :  { %5559 = vst [vmem:[#allocation12 + $0x8] sm:$0xff] %v5804_v26 }
 0x593   :  { %v5806_v50 = vpop.eup %5805 }
 0x594   :  { %5561 = vst [vmem:[#allocation12 + $0x18] sm:$0xff] %v5806_v50 }
 0x595   :  { %5574 = dma.vmem_to_hbm [thread:$0]  %s5567_s25, 512, %s5569_s27, [#allocation7], %s5883_s7, %s5883_s7, %s5884_s28  }
 0x596   :  { %5873 = dma.done.wait [#allocation7], 512  }
 0x597   :  { %5874 = vsyncadd [#allocation7], 4294966784 }
 0x598   :  { %5579 = vsyncpa [#allocation7], 1 }
 0x599   :  { %5580 = vsyncpa [#allocation8], 1 }
 0x59a   :  { %5581 = vsyncpa [#allocation10], 1 }

</bundles_post_ra>
